<compile_context>
chip_gen: v6e
topology: v6e:2x2x1
jax: 0.10.0
libtpu: 0.0.40
codegen_flags: <defaults>
</compile_context>

<pallas_src>
import jax
import jax.numpy as jnp
from jax import lax
from jax.experimental import pallas as pl
from jax.experimental.pallas import tpu as pltpu

LANES = 128  # lane-dense channel/K padding for all matmul operands


# ---------------------------------------------------------------------------
# Glue: phase-separated, K-packed im2col for Conv2d(5x5, pad=2) + MaxPool2d(2)
#
#   glue[nb, 2r+s, g, row, t*cin + c] = xpad[n, 2i + r + kh, 2j + s + kw, c]
#
# with tap index kh*5 + kw = g*tpg + t, pooled position pos = i*Wh + j and
#   row = img*(Hh*Wh) + pos          (pos_major_rows=False, conv layers)
#   row = pos*block_images + img     (pos_major_rows=True,  fused tail)
# ---------------------------------------------------------------------------
def _build_glue(x_nhwc, cin, tpg, block_images, pos_major_rows):
    N, H, W, _ = x_nhwc.shape
    Hh, Wh = H // 2, W // 2
    G = -(-25 // tpg)
    NB = -(-N // block_images)
    Np = NB * block_images

    x = x_nhwc[..., :cin].astype(jnp.bfloat16)          # drop padded channels early
    if Np != N:
        x = jnp.pad(x, ((0, Np - N), (0, 0), (0, 0), (0, 0)))
    xp = jnp.pad(x, ((0, 0), (2, 2), (2, 2), (0, 0)))    # (Np, H+4, W+4, cin)

    # Row parity split (one reshape+transpose), then 6 static row-shift slabs:
    #   R[a, n, i, col, c] = xpad[n, 2i + a, col, c]
    er = xp.reshape(Np, Hh + 2, 2, W + 4, cin).transpose(2, 0, 1, 3, 4)
    R = jnp.stack([er[a % 2, :, a // 2: a // 2 + Hh] for a in range(6)], axis=0)
    # Column parity split, then 6 static column-shift slabs:
    #   S[a, b, n, i, j, c] = xpad[n, 2i + a, 2j + b, c]
    ec = R.reshape(6, Np, Hh, Wh + 2, 2, cin).transpose(4, 0, 1, 2, 3, 5)
    S = jnp.stack([ec[b % 2, :, :, :, b // 2: b // 2 + Wh] for b in range(6)], axis=1)

    phases = []
    for r in (0, 1):
        for s in (0, 1):
            T = S[r:r + 5, s:s + 5]                      # (5,5,Np,Hh,Wh,cin)
            T = T.transpose(2, 3, 4, 0, 1, 5)            # (Np,Hh,Wh,kh,kw,cin)
            phases.append(T.reshape(Np, Hh * Wh, 25, cin))
    P = jnp.stack(phases, axis=1)                        # (Np,4,Hh*Wh,25,cin)

    if G * tpg != 25:                                    # pad taps to full groups
        P = jnp.pad(P, ((0, 0), (0, 0), (0, 0), (0, G * tpg - 25), (0, 0)))
    P = P.reshape(Np, 4, Hh * Wh, G, tpg * cin)
    if tpg * cin != LANES:                               # pad K lanes to 128
        P = jnp.pad(P, ((0, 0), (0, 0), (0, 0), (0, 0), (0, LANES - tpg * cin)))
    P = P.reshape(NB, block_images, 4, Hh * Wh, G, LANES)
    if pos_major_rows:
        P = P.transpose(0, 2, 4, 3, 1, 5)                # (NB,4,G,pos,img,128)
    else:
        P = P.transpose(0, 2, 4, 1, 3, 5)                # (NB,4,G,img,pos,128)
    return P.reshape(NB, 4, G, block_images * Hh * Wh, LANES)


def _pack_conv_weight(w_oihw, tpg):
    """(Cout, Cin, 5, 5) -> (G, 128, 128) bf16, rows = t_in_group*Cin + c."""
    cout, cin = w_oihw.shape[0], w_oihw.shape[1]
    G = -(-25 // tpg)
    wt = jnp.transpose(w_oihw, (2, 3, 1, 0)).reshape(25, cin, cout)  # [tap, c, o]
    wt = jnp.pad(wt, ((0, G * tpg - 25), (0, 0), (0, 0)))
    wt = wt.reshape(G, tpg * cin, cout)
    wt = jnp.pad(wt, ((0, 0), (0, LANES - tpg * cin), (0, LANES - cout)))
    return wt.astype(jnp.bfloat16)


# ---------------------------------------------------------------------------
# Fused Conv2d(5x5, pad=2) + MaxPool2d(2) (layers 1 and 2).
# ---------------------------------------------------------------------------
def conv_pool_layer(x_nhwc, w_oihw, bias, block_images):
    """x_nhwc: (N, H, W, C) with real channels in [:Cin].
    Returns (N, H//2, W//2, 128) bf16 with real channels in [:Cout]."""
    N, H, W, _ = x_nhwc.shape
    assert H % 2 == 0 and W % 2 == 0
    Hh, Wh = H // 2, W // 2
    cout, cin = w_oihw.shape[0], w_oihw.shape[1]
    tpg = min(25, LANES // cin)          # taps packed per 128-lane K group
    G = -(-25 // tpg)
    # Several images per grid step, but keep the grid >= 2 steps (megacore).
    bi = max(1, min(block_images, -(-N // 2)))
    NB = -(-N // bi)
    M = bi * Hh * Wh

    glue = _build_glue(x_nhwc, cin, tpg, bi, pos_major_rows=False)   # bf16
    wp = _pack_conv_weight(w_oihw, tpg)                              # bf16
    brow = jnp.pad(bias, (0, LANES - cout)).reshape(1, LANES).astype(jnp.float32)

    def kernel(g_ref, w_ref, b_ref, o_ref, acc_ref, max_ref):
        # Four pool phases (r, s); max over phases == MaxPool2d(2) of the conv.
        for ph in range(4):
            acc_ref[...] = jnp.dot(g_ref[0, ph, 0], w_ref[0],
                                   preferred_element_type=jnp.float32)
            for g in range(1, G):
                acc_ref[...] += jnp.dot(g_ref[0, ph, g], w_ref[g],
                                        preferred_element_type=jnp.float32)
            if ph == 0:
                max_ref[...] = acc_ref[...]
            else:
                max_ref[...] = jnp.maximum(max_ref[...], acc_ref[...])
        # bias is a per-channel constant -> add after the max (equivalent).
        o_ref[0] = (max_ref[...] + b_ref[...]).astype(o_ref.dtype)

    out = pl.pallas_call(
        kernel,
        out_shape=jax.ShapeDtypeStruct((NB, M, LANES), jnp.bfloat16),
        grid=(NB,),
        in_specs=[
            pl.BlockSpec((1, 4, G, M, LANES), lambda n: (n, 0, 0, 0, 0)),
            pl.BlockSpec((G, LANES, LANES), lambda n: (0, 0, 0)),
            pl.BlockSpec((1, LANES), lambda n: (0, 0)),
        ],
        out_specs=pl.BlockSpec((1, M, LANES), lambda n: (n, 0, 0)),
        scratch_shapes=[pltpu.VMEM((M, LANES), jnp.float32),
                        pltpu.VMEM((M, LANES), jnp.float32)],
        compiler_params=pltpu.CompilerParams(
            dimension_semantics=("parallel",),
            vmem_limit_bytes=32 * 1024 * 1024),
    )(glue, wp, brow)
    return out.reshape(NB * bi, Hh, Wh, LANES)[:N]


# ---------------------------------------------------------------------------
# Fused tail: Conv3(32->64) + MaxPool(2) + Flatten + Linear(1024,64) + Linear(64,10)
# ---------------------------------------------------------------------------
def tail_fused(x_nhwc, w3, b3, wl1, bl1, wl2, bl2):
    """x_nhwc: (N, 8, 8, 128) bf16, real channels in [:32]. Returns (N, 10) f32."""
    N, H, W, _ = x_nhwc.shape
    assert (H, W) == (8, 8)
    BI = 8                    # images per block; rows = pos*8 + img stay 8-aligned
    NB = -(-N // BI)
    cin = w3.shape[1]
    tpg = min(25, LANES // cin)          # = 4
    G = -(-25 // tpg)                    # = 7

    glue = _build_glue(x_nhwc, cin, tpg, BI, pos_major_rows=True)   # (NB,4,7,128,128)
    w3p = _pack_conv_weight(w3, tpg)                                 # (7,128,128) bf16
    b3row = jnp.pad(b3, (0, LANES - 64)).reshape(1, LANES).astype(jnp.float32)

    # Linear1 with the PyTorch NCHW-flatten permutation folded in (kept f32; tiny):
    #   w1p[h*4+w, c, out] = wl1[out, c*16 + h*4 + w]
    w1p = wl1.reshape(64, 64, 4, 4).transpose(2, 3, 1, 0).reshape(16, 64, 64)
    w1p = jnp.pad(w1p, ((0, 0), (0, LANES - 64), (0, LANES - 64))).astype(jnp.float32)
    b1row = jnp.pad(bl1, (0, LANES - 64)).reshape(1, LANES).astype(jnp.float32)
    w2p = jnp.pad(wl2.T, ((0, LANES - 64), (0, LANES - 10))).astype(jnp.float32)
    b2row = jnp.pad(bl2, (0, LANES - 10)).reshape(1, LANES).astype(jnp.float32)

    def kernel(g_ref, w3_ref, b3_ref, w1_ref, b1_ref, w2_ref, b2_ref,
               o_ref, acc_ref, max_ref):
        # conv3 + pool3 (K-packed, phase-separated accumulation, max over phases)
        for ph in range(4):
            acc_ref[...] = jnp.dot(g_ref[0, ph, 0], w3_ref[0],
                                   preferred_element_type=jnp.float32)
            for g in range(1, G):
                acc_ref[...] += jnp.dot(g_ref[0, ph, g], w3_ref[g],
                                        preferred_element_type=jnp.float32)
            if ph == 0:
                max_ref[...] = acc_ref[...]
            else:
                max_ref[...] = jnp.maximum(max_ref[...], acc_ref[...])
        max_ref[...] = max_ref[...] + b3_ref[...]      # pooled map, rows = pos*8 + img
        # Linear1: 16 aligned 8-row slabs (one per pooled spatial position).
        fc1 = jnp.zeros((8, LANES), jnp.float32) + b1_ref[...]
        for p in range(16):
            fc1 = fc1 + jnp.dot(max_ref[p * 8:(p + 1) * 8, :], w1_ref[p],
                                preferred_element_type=jnp.float32)
        # Linear2
        logits = jnp.dot(fc1, w2_ref[...],
                         preferred_element_type=jnp.float32) + b2_ref[...]
        o_ref[0] = logits

    out = pl.pallas_call(
        kernel,
        out_shape=jax.ShapeDtypeStruct((NB, 8, LANES), jnp.float32),
        grid=(NB,),
        in_specs=[
            pl.BlockSpec((1, 4, G, 16 * BI, LANES), lambda i: (i, 0, 0, 0, 0)),
            pl.BlockSpec((G, LANES, LANES), lambda i: (0, 0, 0)),
            pl.BlockSpec((1, LANES), lambda i: (0, 0)),
            pl.BlockSpec((16, LANES, LANES), lambda i: (0, 0, 0)),
            pl.BlockSpec((1, LANES), lambda i: (0, 0)),
            pl.BlockSpec((LANES, LANES), lambda i: (0, 0)),
            pl.BlockSpec((1, LANES), lambda i: (0, 0)),
        ],
        out_specs=pl.BlockSpec((1, 8, LANES), lambda i: (i, 0, 0)),
        scratch_shapes=[pltpu.VMEM((16 * BI, LANES), jnp.float32),
                        pltpu.VMEM((16 * BI, LANES), jnp.float32)],
        compiler_params=pltpu.CompilerParams(
            dimension_semantics=("parallel",),
            vmem_limit_bytes=32 * 1024 * 1024),
    )(glue, w3p, b3row, w1p, b1row, w2p, b2row)
    return out.reshape(NB * 8, LANES)[:N, :10]


# ---------------------------------------------------------------------------
# Full forward pass (matches NN.forward)
# ---------------------------------------------------------------------------
def nn_forward(params, x_nchw):
    x = jnp.transpose(x_nchw, (0, 2, 3, 1))                       # NCHW -> NHWC
    x = conv_pool_layer(x, params["w1"], params["b1"], block_images=4)  # (N,16,16,128)
    x = conv_pool_layer(x, params["w2"], params["b2"], block_images=8)  # (N, 8, 8,128)
    return tail_fused(x, params["w3"], params["b3"],
                      params["wl1"], params["bl1"],
                      params["wl2"], params["bl2"])               # (N, 10) f32


# ---------------------------------------------------------------------------
# Pure-JAX reference (high precision) for a correctness check.
# ---------------------------------------------------------------------------
def reference_forward(params, x_nchw):
    x = jnp.transpose(x_nchw, (0, 2, 3, 1)).astype(jnp.float32)

    def conv(x, w, b):
        y = lax.conv_general_dilated(
            x, jnp.transpose(w, (2, 3, 1, 0)), (1, 1), ((2, 2), (2, 2)),
            dimension_numbers=("NHWC", "HWIO", "NHWC"),
            precision=lax.Precision.HIGHEST)
        return y + b

    def pool(x):
        return lax.reduce_window(x, -jnp.inf, lax.max,
                                 (1, 2, 2, 1), (1, 2, 2, 1), "VALID")

    x = pool(conv(x, params["w1"], params["b1"]))
    x = pool(conv(x, params["w2"], params["b2"]))
    x = pool(conv(x, params["w3"], params["b3"]))
    x = jnp.transpose(x, (0, 3, 1, 2)).reshape(x.shape[0], -1)   # NCHW flatten
    x = jnp.dot(x, params["wl1"].T, precision=lax.Precision.HIGHEST) + params["bl1"]
    x = jnp.dot(x, params["wl2"].T, precision=lax.Precision.HIGHEST) + params["bl2"]
    return x


# ---------------------------------------------------------------------------
# Parameters (deterministic synthetic init, PyTorch-convention shapes)
# ---------------------------------------------------------------------------
def init_params(key):
    ks = jax.random.split(key, 10)

    def conv_init(kw_, kb_, cout, cin, k=5):
        fan_in = cin * k * k
        w = jax.random.normal(kw_, (cout, cin, k, k), jnp.float32) / jnp.sqrt(fan_in)
        b = jax.random.normal(kb_, (cout,), jnp.float32) * 0.01
        return w, b

    def lin_init(kw_, kb_, dout, din):
        w = jax.random.normal(kw_, (dout, din), jnp.float32) / jnp.sqrt(din)
        b = jax.random.normal(kb_, (dout,), jnp.float32) * 0.01
        return w, b

    w1, b1 = conv_init(ks[0], ks[1], 32, 3)
    w2, b2 = conv_init(ks[2], ks[3], 32, 32)
    w3, b3 = conv_init(ks[4], ks[5], 64, 32)
    wl1, bl1 = lin_init(ks[6], ks[7], 64, 1024)
    wl2, bl2 = lin_init(ks[8], ks[9], 10, 64)
    return {"w1": w1, "b1": b1, "w2": w2, "b2": b2, "w3": w3, "b3": b3,
            "wl1": wl1, "bl1": bl1, "wl2": wl2, "bl2": bl2}


if __name__ == "__main__":
    key = jax.random.PRNGKey(0)
    pkey, xkey = jax.random.split(key)
    params = init_params(pkey)

    # Linear(1024, 64) after three 2x pools of a 64-channel map forces 32x32
    # spatial input (CIFAR-10 size); batch kept small.
    x = jax.random.normal(xkey, (2, 3, 32, 32), jnp.float32)

    fwd = jax.jit(nn_forward)
    out = fwd(params, x)
    jax.block_until_ready(out)
    assert out.shape == (2, 10) and out.dtype == jnp.float32

    ref = jax.jit(reference_forward)(params, x)
    jax.block_until_ready(ref)
    # Tolerance accounts for bf16 MXU inputs (f32 accumulation); a real indexing
    # bug would produce O(1) errors, far above this bound.
    assert bool(jnp.allclose(out, ref, rtol=5e-2, atol=5e-2)), (
        f"mismatch vs reference: max_abs_err={float(jnp.max(jnp.abs(out - ref)))}")
    print("KERNEL_OK")
</pallas_src>

<mosaic_0001>
module attributes {stable_mosaic.version = 11 : i64} {
  func.func @kernel(%arg0: i32, %arg1: memref<1x4x1x256x128xbf16, #tpu.memory_space<vmem>>, %arg2: memref<1x128x128xbf16, #tpu.memory_space<vmem>>, %arg3: memref<1x128xf32, #tpu.memory_space<vmem>>, %arg4: memref<1x256x128xbf16, #tpu.memory_space<vmem>>, %arg5: memref<256x128xf32, #tpu.memory_space<vmem>>, %arg6: memref<256x128xf32, #tpu.memory_space<vmem>>) attributes {dimension_semantics = [#tpu.dimension_semantics<parallel>], iteration_bounds = array<i64: 2>, scalar_prefetch = 0 : i64, scratch_operands = 2 : i64, tpu.core_type = #tpu.core_type<tc>, window_params = [{transform_indices = @transform_0, window_bounds = array<i64: 1, 4, 1, 256, 128>}, {pipeline_mode = #tpu.pipeline_mode<synchronous>, transform_indices = @transform_1, window_bounds = array<i64: 1, 128, 128>}, {pipeline_mode = #tpu.pipeline_mode<synchronous>, transform_indices = @transform_2, window_bounds = array<i64: 1, 128>}, {transform_indices = @transform_3, window_bounds = array<i64: 1, 256, 128>}]} {
    %c0 = arith.constant 0 : index
    %c0_0 = arith.constant 0 : index
    %c0_1 = arith.constant 0 : index
    %c0_2 = arith.constant 0 : index
    %c0_3 = arith.constant 0 : index
    %0 = vector.load %arg1[%c0, %c0_0, %c0_1, %c0_2, %c0_3] : memref<1x4x1x256x128xbf16, #tpu.memory_space<vmem>>, vector<1x1x1x256x128xbf16>
    %1 = vector.shape_cast %0 : vector<1x1x1x256x128xbf16> to vector<256x128xbf16>
    %c0_4 = arith.constant 0 : index
    %c0_5 = arith.constant 0 : index
    %c0_6 = arith.constant 0 : index
    %2 = vector.load %arg2[%c0_4, %c0_5, %c0_6] : memref<1x128x128xbf16, #tpu.memory_space<vmem>>, vector<1x128x128xbf16>
    %3 = vector.shape_cast %2 : vector<1x128x128xbf16> to vector<128x128xbf16>
    %cst = arith.constant dense<0.000000e+00> : vector<256x128xf32>
    %4 = tpu.matmul %1, %3, %cst {dimension_numbers = #tpu.dot_dimension_numbers<[1], [0], [0], [1], [0, 0, 1, 1], [], []>} : vector<256x128xbf16>, vector<128x128xbf16>, vector<256x128xf32> -> vector<256x128xf32>
    %c0_7 = arith.constant 0 : index
    %c0_8 = arith.constant 0 : index
    %5 = vector.load %arg5[%c0_7, %c0_8] : memref<256x128xf32, #tpu.memory_space<vmem>>, vector<256x128xf32>
    tpu.vector_store %arg5[%c0_7, %c0_8], %4 {strides = array<i32>} : memref<256x128xf32, #tpu.memory_space<vmem>>, vector<256x128xf32>,
    %c0_9 = arith.constant 0 : index
    %c0_10 = arith.constant 0 : index
    %6 = vector.load %arg5[%c0_9, %c0_10] : memref<256x128xf32, #tpu.memory_space<vmem>>, vector<256x128xf32>
    %c0_11 = arith.constant 0 : index
    %c0_12 = arith.constant 0 : index
    %7 = vector.load %arg6[%c0_11, %c0_12] : memref<256x128xf32, #tpu.memory_space<vmem>>, vector<256x128xf32>
    tpu.vector_store %arg6[%c0_11, %c0_12], %6 {strides = array<i32>} : memref<256x128xf32, #tpu.memory_space<vmem>>, vector<256x128xf32>,
    %c0_13 = arith.constant 0 : index
    %c1 = arith.constant 1 : index
    %c0_14 = arith.constant 0 : index
    %c0_15 = arith.constant 0 : index
    %c0_16 = arith.constant 0 : index
    %8 = vector.load %arg1[%c0_13, %c1, %c0_14, %c0_15, %c0_16] : memref<1x4x1x256x128xbf16, #tpu.memory_space<vmem>>, vector<1x1x1x256x128xbf16>
    %9 = vector.shape_cast %8 : vector<1x1x1x256x128xbf16> to vector<256x128xbf16>
    %c0_17 = arith.constant 0 : index
    %c0_18 = arith.constant 0 : index
    %c0_19 = arith.constant 0 : index
    %10 = vector.load %arg2[%c0_17, %c0_18, %c0_19] : memref<1x128x128xbf16, #tpu.memory_space<vmem>>, vector<1x128x128xbf16>
    %11 = vector.shape_cast %10 : vector<1x128x128xbf16> to vector<128x128xbf16>
    %cst_20 = arith.constant dense<0.000000e+00> : vector<256x128xf32>
    %12 = tpu.matmul %9, %11, %cst_20 {dimension_numbers = #tpu.dot_dimension_numbers<[1], [0], [0], [1], [0, 0, 1, 1], [], []>} : vector<256x128xbf16>, vector<128x128xbf16>, vector<256x128xf32> -> vector<256x128xf32>
    %c0_21 = arith.constant 0 : index
    %c0_22 = arith.constant 0 : index
    %13 = vector.load %arg5[%c0_21, %c0_22] : memref<256x128xf32, #tpu.memory_space<vmem>>, vector<256x128xf32>
    tpu.vector_store %arg5[%c0_21, %c0_22], %12 {strides = array<i32>} : memref<256x128xf32, #tpu.memory_space<vmem>>, vector<256x128xf32>,
    %c0_23 = arith.constant 0 : index
    %c0_24 = arith.constant 0 : index
    %14 = vector.load %arg6[%c0_23, %c0_24] : memref<256x128xf32, #tpu.memory_space<vmem>>, vector<256x128xf32>
    %c0_25 = arith.constant 0 : index
    %c0_26 = arith.constant 0 : index
    %15 = vector.load %arg5[%c0_25, %c0_26] : memref<256x128xf32, #tpu.memory_space<vmem>>, vector<256x128xf32>
    %16 = arith.maximumf %14, %15 : vector<256x128xf32>
    %c0_27 = arith.constant 0 : index
    %c0_28 = arith.constant 0 : index
    %17 = vector.load %arg6[%c0_27, %c0_28] : memref<256x128xf32, #tpu.memory_space<vmem>>, vector<256x128xf32>
    tpu.vector_store %arg6[%c0_27, %c0_28], %16 {strides = array<i32>} : memref<256x128xf32, #tpu.memory_space<vmem>>, vector<256x128xf32>,
    %c0_29 = arith.constant 0 : index
    %c2 = arith.constant 2 : index
    %c0_30 = arith.constant 0 : index
    %c0_31 = arith.constant 0 : index
    %c0_32 = arith.constant 0 : index
    %18 = vector.load %arg1[%c0_29, %c2, %c0_30, %c0_31, %c0_32] : memref<1x4x1x256x128xbf16, #tpu.memory_space<vmem>>, vector<1x1x1x256x128xbf16>
    %19 = vector.shape_cast %18 : vector<1x1x1x256x128xbf16> to vector<256x128xbf16>
    %c0_33 = arith.constant 0 : index
    %c0_34 = arith.constant 0 : index
    %c0_35 = arith.constant 0 : index
    %20 = vector.load %arg2[%c0_33, %c0_34, %c0_35] : memref<1x128x128xbf16, #tpu.memory_space<vmem>>, vector<1x128x128xbf16>
    %21 = vector.shape_cast %20 : vector<1x128x128xbf16> to vector<128x128xbf16>
    %cst_36 = arith.constant dense<0.000000e+00> : vector<256x128xf32>
    %22 = tpu.matmul %19, %21, %cst_36 {dimension_numbers = #tpu.dot_dimension_numbers<[1], [0], [0], [1], [0, 0, 1, 1], [], []>} : vector<256x128xbf16>, vector<128x128xbf16>, vector<256x128xf32> -> vector<256x128xf32>
    %c0_37 = arith.constant 0 : index
    %c0_38 = arith.constant 0 : index
    %23 = vector.load %arg5[%c0_37, %c0_38] : memref<256x128xf32, #tpu.memory_space<vmem>>, vector<256x128xf32>
    tpu.vector_store %arg5[%c0_37, %c0_38], %22 {strides = array<i32>} : memref<256x128xf32, #tpu.memory_space<vmem>>, vector<256x128xf32>,
    %c0_39 = arith.constant 0 : index
    %c0_40 = arith.constant 0 : index
    %24 = vector.load %arg6[%c0_39, %c0_40] : memref<256x128xf32, #tpu.memory_space<vmem>>, vector<256x128xf32>
    %c0_41 = arith.constant 0 : index
    %c0_42 = arith.constant 0 : index
    %25 = vector.load %arg5[%c0_41, %c0_42] : memref<256x128xf32, #tpu.memory_space<vmem>>, vector<256x128xf32>
    %26 = arith.maximumf %24, %25 : vector<256x128xf32>
    %c0_43 = arith.constant 0 : index
    %c0_44 = arith.constant 0 : index
    %27 = vector.load %arg6[%c0_43, %c0_44] : memref<256x128xf32, #tpu.memory_space<vmem>>, vector<256x128xf32>
    tpu.vector_store %arg6[%c0_43, %c0_44], %26 {strides = array<i32>} : memref<256x128xf32, #tpu.memory_space<vmem>>, vector<256x128xf32>,
    %c0_45 = arith.constant 0 : index
    %c3 = arith.constant 3 : index
    %c0_46 = arith.constant 0 : index
    %c0_47 = arith.constant 0 : index
    %c0_48 = arith.constant 0 : index
    %28 = vector.load %arg1[%c0_45, %c3, %c0_46, %c0_47, %c0_48] : memref<1x4x1x256x128xbf16, #tpu.memory_space<vmem>>, vector<1x1x1x256x128xbf16>
    %29 = vector.shape_cast %28 : vector<1x1x1x256x128xbf16> to vector<256x128xbf16>
    %c0_49 = arith.constant 0 : index
    %c0_50 = arith.constant 0 : index
    %c0_51 = arith.constant 0 : index
    %30 = vector.load %arg2[%c0_49, %c0_50, %c0_51] : memref<1x128x128xbf16, #tpu.memory_space<vmem>>, vector<1x128x128xbf16>
    %31 = vector.shape_cast %30 : vector<1x128x128xbf16> to vector<128x128xbf16>
    %cst_52 = arith.constant dense<0.000000e+00> : vector<256x128xf32>
    %32 = tpu.matmul %29, %31, %cst_52 {dimension_numbers = #tpu.dot_dimension_numbers<[1], [0], [0], [1], [0, 0, 1, 1], [], []>} : vector<256x128xbf16>, vector<128x128xbf16>, vector<256x128xf32> -> vector<256x128xf32>
    %c0_53 = arith.constant 0 : index
    %c0_54 = arith.constant 0 : index
    %33 = vector.load %arg5[%c0_53, %c0_54] : memref<256x128xf32, #tpu.memory_space<vmem>>, vector<256x128xf32>
    tpu.vector_store %arg5[%c0_53, %c0_54], %32 {strides = array<i32>} : memref<256x128xf32, #tpu.memory_space<vmem>>, vector<256x128xf32>,
    %c0_55 = arith.constant 0 : index
    %c0_56 = arith.constant 0 : index
    %34 = vector.load %arg6[%c0_55, %c0_56] : memref<256x128xf32, #tpu.memory_space<vmem>>, vector<256x128xf32>
    %c0_57 = arith.constant 0 : index
    %c0_58 = arith.constant 0 : index
    %35 = vector.load %arg5[%c0_57, %c0_58] : memref<256x128xf32, #tpu.memory_space<vmem>>, vector<256x128xf32>
    %36 = arith.maximumf %34, %35 : vector<256x128xf32>
    %c0_59 = arith.constant 0 : index
    %c0_60 = arith.constant 0 : index
    %37 = vector.load %arg6[%c0_59, %c0_60] : memref<256x128xf32, #tpu.memory_space<vmem>>, vector<256x128xf32>
    tpu.vector_store %arg6[%c0_59, %c0_60], %36 {strides = array<i32>} : memref<256x128xf32, #tpu.memory_space<vmem>>, vector<256x128xf32>,
    %c0_61 = arith.constant 0 : index
    %c0_62 = arith.constant 0 : index
    %38 = vector.load %arg6[%c0_61, %c0_62] : memref<256x128xf32, #tpu.memory_space<vmem>>, vector<256x128xf32>
    %c0_63 = arith.constant 0 : index
    %c0_64 = arith.constant 0 : index
    %39 = vector.load %arg3[%c0_63, %c0_64] : memref<1x128xf32, #tpu.memory_space<vmem>>, vector<1x128xf32>
    %40 = vector.broadcast %39 : vector<1x128xf32> to vector<256x128xf32>
    %41 = arith.addf %38, %40 : vector<256x128xf32>
    %42 = arith.truncf %41 : vector<256x128xf32> to vector<256x128xbf16>
    %c0_65 = arith.constant 0 : index
    %c0_66 = arith.constant 0 : index
    %c0_67 = arith.constant 0 : index
    %43 = vector.load %arg4[%c0_65, %c0_66, %c0_67] : memref<1x256x128xbf16, #tpu.memory_space<vmem>>, vector<1x256x128xbf16>
    %44 = vector.shape_cast %43 : vector<1x256x128xbf16> to vector<256x128xbf16>
    %45 = vector.shape_cast %42 : vector<256x128xbf16> to vector<1x256x128xbf16>
    tpu.vector_store %arg4[%c0_65, %c0_66, %c0_67], %45 {strides = array<i32>} : memref<1x256x128xbf16, #tpu.memory_space<vmem>>, vector<1x256x128xbf16>,
    return
  }
  func.func @transform_0(%arg0: i32) -> (i32, i32, i32, i32, i32) {
    %c0_i32 = arith.constant 0 : i32
    %c0_i32_0 = arith.constant 0 : i32
    %c0_i32_1 = arith.constant 0 : i32
    %c0_i32_2 = arith.constant 0 : i32
    %c0_i32_3 = arith.constant 0 : i32
    return %arg0, %c0_i32, %c0_i32_0, %c0_i32_1, %c0_i32_2 : i32, i32, i32, i32, i32
  }
  func.func @transform_1(%arg0: i32) -> (i32, i32, i32) {
    %c0_i32 = arith.constant 0 : i32
    %c0_i32_0 = arith.constant 0 : i32
    %c0_i32_1 = arith.constant 0 : i32
    %c0_i32_2 = arith.constant 0 : i32
    return %c0_i32, %c0_i32_0, %c0_i32_1 : i32, i32, i32
  }
  func.func @transform_2(%arg0: i32) -> (i32, i32) {
    %c0_i32 = arith.constant 0 : i32
    %c0_i32_0 = arith.constant 0 : i32
    %c0_i32_1 = arith.constant 0 : i32
    return %c0_i32, %c0_i32_0 : i32, i32
  }
  func.func @transform_3(%arg0: i32) -> (i32, i32, i32) {
    %c0_i32 = arith.constant 0 : i32
    %c0_i32_0 = arith.constant 0 : i32
    %c0_i32_1 = arith.constant 0 : i32
    return %arg0, %c0_i32, %c0_i32_0 : i32, i32, i32
  }
}

module attributes {stable_mosaic.version = 11 : i64} {
  func.func @kernel(%arg0: i32, %arg1: memref<1x4x7x64x128xbf16, #tpu.memory_space<vmem>>, %arg2: memref<7x128x128xbf16, #tpu.memory_space<vmem>>, %arg3: memref<1x128xf32, #tpu.memory_space<vmem>>, %arg4: memref<1x64x128xbf16, #tpu.memory_space<vmem>>, %arg5: memref<64x128xf32, #tpu.memory_space<vmem>>, %arg6: memref<64x128xf32, #tpu.memory_space<vmem>>) attributes {dimension_semantics = [#tpu.dimension_semantics<parallel>], iteration_bounds = array<i64: 2>, scalar_prefetch = 0 : i64, scratch_operands = 2 : i64, tpu.core_type = #tpu.core_type<tc>, window_params = [{transform_indices = @transform_0, window_bounds = array<i64: 1, 4, 7, 64, 128>}, {pipeline_mode = #tpu.pipeline_mode<synchronous>, transform_indices = @transform_1, window_bounds = array<i64: 7, 128, 128>}, {pipeline_mode = #tpu.pipeline_mode<synchronous>, transform_indices = @transform_2, window_bounds = array<i64: 1, 128>}, {transform_indices = @transform_3, window_bounds = array<i64: 1, 64, 128>}]} {
    %c0 = arith.constant 0 : index
    %c0_0 = arith.constant 0 : index
    %c0_1 = arith.constant 0 : index
    %c0_2 = arith.constant 0 : index
    %c0_3 = arith.constant 0 : index
    %0 = vector.load %arg1[%c0, %c0_0, %c0_1, %c0_2, %c0_3] : memref<1x4x7x64x128xbf16, #tpu.memory_space<vmem>>, vector<1x1x1x64x128xbf16>
    %1 = vector.shape_cast %0 : vector<1x1x1x64x128xbf16> to vector<64x128xbf16>
    %c0_4 = arith.constant 0 : index
    %c0_5 = arith.constant 0 : index
    %c0_6 = arith.constant 0 : index
    %2 = vector.load %arg2[%c0_4, %c0_5, %c0_6] : memref<7x128x128xbf16, #tpu.memory_space<vmem>>, vector<1x128x128xbf16>
    %3 = vector.shape_cast %2 : vector<1x128x128xbf16> to vector<128x128xbf16>
    %cst = arith.constant dense<0.000000e+00> : vector<64x128xf32>
    %4 = tpu.matmul %1, %3, %cst {dimension_numbers = #tpu.dot_dimension_numbers<[1], [0], [0], [1], [0, 0, 1, 1], [], []>} : vector<64x128xbf16>, vector<128x128xbf16>, vector<64x128xf32> -> vector<64x128xf32>
    %c0_7 = arith.constant 0 : index
    %c0_8 = arith.constant 0 : index
    %5 = vector.load %arg5[%c0_7, %c0_8] : memref<64x128xf32, #tpu.memory_space<vmem>>, vector<64x128xf32>
    tpu.vector_store %arg5[%c0_7, %c0_8], %4 {strides = array<i32>} : memref<64x128xf32, #tpu.memory_space<vmem>>, vector<64x128xf32>,
    %c0_9 = arith.constant 0 : index
    %c0_10 = arith.constant 0 : index
    %6 = vector.load %arg5[%c0_9, %c0_10] : memref<64x128xf32, #tpu.memory_space<vmem>>, vector<64x128xf32>
    %c0_11 = arith.constant 0 : index
    %c0_12 = arith.constant 0 : index
    %c1 = arith.constant 1 : index
    %c0_13 = arith.constant 0 : index
    %c0_14 = arith.constant 0 : index
    %7 = vector.load %arg1[%c0_11, %c0_12, %c1, %c0_13, %c0_14] : memref<1x4x7x64x128xbf16, #tpu.memory_space<vmem>>, vector<1x1x1x64x128xbf16>
    %8 = vector.shape_cast %7 : vector<1x1x1x64x128xbf16> to vector<64x128xbf16>
    %c1_15 = arith.constant 1 : index
    %c0_16 = arith.constant 0 : index
    %c0_17 = arith.constant 0 : index
    %9 = vector.load %arg2[%c1_15, %c0_16, %c0_17] : memref<7x128x128xbf16, #tpu.memory_space<vmem>>, vector<1x128x128xbf16>
    %10 = vector.shape_cast %9 : vector<1x128x128xbf16> to vector<128x128xbf16>
    %cst_18 = arith.constant dense<0.000000e+00> : vector<64x128xf32>
    %11 = tpu.matmul %8, %10, %cst_18 {dimension_numbers = #tpu.dot_dimension_numbers<[1], [0], [0], [1], [0, 0, 1, 1], [], []>} : vector<64x128xbf16>, vector<128x128xbf16>, vector<64x128xf32> -> vector<64x128xf32>
    %12 = arith.addf %6, %11 : vector<64x128xf32>
    %c0_19 = arith.constant 0 : index
    %c0_20 = arith.constant 0 : index
    %13 = vector.load %arg5[%c0_19, %c0_20] : memref<64x128xf32, #tpu.memory_space<vmem>>, vector<64x128xf32>
    tpu.vector_store %arg5[%c0_19, %c0_20], %12 {strides = array<i32>} : memref<64x128xf32, #tpu.memory_space<vmem>>, vector<64x128xf32>,
    %c0_21 = arith.constant 0 : index
    %c0_22 = arith.constant 0 : index
    %14 = vector.load %arg5[%c0_21, %c0_22] : memref<64x128xf32, #tpu.memory_space<vmem>>, vector<64x128xf32>
    %c0_23 = arith.constant 0 : index
    %c0_24 = arith.constant 0 : index
    %c2 = arith.constant 2 : index
    %c0_25 = arith.constant 0 : index
    %c0_26 = arith.constant 0 : index
    %15 = vector.load %arg1[%c0_23, %c0_24, %c2, %c0_25, %c0_26] : memref<1x4x7x64x128xbf16, #tpu.memory_space<vmem>>, vector<1x1x1x64x128xbf16>
    %16 = vector.shape_cast %15 : vector<1x1x1x64x128xbf16> to vector<64x128xbf16>
    %c2_27 = arith.constant 2 : index
    %c0_28 = arith.constant 0 : index
    %c0_29 = arith.constant 0 : index
    %17 = vector.load %arg2[%c2_27, %c0_28, %c0_29] : memref<7x128x128xbf16, #tpu.memory_space<vmem>>, vector<1x128x128xbf16>
    %18 = vector.shape_cast %17 : vector<1x128x128xbf16> to vector<128x128xbf16>
    %cst_30 = arith.constant dense<0.000000e+00> : vector<64x128xf32>
    %19 = tpu.matmul %16, %18, %cst_30 {dimension_numbers = #tpu.dot_dimension_numbers<[1], [0], [0], [1], [0, 0, 1, 1], [], []>} : vector<64x128xbf16>, vector<128x128xbf16>, vector<64x128xf32> -> vector<64x128xf32>
    %20 = arith.addf %14, %19 : vector<64x128xf32>
    %c0_31 = arith.constant 0 : index
    %c0_32 = arith.constant 0 : index
    %21 = vector.load %arg5[%c0_31, %c0_32] : memref<64x128xf32, #tpu.memory_space<vmem>>, vector<64x128xf32>
    tpu.vector_store %arg5[%c0_31, %c0_32], %20 {strides = array<i32>} : memref<64x128xf32, #tpu.memory_space<vmem>>, vector<64x128xf32>,
    %c0_33 = arith.constant 0 : index
    %c0_34 = arith.constant 0 : index
    %22 = vector.load %arg5[%c0_33, %c0_34] : memref<64x128xf32, #tpu.memory_space<vmem>>, vector<64x128xf32>
    %c0_35 = arith.constant 0 : index
    %c0_36 = arith.constant 0 : index
    %c3 = arith.constant 3 : index
    %c0_37 = arith.constant 0 : index
    %c0_38 = arith.constant 0 : index
    %23 = vector.load %arg1[%c0_35, %c0_36, %c3, %c0_37, %c0_38] : memref<1x4x7x64x128xbf16, #tpu.memory_space<vmem>>, vector<1x1x1x64x128xbf16>
    %24 = vector.shape_cast %23 : vector<1x1x1x64x128xbf16> to vector<64x128xbf16>
    %c3_39 = arith.constant 3 : index
    %c0_40 = arith.constant 0 : index
    %c0_41 = arith.constant 0 : index
    %25 = vector.load %arg2[%c3_39, %c0_40, %c0_41] : memref<7x128x128xbf16, #tpu.memory_space<vmem>>, vector<1x128x128xbf16>
    %26 = vector.shape_cast %25 : vector<1x128x128xbf16> to vector<128x128xbf16>
    %cst_42 = arith.constant dense<0.000000e+00> : vector<64x128xf32>
    %27 = tpu.matmul %24, %26, %cst_42 {dimension_numbers = #tpu.dot_dimension_numbers<[1], [0], [0], [1], [0, 0, 1, 1], [], []>} : vector<64x128xbf16>, vector<128x128xbf16>, vector<64x128xf32> -> vector<64x128xf32>
    %28 = arith.addf %22, %27 : vector<64x128xf32>
    %c0_43 = arith.constant 0 : index
    %c0_44 = arith.constant 0 : index
    %29 = vector.load %arg5[%c0_43, %c0_44] : memref<64x128xf32, #tpu.memory_space<vmem>>, vector<64x128xf32>
    tpu.vector_store %arg5[%c0_43, %c0_44], %28 {strides = array<i32>} : memref<64x128xf32, #tpu.memory_space<vmem>>, vector<64x128xf32>,
    %c0_45 = arith.constant 0 : index
    %c0_46 = arith.constant 0 : index
    %30 = vector.load %arg5[%c0_45, %c0_46] : memref<64x128xf32, #tpu.memory_space<vmem>>, vector<64x128xf32>
    %c0_47 = arith.constant 0 : index
    %c0_48 = arith.constant 0 : index
    %c4 = arith.constant 4 : index
    %c0_49 = arith.constant 0 : index
    %c0_50 = arith.constant 0 : index
    %31 = vector.load %arg1[%c0_47, %c0_48, %c4, %c0_49, %c0_50] : memref<1x4x7x64x128xbf16, #tpu.memory_space<vmem>>, vector<1x1x1x64x128xbf16>
    %32 = vector.shape_cast %31 : vector<1x1x1x64x128xbf16> to vector<64x128xbf16>
    %c4_51 = arith.constant 4 : index
    %c0_52 = arith.constant 0 : index
    %c0_53 = arith.constant 0 : index
    %33 = vector.load %arg2[%c4_51, %c0_52, %c0_53] : memref<7x128x128xbf16, #tpu.memory_space<vmem>>, vector<1x128x128xbf16>
    %34 = vector.shape_cast %33 : vector<1x128x128xbf16> to vector<128x128xbf16>
    %cst_54 = arith.constant dense<0.000000e+00> : vector<64x128xf32>
    %35 = tpu.matmul %32, %34, %cst_54 {dimension_numbers = #tpu.dot_dimension_numbers<[1], [0], [0], [1], [0, 0, 1, 1], [], []>} : vector<64x128xbf16>, vector<128x128xbf16>, vector<64x128xf32> -> vector<64x128xf32>
    %36 = arith.addf %30, %35 : vector<64x128xf32>
    %c0_55 = arith.constant 0 : index
    %c0_56 = arith.constant 0 : index
    %37 = vector.load %arg5[%c0_55, %c0_56] : memref<64x128xf32, #tpu.memory_space<vmem>>, vector<64x128xf32>
    tpu.vector_store %arg5[%c0_55, %c0_56], %36 {strides = array<i32>} : memref<64x128xf32, #tpu.memory_space<vmem>>, vector<64x128xf32>,
    %c0_57 = arith.constant 0 : index
    %c0_58 = arith.constant 0 : index
    %38 = vector.load %arg5[%c0_57, %c0_58] : memref<64x128xf32, #tpu.memory_space<vmem>>, vector<64x128xf32>
    %c0_59 = arith.constant 0 : index
    %c0_60 = arith.constant 0 : index
    %c5 = arith.constant 5 : index
    %c0_61 = arith.constant 0 : index
    %c0_62 = arith.constant 0 : index
    %39 = vector.load %arg1[%c0_59, %c0_60, %c5, %c0_61, %c0_62] : memref<1x4x7x64x128xbf16, #tpu.memory_space<vmem>>, vector<1x1x1x64x128xbf16>
    %40 = vector.shape_cast %39 : vector<1x1x1x64x128xbf16> to vector<64x128xbf16>
    %c5_63 = arith.constant 5 : index
    %c0_64 = arith.constant 0 : index
    %c0_65 = arith.constant 0 : index
    %41 = vector.load %arg2[%c5_63, %c0_64, %c0_65] : memref<7x128x128xbf16, #tpu.memory_space<vmem>>, vector<1x128x128xbf16>
    %42 = vector.shape_cast %41 : vector<1x128x128xbf16> to vector<128x128xbf16>
    %cst_66 = arith.constant dense<0.000000e+00> : vector<64x128xf32>
    %43 = tpu.matmul %40, %42, %cst_66 {dimension_numbers = #tpu.dot_dimension_numbers<[1], [0], [0], [1], [0, 0, 1, 1], [], []>} : vector<64x128xbf16>, vector<128x128xbf16>, vector<64x128xf32> -> vector<64x128xf32>
    %44 = arith.addf %38, %43 : vector<64x128xf32>
    %c0_67 = arith.constant 0 : index
    %c0_68 = arith.constant 0 : index
    %45 = vector.load %arg5[%c0_67, %c0_68] : memref<64x128xf32, #tpu.memory_space<vmem>>, vector<64x128xf32>
    tpu.vector_store %arg5[%c0_67, %c0_68], %44 {strides = array<i32>} : memref<64x128xf32, #tpu.memory_space<vmem>>, vector<64x128xf32>,
    %c0_69 = arith.constant 0 : index
    %c0_70 = arith.constant 0 : index
    %46 = vector.load %arg5[%c0_69, %c0_70] : memref<64x128xf32, #tpu.memory_space<vmem>>, vector<64x128xf32>
    %c0_71 = arith.constant 0 : index
    %c0_72 = arith.constant 0 : index
    %c6 = arith.constant 6 : index
    %c0_73 = arith.constant 0 : index
    %c0_74 = arith.constant 0 : index
    %47 = vector.load %arg1[%c0_71, %c0_72, %c6, %c0_73, %c0_74] : memref<1x4x7x64x128xbf16, #tpu.memory_space<vmem>>, vector<1x1x1x64x128xbf16>
    %48 = vector.shape_cast %47 : vector<1x1x1x64x128xbf16> to vector<64x128xbf16>
    %c6_75 = arith.constant 6 : index
    %c0_76 = arith.constant 0 : index
    %c0_77 = arith.constant 0 : index
    %49 = vector.load %arg2[%c6_75, %c0_76, %c0_77] : memref<7x128x128xbf16, #tpu.memory_space<vmem>>, vector<1x128x128xbf16>
    %50 = vector.shape_cast %49 : vector<1x128x128xbf16> to vector<128x128xbf16>
    %cst_78 = arith.constant dense<0.000000e+00> : vector<64x128xf32>
    %51 = tpu.matmul %48, %50, %cst_78 {dimension_numbers = #tpu.dot_dimension_numbers<[1], [0], [0], [1], [0, 0, 1, 1], [], []>} : vector<64x128xbf16>, vector<128x128xbf16>, vector<64x128xf32> -> vector<64x128xf32>
    %52 = arith.addf %46, %51 : vector<64x128xf32>
    %c0_79 = arith.constant 0 : index
    %c0_80 = arith.constant 0 : index
    %53 = vector.load %arg5[%c0_79, %c0_80] : memref<64x128xf32, #tpu.memory_space<vmem>>, vector<64x128xf32>
    tpu.vector_store %arg5[%c0_79, %c0_80], %52 {strides = array<i32>} : memref<64x128xf32, #tpu.memory_space<vmem>>, vector<64x128xf32>,
    %c0_81 = arith.constant 0 : index
    %c0_82 = arith.constant 0 : index
    %54 = vector.load %arg5[%c0_81, %c0_82] : memref<64x128xf32, #tpu.memory_space<vmem>>, vector<64x128xf32>
    %c0_83 = arith.constant 0 : index
    %c0_84 = arith.constant 0 : index
    %55 = vector.load %arg6[%c0_83, %c0_84] : memref<64x128xf32, #tpu.memory_space<vmem>>, vector<64x128xf32>
    tpu.vector_store %arg6[%c0_83, %c0_84], %54 {strides = array<i32>} : memref<64x128xf32, #tpu.memory_space<vmem>>, vector<64x128xf32>,
    %c0_85 = arith.constant 0 : index
    %c1_86 = arith.constant 1 : index
    %c0_87 = arith.constant 0 : index
    %c0_88 = arith.constant 0 : index
    %c0_89 = arith.constant 0 : index
    %56 = vector.load %arg1[%c0_85, %c1_86, %c0_87, %c0_88, %c0_89] : memref<1x4x7x64x128xbf16, #tpu.memory_space<vmem>>, vector<1x1x1x64x128xbf16>
    %57 = vector.shape_cast %56 : vector<1x1x1x64x128xbf16> to vector<64x128xbf16>
    %c0_90 = arith.constant 0 : index
    %c0_91 = arith.constant 0 : index
    %c0_92 = arith.constant 0 : index
    %58 = vector.load %arg2[%c0_90, %c0_91, %c0_92] : memref<7x128x128xbf16, #tpu.memory_space<vmem>>, vector<1x128x128xbf16>
    %59 = vector.shape_cast %58 : vector<1x128x128xbf16> to vector<128x128xbf16>
    %cst_93 = arith.constant dense<0.000000e+00> : vector<64x128xf32>
    %60 = tpu.matmul %57, %59, %cst_93 {dimension_numbers = #tpu.dot_dimension_numbers<[1], [0], [0], [1], [0, 0, 1, 1], [], []>} : vector<64x128xbf16>, vector<128x128xbf16>, vector<64x128xf32> -> vector<64x128xf32>
    %c0_94 = arith.constant 0 : index
    %c0_95 = arith.constant 0 : index
    %61 = vector.load %arg5[%c0_94, %c0_95] : memref<64x128xf32, #tpu.memory_space<vmem>>, vector<64x128xf32>
    tpu.vector_store %arg5[%c0_94, %c0_95], %60 {strides = array<i32>} : memref<64x128xf32, #tpu.memory_space<vmem>>, vector<64x128xf32>,
    %c0_96 = arith.constant 0 : index
    %c0_97 = arith.constant 0 : index
    %62 = vector.load %arg5[%c0_96, %c0_97] : memref<64x128xf32, #tpu.memory_space<vmem>>, vector<64x128xf32>
    %c0_98 = arith.constant 0 : index
    %c1_99 = arith.constant 1 : index
    %c1_100 = arith.constant 1 : index
    %c0_101 = arith.constant 0 : index
    %c0_102 = arith.constant 0 : index
    %63 = vector.load %arg1[%c0_98, %c1_99, %c1_100, %c0_101, %c0_102] : memref<1x4x7x64x128xbf16, #tpu.memory_space<vmem>>, vector<1x1x1x64x128xbf16>
    %64 = vector.shape_cast %63 : vector<1x1x1x64x128xbf16> to vector<64x128xbf16>
    %c1_103 = arith.constant 1 : index
    %c0_104 = arith.constant 0 : index
    %c0_105 = arith.constant 0 : index
    %65 = vector.load %arg2[%c1_103, %c0_104, %c0_105] : memref<7x128x128xbf16, #tpu.memory_space<vmem>>, vector<1x128x128xbf16>
    %66 = vector.shape_cast %65 : vector<1x128x128xbf16> to vector<128x128xbf16>
    %cst_106 = arith.constant dense<0.000000e+00> : vector<64x128xf32>
    %67 = tpu.matmul %64, %66, %cst_106 {dimension_numbers = #tpu.dot_dimension_numbers<[1], [0], [0], [1], [0, 0, 1, 1], [], []>} : vector<64x128xbf16>, vector<128x128xbf16>, vector<64x128xf32> -> vector<64x128xf32>
    %68 = arith.addf %62, %67 : vector<64x128xf32>
    %c0_107 = arith.constant 0 : index
    %c0_108 = arith.constant 0 : index
    %69 = vector.load %arg5[%c0_107, %c0_108] : memref<64x128xf32, #tpu.memory_space<vmem>>, vector<64x128xf32>
    tpu.vector_store %arg5[%c0_107, %c0_108], %68 {strides = array<i32>} : memref<64x128xf32, #tpu.memory_space<vmem>>, vector<64x128xf32>,
    %c0_109 = arith.constant 0 : index
    %c0_110 = arith.constant 0 : index
    %70 = vector.load %arg5[%c0_109, %c0_110] : memref<64x128xf32, #tpu.memory_space<vmem>>, vector<64x128xf32>
    %c0_111 = arith.constant 0 : index
    %c1_112 = arith.constant 1 : index
    %c2_113 = arith.constant 2 : index
    %c0_114 = arith.constant 0 : index
    %c0_115 = arith.constant 0 : index
    %71 = vector.load %arg1[%c0_111, %c1_112, %c2_113, %c0_114, %c0_115] : memref<1x4x7x64x128xbf16, #tpu.memory_space<vmem>>, vector<1x1x1x64x128xbf16>
    %72 = vector.shape_cast %71 : vector<1x1x1x64x128xbf16> to vector<64x128xbf16>
    %c2_116 = arith.constant 2 : index
    %c0_117 = arith.constant 0 : index
    %c0_118 = arith.constant 0 : index
    %73 = vector.load %arg2[%c2_116, %c0_117, %c0_118] : memref<7x128x128xbf16, #tpu.memory_space<vmem>>, vector<1x128x128xbf16>
    %74 = vector.shape_cast %73 : vector<1x128x128xbf16> to vector<128x128xbf16>
    %cst_119 = arith.constant dense<0.000000e+00> : vector<64x128xf32>
    %75 = tpu.matmul %72, %74, %cst_119 {dimension_numbers = #tpu.dot_dimension_numbers<[1], [0], [0], [1], [0, 0, 1, 1], [], []>} : vector<64x128xbf16>, vector<128x128xbf16>, vector<64x128xf32> -> vector<64x128xf32>
    %76 = arith.addf %70, %75 : vector<64x128xf32>
    %c0_120 = arith.constant 0 : index
    %c0_121 = arith.constant 0 : index
    %77 = vector.load %arg5[%c0_120, %c0_121] : memref<64x128xf32, #tpu.memory_space<vmem>>, vector<64x128xf32>
    tpu.vector_store %arg5[%c0_120, %c0_121], %76 {strides = array<i32>} : memref<64x128xf32, #tpu.memory_space<vmem>>, vector<64x128xf32>,
    %c0_122 = arith.constant 0 : index
    %c0_123 = arith.constant 0 : index
    %78 = vector.load %arg5[%c0_122, %c0_123] : memref<64x128xf32, #tpu.memory_space<vmem>>, vector<64x128xf32>
    %c0_124 = arith.constant 0 : index
    %c1_125 = arith.constant 1 : index
    %c3_126 = arith.constant 3 : index
    %c0_127 = arith.constant 0 : index
    %c0_128 = arith.constant 0 : index
    %79 = vector.load %arg1[%c0_124, %c1_125, %c3_126, %c0_127, %c0_128] : memref<1x4x7x64x128xbf16, #tpu.memory_space<vmem>>, vector<1x1x1x64x128xbf16>
    %80 = vector.shape_cast %79 : vector<1x1x1x64x128xbf16> to vector<64x128xbf16>
    %c3_129 = arith.constant 3 : index
    %c0_130 = arith.constant 0 : index
    %c0_131 = arith.constant 0 : index
    %81 = vector.load %arg2[%c3_129, %c0_130, %c0_131] : memref<7x128x128xbf16, #tpu.memory_space<vmem>>, vector<1x128x128xbf16>
    %82 = vector.shape_cast %81 : vector<1x128x128xbf16> to vector<128x128xbf16>
    %cst_132 = arith.constant dense<0.000000e+00> : vector<64x128xf32>
    %83 = tpu.matmul %80, %82, %cst_132 {dimension_numbers = #tpu.dot_dimension_numbers<[1], [0], [0], [1], [0, 0, 1, 1], [], []>} : vector<64x128xbf16>, vector<128x128xbf16>, vector<64x128xf32> -> vector<64x128xf32>
    %84 = arith.addf %78, %83 : vector<64x128xf32>
    %c0_133 = arith.constant 0 : index
    %c0_134 = arith.constant 0 : index
    %85 = vector.load %arg5[%c0_133, %c0_134] : memref<64x128xf32, #tpu.memory_space<vmem>>, vector<64x128xf32>
    tpu.vector_store %arg5[%c0_133, %c0_134], %84 {strides = array<i32>} : memref<64x128xf32, #tpu.memory_space<vmem>>, vector<64x128xf32>,
    %c0_135 = arith.constant 0 : index
    %c0_136 = arith.constant 0 : index
    %86 = vector.load %arg5[%c0_135, %c0_136] : memref<64x128xf32, #tpu.memory_space<vmem>>, vector<64x128xf32>
    %c0_137 = arith.constant 0 : index
    %c1_138 = arith.constant 1 : index
    %c4_139 = arith.constant 4 : index
    %c0_140 = arith.constant 0 : index
    %c0_141 = arith.constant 0 : index
    %87 = vector.load %arg1[%c0_137, %c1_138, %c4_139, %c0_140, %c0_141] : memref<1x4x7x64x128xbf16, #tpu.memory_space<vmem>>, vector<1x1x1x64x128xbf16>
    %88 = vector.shape_cast %87 : vector<1x1x1x64x128xbf16> to vector<64x128xbf16>
    %c4_142 = arith.constant 4 : index
    %c0_143 = arith.constant 0 : index
    %c0_144 = arith.constant 0 : index
    %89 = vector.load %arg2[%c4_142, %c0_143, %c0_144] : memref<7x128x128xbf16, #tpu.memory_space<vmem>>, vector<1x128x128xbf16>
    %90 = vector.shape_cast %89 : vector<1x128x128xbf16> to vector<128x128xbf16>
    %cst_145 = arith.constant dense<0.000000e+00> : vector<64x128xf32>
    %91 = tpu.matmul %88, %90, %cst_145 {dimension_numbers = #tpu.dot_dimension_numbers<[1], [0], [0], [1], [0, 0, 1, 1], [], []>} : vector<64x128xbf16>, vector<128x128xbf16>, vector<64x128xf32> -> vector<64x128xf32>
    %92 = arith.addf %86, %91 : vector<64x128xf32>
    %c0_146 = arith.constant 0 : index
    %c0_147 = arith.constant 0 : index
    %93 = vector.load %arg5[%c0_146, %c0_147] : memref<64x128xf32, #tpu.memory_space<vmem>>, vector<64x128xf32>
    tpu.vector_store %arg5[%c0_146, %c0_147], %92 {strides = array<i32>} : memref<64x128xf32, #tpu.memory_space<vmem>>, vector<64x128xf32>,
    %c0_148 = arith.constant 0 : index
    %c0_149 = arith.constant 0 : index
    %94 = vector.load %arg5[%c0_148, %c0_149] : memref<64x128xf32, #tpu.memory_space<vmem>>, vector<64x128xf32>
    %c0_150 = arith.constant 0 : index
    %c1_151 = arith.constant 1 : index
    %c5_152 = arith.constant 5 : index
    %c0_153 = arith.constant 0 : index
    %c0_154 = arith.constant 0 : index
    %95 = vector.load %arg1[%c0_150, %c1_151, %c5_152, %c0_153, %c0_154] : memref<1x4x7x64x128xbf16, #tpu.memory_space<vmem>>, vector<1x1x1x64x128xbf16>
    %96 = vector.shape_cast %95 : vector<1x1x1x64x128xbf16> to vector<64x128xbf16>
    %c5_155 = arith.constant 5 : index
    %c0_156 = arith.constant 0 : index
    %c0_157 = arith.constant 0 : index
    %97 = vector.load %arg2[%c5_155, %c0_156, %c0_157] : memref<7x128x128xbf16, #tpu.memory_space<vmem>>, vector<1x128x128xbf16>
    %98 = vector.shape_cast %97 : vector<1x128x128xbf16> to vector<128x128xbf16>
    %cst_158 = arith.constant dense<0.000000e+00> : vector<64x128xf32>
    %99 = tpu.matmul %96, %98, %cst_158 {dimension_numbers = #tpu.dot_dimension_numbers<[1], [0], [0], [1], [0, 0, 1, 1], [], []>} : vector<64x128xbf16>, vector<128x128xbf16>, vector<64x128xf32> -> vector<64x128xf32>
    %100 = arith.addf %94, %99 : vector<64x128xf32>
    %c0_159 = arith.constant 0 : index
    %c0_160 = arith.constant 0 : index
    %101 = vector.load %arg5[%c0_159, %c0_160] : memref<64x128xf32, #tpu.memory_space<vmem>>, vector<64x128xf32>
    tpu.vector_store %arg5[%c0_159, %c0_160], %100 {strides = array<i32>} : memref<64x128xf32, #tpu.memory_space<vmem>>, vector<64x128xf32>,
    %c0_161 = arith.constant 0 : index
    %c0_162 = arith.constant 0 : index
    %102 = vector.load %arg5[%c0_161, %c0_162] : memref<64x128xf32, #tpu.memory_space<vmem>>, vector<64x128xf32>
    %c0_163 = arith.constant 0 : index
    %c1_164 = arith.constant 1 : index
    %c6_165 = arith.constant 6 : index
    %c0_166 = arith.constant 0 : index
    %c0_167 = arith.constant 0 : index
    %103 = vector.load %arg1[%c0_163, %c1_164, %c6_165, %c0_166, %c0_167] : memref<1x4x7x64x128xbf16, #tpu.memory_space<vmem>>, vector<1x1x1x64x128xbf16>
    %104 = vector.shape_cast %103 : vector<1x1x1x64x128xbf16> to vector<64x128xbf16>
    %c6_168 = arith.constant 6 : index
    %c0_169 = arith.constant 0 : index
    %c0_170 = arith.constant 0 : index
    %105 = vector.load %arg2[%c6_168, %c0_169, %c0_170] : memref<7x128x128xbf16, #tpu.memory_space<vmem>>, vector<1x128x128xbf16>
    %106 = vector.shape_cast %105 : vector<1x128x128xbf16> to vector<128x128xbf16>
    %cst_171 = arith.constant dense<0.000000e+00> : vector<64x128xf32>
    %107 = tpu.matmul %104, %106, %cst_171 {dimension_numbers = #tpu.dot_dimension_numbers<[1], [0], [0], [1], [0, 0, 1, 1], [], []>} : vector<64x128xbf16>, vector<128x128xbf16>, vector<64x128xf32> -> vector<64x128xf32>
    %108 = arith.addf %102, %107 : vector<64x128xf32>
    %c0_172 = arith.constant 0 : index
    %c0_173 = arith.constant 0 : index
    %109 = vector.load %arg5[%c0_172, %c0_173] : memref<64x128xf32, #tpu.memory_space<vmem>>, vector<64x128xf32>
    tpu.vector_store %arg5[%c0_172, %c0_173], %108 {strides = array<i32>} : memref<64x128xf32, #tpu.memory_space<vmem>>, vector<64x128xf32>,
    %c0_174 = arith.constant 0 : index
    %c0_175 = arith.constant 0 : index
    %110 = vector.load %arg6[%c0_174, %c0_175] : memref<64x128xf32, #tpu.memory_space<vmem>>, vector<64x128xf32>
    %c0_176 = arith.constant 0 : index
    %c0_177 = arith.constant 0 : index
    %111 = vector.load %arg5[%c0_176, %c0_177] : memref<64x128xf32, #tpu.memory_space<vmem>>, vector<64x128xf32>
    %112 = arith.maximumf %110, %111 : vector<64x128xf32>
    %c0_178 = arith.constant 0 : index
    %c0_179 = arith.constant 0 : index
    %113 = vector.load %arg6[%c0_178, %c0_179] : memref<64x128xf32, #tpu.memory_space<vmem>>, vector<64x128xf32>
    tpu.vector_store %arg6[%c0_178, %c0_179], %112 {strides = array<i32>} : memref<64x128xf32, #tpu.memory_space<vmem>>, vector<64x128xf32>,
    %c0_180 = arith.constant 0 : index
    %c2_181 = arith.constant 2 : index
    %c0_182 = arith.constant 0 : index
    %c0_183 = arith.constant 0 : index
    %c0_184 = arith.constant 0 : index
    %114 = vector.load %arg1[%c0_180, %c2_181, %c0_182, %c0_183, %c0_184] : memref<1x4x7x64x128xbf16, #tpu.memory_space<vmem>>, vector<1x1x1x64x128xbf16>
    %115 = vector.shape_cast %114 : vector<1x1x1x64x128xbf16> to vector<64x128xbf16>
    %c0_185 = arith.constant 0 : index
    %c0_186 = arith.constant 0 : index
    %c0_187 = arith.constant 0 : index
    %116 = vector.load %arg2[%c0_185, %c0_186, %c0_187] : memref<7x128x128xbf16, #tpu.memory_space<vmem>>, vector<1x128x128xbf16>
    %117 = vector.shape_cast %116 : vector<1x128x128xbf16> to vector<128x128xbf16>
    %cst_188 = arith.constant dense<0.000000e+00> : vector<64x128xf32>
    %118 = tpu.matmul %115, %117, %cst_188 {dimension_numbers = #tpu.dot_dimension_numbers<[1], [0], [0], [1], [0, 0, 1, 1], [], []>} : vector<64x128xbf16>, vector<128x128xbf16>, vector<64x128xf32> -> vector<64x128xf32>
    %c0_189 = arith.constant 0 : index
    %c0_190 = arith.constant 0 : index
    %119 = vector.load %arg5[%c0_189, %c0_190] : memref<64x128xf32, #tpu.memory_space<vmem>>, vector<64x128xf32>
    tpu.vector_store %arg5[%c0_189, %c0_190], %118 {strides = array<i32>} : memref<64x128xf32, #tpu.memory_space<vmem>>, vector<64x128xf32>,
    %c0_191 = arith.constant 0 : index
    %c0_192 = arith.constant 0 : index
    %120 = vector.load %arg5[%c0_191, %c0_192] : memref<64x128xf32, #tpu.memory_space<vmem>>, vector<64x128xf32>
    %c0_193 = arith.constant 0 : index
    %c2_194 = arith.constant 2 : index
    %c1_195 = arith.constant 1 : index
    %c0_196 = arith.constant 0 : index
    %c0_197 = arith.constant 0 : index
    %121 = vector.load %arg1[%c0_193, %c2_194, %c1_195, %c0_196, %c0_197] : memref<1x4x7x64x128xbf16, #tpu.memory_space<vmem>>, vector<1x1x1x64x128xbf16>
    %122 = vector.shape_cast %121 : vector<1x1x1x64x128xbf16> to vector<64x128xbf16>
    %c1_198 = arith.constant 1 : index
    %c0_199 = arith.constant 0 : index
    %c0_200 = arith.constant 0 : index
    %123 = vector.load %arg2[%c1_198, %c0_199, %c0_200] : memref<7x128x128xbf16, #tpu.memory_space<vmem>>, vector<1x128x128xbf16>
    %124 = vector.shape_cast %123 : vector<1x128x128xbf16> to vector<128x128xbf16>
    %cst_201 = arith.constant dense<0.000000e+00> : vector<64x128xf32>
    %125 = tpu.matmul %122, %124, %cst_201 {dimension_numbers = #tpu.dot_dimension_numbers<[1], [0], [0], [1], [0, 0, 1, 1], [], []>} : vector<64x128xbf16>, vector<128x128xbf16>, vector<64x128xf32> -> vector<64x128xf32>
    %126 = arith.addf %120, %125 : vector<64x128xf32>
    %c0_202 = arith.constant 0 : index
    %c0_203 = arith.constant 0 : index
    %127 = vector.load %arg5[%c0_202, %c0_203] : memref<64x128xf32, #tpu.memory_space<vmem>>, vector<64x128xf32>
    tpu.vector_store %arg5[%c0_202, %c0_203], %126 {strides = array<i32>} : memref<64x128xf32, #tpu.memory_space<vmem>>, vector<64x128xf32>,
    %c0_204 = arith.constant 0 : index
    %c0_205 = arith.constant 0 : index
    %128 = vector.load %arg5[%c0_204, %c0_205] : memref<64x128xf32, #tpu.memory_space<vmem>>, vector<64x128xf32>
    %c0_206 = arith.constant 0 : index
    %c2_207 = arith.constant 2 : index
    %c2_208 = arith.constant 2 : index
    %c0_209 = arith.constant 0 : index
    %c0_210 = arith.constant 0 : index
    %129 = vector.load %arg1[%c0_206, %c2_207, %c2_208, %c0_209, %c0_210] : memref<1x4x7x64x128xbf16, #tpu.memory_space<vmem>>, vector<1x1x1x64x128xbf16>
    %130 = vector.shape_cast %129 : vector<1x1x1x64x128xbf16> to vector<64x128xbf16>
    %c2_211 = arith.constant 2 : index
    %c0_212 = arith.constant 0 : index
    %c0_213 = arith.constant 0 : index
    %131 = vector.load %arg2[%c2_211, %c0_212, %c0_213] : memref<7x128x128xbf16, #tpu.memory_space<vmem>>, vector<1x128x128xbf16>
    %132 = vector.shape_cast %131 : vector<1x128x128xbf16> to vector<128x128xbf16>
    %cst_214 = arith.constant dense<0.000000e+00> : vector<64x128xf32>
    %133 = tpu.matmul %130, %132, %cst_214 {dimension_numbers = #tpu.dot_dimension_numbers<[1], [0], [0], [1], [0, 0, 1, 1], [], []>} : vector<64x128xbf16>, vector<128x128xbf16>, vector<64x128xf32> -> vector<64x128xf32>
    %134 = arith.addf %128, %133 : vector<64x128xf32>
    %c0_215 = arith.constant 0 : index
    %c0_216 = arith.constant 0 : index
    %135 = vector.load %arg5[%c0_215, %c0_216] : memref<64x128xf32, #tpu.memory_space<vmem>>, vector<64x128xf32>
    tpu.vector_store %arg5[%c0_215, %c0_216], %134 {strides = array<i32>} : memref<64x128xf32, #tpu.memory_space<vmem>>, vector<64x128xf32>,
    %c0_217 = arith.constant 0 : index
    %c0_218 = arith.constant 0 : index
    %136 = vector.load %arg5[%c0_217, %c0_218] : memref<64x128xf32, #tpu.memory_space<vmem>>, vector<64x128xf32>
    %c0_219 = arith.constant 0 : index
    %c2_220 = arith.constant 2 : index
    %c3_221 = arith.constant 3 : index
    %c0_222 = arith.constant 0 : index
    %c0_223 = arith.constant 0 : index
    %137 = vector.load %arg1[%c0_219, %c2_220, %c3_221, %c0_222, %c0_223] : memref<1x4x7x64x128xbf16, #tpu.memory_space<vmem>>, vector<1x1x1x64x128xbf16>
    %138 = vector.shape_cast %137 : vector<1x1x1x64x128xbf16> to vector<64x128xbf16>
    %c3_224 = arith.constant 3 : index
    %c0_225 = arith.constant 0 : index
    %c0_226 = arith.constant 0 : index
    %139 = vector.load %arg2[%c3_224, %c0_225, %c0_226] : memref<7x128x128xbf16, #tpu.memory_space<vmem>>, vector<1x128x128xbf16>
    %140 = vector.shape_cast %139 : vector<1x128x128xbf16> to vector<128x128xbf16>
    %cst_227 = arith.constant dense<0.000000e+00> : vector<64x128xf32>
    %141 = tpu.matmul %138, %140, %cst_227 {dimension_numbers = #tpu.dot_dimension_numbers<[1], [0], [0], [1], [0, 0, 1, 1], [], []>} : vector<64x128xbf16>, vector<128x128xbf16>, vector<64x128xf32> -> vector<64x128xf32>
    %142 = arith.addf %136, %141 : vector<64x128xf32>
    %c0_228 = arith.constant 0 : index
    %c0_229 = arith.constant 0 : index
    %143 = vector.load %arg5[%c0_228, %c0_229] : memref<64x128xf32, #tpu.memory_space<vmem>>, vector<64x128xf32>
    tpu.vector_store %arg5[%c0_228, %c0_229], %142 {strides = array<i32>} : memref<64x128xf32, #tpu.memory_space<vmem>>, vector<64x128xf32>,
    %c0_230 = arith.constant 0 : index
    %c0_231 = arith.constant 0 : index
    %144 = vector.load %arg5[%c0_230, %c0_231] : memref<64x128xf32, #tpu.memory_space<vmem>>, vector<64x128xf32>
    %c0_232 = arith.constant 0 : index
    %c2_233 = arith.constant 2 : index
    %c4_234 = arith.constant 4 : index
    %c0_235 = arith.constant 0 : index
    %c0_236 = arith.constant 0 : index
    %145 = vector.load %arg1[%c0_232, %c2_233, %c4_234, %c0_235, %c0_236] : memref<1x4x7x64x128xbf16, #tpu.memory_space<vmem>>, vector<1x1x1x64x128xbf16>
    %146 = vector.shape_cast %145 : vector<1x1x1x64x128xbf16> to vector<64x128xbf16>
    %c4_237 = arith.constant 4 : index
    %c0_238 = arith.constant 0 : index
    %c0_239 = arith.constant 0 : index
    %147 = vector.load %arg2[%c4_237, %c0_238, %c0_239] : memref<7x128x128xbf16, #tpu.memory_space<vmem>>, vector<1x128x128xbf16>
    %148 = vector.shape_cast %147 : vector<1x128x128xbf16> to vector<128x128xbf16>
    %cst_240 = arith.constant dense<0.000000e+00> : vector<64x128xf32>
    %149 = tpu.matmul %146, %148, %cst_240 {dimension_numbers = #tpu.dot_dimension_numbers<[1], [0], [0], [1], [0, 0, 1, 1], [], []>} : vector<64x128xbf16>, vector<128x128xbf16>, vector<64x128xf32> -> vector<64x128xf32>
    %150 = arith.addf %144, %149 : vector<64x128xf32>
    %c0_241 = arith.constant 0 : index
    %c0_242 = arith.constant 0 : index
    %151 = vector.load %arg5[%c0_241, %c0_242] : memref<64x128xf32, #tpu.memory_space<vmem>>, vector<64x128xf32>
    tpu.vector_store %arg5[%c0_241, %c0_242], %150 {strides = array<i32>} : memref<64x128xf32, #tpu.memory_space<vmem>>, vector<64x128xf32>,
    %c0_243 = arith.constant 0 : index
    %c0_244 = arith.constant 0 : index
    %152 = vector.load %arg5[%c0_243, %c0_244] : memref<64x128xf32, #tpu.memory_space<vmem>>, vector<64x128xf32>
    %c0_245 = arith.constant 0 : index
    %c2_246 = arith.constant 2 : index
    %c5_247 = arith.constant 5 : index
    %c0_248 = arith.constant 0 : index
    %c0_249 = arith.constant 0 : index
    %153 = vector.load %arg1[%c0_245, %c2_246, %c5_247, %c0_248, %c0_249] : memref<1x4x7x64x128xbf16, #tpu.memory_space<vmem>>, vector<1x1x1x64x128xbf16>
    %154 = vector.shape_cast %153 : vector<1x1x1x64x128xbf16> to vector<64x128xbf16>
    %c5_250 = arith.constant 5 : index
    %c0_251 = arith.constant 0 : index
    %c0_252 = arith.constant 0 : index
    %155 = vector.load %arg2[%c5_250, %c0_251, %c0_252] : memref<7x128x128xbf16, #tpu.memory_space<vmem>>, vector<1x128x128xbf16>
    %156 = vector.shape_cast %155 : vector<1x128x128xbf16> to vector<128x128xbf16>
    %cst_253 = arith.constant dense<0.000000e+00> : vector<64x128xf32>
    %157 = tpu.matmul %154, %156, %cst_253 {dimension_numbers = #tpu.dot_dimension_numbers<[1], [0], [0], [1], [0, 0, 1, 1], [], []>} : vector<64x128xbf16>, vector<128x128xbf16>, vector<64x128xf32> -> vector<64x128xf32>
    %158 = arith.addf %152, %157 : vector<64x128xf32>
    %c0_254 = arith.constant 0 : index
    %c0_255 = arith.constant 0 : index
    %159 = vector.load %arg5[%c0_254, %c0_255] : memref<64x128xf32, #tpu.memory_space<vmem>>, vector<64x128xf32>
    tpu.vector_store %arg5[%c0_254, %c0_255], %158 {strides = array<i32>} : memref<64x128xf32, #tpu.memory_space<vmem>>, vector<64x128xf32>,
    %c0_256 = arith.constant 0 : index
    %c0_257 = arith.constant 0 : index
    %160 = vector.load %arg5[%c0_256, %c0_257] : memref<64x128xf32, #tpu.memory_space<vmem>>, vector<64x128xf32>
    %c0_258 = arith.constant 0 : index
    %c2_259 = arith.constant 2 : index
    %c6_260 = arith.constant 6 : index
    %c0_261 = arith.constant 0 : index
    %c0_262 = arith.constant 0 : index
    %161 = vector.load %arg1[%c0_258, %c2_259, %c6_260, %c0_261, %c0_262] : memref<1x4x7x64x128xbf16, #tpu.memory_space<vmem>>, vector<1x1x1x64x128xbf16>
    %162 = vector.shape_cast %161 : vector<1x1x1x64x128xbf16> to vector<64x128xbf16>
    %c6_263 = arith.constant 6 : index
    %c0_264 = arith.constant 0 : index
    %c0_265 = arith.constant 0 : index
    %163 = vector.load %arg2[%c6_263, %c0_264, %c0_265] : memref<7x128x128xbf16, #tpu.memory_space<vmem>>, vector<1x128x128xbf16>
    %164 = vector.shape_cast %163 : vector<1x128x128xbf16> to vector<128x128xbf16>
    %cst_266 = arith.constant dense<0.000000e+00> : vector<64x128xf32>
    %165 = tpu.matmul %162, %164, %cst_266 {dimension_numbers = #tpu.dot_dimension_numbers<[1], [0], [0], [1], [0, 0, 1, 1], [], []>} : vector<64x128xbf16>, vector<128x128xbf16>, vector<64x128xf32> -> vector<64x128xf32>
    %166 = arith.addf %160, %165 : vector<64x128xf32>
    %c0_267 = arith.constant 0 : index
    %c0_268 = arith.constant 0 : index
    %167 = vector.load %arg5[%c0_267, %c0_268] : memref<64x128xf32, #tpu.memory_space<vmem>>, vector<64x128xf32>
    tpu.vector_store %arg5[%c0_267, %c0_268], %166 {strides = array<i32>} : memref<64x128xf32, #tpu.memory_space<vmem>>, vector<64x128xf32>,
    %c0_269 = arith.constant 0 : index
    %c0_270 = arith.constant 0 : index
    %168 = vector.load %arg6[%c0_269, %c0_270] : memref<64x128xf32, #tpu.memory_space<vmem>>, vector<64x128xf32>
    %c0_271 = arith.constant 0 : index
    %c0_272 = arith.constant 0 : index
    %169 = vector.load %arg5[%c0_271, %c0_272] : memref<64x128xf32, #tpu.memory_space<vmem>>, vector<64x128xf32>
    %170 = arith.maximumf %168, %169 : vector<64x128xf32>
    %c0_273 = arith.constant 0 : index
    %c0_274 = arith.constant 0 : index
    %171 = vector.load %arg6[%c0_273, %c0_274] : memref<64x128xf32, #tpu.memory_space<vmem>>, vector<64x128xf32>
    tpu.vector_store %arg6[%c0_273, %c0_274], %170 {strides = array<i32>} : memref<64x128xf32, #tpu.memory_space<vmem>>, vector<64x128xf32>,
    %c0_275 = arith.constant 0 : index
    %c3_276 = arith.constant 3 : index
    %c0_277 = arith.constant 0 : index
    %c0_278 = arith.constant 0 : index
    %c0_279 = arith.constant 0 : index
    %172 = vector.load %arg1[%c0_275, %c3_276, %c0_277, %c0_278, %c0_279] : memref<1x4x7x64x128xbf16, #tpu.memory_space<vmem>>, vector<1x1x1x64x128xbf16>
    %173 = vector.shape_cast %172 : vector<1x1x1x64x128xbf16> to vector<64x128xbf16>
    %c0_280 = arith.constant 0 : index
    %c0_281 = arith.constant 0 : index
    %c0_282 = arith.constant 0 : index
    %174 = vector.load %arg2[%c0_280, %c0_281, %c0_282] : memref<7x128x128xbf16, #tpu.memory_space<vmem>>, vector<1x128x128xbf16>
    %175 = vector.shape_cast %174 : vector<1x128x128xbf16> to vector<128x128xbf16>
    %cst_283 = arith.constant dense<0.000000e+00> : vector<64x128xf32>
    %176 = tpu.matmul %173, %175, %cst_283 {dimension_numbers = #tpu.dot_dimension_numbers<[1], [0], [0], [1], [0, 0, 1, 1], [], []>} : vector<64x128xbf16>, vector<128x128xbf16>, vector<64x128xf32> -> vector<64x128xf32>
    %c0_284 = arith.constant 0 : index
    %c0_285 = arith.constant 0 : index
    %177 = vector.load %arg5[%c0_284, %c0_285] : memref<64x128xf32, #tpu.memory_space<vmem>>, vector<64x128xf32>
    tpu.vector_store %arg5[%c0_284, %c0_285], %176 {strides = array<i32>} : memref<64x128xf32, #tpu.memory_space<vmem>>, vector<64x128xf32>,
    %c0_286 = arith.constant 0 : index
    %c0_287 = arith.constant 0 : index
    %178 = vector.load %arg5[%c0_286, %c0_287] : memref<64x128xf32, #tpu.memory_space<vmem>>, vector<64x128xf32>
    %c0_288 = arith.constant 0 : index
    %c3_289 = arith.constant 3 : index
    %c1_290 = arith.constant 1 : index
    %c0_291 = arith.constant 0 : index
    %c0_292 = arith.constant 0 : index
    %179 = vector.load %arg1[%c0_288, %c3_289, %c1_290, %c0_291, %c0_292] : memref<1x4x7x64x128xbf16, #tpu.memory_space<vmem>>, vector<1x1x1x64x128xbf16>
    %180 = vector.shape_cast %179 : vector<1x1x1x64x128xbf16> to vector<64x128xbf16>
    %c1_293 = arith.constant 1 : index
    %c0_294 = arith.constant 0 : index
    %c0_295 = arith.constant 0 : index
    %181 = vector.load %arg2[%c1_293, %c0_294, %c0_295] : memref<7x128x128xbf16, #tpu.memory_space<vmem>>, vector<1x128x128xbf16>
    %182 = vector.shape_cast %181 : vector<1x128x128xbf16> to vector<128x128xbf16>
    %cst_296 = arith.constant dense<0.000000e+00> : vector<64x128xf32>
    %183 = tpu.matmul %180, %182, %cst_296 {dimension_numbers = #tpu.dot_dimension_numbers<[1], [0], [0], [1], [0, 0, 1, 1], [], []>} : vector<64x128xbf16>, vector<128x128xbf16>, vector<64x128xf32> -> vector<64x128xf32>
    %184 = arith.addf %178, %183 : vector<64x128xf32>
    %c0_297 = arith.constant 0 : index
    %c0_298 = arith.constant 0 : index
    %185 = vector.load %arg5[%c0_297, %c0_298] : memref<64x128xf32, #tpu.memory_space<vmem>>, vector<64x128xf32>
    tpu.vector_store %arg5[%c0_297, %c0_298], %184 {strides = array<i32>} : memref<64x128xf32, #tpu.memory_space<vmem>>, vector<64x128xf32>,
    %c0_299 = arith.constant 0 : index
    %c0_300 = arith.constant 0 : index
    %186 = vector.load %arg5[%c0_299, %c0_300] : memref<64x128xf32, #tpu.memory_space<vmem>>, vector<64x128xf32>
    %c0_301 = arith.constant 0 : index
    %c3_302 = arith.constant 3 : index
    %c2_303 = arith.constant 2 : index
    %c0_304 = arith.constant 0 : index
    %c0_305 = arith.constant 0 : index
    %187 = vector.load %arg1[%c0_301, %c3_302, %c2_303, %c0_304, %c0_305] : memref<1x4x7x64x128xbf16, #tpu.memory_space<vmem>>, vector<1x1x1x64x128xbf16>
    %188 = vector.shape_cast %187 : vector<1x1x1x64x128xbf16> to vector<64x128xbf16>
    %c2_306 = arith.constant 2 : index
    %c0_307 = arith.constant 0 : index
    %c0_308 = arith.constant 0 : index
    %189 = vector.load %arg2[%c2_306, %c0_307, %c0_308] : memref<7x128x128xbf16, #tpu.memory_space<vmem>>, vector<1x128x128xbf16>
    %190 = vector.shape_cast %189 : vector<1x128x128xbf16> to vector<128x128xbf16>
    %cst_309 = arith.constant dense<0.000000e+00> : vector<64x128xf32>
    %191 = tpu.matmul %188, %190, %cst_309 {dimension_numbers = #tpu.dot_dimension_numbers<[1], [0], [0], [1], [0, 0, 1, 1], [], []>} : vector<64x128xbf16>, vector<128x128xbf16>, vector<64x128xf32> -> vector<64x128xf32>
    %192 = arith.addf %186, %191 : vector<64x128xf32>
    %c0_310 = arith.constant 0 : index
    %c0_311 = arith.constant 0 : index
    %193 = vector.load %arg5[%c0_310, %c0_311] : memref<64x128xf32, #tpu.memory_space<vmem>>, vector<64x128xf32>
    tpu.vector_store %arg5[%c0_310, %c0_311], %192 {strides = array<i32>} : memref<64x128xf32, #tpu.memory_space<vmem>>, vector<64x128xf32>,
    %c0_312 = arith.constant 0 : index
    %c0_313 = arith.constant 0 : index
    %194 = vector.load %arg5[%c0_312, %c0_313] : memref<64x128xf32, #tpu.memory_space<vmem>>, vector<64x128xf32>
    %c0_314 = arith.constant 0 : index
    %c3_315 = arith.constant 3 : index
    %c3_316 = arith.constant 3 : index
    %c0_317 = arith.constant 0 : index
    %c0_318 = arith.constant 0 : index
    %195 = vector.load %arg1[%c0_314, %c3_315, %c3_316, %c0_317, %c0_318] : memref<1x4x7x64x128xbf16, #tpu.memory_space<vmem>>, vector<1x1x1x64x128xbf16>
    %196 = vector.shape_cast %195 : vector<1x1x1x64x128xbf16> to vector<64x128xbf16>
    %c3_319 = arith.constant 3 : index
    %c0_320 = arith.constant 0 : index
    %c0_321 = arith.constant 0 : index
    %197 = vector.load %arg2[%c3_319, %c0_320, %c0_321] : memref<7x128x128xbf16, #tpu.memory_space<vmem>>, vector<1x128x128xbf16>
    %198 = vector.shape_cast %197 : vector<1x128x128xbf16> to vector<128x128xbf16>
    %cst_322 = arith.constant dense<0.000000e+00> : vector<64x128xf32>
    %199 = tpu.matmul %196, %198, %cst_322 {dimension_numbers = #tpu.dot_dimension_numbers<[1], [0], [0], [1], [0, 0, 1, 1], [], []>} : vector<64x128xbf16>, vector<128x128xbf16>, vector<64x128xf32> -> vector<64x128xf32>
    %200 = arith.addf %194, %199 : vector<64x128xf32>
    %c0_323 = arith.constant 0 : index
    %c0_324 = arith.constant 0 : index
    %201 = vector.load %arg5[%c0_323, %c0_324] : memref<64x128xf32, #tpu.memory_space<vmem>>, vector<64x128xf32>
    tpu.vector_store %arg5[%c0_323, %c0_324], %200 {strides = array<i32>} : memref<64x128xf32, #tpu.memory_space<vmem>>, vector<64x128xf32>,
    %c0_325 = arith.constant 0 : index
    %c0_326 = arith.constant 0 : index
    %202 = vector.load %arg5[%c0_325, %c0_326] : memref<64x128xf32, #tpu.memory_space<vmem>>, vector<64x128xf32>
    %c0_327 = arith.constant 0 : index
    %c3_328 = arith.constant 3 : index
    %c4_329 = arith.constant 4 : index
    %c0_330 = arith.constant 0 : index
    %c0_331 = arith.constant 0 : index
    %203 = vector.load %arg1[%c0_327, %c3_328, %c4_329, %c0_330, %c0_331] : memref<1x4x7x64x128xbf16, #tpu.memory_space<vmem>>, vector<1x1x1x64x128xbf16>
    %204 = vector.shape_cast %203 : vector<1x1x1x64x128xbf16> to vector<64x128xbf16>
    %c4_332 = arith.constant 4 : index
    %c0_333 = arith.constant 0 : index
    %c0_334 = arith.constant 0 : index
    %205 = vector.load %arg2[%c4_332, %c0_333, %c0_334] : memref<7x128x128xbf16, #tpu.memory_space<vmem>>, vector<1x128x128xbf16>
    %206 = vector.shape_cast %205 : vector<1x128x128xbf16> to vector<128x128xbf16>
    %cst_335 = arith.constant dense<0.000000e+00> : vector<64x128xf32>
    %207 = tpu.matmul %204, %206, %cst_335 {dimension_numbers = #tpu.dot_dimension_numbers<[1], [0], [0], [1], [0, 0, 1, 1], [], []>} : vector<64x128xbf16>, vector<128x128xbf16>, vector<64x128xf32> -> vector<64x128xf32>
    %208 = arith.addf %202, %207 : vector<64x128xf32>
    %c0_336 = arith.constant 0 : index
    %c0_337 = arith.constant 0 : index
    %209 = vector.load %arg5[%c0_336, %c0_337] : memref<64x128xf32, #tpu.memory_space<vmem>>, vector<64x128xf32>
    tpu.vector_store %arg5[%c0_336, %c0_337], %208 {strides = array<i32>} : memref<64x128xf32, #tpu.memory_space<vmem>>, vector<64x128xf32>,
    %c0_338 = arith.constant 0 : index
    %c0_339 = arith.constant 0 : index
    %210 = vector.load %arg5[%c0_338, %c0_339] : memref<64x128xf32, #tpu.memory_space<vmem>>, vector<64x128xf32>
    %c0_340 = arith.constant 0 : index
    %c3_341 = arith.constant 3 : index
    %c5_342 = arith.constant 5 : index
    %c0_343 = arith.constant 0 : index
    %c0_344 = arith.constant 0 : index
    %211 = vector.load %arg1[%c0_340, %c3_341, %c5_342, %c0_343, %c0_344] : memref<1x4x7x64x128xbf16, #tpu.memory_space<vmem>>, vector<1x1x1x64x128xbf16>
    %212 = vector.shape_cast %211 : vector<1x1x1x64x128xbf16> to vector<64x128xbf16>
    %c5_345 = arith.constant 5 : index
    %c0_346 = arith.constant 0 : index
    %c0_347 = arith.constant 0 : index
    %213 = vector.load %arg2[%c5_345, %c0_346, %c0_347] : memref<7x128x128xbf16, #tpu.memory_space<vmem>>, vector<1x128x128xbf16>
    %214 = vector.shape_cast %213 : vector<1x128x128xbf16> to vector<128x128xbf16>
    %cst_348 = arith.constant dense<0.000000e+00> : vector<64x128xf32>
    %215 = tpu.matmul %212, %214, %cst_348 {dimension_numbers = #tpu.dot_dimension_numbers<[1], [0], [0], [1], [0, 0, 1, 1], [], []>} : vector<64x128xbf16>, vector<128x128xbf16>, vector<64x128xf32> -> vector<64x128xf32>
    %216 = arith.addf %210, %215 : vector<64x128xf32>
    %c0_349 = arith.constant 0 : index
    %c0_350 = arith.constant 0 : index
    %217 = vector.load %arg5[%c0_349, %c0_350] : memref<64x128xf32, #tpu.memory_space<vmem>>, vector<64x128xf32>
    tpu.vector_store %arg5[%c0_349, %c0_350], %216 {strides = array<i32>} : memref<64x128xf32, #tpu.memory_space<vmem>>, vector<64x128xf32>,
    %c0_351 = arith.constant 0 : index
    %c0_352 = arith.constant 0 : index
    %218 = vector.load %arg5[%c0_351, %c0_352] : memref<64x128xf32, #tpu.memory_space<vmem>>, vector<64x128xf32>
    %c0_353 = arith.constant 0 : index
    %c3_354 = arith.constant 3 : index
    %c6_355 = arith.constant 6 : index
    %c0_356 = arith.constant 0 : index
    %c0_357 = arith.constant 0 : index
    %219 = vector.load %arg1[%c0_353, %c3_354, %c6_355, %c0_356, %c0_357] : memref<1x4x7x64x128xbf16, #tpu.memory_space<vmem>>, vector<1x1x1x64x128xbf16>
    %220 = vector.shape_cast %219 : vector<1x1x1x64x128xbf16> to vector<64x128xbf16>
    %c6_358 = arith.constant 6 : index
    %c0_359 = arith.constant 0 : index
    %c0_360 = arith.constant 0 : index
    %221 = vector.load %arg2[%c6_358, %c0_359, %c0_360] : memref<7x128x128xbf16, #tpu.memory_space<vmem>>, vector<1x128x128xbf16>
    %222 = vector.shape_cast %221 : vector<1x128x128xbf16> to vector<128x128xbf16>
    %cst_361 = arith.constant dense<0.000000e+00> : vector<64x128xf32>
    %223 = tpu.matmul %220, %222, %cst_361 {dimension_numbers = #tpu.dot_dimension_numbers<[1], [0], [0], [1], [0, 0, 1, 1], [], []>} : vector<64x128xbf16>, vector<128x128xbf16>, vector<64x128xf32> -> vector<64x128xf32>
    %224 = arith.addf %218, %223 : vector<64x128xf32>
    %c0_362 = arith.constant 0 : index
    %c0_363 = arith.constant 0 : index
    %225 = vector.load %arg5[%c0_362, %c0_363] : memref<64x128xf32, #tpu.memory_space<vmem>>, vector<64x128xf32>
    tpu.vector_store %arg5[%c0_362, %c0_363], %224 {strides = array<i32>} : memref<64x128xf32, #tpu.memory_space<vmem>>, vector<64x128xf32>,
    %c0_364 = arith.constant 0 : index
    %c0_365 = arith.constant 0 : index
    %226 = vector.load %arg6[%c0_364, %c0_365] : memref<64x128xf32, #tpu.memory_space<vmem>>, vector<64x128xf32>
    %c0_366 = arith.constant 0 : index
    %c0_367 = arith.constant 0 : index
    %227 = vector.load %arg5[%c0_366, %c0_367] : memref<64x128xf32, #tpu.memory_space<vmem>>, vector<64x128xf32>
    %228 = arith.maximumf %226, %227 : vector<64x128xf32>
    %c0_368 = arith.constant 0 : index
    %c0_369 = arith.constant 0 : index
    %229 = vector.load %arg6[%c0_368, %c0_369] : memref<64x128xf32, #tpu.memory_space<vmem>>, vector<64x128xf32>
    tpu.vector_store %arg6[%c0_368, %c0_369], %228 {strides = array<i32>} : memref<64x128xf32, #tpu.memory_space<vmem>>, vector<64x128xf32>,
    %c0_370 = arith.constant 0 : index
    %c0_371 = arith.constant 0 : index
    %230 = vector.load %arg6[%c0_370, %c0_371] : memref<64x128xf32, #tpu.memory_space<vmem>>, vector<64x128xf32>
    %c0_372 = arith.constant 0 : index
    %c0_373 = arith.constant 0 : index
    %231 = vector.load %arg3[%c0_372, %c0_373] : memref<1x128xf32, #tpu.memory_space<vmem>>, vector<1x128xf32>
    %232 = vector.broadcast %231 : vector<1x128xf32> to vector<64x128xf32>
    %233 = arith.addf %230, %232 : vector<64x128xf32>
    %234 = arith.truncf %233 : vector<64x128xf32> to vector<64x128xbf16>
    %c0_374 = arith.constant 0 : index
    %c0_375 = arith.constant 0 : index
    %c0_376 = arith.constant 0 : index
    %235 = vector.load %arg4[%c0_374, %c0_375, %c0_376] : memref<1x64x128xbf16, #tpu.memory_space<vmem>>, vector<1x64x128xbf16>
    %236 = vector.shape_cast %235 : vector<1x64x128xbf16> to vector<64x128xbf16>
    %237 = vector.shape_cast %234 : vector<64x128xbf16> to vector<1x64x128xbf16>
    tpu.vector_store %arg4[%c0_374, %c0_375, %c0_376], %237 {strides = array<i32>} : memref<1x64x128xbf16, #tpu.memory_space<vmem>>, vector<1x64x128xbf16>,
    return
  }
  func.func @transform_0(%arg0: i32) -> (i32, i32, i32, i32, i32) {
    %c0_i32 = arith.constant 0 : i32
    %c0_i32_0 = arith.constant 0 : i32
    %c0_i32_1 = arith.constant 0 : i32
    %c0_i32_2 = arith.constant 0 : i32
    %c0_i32_3 = arith.constant 0 : i32
    return %arg0, %c0_i32, %c0_i32_0, %c0_i32_1, %c0_i32_2 : i32, i32, i32, i32, i32
  }
  func.func @transform_1(%arg0: i32) -> (i32, i32, i32) {
    %c0_i32 = arith.constant 0 : i32
    %c0_i32_0 = arith.constant 0 : i32
    %c0_i32_1 = arith.constant 0 : i32
    %c0_i32_2 = arith.constant 0 : i32
    return %c0_i32, %c0_i32_0, %c0_i32_1 : i32, i32, i32
  }
  func.func @transform_2(%arg0: i32) -> (i32, i32) {
    %c0_i32 = arith.constant 0 : i32
    %c0_i32_0 = arith.constant 0 : i32
    %c0_i32_1 = arith.constant 0 : i32
    return %c0_i32, %c0_i32_0 : i32, i32
  }
  func.func @transform_3(%arg0: i32) -> (i32, i32, i32) {
    %c0_i32 = arith.constant 0 : i32
    %c0_i32_0 = arith.constant 0 : i32
    %c0_i32_1 = arith.constant 0 : i32
    return %arg0, %c0_i32, %c0_i32_0 : i32, i32, i32
  }
}

module attributes {stable_mosaic.version = 11 : i64} {
  func.func @kernel(%arg0: i32, %arg1: memref<1x4x7x128x128xbf16, #tpu.memory_space<vmem>>, %arg2: memref<7x128x128xbf16, #tpu.memory_space<vmem>>, %arg3: memref<1x128xf32, #tpu.memory_space<vmem>>, %arg4: memref<16x128x128xf32, #tpu.memory_space<vmem>>, %arg5: memref<1x128xf32, #tpu.memory_space<vmem>>, %arg6: memref<128x128xf32, #tpu.memory_space<vmem>>, %arg7: memref<1x128xf32, #tpu.memory_space<vmem>>, %arg8: memref<1x8x128xf32, #tpu.memory_space<vmem>>, %arg9: memref<128x128xf32, #tpu.memory_space<vmem>>, %arg10: memref<128x128xf32, #tpu.memory_space<vmem>>) attributes {dimension_semantics = [#tpu.dimension_semantics<parallel>], iteration_bounds = array<i64: 1>, scalar_prefetch = 0 : i64, scratch_operands = 2 : i64, tpu.core_type = #tpu.core_type<tc>, window_params = [{transform_indices = @transform_0, window_bounds = array<i64: 1, 4, 7, 128, 128>}, {pipeline_mode = #tpu.pipeline_mode<synchronous>, transform_indices = @transform_1, window_bounds = array<i64: 7, 128, 128>}, {pipeline_mode = #tpu.pipeline_mode<synchronous>, transform_indices = @transform_2, window_bounds = array<i64: 1, 128>}, {pipeline_mode = #tpu.pipeline_mode<synchronous>, transform_indices = @transform_3, window_bounds = array<i64: 16, 128, 128>}, {pipeline_mode = #tpu.pipeline_mode<synchronous>, transform_indices = @transform_4, window_bounds = array<i64: 1, 128>}, {pipeline_mode = #tpu.pipeline_mode<synchronous>, transform_indices = @transform_5, window_bounds = array<i64: 128, 128>}, {pipeline_mode = #tpu.pipeline_mode<synchronous>, transform_indices = @transform_6, window_bounds = array<i64: 1, 128>}, {transform_indices = @transform_7, window_bounds = array<i64: 1, 8, 128>}]} {
    %c0 = arith.constant 0 : index
    %c0_0 = arith.constant 0 : index
    %c0_1 = arith.constant 0 : index
    %c0_2 = arith.constant 0 : index
    %c0_3 = arith.constant 0 : index
    %0 = vector.load %arg1[%c0, %c0_0, %c0_1, %c0_2, %c0_3] : memref<1x4x7x128x128xbf16, #tpu.memory_space<vmem>>, vector<1x1x1x128x128xbf16>
    %1 = vector.shape_cast %0 : vector<1x1x1x128x128xbf16> to vector<128x128xbf16>
    %c0_4 = arith.constant 0 : index
    %c0_5 = arith.constant 0 : index
    %c0_6 = arith.constant 0 : index
    %2 = vector.load %arg2[%c0_4, %c0_5, %c0_6] : memref<7x128x128xbf16, #tpu.memory_space<vmem>>, vector<1x128x128xbf16>
    %3 = vector.shape_cast %2 : vector<1x128x128xbf16> to vector<128x128xbf16>
    %cst = arith.constant dense<0.000000e+00> : vector<128x128xf32>
    %4 = tpu.matmul %1, %3, %cst {dimension_numbers = #tpu.dot_dimension_numbers<[1], [0], [0], [1], [0, 0, 1, 1], [], []>} : vector<128x128xbf16>, vector<128x128xbf16>, vector<128x128xf32> -> vector<128x128xf32>
    %c0_7 = arith.constant 0 : index
    %c0_8 = arith.constant 0 : index
    %5 = vector.load %arg9[%c0_7, %c0_8] : memref<128x128xf32, #tpu.memory_space<vmem>>, vector<128x128xf32>
    tpu.vector_store %arg9[%c0_7, %c0_8], %4 {strides = array<i32>} : memref<128x128xf32, #tpu.memory_space<vmem>>, vector<128x128xf32>,
    %c0_9 = arith.constant 0 : index
    %c0_10 = arith.constant 0 : index
    %6 = vector.load %arg9[%c0_9, %c0_10] : memref<128x128xf32, #tpu.memory_space<vmem>>, vector<128x128xf32>
    %c0_11 = arith.constant 0 : index
    %c0_12 = arith.constant 0 : index
    %c1 = arith.constant 1 : index
    %c0_13 = arith.constant 0 : index
    %c0_14 = arith.constant 0 : index
    %7 = vector.load %arg1[%c0_11, %c0_12, %c1, %c0_13, %c0_14] : memref<1x4x7x128x128xbf16, #tpu.memory_space<vmem>>, vector<1x1x1x128x128xbf16>
    %8 = vector.shape_cast %7 : vector<1x1x1x128x128xbf16> to vector<128x128xbf16>
    %c1_15 = arith.constant 1 : index
    %c0_16 = arith.constant 0 : index
    %c0_17 = arith.constant 0 : index
    %9 = vector.load %arg2[%c1_15, %c0_16, %c0_17] : memref<7x128x128xbf16, #tpu.memory_space<vmem>>, vector<1x128x128xbf16>
    %10 = vector.shape_cast %9 : vector<1x128x128xbf16> to vector<128x128xbf16>
    %cst_18 = arith.constant dense<0.000000e+00> : vector<128x128xf32>
    %11 = tpu.matmul %8, %10, %cst_18 {dimension_numbers = #tpu.dot_dimension_numbers<[1], [0], [0], [1], [0, 0, 1, 1], [], []>} : vector<128x128xbf16>, vector<128x128xbf16>, vector<128x128xf32> -> vector<128x128xf32>
    %12 = arith.addf %6, %11 : vector<128x128xf32>
    %c0_19 = arith.constant 0 : index
    %c0_20 = arith.constant 0 : index
    %13 = vector.load %arg9[%c0_19, %c0_20] : memref<128x128xf32, #tpu.memory_space<vmem>>, vector<128x128xf32>
    tpu.vector_store %arg9[%c0_19, %c0_20], %12 {strides = array<i32>} : memref<128x128xf32, #tpu.memory_space<vmem>>, vector<128x128xf32>,
    %c0_21 = arith.constant 0 : index
    %c0_22 = arith.constant 0 : index
    %14 = vector.load %arg9[%c0_21, %c0_22] : memref<128x128xf32, #tpu.memory_space<vmem>>, vector<128x128xf32>
    %c0_23 = arith.constant 0 : index
    %c0_24 = arith.constant 0 : index
    %c2 = arith.constant 2 : index
    %c0_25 = arith.constant 0 : index
    %c0_26 = arith.constant 0 : index
    %15 = vector.load %arg1[%c0_23, %c0_24, %c2, %c0_25, %c0_26] : memref<1x4x7x128x128xbf16, #tpu.memory_space<vmem>>, vector<1x1x1x128x128xbf16>
    %16 = vector.shape_cast %15 : vector<1x1x1x128x128xbf16> to vector<128x128xbf16>
    %c2_27 = arith.constant 2 : index
    %c0_28 = arith.constant 0 : index
    %c0_29 = arith.constant 0 : index
    %17 = vector.load %arg2[%c2_27, %c0_28, %c0_29] : memref<7x128x128xbf16, #tpu.memory_space<vmem>>, vector<1x128x128xbf16>
    %18 = vector.shape_cast %17 : vector<1x128x128xbf16> to vector<128x128xbf16>
    %cst_30 = arith.constant dense<0.000000e+00> : vector<128x128xf32>
    %19 = tpu.matmul %16, %18, %cst_30 {dimension_numbers = #tpu.dot_dimension_numbers<[1], [0], [0], [1], [0, 0, 1, 1], [], []>} : vector<128x128xbf16>, vector<128x128xbf16>, vector<128x128xf32> -> vector<128x128xf32>
    %20 = arith.addf %14, %19 : vector<128x128xf32>
    %c0_31 = arith.constant 0 : index
    %c0_32 = arith.constant 0 : index
    %21 = vector.load %arg9[%c0_31, %c0_32] : memref<128x128xf32, #tpu.memory_space<vmem>>, vector<128x128xf32>
    tpu.vector_store %arg9[%c0_31, %c0_32], %20 {strides = array<i32>} : memref<128x128xf32, #tpu.memory_space<vmem>>, vector<128x128xf32>,
    %c0_33 = arith.constant 0 : index
    %c0_34 = arith.constant 0 : index
    %22 = vector.load %arg9[%c0_33, %c0_34] : memref<128x128xf32, #tpu.memory_space<vmem>>, vector<128x128xf32>
    %c0_35 = arith.constant 0 : index
    %c0_36 = arith.constant 0 : index
    %c3 = arith.constant 3 : index
    %c0_37 = arith.constant 0 : index
    %c0_38 = arith.constant 0 : index
    %23 = vector.load %arg1[%c0_35, %c0_36, %c3, %c0_37, %c0_38] : memref<1x4x7x128x128xbf16, #tpu.memory_space<vmem>>, vector<1x1x1x128x128xbf16>
    %24 = vector.shape_cast %23 : vector<1x1x1x128x128xbf16> to vector<128x128xbf16>
    %c3_39 = arith.constant 3 : index
    %c0_40 = arith.constant 0 : index
    %c0_41 = arith.constant 0 : index
    %25 = vector.load %arg2[%c3_39, %c0_40, %c0_41] : memref<7x128x128xbf16, #tpu.memory_space<vmem>>, vector<1x128x128xbf16>
    %26 = vector.shape_cast %25 : vector<1x128x128xbf16> to vector<128x128xbf16>
    %cst_42 = arith.constant dense<0.000000e+00> : vector<128x128xf32>
    %27 = tpu.matmul %24, %26, %cst_42 {dimension_numbers = #tpu.dot_dimension_numbers<[1], [0], [0], [1], [0, 0, 1, 1], [], []>} : vector<128x128xbf16>, vector<128x128xbf16>, vector<128x128xf32> -> vector<128x128xf32>
    %28 = arith.addf %22, %27 : vector<128x128xf32>
    %c0_43 = arith.constant 0 : index
    %c0_44 = arith.constant 0 : index
    %29 = vector.load %arg9[%c0_43, %c0_44] : memref<128x128xf32, #tpu.memory_space<vmem>>, vector<128x128xf32>
    tpu.vector_store %arg9[%c0_43, %c0_44], %28 {strides = array<i32>} : memref<128x128xf32, #tpu.memory_space<vmem>>, vector<128x128xf32>,
    %c0_45 = arith.constant 0 : index
    %c0_46 = arith.constant 0 : index
    %30 = vector.load %arg9[%c0_45, %c0_46] : memref<128x128xf32, #tpu.memory_space<vmem>>, vector<128x128xf32>
    %c0_47 = arith.constant 0 : index
    %c0_48 = arith.constant 0 : index
    %c4 = arith.constant 4 : index
    %c0_49 = arith.constant 0 : index
    %c0_50 = arith.constant 0 : index
    %31 = vector.load %arg1[%c0_47, %c0_48, %c4, %c0_49, %c0_50] : memref<1x4x7x128x128xbf16, #tpu.memory_space<vmem>>, vector<1x1x1x128x128xbf16>
    %32 = vector.shape_cast %31 : vector<1x1x1x128x128xbf16> to vector<128x128xbf16>
    %c4_51 = arith.constant 4 : index
    %c0_52 = arith.constant 0 : index
    %c0_53 = arith.constant 0 : index
    %33 = vector.load %arg2[%c4_51, %c0_52, %c0_53] : memref<7x128x128xbf16, #tpu.memory_space<vmem>>, vector<1x128x128xbf16>
    %34 = vector.shape_cast %33 : vector<1x128x128xbf16> to vector<128x128xbf16>
    %cst_54 = arith.constant dense<0.000000e+00> : vector<128x128xf32>
    %35 = tpu.matmul %32, %34, %cst_54 {dimension_numbers = #tpu.dot_dimension_numbers<[1], [0], [0], [1], [0, 0, 1, 1], [], []>} : vector<128x128xbf16>, vector<128x128xbf16>, vector<128x128xf32> -> vector<128x128xf32>
    %36 = arith.addf %30, %35 : vector<128x128xf32>
    %c0_55 = arith.constant 0 : index
    %c0_56 = arith.constant 0 : index
    %37 = vector.load %arg9[%c0_55, %c0_56] : memref<128x128xf32, #tpu.memory_space<vmem>>, vector<128x128xf32>
    tpu.vector_store %arg9[%c0_55, %c0_56], %36 {strides = array<i32>} : memref<128x128xf32, #tpu.memory_space<vmem>>, vector<128x128xf32>,
    %c0_57 = arith.constant 0 : index
    %c0_58 = arith.constant 0 : index
    %38 = vector.load %arg9[%c0_57, %c0_58] : memref<128x128xf32, #tpu.memory_space<vmem>>, vector<128x128xf32>
    %c0_59 = arith.constant 0 : index
    %c0_60 = arith.constant 0 : index
    %c5 = arith.constant 5 : index
    %c0_61 = arith.constant 0 : index
    %c0_62 = arith.constant 0 : index
    %39 = vector.load %arg1[%c0_59, %c0_60, %c5, %c0_61, %c0_62] : memref<1x4x7x128x128xbf16, #tpu.memory_space<vmem>>, vector<1x1x1x128x128xbf16>
    %40 = vector.shape_cast %39 : vector<1x1x1x128x128xbf16> to vector<128x128xbf16>
    %c5_63 = arith.constant 5 : index
    %c0_64 = arith.constant 0 : index
    %c0_65 = arith.constant 0 : index
    %41 = vector.load %arg2[%c5_63, %c0_64, %c0_65] : memref<7x128x128xbf16, #tpu.memory_space<vmem>>, vector<1x128x128xbf16>
    %42 = vector.shape_cast %41 : vector<1x128x128xbf16> to vector<128x128xbf16>
    %cst_66 = arith.constant dense<0.000000e+00> : vector<128x128xf32>
    %43 = tpu.matmul %40, %42, %cst_66 {dimension_numbers = #tpu.dot_dimension_numbers<[1], [0], [0], [1], [0, 0, 1, 1], [], []>} : vector<128x128xbf16>, vector<128x128xbf16>, vector<128x128xf32> -> vector<128x128xf32>
    %44 = arith.addf %38, %43 : vector<128x128xf32>
    %c0_67 = arith.constant 0 : index
    %c0_68 = arith.constant 0 : index
    %45 = vector.load %arg9[%c0_67, %c0_68] : memref<128x128xf32, #tpu.memory_space<vmem>>, vector<128x128xf32>
    tpu.vector_store %arg9[%c0_67, %c0_68], %44 {strides = array<i32>} : memref<128x128xf32, #tpu.memory_space<vmem>>, vector<128x128xf32>,
    %c0_69 = arith.constant 0 : index
    %c0_70 = arith.constant 0 : index
    %46 = vector.load %arg9[%c0_69, %c0_70] : memref<128x128xf32, #tpu.memory_space<vmem>>, vector<128x128xf32>
    %c0_71 = arith.constant 0 : index
    %c0_72 = arith.constant 0 : index
    %c6 = arith.constant 6 : index
    %c0_73 = arith.constant 0 : index
    %c0_74 = arith.constant 0 : index
    %47 = vector.load %arg1[%c0_71, %c0_72, %c6, %c0_73, %c0_74] : memref<1x4x7x128x128xbf16, #tpu.memory_space<vmem>>, vector<1x1x1x128x128xbf16>
    %48 = vector.shape_cast %47 : vector<1x1x1x128x128xbf16> to vector<128x128xbf16>
    %c6_75 = arith.constant 6 : index
    %c0_76 = arith.constant 0 : index
    %c0_77 = arith.constant 0 : index
    %49 = vector.load %arg2[%c6_75, %c0_76, %c0_77] : memref<7x128x128xbf16, #tpu.memory_space<vmem>>, vector<1x128x128xbf16>
    %50 = vector.shape_cast %49 : vector<1x128x128xbf16> to vector<128x128xbf16>
    %cst_78 = arith.constant dense<0.000000e+00> : vector<128x128xf32>
    %51 = tpu.matmul %48, %50, %cst_78 {dimension_numbers = #tpu.dot_dimension_numbers<[1], [0], [0], [1], [0, 0, 1, 1], [], []>} : vector<128x128xbf16>, vector<128x128xbf16>, vector<128x128xf32> -> vector<128x128xf32>
    %52 = arith.addf %46, %51 : vector<128x128xf32>
    %c0_79 = arith.constant 0 : index
    %c0_80 = arith.constant 0 : index
    %53 = vector.load %arg9[%c0_79, %c0_80] : memref<128x128xf32, #tpu.memory_space<vmem>>, vector<128x128xf32>
    tpu.vector_store %arg9[%c0_79, %c0_80], %52 {strides = array<i32>} : memref<128x128xf32, #tpu.memory_space<vmem>>, vector<128x128xf32>,
    %c0_81 = arith.constant 0 : index
    %c0_82 = arith.constant 0 : index
    %54 = vector.load %arg9[%c0_81, %c0_82] : memref<128x128xf32, #tpu.memory_space<vmem>>, vector<128x128xf32>
    %c0_83 = arith.constant 0 : index
    %c0_84 = arith.constant 0 : index
    %55 = vector.load %arg10[%c0_83, %c0_84] : memref<128x128xf32, #tpu.memory_space<vmem>>, vector<128x128xf32>
    tpu.vector_store %arg10[%c0_83, %c0_84], %54 {strides = array<i32>} : memref<128x128xf32, #tpu.memory_space<vmem>>, vector<128x128xf32>,
    %c0_85 = arith.constant 0 : index
    %c1_86 = arith.constant 1 : index
    %c0_87 = arith.constant 0 : index
    %c0_88 = arith.constant 0 : index
    %c0_89 = arith.constant 0 : index
    %56 = vector.load %arg1[%c0_85, %c1_86, %c0_87, %c0_88, %c0_89] : memref<1x4x7x128x128xbf16, #tpu.memory_space<vmem>>, vector<1x1x1x128x128xbf16>
    %57 = vector.shape_cast %56 : vector<1x1x1x128x128xbf16> to vector<128x128xbf16>
    %c0_90 = arith.constant 0 : index
    %c0_91 = arith.constant 0 : index
    %c0_92 = arith.constant 0 : index
    %58 = vector.load %arg2[%c0_90, %c0_91, %c0_92] : memref<7x128x128xbf16, #tpu.memory_space<vmem>>, vector<1x128x128xbf16>
    %59 = vector.shape_cast %58 : vector<1x128x128xbf16> to vector<128x128xbf16>
    %cst_93 = arith.constant dense<0.000000e+00> : vector<128x128xf32>
    %60 = tpu.matmul %57, %59, %cst_93 {dimension_numbers = #tpu.dot_dimension_numbers<[1], [0], [0], [1], [0, 0, 1, 1], [], []>} : vector<128x128xbf16>, vector<128x128xbf16>, vector<128x128xf32> -> vector<128x128xf32>
    %c0_94 = arith.constant 0 : index
    %c0_95 = arith.constant 0 : index
    %61 = vector.load %arg9[%c0_94, %c0_95] : memref<128x128xf32, #tpu.memory_space<vmem>>, vector<128x128xf32>
    tpu.vector_store %arg9[%c0_94, %c0_95], %60 {strides = array<i32>} : memref<128x128xf32, #tpu.memory_space<vmem>>, vector<128x128xf32>,
    %c0_96 = arith.constant 0 : index
    %c0_97 = arith.constant 0 : index
    %62 = vector.load %arg9[%c0_96, %c0_97] : memref<128x128xf32, #tpu.memory_space<vmem>>, vector<128x128xf32>
    %c0_98 = arith.constant 0 : index
    %c1_99 = arith.constant 1 : index
    %c1_100 = arith.constant 1 : index
    %c0_101 = arith.constant 0 : index
    %c0_102 = arith.constant 0 : index
    %63 = vector.load %arg1[%c0_98, %c1_99, %c1_100, %c0_101, %c0_102] : memref<1x4x7x128x128xbf16, #tpu.memory_space<vmem>>, vector<1x1x1x128x128xbf16>
    %64 = vector.shape_cast %63 : vector<1x1x1x128x128xbf16> to vector<128x128xbf16>
    %c1_103 = arith.constant 1 : index
    %c0_104 = arith.constant 0 : index
    %c0_105 = arith.constant 0 : index
    %65 = vector.load %arg2[%c1_103, %c0_104, %c0_105] : memref<7x128x128xbf16, #tpu.memory_space<vmem>>, vector<1x128x128xbf16>
    %66 = vector.shape_cast %65 : vector<1x128x128xbf16> to vector<128x128xbf16>
    %cst_106 = arith.constant dense<0.000000e+00> : vector<128x128xf32>
    %67 = tpu.matmul %64, %66, %cst_106 {dimension_numbers = #tpu.dot_dimension_numbers<[1], [0], [0], [1], [0, 0, 1, 1], [], []>} : vector<128x128xbf16>, vector<128x128xbf16>, vector<128x128xf32> -> vector<128x128xf32>
    %68 = arith.addf %62, %67 : vector<128x128xf32>
    %c0_107 = arith.constant 0 : index
    %c0_108 = arith.constant 0 : index
    %69 = vector.load %arg9[%c0_107, %c0_108] : memref<128x128xf32, #tpu.memory_space<vmem>>, vector<128x128xf32>
    tpu.vector_store %arg9[%c0_107, %c0_108], %68 {strides = array<i32>} : memref<128x128xf32, #tpu.memory_space<vmem>>, vector<128x128xf32>,
    %c0_109 = arith.constant 0 : index
    %c0_110 = arith.constant 0 : index
    %70 = vector.load %arg9[%c0_109, %c0_110] : memref<128x128xf32, #tpu.memory_space<vmem>>, vector<128x128xf32>
    %c0_111 = arith.constant 0 : index
    %c1_112 = arith.constant 1 : index
    %c2_113 = arith.constant 2 : index
    %c0_114 = arith.constant 0 : index
    %c0_115 = arith.constant 0 : index
    %71 = vector.load %arg1[%c0_111, %c1_112, %c2_113, %c0_114, %c0_115] : memref<1x4x7x128x128xbf16, #tpu.memory_space<vmem>>, vector<1x1x1x128x128xbf16>
    %72 = vector.shape_cast %71 : vector<1x1x1x128x128xbf16> to vector<128x128xbf16>
    %c2_116 = arith.constant 2 : index
    %c0_117 = arith.constant 0 : index
    %c0_118 = arith.constant 0 : index
    %73 = vector.load %arg2[%c2_116, %c0_117, %c0_118] : memref<7x128x128xbf16, #tpu.memory_space<vmem>>, vector<1x128x128xbf16>
    %74 = vector.shape_cast %73 : vector<1x128x128xbf16> to vector<128x128xbf16>
    %cst_119 = arith.constant dense<0.000000e+00> : vector<128x128xf32>
    %75 = tpu.matmul %72, %74, %cst_119 {dimension_numbers = #tpu.dot_dimension_numbers<[1], [0], [0], [1], [0, 0, 1, 1], [], []>} : vector<128x128xbf16>, vector<128x128xbf16>, vector<128x128xf32> -> vector<128x128xf32>
    %76 = arith.addf %70, %75 : vector<128x128xf32>
    %c0_120 = arith.constant 0 : index
    %c0_121 = arith.constant 0 : index
    %77 = vector.load %arg9[%c0_120, %c0_121] : memref<128x128xf32, #tpu.memory_space<vmem>>, vector<128x128xf32>
    tpu.vector_store %arg9[%c0_120, %c0_121], %76 {strides = array<i32>} : memref<128x128xf32, #tpu.memory_space<vmem>>, vector<128x128xf32>,
    %c0_122 = arith.constant 0 : index
    %c0_123 = arith.constant 0 : index
    %78 = vector.load %arg9[%c0_122, %c0_123] : memref<128x128xf32, #tpu.memory_space<vmem>>, vector<128x128xf32>
    %c0_124 = arith.constant 0 : index
    %c1_125 = arith.constant 1 : index
    %c3_126 = arith.constant 3 : index
    %c0_127 = arith.constant 0 : index
    %c0_128 = arith.constant 0 : index
    %79 = vector.load %arg1[%c0_124, %c1_125, %c3_126, %c0_127, %c0_128] : memref<1x4x7x128x128xbf16, #tpu.memory_space<vmem>>, vector<1x1x1x128x128xbf16>
    %80 = vector.shape_cast %79 : vector<1x1x1x128x128xbf16> to vector<128x128xbf16>
    %c3_129 = arith.constant 3 : index
    %c0_130 = arith.constant 0 : index
    %c0_131 = arith.constant 0 : index
    %81 = vector.load %arg2[%c3_129, %c0_130, %c0_131] : memref<7x128x128xbf16, #tpu.memory_space<vmem>>, vector<1x128x128xbf16>
    %82 = vector.shape_cast %81 : vector<1x128x128xbf16> to vector<128x128xbf16>
    %cst_132 = arith.constant dense<0.000000e+00> : vector<128x128xf32>
    %83 = tpu.matmul %80, %82, %cst_132 {dimension_numbers = #tpu.dot_dimension_numbers<[1], [0], [0], [1], [0, 0, 1, 1], [], []>} : vector<128x128xbf16>, vector<128x128xbf16>, vector<128x128xf32> -> vector<128x128xf32>
    %84 = arith.addf %78, %83 : vector<128x128xf32>
    %c0_133 = arith.constant 0 : index
    %c0_134 = arith.constant 0 : index
    %85 = vector.load %arg9[%c0_133, %c0_134] : memref<128x128xf32, #tpu.memory_space<vmem>>, vector<128x128xf32>
    tpu.vector_store %arg9[%c0_133, %c0_134], %84 {strides = array<i32>} : memref<128x128xf32, #tpu.memory_space<vmem>>, vector<128x128xf32>,
    %c0_135 = arith.constant 0 : index
    %c0_136 = arith.constant 0 : index
    %86 = vector.load %arg9[%c0_135, %c0_136] : memref<128x128xf32, #tpu.memory_space<vmem>>, vector<128x128xf32>
    %c0_137 = arith.constant 0 : index
    %c1_138 = arith.constant 1 : index
    %c4_139 = arith.constant 4 : index
    %c0_140 = arith.constant 0 : index
    %c0_141 = arith.constant 0 : index
    %87 = vector.load %arg1[%c0_137, %c1_138, %c4_139, %c0_140, %c0_141] : memref<1x4x7x128x128xbf16, #tpu.memory_space<vmem>>, vector<1x1x1x128x128xbf16>
    %88 = vector.shape_cast %87 : vector<1x1x1x128x128xbf16> to vector<128x128xbf16>
    %c4_142 = arith.constant 4 : index
    %c0_143 = arith.constant 0 : index
    %c0_144 = arith.constant 0 : index
    %89 = vector.load %arg2[%c4_142, %c0_143, %c0_144] : memref<7x128x128xbf16, #tpu.memory_space<vmem>>, vector<1x128x128xbf16>
    %90 = vector.shape_cast %89 : vector<1x128x128xbf16> to vector<128x128xbf16>
    %cst_145 = arith.constant dense<0.000000e+00> : vector<128x128xf32>
    %91 = tpu.matmul %88, %90, %cst_145 {dimension_numbers = #tpu.dot_dimension_numbers<[1], [0], [0], [1], [0, 0, 1, 1], [], []>} : vector<128x128xbf16>, vector<128x128xbf16>, vector<128x128xf32> -> vector<128x128xf32>
    %92 = arith.addf %86, %91 : vector<128x128xf32>
    %c0_146 = arith.constant 0 : index
    %c0_147 = arith.constant 0 : index
    %93 = vector.load %arg9[%c0_146, %c0_147] : memref<128x128xf32, #tpu.memory_space<vmem>>, vector<128x128xf32>
    tpu.vector_store %arg9[%c0_146, %c0_147], %92 {strides = array<i32>} : memref<128x128xf32, #tpu.memory_space<vmem>>, vector<128x128xf32>,
    %c0_148 = arith.constant 0 : index
    %c0_149 = arith.constant 0 : index
    %94 = vector.load %arg9[%c0_148, %c0_149] : memref<128x128xf32, #tpu.memory_space<vmem>>, vector<128x128xf32>
    %c0_150 = arith.constant 0 : index
    %c1_151 = arith.constant 1 : index
    %c5_152 = arith.constant 5 : index
    %c0_153 = arith.constant 0 : index
    %c0_154 = arith.constant 0 : index
    %95 = vector.load %arg1[%c0_150, %c1_151, %c5_152, %c0_153, %c0_154] : memref<1x4x7x128x128xbf16, #tpu.memory_space<vmem>>, vector<1x1x1x128x128xbf16>
    %96 = vector.shape_cast %95 : vector<1x1x1x128x128xbf16> to vector<128x128xbf16>
    %c5_155 = arith.constant 5 : index
    %c0_156 = arith.constant 0 : index
    %c0_157 = arith.constant 0 : index
    %97 = vector.load %arg2[%c5_155, %c0_156, %c0_157] : memref<7x128x128xbf16, #tpu.memory_space<vmem>>, vector<1x128x128xbf16>
    %98 = vector.shape_cast %97 : vector<1x128x128xbf16> to vector<128x128xbf16>
    %cst_158 = arith.constant dense<0.000000e+00> : vector<128x128xf32>
    %99 = tpu.matmul %96, %98, %cst_158 {dimension_numbers = #tpu.dot_dimension_numbers<[1], [0], [0], [1], [0, 0, 1, 1], [], []>} : vector<128x128xbf16>, vector<128x128xbf16>, vector<128x128xf32> -> vector<128x128xf32>
    %100 = arith.addf %94, %99 : vector<128x128xf32>
    %c0_159 = arith.constant 0 : index
    %c0_160 = arith.constant 0 : index
    %101 = vector.load %arg9[%c0_159, %c0_160] : memref<128x128xf32, #tpu.memory_space<vmem>>, vector<128x128xf32>
    tpu.vector_store %arg9[%c0_159, %c0_160], %100 {strides = array<i32>} : memref<128x128xf32, #tpu.memory_space<vmem>>, vector<128x128xf32>,
    %c0_161 = arith.constant 0 : index
    %c0_162 = arith.constant 0 : index
    %102 = vector.load %arg9[%c0_161, %c0_162] : memref<128x128xf32, #tpu.memory_space<vmem>>, vector<128x128xf32>
    %c0_163 = arith.constant 0 : index
    %c1_164 = arith.constant 1 : index
    %c6_165 = arith.constant 6 : index
    %c0_166 = arith.constant 0 : index
    %c0_167 = arith.constant 0 : index
    %103 = vector.load %arg1[%c0_163, %c1_164, %c6_165, %c0_166, %c0_167] : memref<1x4x7x128x128xbf16, #tpu.memory_space<vmem>>, vector<1x1x1x128x128xbf16>
    %104 = vector.shape_cast %103 : vector<1x1x1x128x128xbf16> to vector<128x128xbf16>
    %c6_168 = arith.constant 6 : index
    %c0_169 = arith.constant 0 : index
    %c0_170 = arith.constant 0 : index
    %105 = vector.load %arg2[%c6_168, %c0_169, %c0_170] : memref<7x128x128xbf16, #tpu.memory_space<vmem>>, vector<1x128x128xbf16>
    %106 = vector.shape_cast %105 : vector<1x128x128xbf16> to vector<128x128xbf16>
    %cst_171 = arith.constant dense<0.000000e+00> : vector<128x128xf32>
    %107 = tpu.matmul %104, %106, %cst_171 {dimension_numbers = #tpu.dot_dimension_numbers<[1], [0], [0], [1], [0, 0, 1, 1], [], []>} : vector<128x128xbf16>, vector<128x128xbf16>, vector<128x128xf32> -> vector<128x128xf32>
    %108 = arith.addf %102, %107 : vector<128x128xf32>
    %c0_172 = arith.constant 0 : index
    %c0_173 = arith.constant 0 : index
    %109 = vector.load %arg9[%c0_172, %c0_173] : memref<128x128xf32, #tpu.memory_space<vmem>>, vector<128x128xf32>
    tpu.vector_store %arg9[%c0_172, %c0_173], %108 {strides = array<i32>} : memref<128x128xf32, #tpu.memory_space<vmem>>, vector<128x128xf32>,
    %c0_174 = arith.constant 0 : index
    %c0_175 = arith.constant 0 : index
    %110 = vector.load %arg10[%c0_174, %c0_175] : memref<128x128xf32, #tpu.memory_space<vmem>>, vector<128x128xf32>
    %c0_176 = arith.constant 0 : index
    %c0_177 = arith.constant 0 : index
    %111 = vector.load %arg9[%c0_176, %c0_177] : memref<128x128xf32, #tpu.memory_space<vmem>>, vector<128x128xf32>
    %112 = arith.maximumf %110, %111 : vector<128x128xf32>
    %c0_178 = arith.constant 0 : index
    %c0_179 = arith.constant 0 : index
    %113 = vector.load %arg10[%c0_178, %c0_179] : memref<128x128xf32, #tpu.memory_space<vmem>>, vector<128x128xf32>
    tpu.vector_store %arg10[%c0_178, %c0_179], %112 {strides = array<i32>} : memref<128x128xf32, #tpu.memory_space<vmem>>, vector<128x128xf32>,
    %c0_180 = arith.constant 0 : index
    %c2_181 = arith.constant 2 : index
    %c0_182 = arith.constant 0 : index
    %c0_183 = arith.constant 0 : index
    %c0_184 = arith.constant 0 : index
    %114 = vector.load %arg1[%c0_180, %c2_181, %c0_182, %c0_183, %c0_184] : memref<1x4x7x128x128xbf16, #tpu.memory_space<vmem>>, vector<1x1x1x128x128xbf16>
    %115 = vector.shape_cast %114 : vector<1x1x1x128x128xbf16> to vector<128x128xbf16>
    %c0_185 = arith.constant 0 : index
    %c0_186 = arith.constant 0 : index
    %c0_187 = arith.constant 0 : index
    %116 = vector.load %arg2[%c0_185, %c0_186, %c0_187] : memref<7x128x128xbf16, #tpu.memory_space<vmem>>, vector<1x128x128xbf16>
    %117 = vector.shape_cast %116 : vector<1x128x128xbf16> to vector<128x128xbf16>
    %cst_188 = arith.constant dense<0.000000e+00> : vector<128x128xf32>
    %118 = tpu.matmul %115, %117, %cst_188 {dimension_numbers = #tpu.dot_dimension_numbers<[1], [0], [0], [1], [0, 0, 1, 1], [], []>} : vector<128x128xbf16>, vector<128x128xbf16>, vector<128x128xf32> -> vector<128x128xf32>
    %c0_189 = arith.constant 0 : index
    %c0_190 = arith.constant 0 : index
    %119 = vector.load %arg9[%c0_189, %c0_190] : memref<128x128xf32, #tpu.memory_space<vmem>>, vector<128x128xf32>
    tpu.vector_store %arg9[%c0_189, %c0_190], %118 {strides = array<i32>} : memref<128x128xf32, #tpu.memory_space<vmem>>, vector<128x128xf32>,
    %c0_191 = arith.constant 0 : index
    %c0_192 = arith.constant 0 : index
    %120 = vector.load %arg9[%c0_191, %c0_192] : memref<128x128xf32, #tpu.memory_space<vmem>>, vector<128x128xf32>
    %c0_193 = arith.constant 0 : index
    %c2_194 = arith.constant 2 : index
    %c1_195 = arith.constant 1 : index
    %c0_196 = arith.constant 0 : index
    %c0_197 = arith.constant 0 : index
    %121 = vector.load %arg1[%c0_193, %c2_194, %c1_195, %c0_196, %c0_197] : memref<1x4x7x128x128xbf16, #tpu.memory_space<vmem>>, vector<1x1x1x128x128xbf16>
    %122 = vector.shape_cast %121 : vector<1x1x1x128x128xbf16> to vector<128x128xbf16>
    %c1_198 = arith.constant 1 : index
    %c0_199 = arith.constant 0 : index
    %c0_200 = arith.constant 0 : index
    %123 = vector.load %arg2[%c1_198, %c0_199, %c0_200] : memref<7x128x128xbf16, #tpu.memory_space<vmem>>, vector<1x128x128xbf16>
    %124 = vector.shape_cast %123 : vector<1x128x128xbf16> to vector<128x128xbf16>
    %cst_201 = arith.constant dense<0.000000e+00> : vector<128x128xf32>
    %125 = tpu.matmul %122, %124, %cst_201 {dimension_numbers = #tpu.dot_dimension_numbers<[1], [0], [0], [1], [0, 0, 1, 1], [], []>} : vector<128x128xbf16>, vector<128x128xbf16>, vector<128x128xf32> -> vector<128x128xf32>
    %126 = arith.addf %120, %125 : vector<128x128xf32>
    %c0_202 = arith.constant 0 : index
    %c0_203 = arith.constant 0 : index
    %127 = vector.load %arg9[%c0_202, %c0_203] : memref<128x128xf32, #tpu.memory_space<vmem>>, vector<128x128xf32>
    tpu.vector_store %arg9[%c0_202, %c0_203], %126 {strides = array<i32>} : memref<128x128xf32, #tpu.memory_space<vmem>>, vector<128x128xf32>,
    %c0_204 = arith.constant 0 : index
    %c0_205 = arith.constant 0 : index
    %128 = vector.load %arg9[%c0_204, %c0_205] : memref<128x128xf32, #tpu.memory_space<vmem>>, vector<128x128xf32>
    %c0_206 = arith.constant 0 : index
    %c2_207 = arith.constant 2 : index
    %c2_208 = arith.constant 2 : index
    %c0_209 = arith.constant 0 : index
    %c0_210 = arith.constant 0 : index
    %129 = vector.load %arg1[%c0_206, %c2_207, %c2_208, %c0_209, %c0_210] : memref<1x4x7x128x128xbf16, #tpu.memory_space<vmem>>, vector<1x1x1x128x128xbf16>
    %130 = vector.shape_cast %129 : vector<1x1x1x128x128xbf16> to vector<128x128xbf16>
    %c2_211 = arith.constant 2 : index
    %c0_212 = arith.constant 0 : index
    %c0_213 = arith.constant 0 : index
    %131 = vector.load %arg2[%c2_211, %c0_212, %c0_213] : memref<7x128x128xbf16, #tpu.memory_space<vmem>>, vector<1x128x128xbf16>
    %132 = vector.shape_cast %131 : vector<1x128x128xbf16> to vector<128x128xbf16>
    %cst_214 = arith.constant dense<0.000000e+00> : vector<128x128xf32>
    %133 = tpu.matmul %130, %132, %cst_214 {dimension_numbers = #tpu.dot_dimension_numbers<[1], [0], [0], [1], [0, 0, 1, 1], [], []>} : vector<128x128xbf16>, vector<128x128xbf16>, vector<128x128xf32> -> vector<128x128xf32>
    %134 = arith.addf %128, %133 : vector<128x128xf32>
    %c0_215 = arith.constant 0 : index
    %c0_216 = arith.constant 0 : index
    %135 = vector.load %arg9[%c0_215, %c0_216] : memref<128x128xf32, #tpu.memory_space<vmem>>, vector<128x128xf32>
    tpu.vector_store %arg9[%c0_215, %c0_216], %134 {strides = array<i32>} : memref<128x128xf32, #tpu.memory_space<vmem>>, vector<128x128xf32>,
    %c0_217 = arith.constant 0 : index
    %c0_218 = arith.constant 0 : index
    %136 = vector.load %arg9[%c0_217, %c0_218] : memref<128x128xf32, #tpu.memory_space<vmem>>, vector<128x128xf32>
    %c0_219 = arith.constant 0 : index
    %c2_220 = arith.constant 2 : index
    %c3_221 = arith.constant 3 : index
    %c0_222 = arith.constant 0 : index
    %c0_223 = arith.constant 0 : index
    %137 = vector.load %arg1[%c0_219, %c2_220, %c3_221, %c0_222, %c0_223] : memref<1x4x7x128x128xbf16, #tpu.memory_space<vmem>>, vector<1x1x1x128x128xbf16>
    %138 = vector.shape_cast %137 : vector<1x1x1x128x128xbf16> to vector<128x128xbf16>
    %c3_224 = arith.constant 3 : index
    %c0_225 = arith.constant 0 : index
    %c0_226 = arith.constant 0 : index
    %139 = vector.load %arg2[%c3_224, %c0_225, %c0_226] : memref<7x128x128xbf16, #tpu.memory_space<vmem>>, vector<1x128x128xbf16>
    %140 = vector.shape_cast %139 : vector<1x128x128xbf16> to vector<128x128xbf16>
    %cst_227 = arith.constant dense<0.000000e+00> : vector<128x128xf32>
    %141 = tpu.matmul %138, %140, %cst_227 {dimension_numbers = #tpu.dot_dimension_numbers<[1], [0], [0], [1], [0, 0, 1, 1], [], []>} : vector<128x128xbf16>, vector<128x128xbf16>, vector<128x128xf32> -> vector<128x128xf32>
    %142 = arith.addf %136, %141 : vector<128x128xf32>
    %c0_228 = arith.constant 0 : index
    %c0_229 = arith.constant 0 : index
    %143 = vector.load %arg9[%c0_228, %c0_229] : memref<128x128xf32, #tpu.memory_space<vmem>>, vector<128x128xf32>
    tpu.vector_store %arg9[%c0_228, %c0_229], %142 {strides = array<i32>} : memref<128x128xf32, #tpu.memory_space<vmem>>, vector<128x128xf32>,
    %c0_230 = arith.constant 0 : index
    %c0_231 = arith.constant 0 : index
    %144 = vector.load %arg9[%c0_230, %c0_231] : memref<128x128xf32, #tpu.memory_space<vmem>>, vector<128x128xf32>
    %c0_232 = arith.constant 0 : index
    %c2_233 = arith.constant 2 : index
    %c4_234 = arith.constant 4 : index
    %c0_235 = arith.constant 0 : index
    %c0_236 = arith.constant 0 : index
    %145 = vector.load %arg1[%c0_232, %c2_233, %c4_234, %c0_235, %c0_236] : memref<1x4x7x128x128xbf16, #tpu.memory_space<vmem>>, vector<1x1x1x128x128xbf16>
    %146 = vector.shape_cast %145 : vector<1x1x1x128x128xbf16> to vector<128x128xbf16>
    %c4_237 = arith.constant 4 : index
    %c0_238 = arith.constant 0 : index
    %c0_239 = arith.constant 0 : index
    %147 = vector.load %arg2[%c4_237, %c0_238, %c0_239] : memref<7x128x128xbf16, #tpu.memory_space<vmem>>, vector<1x128x128xbf16>
    %148 = vector.shape_cast %147 : vector<1x128x128xbf16> to vector<128x128xbf16>
    %cst_240 = arith.constant dense<0.000000e+00> : vector<128x128xf32>
    %149 = tpu.matmul %146, %148, %cst_240 {dimension_numbers = #tpu.dot_dimension_numbers<[1], [0], [0], [1], [0, 0, 1, 1], [], []>} : vector<128x128xbf16>, vector<128x128xbf16>, vector<128x128xf32> -> vector<128x128xf32>
    %150 = arith.addf %144, %149 : vector<128x128xf32>
    %c0_241 = arith.constant 0 : index
    %c0_242 = arith.constant 0 : index
    %151 = vector.load %arg9[%c0_241, %c0_242] : memref<128x128xf32, #tpu.memory_space<vmem>>, vector<128x128xf32>
    tpu.vector_store %arg9[%c0_241, %c0_242], %150 {strides = array<i32>} : memref<128x128xf32, #tpu.memory_space<vmem>>, vector<128x128xf32>,
    %c0_243 = arith.constant 0 : index
    %c0_244 = arith.constant 0 : index
    %152 = vector.load %arg9[%c0_243, %c0_244] : memref<128x128xf32, #tpu.memory_space<vmem>>, vector<128x128xf32>
    %c0_245 = arith.constant 0 : index
    %c2_246 = arith.constant 2 : index
    %c5_247 = arith.constant 5 : index
    %c0_248 = arith.constant 0 : index
    %c0_249 = arith.constant 0 : index
    %153 = vector.load %arg1[%c0_245, %c2_246, %c5_247, %c0_248, %c0_249] : memref<1x4x7x128x128xbf16, #tpu.memory_space<vmem>>, vector<1x1x1x128x128xbf16>
    %154 = vector.shape_cast %153 : vector<1x1x1x128x128xbf16> to vector<128x128xbf16>
    %c5_250 = arith.constant 5 : index
    %c0_251 = arith.constant 0 : index
    %c0_252 = arith.constant 0 : index
    %155 = vector.load %arg2[%c5_250, %c0_251, %c0_252] : memref<7x128x128xbf16, #tpu.memory_space<vmem>>, vector<1x128x128xbf16>
    %156 = vector.shape_cast %155 : vector<1x128x128xbf16> to vector<128x128xbf16>
    %cst_253 = arith.constant dense<0.000000e+00> : vector<128x128xf32>
    %157 = tpu.matmul %154, %156, %cst_253 {dimension_numbers = #tpu.dot_dimension_numbers<[1], [0], [0], [1], [0, 0, 1, 1], [], []>} : vector<128x128xbf16>, vector<128x128xbf16>, vector<128x128xf32> -> vector<128x128xf32>
    %158 = arith.addf %152, %157 : vector<128x128xf32>
    %c0_254 = arith.constant 0 : index
    %c0_255 = arith.constant 0 : index
    %159 = vector.load %arg9[%c0_254, %c0_255] : memref<128x128xf32, #tpu.memory_space<vmem>>, vector<128x128xf32>
    tpu.vector_store %arg9[%c0_254, %c0_255], %158 {strides = array<i32>} : memref<128x128xf32, #tpu.memory_space<vmem>>, vector<128x128xf32>,
    %c0_256 = arith.constant 0 : index
    %c0_257 = arith.constant 0 : index
    %160 = vector.load %arg9[%c0_256, %c0_257] : memref<128x128xf32, #tpu.memory_space<vmem>>, vector<128x128xf32>
    %c0_258 = arith.constant 0 : index
    %c2_259 = arith.constant 2 : index
    %c6_260 = arith.constant 6 : index
    %c0_261 = arith.constant 0 : index
    %c0_262 = arith.constant 0 : index
    %161 = vector.load %arg1[%c0_258, %c2_259, %c6_260, %c0_261, %c0_262] : memref<1x4x7x128x128xbf16, #tpu.memory_space<vmem>>, vector<1x1x1x128x128xbf16>
    %162 = vector.shape_cast %161 : vector<1x1x1x128x128xbf16> to vector<128x128xbf16>
    %c6_263 = arith.constant 6 : index
    %c0_264 = arith.constant 0 : index
    %c0_265 = arith.constant 0 : index
    %163 = vector.load %arg2[%c6_263, %c0_264, %c0_265] : memref<7x128x128xbf16, #tpu.memory_space<vmem>>, vector<1x128x128xbf16>
    %164 = vector.shape_cast %163 : vector<1x128x128xbf16> to vector<128x128xbf16>
    %cst_266 = arith.constant dense<0.000000e+00> : vector<128x128xf32>
    %165 = tpu.matmul %162, %164, %cst_266 {dimension_numbers = #tpu.dot_dimension_numbers<[1], [0], [0], [1], [0, 0, 1, 1], [], []>} : vector<128x128xbf16>, vector<128x128xbf16>, vector<128x128xf32> -> vector<128x128xf32>
    %166 = arith.addf %160, %165 : vector<128x128xf32>
    %c0_267 = arith.constant 0 : index
    %c0_268 = arith.constant 0 : index
    %167 = vector.load %arg9[%c0_267, %c0_268] : memref<128x128xf32, #tpu.memory_space<vmem>>, vector<128x128xf32>
    tpu.vector_store %arg9[%c0_267, %c0_268], %166 {strides = array<i32>} : memref<128x128xf32, #tpu.memory_space<vmem>>, vector<128x128xf32>,
    %c0_269 = arith.constant 0 : index
    %c0_270 = arith.constant 0 : index
    %168 = vector.load %arg10[%c0_269, %c0_270] : memref<128x128xf32, #tpu.memory_space<vmem>>, vector<128x128xf32>
    %c0_271 = arith.constant 0 : index
    %c0_272 = arith.constant 0 : index
    %169 = vector.load %arg9[%c0_271, %c0_272] : memref<128x128xf32, #tpu.memory_space<vmem>>, vector<128x128xf32>
    %170 = arith.maximumf %168, %169 : vector<128x128xf32>
    %c0_273 = arith.constant 0 : index
    %c0_274 = arith.constant 0 : index
    %171 = vector.load %arg10[%c0_273, %c0_274] : memref<128x128xf32, #tpu.memory_space<vmem>>, vector<128x128xf32>
    tpu.vector_store %arg10[%c0_273, %c0_274], %170 {strides = array<i32>} : memref<128x128xf32, #tpu.memory_space<vmem>>, vector<128x128xf32>,
    %c0_275 = arith.constant 0 : index
    %c3_276 = arith.constant 3 : index
    %c0_277 = arith.constant 0 : index
    %c0_278 = arith.constant 0 : index
    %c0_279 = arith.constant 0 : index
    %172 = vector.load %arg1[%c0_275, %c3_276, %c0_277, %c0_278, %c0_279] : memref<1x4x7x128x128xbf16, #tpu.memory_space<vmem>>, vector<1x1x1x128x128xbf16>
    %173 = vector.shape_cast %172 : vector<1x1x1x128x128xbf16> to vector<128x128xbf16>
    %c0_280 = arith.constant 0 : index
    %c0_281 = arith.constant 0 : index
    %c0_282 = arith.constant 0 : index
    %174 = vector.load %arg2[%c0_280, %c0_281, %c0_282] : memref<7x128x128xbf16, #tpu.memory_space<vmem>>, vector<1x128x128xbf16>
    %175 = vector.shape_cast %174 : vector<1x128x128xbf16> to vector<128x128xbf16>
    %cst_283 = arith.constant dense<0.000000e+00> : vector<128x128xf32>
    %176 = tpu.matmul %173, %175, %cst_283 {dimension_numbers = #tpu.dot_dimension_numbers<[1], [0], [0], [1], [0, 0, 1, 1], [], []>} : vector<128x128xbf16>, vector<128x128xbf16>, vector<128x128xf32> -> vector<128x128xf32>
    %c0_284 = arith.constant 0 : index
    %c0_285 = arith.constant 0 : index
    %177 = vector.load %arg9[%c0_284, %c0_285] : memref<128x128xf32, #tpu.memory_space<vmem>>, vector<128x128xf32>
    tpu.vector_store %arg9[%c0_284, %c0_285], %176 {strides = array<i32>} : memref<128x128xf32, #tpu.memory_space<vmem>>, vector<128x128xf32>,
    %c0_286 = arith.constant 0 : index
    %c0_287 = arith.constant 0 : index
    %178 = vector.load %arg9[%c0_286, %c0_287] : memref<128x128xf32, #tpu.memory_space<vmem>>, vector<128x128xf32>
    %c0_288 = arith.constant 0 : index
    %c3_289 = arith.constant 3 : index
    %c1_290 = arith.constant 1 : index
    %c0_291 = arith.constant 0 : index
    %c0_292 = arith.constant 0 : index
    %179 = vector.load %arg1[%c0_288, %c3_289, %c1_290, %c0_291, %c0_292] : memref<1x4x7x128x128xbf16, #tpu.memory_space<vmem>>, vector<1x1x1x128x128xbf16>
    %180 = vector.shape_cast %179 : vector<1x1x1x128x128xbf16> to vector<128x128xbf16>
    %c1_293 = arith.constant 1 : index
    %c0_294 = arith.constant 0 : index
    %c0_295 = arith.constant 0 : index
    %181 = vector.load %arg2[%c1_293, %c0_294, %c0_295] : memref<7x128x128xbf16, #tpu.memory_space<vmem>>, vector<1x128x128xbf16>
    %182 = vector.shape_cast %181 : vector<1x128x128xbf16> to vector<128x128xbf16>
    %cst_296 = arith.constant dense<0.000000e+00> : vector<128x128xf32>
    %183 = tpu.matmul %180, %182, %cst_296 {dimension_numbers = #tpu.dot_dimension_numbers<[1], [0], [0], [1], [0, 0, 1, 1], [], []>} : vector<128x128xbf16>, vector<128x128xbf16>, vector<128x128xf32> -> vector<128x128xf32>
    %184 = arith.addf %178, %183 : vector<128x128xf32>
    %c0_297 = arith.constant 0 : index
    %c0_298 = arith.constant 0 : index
    %185 = vector.load %arg9[%c0_297, %c0_298] : memref<128x128xf32, #tpu.memory_space<vmem>>, vector<128x128xf32>
    tpu.vector_store %arg9[%c0_297, %c0_298], %184 {strides = array<i32>} : memref<128x128xf32, #tpu.memory_space<vmem>>, vector<128x128xf32>,
    %c0_299 = arith.constant 0 : index
    %c0_300 = arith.constant 0 : index
    %186 = vector.load %arg9[%c0_299, %c0_300] : memref<128x128xf32, #tpu.memory_space<vmem>>, vector<128x128xf32>
    %c0_301 = arith.constant 0 : index
    %c3_302 = arith.constant 3 : index
    %c2_303 = arith.constant 2 : index
    %c0_304 = arith.constant 0 : index
    %c0_305 = arith.constant 0 : index
    %187 = vector.load %arg1[%c0_301, %c3_302, %c2_303, %c0_304, %c0_305] : memref<1x4x7x128x128xbf16, #tpu.memory_space<vmem>>, vector<1x1x1x128x128xbf16>
    %188 = vector.shape_cast %187 : vector<1x1x1x128x128xbf16> to vector<128x128xbf16>
    %c2_306 = arith.constant 2 : index
    %c0_307 = arith.constant 0 : index
    %c0_308 = arith.constant 0 : index
    %189 = vector.load %arg2[%c2_306, %c0_307, %c0_308] : memref<7x128x128xbf16, #tpu.memory_space<vmem>>, vector<1x128x128xbf16>
    %190 = vector.shape_cast %189 : vector<1x128x128xbf16> to vector<128x128xbf16>
    %cst_309 = arith.constant dense<0.000000e+00> : vector<128x128xf32>
    %191 = tpu.matmul %188, %190, %cst_309 {dimension_numbers = #tpu.dot_dimension_numbers<[1], [0], [0], [1], [0, 0, 1, 1], [], []>} : vector<128x128xbf16>, vector<128x128xbf16>, vector<128x128xf32> -> vector<128x128xf32>
    %192 = arith.addf %186, %191 : vector<128x128xf32>
    %c0_310 = arith.constant 0 : index
    %c0_311 = arith.constant 0 : index
    %193 = vector.load %arg9[%c0_310, %c0_311] : memref<128x128xf32, #tpu.memory_space<vmem>>, vector<128x128xf32>
    tpu.vector_store %arg9[%c0_310, %c0_311], %192 {strides = array<i32>} : memref<128x128xf32, #tpu.memory_space<vmem>>, vector<128x128xf32>,
    %c0_312 = arith.constant 0 : index
    %c0_313 = arith.constant 0 : index
    %194 = vector.load %arg9[%c0_312, %c0_313] : memref<128x128xf32, #tpu.memory_space<vmem>>, vector<128x128xf32>
    %c0_314 = arith.constant 0 : index
    %c3_315 = arith.constant 3 : index
    %c3_316 = arith.constant 3 : index
    %c0_317 = arith.constant 0 : index
    %c0_318 = arith.constant 0 : index
    %195 = vector.load %arg1[%c0_314, %c3_315, %c3_316, %c0_317, %c0_318] : memref<1x4x7x128x128xbf16, #tpu.memory_space<vmem>>, vector<1x1x1x128x128xbf16>
    %196 = vector.shape_cast %195 : vector<1x1x1x128x128xbf16> to vector<128x128xbf16>
    %c3_319 = arith.constant 3 : index
    %c0_320 = arith.constant 0 : index
    %c0_321 = arith.constant 0 : index
    %197 = vector.load %arg2[%c3_319, %c0_320, %c0_321] : memref<7x128x128xbf16, #tpu.memory_space<vmem>>, vector<1x128x128xbf16>
    %198 = vector.shape_cast %197 : vector<1x128x128xbf16> to vector<128x128xbf16>
    %cst_322 = arith.constant dense<0.000000e+00> : vector<128x128xf32>
    %199 = tpu.matmul %196, %198, %cst_322 {dimension_numbers = #tpu.dot_dimension_numbers<[1], [0], [0], [1], [0, 0, 1, 1], [], []>} : vector<128x128xbf16>, vector<128x128xbf16>, vector<128x128xf32> -> vector<128x128xf32>
    %200 = arith.addf %194, %199 : vector<128x128xf32>
    %c0_323 = arith.constant 0 : index
    %c0_324 = arith.constant 0 : index
    %201 = vector.load %arg9[%c0_323, %c0_324] : memref<128x128xf32, #tpu.memory_space<vmem>>, vector<128x128xf32>
    tpu.vector_store %arg9[%c0_323, %c0_324], %200 {strides = array<i32>} : memref<128x128xf32, #tpu.memory_space<vmem>>, vector<128x128xf32>,
    %c0_325 = arith.constant 0 : index
    %c0_326 = arith.constant 0 : index
    %202 = vector.load %arg9[%c0_325, %c0_326] : memref<128x128xf32, #tpu.memory_space<vmem>>, vector<128x128xf32>
    %c0_327 = arith.constant 0 : index
    %c3_328 = arith.constant 3 : index
    %c4_329 = arith.constant 4 : index
    %c0_330 = arith.constant 0 : index
    %c0_331 = arith.constant 0 : index
    %203 = vector.load %arg1[%c0_327, %c3_328, %c4_329, %c0_330, %c0_331] : memref<1x4x7x128x128xbf16, #tpu.memory_space<vmem>>, vector<1x1x1x128x128xbf16>
    %204 = vector.shape_cast %203 : vector<1x1x1x128x128xbf16> to vector<128x128xbf16>
    %c4_332 = arith.constant 4 : index
    %c0_333 = arith.constant 0 : index
    %c0_334 = arith.constant 0 : index
    %205 = vector.load %arg2[%c4_332, %c0_333, %c0_334] : memref<7x128x128xbf16, #tpu.memory_space<vmem>>, vector<1x128x128xbf16>
    %206 = vector.shape_cast %205 : vector<1x128x128xbf16> to vector<128x128xbf16>
    %cst_335 = arith.constant dense<0.000000e+00> : vector<128x128xf32>
    %207 = tpu.matmul %204, %206, %cst_335 {dimension_numbers = #tpu.dot_dimension_numbers<[1], [0], [0], [1], [0, 0, 1, 1], [], []>} : vector<128x128xbf16>, vector<128x128xbf16>, vector<128x128xf32> -> vector<128x128xf32>
    %208 = arith.addf %202, %207 : vector<128x128xf32>
    %c0_336 = arith.constant 0 : index
    %c0_337 = arith.constant 0 : index
    %209 = vector.load %arg9[%c0_336, %c0_337] : memref<128x128xf32, #tpu.memory_space<vmem>>, vector<128x128xf32>
    tpu.vector_store %arg9[%c0_336, %c0_337], %208 {strides = array<i32>} : memref<128x128xf32, #tpu.memory_space<vmem>>, vector<128x128xf32>,
    %c0_338 = arith.constant 0 : index
    %c0_339 = arith.constant 0 : index
    %210 = vector.load %arg9[%c0_338, %c0_339] : memref<128x128xf32, #tpu.memory_space<vmem>>, vector<128x128xf32>
    %c0_340 = arith.constant 0 : index
    %c3_341 = arith.constant 3 : index
    %c5_342 = arith.constant 5 : index
    %c0_343 = arith.constant 0 : index
    %c0_344 = arith.constant 0 : index
    %211 = vector.load %arg1[%c0_340, %c3_341, %c5_342, %c0_343, %c0_344] : memref<1x4x7x128x128xbf16, #tpu.memory_space<vmem>>, vector<1x1x1x128x128xbf16>
    %212 = vector.shape_cast %211 : vector<1x1x1x128x128xbf16> to vector<128x128xbf16>
    %c5_345 = arith.constant 5 : index
    %c0_346 = arith.constant 0 : index
    %c0_347 = arith.constant 0 : index
    %213 = vector.load %arg2[%c5_345, %c0_346, %c0_347] : memref<7x128x128xbf16, #tpu.memory_space<vmem>>, vector<1x128x128xbf16>
    %214 = vector.shape_cast %213 : vector<1x128x128xbf16> to vector<128x128xbf16>
    %cst_348 = arith.constant dense<0.000000e+00> : vector<128x128xf32>
    %215 = tpu.matmul %212, %214, %cst_348 {dimension_numbers = #tpu.dot_dimension_numbers<[1], [0], [0], [1], [0, 0, 1, 1], [], []>} : vector<128x128xbf16>, vector<128x128xbf16>, vector<128x128xf32> -> vector<128x128xf32>
    %216 = arith.addf %210, %215 : vector<128x128xf32>
    %c0_349 = arith.constant 0 : index
    %c0_350 = arith.constant 0 : index
    %217 = vector.load %arg9[%c0_349, %c0_350] : memref<128x128xf32, #tpu.memory_space<vmem>>, vector<128x128xf32>
    tpu.vector_store %arg9[%c0_349, %c0_350], %216 {strides = array<i32>} : memref<128x128xf32, #tpu.memory_space<vmem>>, vector<128x128xf32>,
    %c0_351 = arith.constant 0 : index
    %c0_352 = arith.constant 0 : index
    %218 = vector.load %arg9[%c0_351, %c0_352] : memref<128x128xf32, #tpu.memory_space<vmem>>, vector<128x128xf32>
    %c0_353 = arith.constant 0 : index
    %c3_354 = arith.constant 3 : index
    %c6_355 = arith.constant 6 : index
    %c0_356 = arith.constant 0 : index
    %c0_357 = arith.constant 0 : index
    %219 = vector.load %arg1[%c0_353, %c3_354, %c6_355, %c0_356, %c0_357] : memref<1x4x7x128x128xbf16, #tpu.memory_space<vmem>>, vector<1x1x1x128x128xbf16>
    %220 = vector.shape_cast %219 : vector<1x1x1x128x128xbf16> to vector<128x128xbf16>
    %c6_358 = arith.constant 6 : index
    %c0_359 = arith.constant 0 : index
    %c0_360 = arith.constant 0 : index
    %221 = vector.load %arg2[%c6_358, %c0_359, %c0_360] : memref<7x128x128xbf16, #tpu.memory_space<vmem>>, vector<1x128x128xbf16>
    %222 = vector.shape_cast %221 : vector<1x128x128xbf16> to vector<128x128xbf16>
    %cst_361 = arith.constant dense<0.000000e+00> : vector<128x128xf32>
    %223 = tpu.matmul %220, %222, %cst_361 {dimension_numbers = #tpu.dot_dimension_numbers<[1], [0], [0], [1], [0, 0, 1, 1], [], []>} : vector<128x128xbf16>, vector<128x128xbf16>, vector<128x128xf32> -> vector<128x128xf32>
    %224 = arith.addf %218, %223 : vector<128x128xf32>
    %c0_362 = arith.constant 0 : index
    %c0_363 = arith.constant 0 : index
    %225 = vector.load %arg9[%c0_362, %c0_363] : memref<128x128xf32, #tpu.memory_space<vmem>>, vector<128x128xf32>
    tpu.vector_store %arg9[%c0_362, %c0_363], %224 {strides = array<i32>} : memref<128x128xf32, #tpu.memory_space<vmem>>, vector<128x128xf32>,
    %c0_364 = arith.constant 0 : index
    %c0_365 = arith.constant 0 : index
    %226 = vector.load %arg10[%c0_364, %c0_365] : memref<128x128xf32, #tpu.memory_space<vmem>>, vector<128x128xf32>
    %c0_366 = arith.constant 0 : index
    %c0_367 = arith.constant 0 : index
    %227 = vector.load %arg9[%c0_366, %c0_367] : memref<128x128xf32, #tpu.memory_space<vmem>>, vector<128x128xf32>
    %228 = arith.maximumf %226, %227 : vector<128x128xf32>
    %c0_368 = arith.constant 0 : index
    %c0_369 = arith.constant 0 : index
    %229 = vector.load %arg10[%c0_368, %c0_369] : memref<128x128xf32, #tpu.memory_space<vmem>>, vector<128x128xf32>
    tpu.vector_store %arg10[%c0_368, %c0_369], %228 {strides = array<i32>} : memref<128x128xf32, #tpu.memory_space<vmem>>, vector<128x128xf32>,
    %c0_370 = arith.constant 0 : index
    %c0_371 = arith.constant 0 : index
    %230 = vector.load %arg10[%c0_370, %c0_371] : memref<128x128xf32, #tpu.memory_space<vmem>>, vector<128x128xf32>
    %c0_372 = arith.constant 0 : index
    %c0_373 = arith.constant 0 : index
    %231 = vector.load %arg3[%c0_372, %c0_373] : memref<1x128xf32, #tpu.memory_space<vmem>>, vector<1x128xf32>
    %232 = vector.broadcast %231 : vector<1x128xf32> to vector<128x128xf32>
    %233 = arith.addf %230, %232 : vector<128x128xf32>
    %c0_374 = arith.constant 0 : index
    %c0_375 = arith.constant 0 : index
    %234 = vector.load %arg10[%c0_374, %c0_375] : memref<128x128xf32, #tpu.memory_space<vmem>>, vector<128x128xf32>
    tpu.vector_store %arg10[%c0_374, %c0_375], %233 {strides = array<i32>} : memref<128x128xf32, #tpu.memory_space<vmem>>, vector<128x128xf32>,
    %cst_376 = arith.constant 0.000000e+00 : f32
    %235 = vector.broadcast %cst_376 : f32 to vector<8x128xf32>
    %c0_377 = arith.constant 0 : index
    %c0_378 = arith.constant 0 : index
    %236 = vector.load %arg5[%c0_377, %c0_378] : memref<1x128xf32, #tpu.memory_space<vmem>>, vector<1x128xf32>
    %237 = vector.broadcast %236 : vector<1x128xf32> to vector<8x128xf32>
    %238 = arith.addf %235, %237 : vector<8x128xf32>
    %c0_379 = arith.constant 0 : index
    %c0_380 = arith.constant 0 : index
    %239 = vector.load %arg10[%c0_379, %c0_380] : memref<128x128xf32, #tpu.memory_space<vmem>>, vector<8x128xf32>
    %c0_381 = arith.constant 0 : index
    %c0_382 = arith.constant 0 : index
    %c0_383 = arith.constant 0 : index
    %240 = vector.load %arg4[%c0_381, %c0_382, %c0_383] : memref<16x128x128xf32, #tpu.memory_space<vmem>>, vector<1x128x128xf32>
    %241 = vector.shape_cast %240 : vector<1x128x128xf32> to vector<128x128xf32>
    %cst_384 = arith.constant dense<0.000000e+00> : vector<8x128xf32>
    %242 = tpu.matmul %239, %241, %cst_384 {dimension_numbers = #tpu.dot_dimension_numbers<[1], [0], [0], [1], [0, 0, 1, 1], [], []>} : vector<8x128xf32>, vector<128x128xf32>, vector<8x128xf32> -> vector<8x128xf32>
    %243 = arith.addf %238, %242 : vector<8x128xf32>
    %c8 = arith.constant 8 : index
    %c0_385 = arith.constant 0 : index
    %244 = vector.load %arg10[%c8, %c0_385] : memref<128x128xf32, #tpu.memory_space<vmem>>, vector<8x128xf32>
    %c1_386 = arith.constant 1 : index
    %c0_387 = arith.constant 0 : index
    %c0_388 = arith.constant 0 : index
    %245 = vector.load %arg4[%c1_386, %c0_387, %c0_388] : memref<16x128x128xf32, #tpu.memory_space<vmem>>, vector<1x128x128xf32>
    %246 = vector.shape_cast %245 : vector<1x128x128xf32> to vector<128x128xf32>
    %cst_389 = arith.constant dense<0.000000e+00> : vector<8x128xf32>
    %247 = tpu.matmul %244, %246, %cst_389 {dimension_numbers = #tpu.dot_dimension_numbers<[1], [0], [0], [1], [0, 0, 1, 1], [], []>} : vector<8x128xf32>, vector<128x128xf32>, vector<8x128xf32> -> vector<8x128xf32>
    %248 = arith.addf %243, %247 : vector<8x128xf32>
    %c16 = arith.constant 16 : index
    %c0_390 = arith.constant 0 : index
    %249 = vector.load %arg10[%c16, %c0_390] : memref<128x128xf32, #tpu.memory_space<vmem>>, vector<8x128xf32>
    %c2_391 = arith.constant 2 : index
    %c0_392 = arith.constant 0 : index
    %c0_393 = arith.constant 0 : index
    %250 = vector.load %arg4[%c2_391, %c0_392, %c0_393] : memref<16x128x128xf32, #tpu.memory_space<vmem>>, vector<1x128x128xf32>
    %251 = vector.shape_cast %250 : vector<1x128x128xf32> to vector<128x128xf32>
    %cst_394 = arith.constant dense<0.000000e+00> : vector<8x128xf32>
    %252 = tpu.matmul %249, %251, %cst_394 {dimension_numbers = #tpu.dot_dimension_numbers<[1], [0], [0], [1], [0, 0, 1, 1], [], []>} : vector<8x128xf32>, vector<128x128xf32>, vector<8x128xf32> -> vector<8x128xf32>
    %253 = arith.addf %248, %252 : vector<8x128xf32>
    %c24 = arith.constant 24 : index
    %c0_395 = arith.constant 0 : index
    %254 = vector.load %arg10[%c24, %c0_395] : memref<128x128xf32, #tpu.memory_space<vmem>>, vector<8x128xf32>
    %c3_396 = arith.constant 3 : index
    %c0_397 = arith.constant 0 : index
    %c0_398 = arith.constant 0 : index
    %255 = vector.load %arg4[%c3_396, %c0_397, %c0_398] : memref<16x128x128xf32, #tpu.memory_space<vmem>>, vector<1x128x128xf32>
    %256 = vector.shape_cast %255 : vector<1x128x128xf32> to vector<128x128xf32>
    %cst_399 = arith.constant dense<0.000000e+00> : vector<8x128xf32>
    %257 = tpu.matmul %254, %256, %cst_399 {dimension_numbers = #tpu.dot_dimension_numbers<[1], [0], [0], [1], [0, 0, 1, 1], [], []>} : vector<8x128xf32>, vector<128x128xf32>, vector<8x128xf32> -> vector<8x128xf32>
    %258 = arith.addf %253, %257 : vector<8x128xf32>
    %c32 = arith.constant 32 : index
    %c0_400 = arith.constant 0 : index
    %259 = vector.load %arg10[%c32, %c0_400] : memref<128x128xf32, #tpu.memory_space<vmem>>, vector<8x128xf32>
    %c4_401 = arith.constant 4 : index
    %c0_402 = arith.constant 0 : index
    %c0_403 = arith.constant 0 : index
    %260 = vector.load %arg4[%c4_401, %c0_402, %c0_403] : memref<16x128x128xf32, #tpu.memory_space<vmem>>, vector<1x128x128xf32>
    %261 = vector.shape_cast %260 : vector<1x128x128xf32> to vector<128x128xf32>
    %cst_404 = arith.constant dense<0.000000e+00> : vector<8x128xf32>
    %262 = tpu.matmul %259, %261, %cst_404 {dimension_numbers = #tpu.dot_dimension_numbers<[1], [0], [0], [1], [0, 0, 1, 1], [], []>} : vector<8x128xf32>, vector<128x128xf32>, vector<8x128xf32> -> vector<8x128xf32>
    %263 = arith.addf %258, %262 : vector<8x128xf32>
    %c40 = arith.constant 40 : index
    %c0_405 = arith.constant 0 : index
    %264 = vector.load %arg10[%c40, %c0_405] : memref<128x128xf32, #tpu.memory_space<vmem>>, vector<8x128xf32>
    %c5_406 = arith.constant 5 : index
    %c0_407 = arith.constant 0 : index
    %c0_408 = arith.constant 0 : index
    %265 = vector.load %arg4[%c5_406, %c0_407, %c0_408] : memref<16x128x128xf32, #tpu.memory_space<vmem>>, vector<1x128x128xf32>
    %266 = vector.shape_cast %265 : vector<1x128x128xf32> to vector<128x128xf32>
    %cst_409 = arith.constant dense<0.000000e+00> : vector<8x128xf32>
    %267 = tpu.matmul %264, %266, %cst_409 {dimension_numbers = #tpu.dot_dimension_numbers<[1], [0], [0], [1], [0, 0, 1, 1], [], []>} : vector<8x128xf32>, vector<128x128xf32>, vector<8x128xf32> -> vector<8x128xf32>
    %268 = arith.addf %263, %267 : vector<8x128xf32>
    %c48 = arith.constant 48 : index
    %c0_410 = arith.constant 0 : index
    %269 = vector.load %arg10[%c48, %c0_410] : memref<128x128xf32, #tpu.memory_space<vmem>>, vector<8x128xf32>
    %c6_411 = arith.constant 6 : index
    %c0_412 = arith.constant 0 : index
    %c0_413 = arith.constant 0 : index
    %270 = vector.load %arg4[%c6_411, %c0_412, %c0_413] : memref<16x128x128xf32, #tpu.memory_space<vmem>>, vector<1x128x128xf32>
    %271 = vector.shape_cast %270 : vector<1x128x128xf32> to vector<128x128xf32>
    %cst_414 = arith.constant dense<0.000000e+00> : vector<8x128xf32>
    %272 = tpu.matmul %269, %271, %cst_414 {dimension_numbers = #tpu.dot_dimension_numbers<[1], [0], [0], [1], [0, 0, 1, 1], [], []>} : vector<8x128xf32>, vector<128x128xf32>, vector<8x128xf32> -> vector<8x128xf32>
    %273 = arith.addf %268, %272 : vector<8x128xf32>
    %c56 = arith.constant 56 : index
    %c0_415 = arith.constant 0 : index
    %274 = vector.load %arg10[%c56, %c0_415] : memref<128x128xf32, #tpu.memory_space<vmem>>, vector<8x128xf32>
    %c7 = arith.constant 7 : index
    %c0_416 = arith.constant 0 : index
    %c0_417 = arith.constant 0 : index
    %275 = vector.load %arg4[%c7, %c0_416, %c0_417] : memref<16x128x128xf32, #tpu.memory_space<vmem>>, vector<1x128x128xf32>
    %276 = vector.shape_cast %275 : vector<1x128x128xf32> to vector<128x128xf32>
    %cst_418 = arith.constant dense<0.000000e+00> : vector<8x128xf32>
    %277 = tpu.matmul %274, %276, %cst_418 {dimension_numbers = #tpu.dot_dimension_numbers<[1], [0], [0], [1], [0, 0, 1, 1], [], []>} : vector<8x128xf32>, vector<128x128xf32>, vector<8x128xf32> -> vector<8x128xf32>
    %278 = arith.addf %273, %277 : vector<8x128xf32>
    %c64 = arith.constant 64 : index
    %c0_419 = arith.constant 0 : index
    %279 = vector.load %arg10[%c64, %c0_419] : memref<128x128xf32, #tpu.memory_space<vmem>>, vector<8x128xf32>
    %c8_420 = arith.constant 8 : index
    %c0_421 = arith.constant 0 : index
    %c0_422 = arith.constant 0 : index
    %280 = vector.load %arg4[%c8_420, %c0_421, %c0_422] : memref<16x128x128xf32, #tpu.memory_space<vmem>>, vector<1x128x128xf32>
    %281 = vector.shape_cast %280 : vector<1x128x128xf32> to vector<128x128xf32>
    %cst_423 = arith.constant dense<0.000000e+00> : vector<8x128xf32>
    %282 = tpu.matmul %279, %281, %cst_423 {dimension_numbers = #tpu.dot_dimension_numbers<[1], [0], [0], [1], [0, 0, 1, 1], [], []>} : vector<8x128xf32>, vector<128x128xf32>, vector<8x128xf32> -> vector<8x128xf32>
    %283 = arith.addf %278, %282 : vector<8x128xf32>
    %c72 = arith.constant 72 : index
    %c0_424 = arith.constant 0 : index
    %284 = vector.load %arg10[%c72, %c0_424] : memref<128x128xf32, #tpu.memory_space<vmem>>, vector<8x128xf32>
    %c9 = arith.constant 9 : index
    %c0_425 = arith.constant 0 : index
    %c0_426 = arith.constant 0 : index
    %285 = vector.load %arg4[%c9, %c0_425, %c0_426] : memref<16x128x128xf32, #tpu.memory_space<vmem>>, vector<1x128x128xf32>
    %286 = vector.shape_cast %285 : vector<1x128x128xf32> to vector<128x128xf32>
    %cst_427 = arith.constant dense<0.000000e+00> : vector<8x128xf32>
    %287 = tpu.matmul %284, %286, %cst_427 {dimension_numbers = #tpu.dot_dimension_numbers<[1], [0], [0], [1], [0, 0, 1, 1], [], []>} : vector<8x128xf32>, vector<128x128xf32>, vector<8x128xf32> -> vector<8x128xf32>
    %288 = arith.addf %283, %287 : vector<8x128xf32>
    %c80 = arith.constant 80 : index
    %c0_428 = arith.constant 0 : index
    %289 = vector.load %arg10[%c80, %c0_428] : memref<128x128xf32, #tpu.memory_space<vmem>>, vector<8x128xf32>
    %c10 = arith.constant 10 : index
    %c0_429 = arith.constant 0 : index
    %c0_430 = arith.constant 0 : index
    %290 = vector.load %arg4[%c10, %c0_429, %c0_430] : memref<16x128x128xf32, #tpu.memory_space<vmem>>, vector<1x128x128xf32>
    %291 = vector.shape_cast %290 : vector<1x128x128xf32> to vector<128x128xf32>
    %cst_431 = arith.constant dense<0.000000e+00> : vector<8x128xf32>
    %292 = tpu.matmul %289, %291, %cst_431 {dimension_numbers = #tpu.dot_dimension_numbers<[1], [0], [0], [1], [0, 0, 1, 1], [], []>} : vector<8x128xf32>, vector<128x128xf32>, vector<8x128xf32> -> vector<8x128xf32>
    %293 = arith.addf %288, %292 : vector<8x128xf32>
    %c88 = arith.constant 88 : index
    %c0_432 = arith.constant 0 : index
    %294 = vector.load %arg10[%c88, %c0_432] : memref<128x128xf32, #tpu.memory_space<vmem>>, vector<8x128xf32>
    %c11 = arith.constant 11 : index
    %c0_433 = arith.constant 0 : index
    %c0_434 = arith.constant 0 : index
    %295 = vector.load %arg4[%c11, %c0_433, %c0_434] : memref<16x128x128xf32, #tpu.memory_space<vmem>>, vector<1x128x128xf32>
    %296 = vector.shape_cast %295 : vector<1x128x128xf32> to vector<128x128xf32>
    %cst_435 = arith.constant dense<0.000000e+00> : vector<8x128xf32>
    %297 = tpu.matmul %294, %296, %cst_435 {dimension_numbers = #tpu.dot_dimension_numbers<[1], [0], [0], [1], [0, 0, 1, 1], [], []>} : vector<8x128xf32>, vector<128x128xf32>, vector<8x128xf32> -> vector<8x128xf32>
    %298 = arith.addf %293, %297 : vector<8x128xf32>
    %c96 = arith.constant 96 : index
    %c0_436 = arith.constant 0 : index
    %299 = vector.load %arg10[%c96, %c0_436] : memref<128x128xf32, #tpu.memory_space<vmem>>, vector<8x128xf32>
    %c12 = arith.constant 12 : index
    %c0_437 = arith.constant 0 : index
    %c0_438 = arith.constant 0 : index
    %300 = vector.load %arg4[%c12, %c0_437, %c0_438] : memref<16x128x128xf32, #tpu.memory_space<vmem>>, vector<1x128x128xf32>
    %301 = vector.shape_cast %300 : vector<1x128x128xf32> to vector<128x128xf32>
    %cst_439 = arith.constant dense<0.000000e+00> : vector<8x128xf32>
    %302 = tpu.matmul %299, %301, %cst_439 {dimension_numbers = #tpu.dot_dimension_numbers<[1], [0], [0], [1], [0, 0, 1, 1], [], []>} : vector<8x128xf32>, vector<128x128xf32>, vector<8x128xf32> -> vector<8x128xf32>
    %303 = arith.addf %298, %302 : vector<8x128xf32>
    %c104 = arith.constant 104 : index
    %c0_440 = arith.constant 0 : index
    %304 = vector.load %arg10[%c104, %c0_440] : memref<128x128xf32, #tpu.memory_space<vmem>>, vector<8x128xf32>
    %c13 = arith.constant 13 : index
    %c0_441 = arith.constant 0 : index
    %c0_442 = arith.constant 0 : index
    %305 = vector.load %arg4[%c13, %c0_441, %c0_442] : memref<16x128x128xf32, #tpu.memory_space<vmem>>, vector<1x128x128xf32>
    %306 = vector.shape_cast %305 : vector<1x128x128xf32> to vector<128x128xf32>
    %cst_443 = arith.constant dense<0.000000e+00> : vector<8x128xf32>
    %307 = tpu.matmul %304, %306, %cst_443 {dimension_numbers = #tpu.dot_dimension_numbers<[1], [0], [0], [1], [0, 0, 1, 1], [], []>} : vector<8x128xf32>, vector<128x128xf32>, vector<8x128xf32> -> vector<8x128xf32>
    %308 = arith.addf %303, %307 : vector<8x128xf32>
    %c112 = arith.constant 112 : index
    %c0_444 = arith.constant 0 : index
    %309 = vector.load %arg10[%c112, %c0_444] : memref<128x128xf32, #tpu.memory_space<vmem>>, vector<8x128xf32>
    %c14 = arith.constant 14 : index
    %c0_445 = arith.constant 0 : index
    %c0_446 = arith.constant 0 : index
    %310 = vector.load %arg4[%c14, %c0_445, %c0_446] : memref<16x128x128xf32, #tpu.memory_space<vmem>>, vector<1x128x128xf32>
    %311 = vector.shape_cast %310 : vector<1x128x128xf32> to vector<128x128xf32>
    %cst_447 = arith.constant dense<0.000000e+00> : vector<8x128xf32>
    %312 = tpu.matmul %309, %311, %cst_447 {dimension_numbers = #tpu.dot_dimension_numbers<[1], [0], [0], [1], [0, 0, 1, 1], [], []>} : vector<8x128xf32>, vector<128x128xf32>, vector<8x128xf32> -> vector<8x128xf32>
    %313 = arith.addf %308, %312 : vector<8x128xf32>
    %c120 = arith.constant 120 : index
    %c0_448 = arith.constant 0 : index
    %314 = vector.load %arg10[%c120, %c0_448] : memref<128x128xf32, #tpu.memory_space<vmem>>, vector<8x128xf32>
    %c15 = arith.constant 15 : index
    %c0_449 = arith.constant 0 : index
    %c0_450 = arith.constant 0 : index
    %315 = vector.load %arg4[%c15, %c0_449, %c0_450] : memref<16x128x128xf32, #tpu.memory_space<vmem>>, vector<1x128x128xf32>
    %316 = vector.shape_cast %315 : vector<1x128x128xf32> to vector<128x128xf32>
    %cst_451 = arith.constant dense<0.000000e+00> : vector<8x128xf32>
    %317 = tpu.matmul %314, %316, %cst_451 {dimension_numbers = #tpu.dot_dimension_numbers<[1], [0], [0], [1], [0, 0, 1, 1], [], []>} : vector<8x128xf32>, vector<128x128xf32>, vector<8x128xf32> -> vector<8x128xf32>
    %318 = arith.addf %313, %317 : vector<8x128xf32>
    %c0_452 = arith.constant 0 : index
    %c0_453 = arith.constant 0 : index
    %319 = vector.load %arg6[%c0_452, %c0_453] : memref<128x128xf32, #tpu.memory_space<vmem>>, vector<128x128xf32>
    %cst_454 = arith.constant dense<0.000000e+00> : vector<8x128xf32>
    %320 = tpu.matmul %318, %319, %cst_454 {dimension_numbers = #tpu.dot_dimension_numbers<[1], [0], [0], [1], [0, 0, 1, 1], [], []>} : vector<8x128xf32>, vector<128x128xf32>, vector<8x128xf32> -> vector<8x128xf32>
    %c0_455 = arith.constant 0 : index
    %c0_456 = arith.constant 0 : index
    %321 = vector.load %arg7[%c0_455, %c0_456] : memref<1x128xf32, #tpu.memory_space<vmem>>, vector<1x128xf32>
    %322 = vector.broadcast %321 : vector<1x128xf32> to vector<8x128xf32>
    %323 = arith.addf %320, %322 : vector<8x128xf32>
    %c0_457 = arith.constant 0 : index
    %c0_458 = arith.constant 0 : index
    %c0_459 = arith.constant 0 : index
    %324 = vector.load %arg8[%c0_457, %c0_458, %c0_459] : memref<1x8x128xf32, #tpu.memory_space<vmem>>, vector<1x8x128xf32>
    %325 = vector.shape_cast %324 : vector<1x8x128xf32> to vector<8x128xf32>
    %326 = vector.shape_cast %323 : vector<8x128xf32> to vector<1x8x128xf32>
    tpu.vector_store %arg8[%c0_457, %c0_458, %c0_459], %326 {strides = array<i32>} : memref<1x8x128xf32, #tpu.memory_space<vmem>>, vector<1x8x128xf32>,
    return
  }
  func.func @transform_0(%arg0: i32) -> (i32, i32, i32, i32, i32) {
    %c0_i32 = arith.constant 0 : i32
    %c0_i32_0 = arith.constant 0 : i32
    %c0_i32_1 = arith.constant 0 : i32
    %c0_i32_2 = arith.constant 0 : i32
    %c0_i32_3 = arith.constant 0 : i32
    return %arg0, %c0_i32, %c0_i32_0, %c0_i32_1, %c0_i32_2 : i32, i32, i32, i32, i32
  }
  func.func @transform_1(%arg0: i32) -> (i32, i32, i32) {
    %c0_i32 = arith.constant 0 : i32
    %c0_i32_0 = arith.constant 0 : i32
    %c0_i32_1 = arith.constant 0 : i32
    %c0_i32_2 = arith.constant 0 : i32
    return %c0_i32, %c0_i32_0, %c0_i32_1 : i32, i32, i32
  }
  func.func @transform_2(%arg0: i32) -> (i32, i32) {
    %c0_i32 = arith.constant 0 : i32
    %c0_i32_0 = arith.constant 0 : i32
    %c0_i32_1 = arith.constant 0 : i32
    return %c0_i32, %c0_i32_0 : i32, i32
  }
  func.func @transform_3(%arg0: i32) -> (i32, i32, i32) {
    %c0_i32 = arith.constant 0 : i32
    %c0_i32_0 = arith.constant 0 : i32
    %c0_i32_1 = arith.constant 0 : i32
    %c0_i32_2 = arith.constant 0 : i32
    return %c0_i32, %c0_i32_0, %c0_i32_1 : i32, i32, i32
  }
  func.func @transform_4(%arg0: i32) -> (i32, i32) {
    %c0_i32 = arith.constant 0 : i32
    %c0_i32_0 = arith.constant 0 : i32
    %c0_i32_1 = arith.constant 0 : i32
    return %c0_i32, %c0_i32_0 : i32, i32
  }
  func.func @transform_5(%arg0: i32) -> (i32, i32) {
    %c0_i32 = arith.constant 0 : i32
    %c0_i32_0 = arith.constant 0 : i32
    %c0_i32_1 = arith.constant 0 : i32
    return %c0_i32, %c0_i32_0 : i32, i32
  }
  func.func @transform_6(%arg0: i32) -> (i32, i32) {
    %c0_i32 = arith.constant 0 : i32
    %c0_i32_0 = arith.constant 0 : i32
    %c0_i32_1 = arith.constant 0 : i32
    return %c0_i32, %c0_i32_0 : i32, i32
  }
  func.func @transform_7(%arg0: i32) -> (i32, i32, i32) {
    %c0_i32 = arith.constant 0 : i32
    %c0_i32_0 = arith.constant 0 : i32
    %c0_i32_1 = arith.constant 0 : i32
    return %arg0, %c0_i32, %c0_i32_0 : i32, i32, i32
  }
}

</mosaic_0001>

<bundles_post_ra>
// kernel: nn_forward.3
= control target key start
LH: loop header
LB: loop body
LE: loop exit
PB: predicated region body
PF: predicated region fallthrough
CT: control target
= control target key end

     0   :  { %s3234_s12 = smov 0   ;;  %s3712_s0 = inlined_call_operand.vmem [shape: bf16[2,4,1,256,128], index: 0, kind: input, shape index: {}]   ;;  %s3713_s1 = inlined_call_operand.vmem [shape: bf16[1,128,128], index: 1, kind: input, shape index: {}]   ;;  %s3714_s2 = inlined_call_operand.vmem [shape: f32[1,128], index: 2, kind: input, shape index: {}]   ;;  %s3715_s3 = inlined_call_operand.vmem [shape: bf16[2,256,128], index: 3, kind: output, shape index: {}]  }
   0x1 LB: > { %s2449_s13 = sadd.s32 4294967295, %s3212_s12   ;;  %p2453_p0 = scmp.ge.s32.totalorder %s3212_s12, 1  ;;  %s3212_s12 = sphi %s3234_s12, %s13_s12  }
   0x2   : > { %p137_p1 = scmp.lt.s32.totalorder %s3212_s12, 3 }
   0x4   : > { %p138_p2 = pnand %p2453_p0, %p137_p1 }
   0x6   : > { %141 = sbr.rel (%p138_p2) target bundleno = 372 (0x174), region = 32 }
   0xb   : > { %v3110_v0 = vld [vmem:[%s3713_s1 + $0x38] sm:$0xff]   ;;  %v3112_v2 = vld [vmem:[%s3713_s1 + $0x30] sm:$0xff]   ;;  %p161_p3 = scmp.lt.s32.totalorder %s2449_s13, 1  ;;  %v3114_v4 = vld [vmem:[%s3713_s1 + $0x28] sm:$0xff]  }
   0xc   : > { %v3111_v1 = vld [vmem:[%s3713_s1 + $0x38] sm:$0xff]   ;;  %2910 = vmatprep.subr.bf16.mxu0 %v3110_v0  ;;  %v3113_v3 = vld [vmem:[%s3713_s1 + $0x30] sm:$0xff]   ;;  %v3115_v5 = vld [vmem:[%s3713_s1 + $0x28] sm:$0xff]  }
   0xd   : > { %2958 = vmatprep.subr.bf16.mxu1 %v3111_v1  ;;  %2911 = vmatpush3.bf16.msra.mxu0 %v3110_v0  ;;  %s3767_s13 = smov (!%p161_p3, %s2449_s13), 1  ;;  %v3116_v6 = vld [vmem:[%s3713_s1 + $0x20] sm:$0xff]   ;;  %v3118_v8 = vld [vmem:[%s3713_s1 + $0x18] sm:$0xff]   ;;  %v3120_v10 = vld [vmem:[%s3713_s1 + $0x10] sm:$0xff]  }
   0xe   : > { %2959 = vmatpush3.bf16.msra.mxu1 %v3111_v1  ;;  %2912 = vmatprep.subr.bf16.mxu0 %v3112_v2  ;;  %v3117_v7 = vld [vmem:[%s3713_s1 + $0x20] sm:$0xff]   ;;  %s2685_s30 = sshll.u32 %s3767_s13, 9  ;;  %v3119_v9 = vld [vmem:[%s3713_s1 + $0x18] sm:$0xff]   ;;  %v3121_v11 = vld [vmem:[%s3713_s1 + $0x10] sm:$0xff]   ;;  %s2686_s7 = sshll.u32 %s3767_s13, 7 }
   0xf   : > { %2960 = vmatprep.subr.bf16.mxu1 %v3113_v3  ;;  %s3278_s10 = scalar_lea.vmem %s3712_s0, %s2685_s30  ;;  %v3122_v14 = vld [vmem:[%s3713_s1 + $0x8] sm:$0xff]   ;;  %v3124_v16 = vld [vmem:[%s3713_s1] sm:$0xff]   ;;  %v3130_v19 = vld [vmem:[%s3713_s1 + $0x38] sm:$0xff]   ;;  %s3596_s13 = scalar_lea.vmem %s3715_s3, %s2686_s7 }
  0x10   : > { %v3126_v12 = vld [vmem:[%s3278_s10] sm:$0xff]   ;;  %v3123_v15 = vld [vmem:[%s3713_s1 + $0x8] sm:$0xff]   ;;  %v3131_v20 = vld [vmem:[%s3713_s1 + $0x38] sm:$0xff]  }
  0x11   : > { %2913 = vmatpush3.bf16.msra.mxu0 %v3112_v2  ;;  %v3127_v13 = vld [vmem:[%s3278_s10 + $0x80] sm:$0xff]   ;;  %2926 = vmatprep.mubr.bf16.mxu0 %v3126_v12  ;;  %v3128_v18 = vld [vmem:[%s3278_s10 + $0x8] sm:$0xff]   ;;  %v3132_v22 = vld [vmem:[%s3278_s10 + $0x10] sm:$0xff]  }
  0x12   : > { %2961 = vmatpush3.bf16.msra.mxu1 %v3113_v3  ;;  %2914 = vmatprep.subr.bf16.mxu0 %v3114_v4  ;;  %v3125_v17 = vld [vmem:[%s3713_s1] sm:$0xff]   ;;  %v3129_v21 = vld [vmem:[%s3278_s10 + $0x88] sm:$0xff]   ;;  %v3133_v23 = vld [vmem:[%s3278_s10 + $0x90] sm:$0xff]  }
  0x13   : > { %2962 = vmatprep.subr.bf16.mxu1 %v3115_v5  ;;  %2974 = vmatprep.mubr.bf16.mxu1 %v3127_v13  ;;  %v3136_v24 = vld [vmem:[%s3713_s1 + $0x30] sm:$0xff]   ;;  %v3134_v26 = vld [vmem:[%s3278_s10 + $0x18] sm:$0xff]   ;;  %v3142_v27 = vld [vmem:[%s3713_s1 + $0x28] sm:$0xff]  }
  0x14   : > { %v3137_v25 = vld [vmem:[%s3713_s1 + $0x30] sm:$0xff]   ;;  %v3143_v28 = vld [vmem:[%s3713_s1 + $0x28] sm:$0xff]   ;;  %v3135_v29 = vld [vmem:[%s3278_s10 + $0x98] sm:$0xff]  }
  0x15   : > { %2915 = vmatpush3.bf16.msra.mxu0 %v3114_v4  ;;  %v3138_v30 = vld [vmem:[%s3278_s10 + $0x20] sm:$0xff]   ;;  %v3140_v34 = vld [vmem:[%s3278_s10 + $0x28] sm:$0xff]   ;;  %v3154_v36 = vld [vmem:[%s3713_s1 + $0x18] sm:$0xff]  }
  0x16   : > { %2963 = vmatpush3.bf16.msra.mxu1 %v3115_v5  ;;  %2916 = vmatprep.subr.bf16.mxu0 %v3116_v6  ;;  %v3139_v31 = vld [vmem:[%s3278_s10 + $0xa0] sm:$0xff]   ;;  %v3141_v35 = vld [vmem:[%s3278_s10 + $0xa8] sm:$0xff]   ;;  %v3155_v37 = vld [vmem:[%s3713_s1 + $0x18] sm:$0xff]  }
  0x17   : > { %2964 = vmatprep.subr.bf16.mxu1 %v3117_v7  ;;  %v3148_v32 = vld [vmem:[%s3713_s1 + $0x20] sm:$0xff]   ;;  %v3144_v38 = vld [vmem:[%s3278_s10 + $0x30] sm:$0xff]   ;;  %v3146_v42 = vld [vmem:[%s3278_s10 + $0x38] sm:$0xff]  }
  0x18   : > { %v3149_v33 = vld [vmem:[%s3713_s1 + $0x20] sm:$0xff]   ;;  %v3145_v39 = vld [vmem:[%s3278_s10 + $0xb0] sm:$0xff]   ;;  %v3147_v43 = vld [vmem:[%s3278_s10 + $0xb8] sm:$0xff]  }
  0x19   : > { %2917 = vmatpush3.bf16.msra.mxu0 %v3116_v6  ;;  %v3160_v40 = vld [vmem:[%s3713_s1 + $0x10] sm:$0xff]   ;;  %v3150_v44 = vld [vmem:[%s3278_s10 + $0x40] sm:$0xff]   ;;  %v3166_v46 = vld [vmem:[%s3713_s1 + $0x8] sm:$0xff]  }
  0x1a   : > { %2965 = vmatpush3.bf16.msra.mxu1 %v3117_v7  ;;  %2918 = vmatprep.subr.bf16.mxu0 %v3118_v8  ;;  %v3161_v41 = vld [vmem:[%s3713_s1 + $0x10] sm:$0xff]   ;;  %v3151_v45 = vld [vmem:[%s3278_s10 + $0xc0] sm:$0xff]   ;;  %v3167_v47 = vld [vmem:[%s3713_s1 + $0x8] sm:$0xff]  }
  0x1b   : > { %2966 = vmatprep.subr.bf16.mxu1 %v3119_v9  ;;  %v3152_v48 = vld [vmem:[%s3278_s10 + $0x48] sm:$0xff]   ;;  %v3156_v50 = vld [vmem:[%s3278_s10 + $0x50] sm:$0xff]   ;;  %v3172_v51 = vld [vmem:[%s3713_s1] sm:$0xff]  }
  0x1c   : > { %v3153_v49 = vld [vmem:[%s3278_s10 + $0xc8] sm:$0xff]   ;;  %v3173_v52 = vld [vmem:[%s3713_s1] sm:$0xff]   ;;  %v3157_v53 = vld [vmem:[%s3278_s10 + $0xd0] sm:$0xff]  }
  0x1d   : > { %2919 = vmatpush3.bf16.msra.mxu0 %v3118_v8  ;;  %v3158_v54 = vld [vmem:[%s3278_s10 + $0x58] sm:$0xff]   ;;  %v3162_v56 = vld [vmem:[%s3278_s10 + $0x60] sm:$0xff]   ;;  %v3164_v58 = vld [vmem:[%s3278_s10 + $0x68] sm:$0xff]  }
  0x1e   : > { %2967 = vmatpush3.bf16.msra.mxu1 %v3119_v9  ;;  %2920 = vmatprep.subr.bf16.mxu0 %v3120_v10  ;;  %v3159_v55 = vld [vmem:[%s3278_s10 + $0xd8] sm:$0xff]   ;;  %v3163_v57 = vld [vmem:[%s3278_s10 + $0xe0] sm:$0xff]   ;;  %v3165_v59 = vld [vmem:[%s3278_s10 + $0xe8] sm:$0xff]  }
  0x1f   : > { %2968 = vmatprep.subr.bf16.mxu1 %v3121_v11  ;;  %v3168_v60 = vld [vmem:[%s3278_s10 + $0x70] sm:$0xff]   ;;  %v3170_v62 = vld [vmem:[%s3278_s10 + $0x78] sm:$0xff]   ;;  %v3174_v0 = vld [vmem:[%s3278_s10 + $0x100] sm:$0xff]  }
  0x20   : > { %v3169_v61 = vld [vmem:[%s3278_s10 + $0xf0] sm:$0xff]   ;;  %v3171_v63 = vld [vmem:[%s3278_s10 + $0xf8] sm:$0xff]   ;;  %v3175_v1 = vld [vmem:[%s3278_s10 + $0x180] sm:$0xff]  }
  0x21   : > { %2921 = vmatpush3.bf16.msra.mxu0 %v3120_v10  ;;  %v3176_v2 = vld [vmem:[%s3278_s10 + $0x108] sm:$0xff]   ;;  %v3178_v4 = vld [vmem:[%s3278_s10 + $0x110] sm:$0xff]   ;;  %v3180_v6 = vld [vmem:[%s3278_s10 + $0x118] sm:$0xff]  }
  0x22   : > { %2969 = vmatpush3.bf16.msra.mxu1 %v3121_v11  ;;  %2922 = vmatprep.subr.bf16.mxu0 %v3122_v14  ;;  %v3177_v3 = vld [vmem:[%s3278_s10 + $0x188] sm:$0xff]   ;;  %v3179_v5 = vld [vmem:[%s3278_s10 + $0x190] sm:$0xff]   ;;  %v3181_v7 = vld [vmem:[%s3278_s10 + $0x198] sm:$0xff]  }
  0x23   : > { %2970 = vmatprep.subr.bf16.mxu1 %v3123_v15  ;;  %v3182_v8 = vld [vmem:[%s3278_s10 + $0x120] sm:$0xff]   ;;  %v3184_v10 = vld [vmem:[%s3278_s10 + $0x128] sm:$0xff]   ;;  %v3186_v12 = vld [vmem:[%s3278_s10 + $0x130] sm:$0xff]  }
  0x24   : > { %v3183_v9 = vld [vmem:[%s3278_s10 + $0x1a0] sm:$0xff]   ;;  %v3185_v11 = vld [vmem:[%s3278_s10 + $0x1a8] sm:$0xff]   ;;  %v3187_v13 = vld [vmem:[%s3278_s10 + $0x1b0] sm:$0xff]  }
  0x25   : > { %2923 = vmatpush3.bf16.msra.mxu0 %v3122_v14  ;;  %v3188_v14 = vld [vmem:[%s3278_s10 + $0x138] sm:$0xff]  }
  0x26   : > { %2971 = vmatpush3.bf16.msra.mxu1 %v3123_v15  ;;  %2924 = vmatprep.subr.bf16.mxu0 %v3124_v16  ;;  %v3189_v15 = vld [vmem:[%s3278_s10 + $0x1b8] sm:$0xff]  }
  0x27   : > { %2972 = vmatprep.subr.bf16.mxu1 %v3125_v17 }
  0x29   : > { %2925 = vmatpush3.bf16.msra.mxu0 %v3124_v16  ;;  %v3190_v16 = vld [vmem:[%s3278_s10 + $0x140] sm:$0xff]  }
  0x2a   : > { %2973 = vmatpush3.bf16.msra.mxu1 %v3125_v17  ;;  %3006 = vmatprep.subr.bf16.mxu0 %v3130_v19  ;;  %v3191_v17 = vld [vmem:[%s3278_s10 + $0x1c0] sm:$0xff]  }
  0x2b   : > { %3054 = vmatprep.subr.bf16.mxu1 %v3131_v20 }
  0x2c   : > { %2927 = vmatmul.mubr.bf16.vlgmr.msra.gmra.mxu0 %v3128_v18  ;;  %v3192_v18 = vld [vmem:[%s3278_s10 + $0x148] sm:$0xff]  }
  0x2d   : > { %2975 = vmatmul.mubr.bf16.vlgmr.msra.gmra.mxu1 %v3129_v21  ;;  %3007 = vmatpush3.bf16.msra.mxu0 %v3130_v19  ;;  %v3193_v19 = vld [vmem:[%s3278_s10 + $0x1c8] sm:$0xff]   ;;  %v3195_v21 = vld [vmem:[%s3278_s10 + $0x1d0] sm:$0xff]  }
  0x2e   : > { %3055 = vmatpush3.bf16.msra.mxu1 %v3131_v20  ;;  %2930 = vmatprep.mubr.bf16.mxu0 %v3132_v22  ;;  %v3194_v20 = vld [vmem:[%s3278_s10 + $0x150] sm:$0xff]   ;;  %v3196_v22 = vld [vmem:[%s3278_s10 + $0x158] sm:$0xff]  }
  0x2f   : > { %2978 = vmatprep.mubr.bf16.mxu1 %v3133_v23  ;;  %3008 = vmatprep.subr.bf16.mxu0 %v3136_v24  ;;  %v3197_v23 = vld [vmem:[%s3278_s10 + $0x1d8] sm:$0xff]  }
  0x30   : > { %3056 = vmatprep.subr.bf16.mxu1 %v3137_v25 }
  0x31   : > { %3009 = vmatpush3.bf16.msra.mxu0 %v3136_v24  ;;  %v3198_v24 = vld [vmem:[%s3278_s10 + $0x160] sm:$0xff]  }
  0x32   : > { %3057 = vmatpush3.bf16.msra.mxu1 %v3137_v25  ;;  %3010 = vmatprep.subr.bf16.mxu0 %v3142_v27  ;;  %v3199_v25 = vld [vmem:[%s3278_s10 + $0x1e0] sm:$0xff]  }
  0x33   : > { %3058 = vmatprep.subr.bf16.mxu1 %v3143_v28 }
  0x34   : > { %2931 = vmatmul.mubr.bf16.gmra.mxu0 %v3134_v26  ;;  %v3200_v26 = vld [vmem:[%s3278_s10 + $0x168] sm:$0xff]  }
  0x35   : > { %2979 = vmatmul.mubr.bf16.gmra.mxu1 %v3135_v29  ;;  %2934 = vmatprep.mubr.bf16.mxu0 %v3138_v30  ;;  %v3203_v29 = vld [vmem:[%s3278_s10 + $0x1f0] sm:$0xff]   ;;  %v3204_v30 = vld [vmem:[%s3278_s10 + $0x178] sm:$0xff]  }
  0x36   : > { %2982 = vmatprep.mubr.bf16.mxu1 %v3139_v31  ;;  %3011 = vmatpush3.bf16.msra.mxu0 %v3142_v27  ;;  %v3201_v27 = vld [vmem:[%s3278_s10 + $0x1e8] sm:$0xff]   ;;  %v3205_v31 = vld [vmem:[%s3278_s10 + $0x1f8] sm:$0xff]  }
  0x37   : > { %3059 = vmatpush3.bf16.msra.mxu1 %v3143_v28  ;;  %3012 = vmatprep.subr.bf16.mxu0 %v3148_v32  ;;  %v3202_v28 = vld [vmem:[%s3278_s10 + $0x170] sm:$0xff]  }
  0x38   : > { %3060 = vmatprep.subr.bf16.mxu1 %v3149_v33 }
  0x3a   : > { %3013 = vmatpush3.bf16.msra.mxu0 %v3148_v32 }
  0x3b   : > { %3061 = vmatpush3.bf16.msra.mxu1 %v3149_v33  ;;  %3014 = vmatprep.subr.bf16.mxu0 %v3154_v36 }
  0x3c   : > { %2935 = vmatmul.mubr.bf16.gmra.mxu0 %v3140_v34  ;;  %3062 = vmatprep.subr.bf16.mxu1 %v3155_v37 }
  0x3d   : > { %2983 = vmatmul.mubr.bf16.gmra.mxu1 %v3141_v35  ;;  %2938 = vmatprep.mubr.bf16.mxu0 %v3144_v38 }
  0x3e   : > { %2986 = vmatprep.mubr.bf16.mxu1 %v3145_v39  ;;  %3015 = vmatpush3.bf16.msra.mxu0 %v3154_v36 }
  0x3f   : > { %3063 = vmatpush3.bf16.msra.mxu1 %v3155_v37  ;;  %3016 = vmatprep.subr.bf16.mxu0 %v3160_v40 }
  0x40   : > { %3064 = vmatprep.subr.bf16.mxu1 %v3161_v41 }
  0x42   : > { %3017 = vmatpush3.bf16.msra.mxu0 %v3160_v40 }
  0x43   : > { %3065 = vmatpush3.bf16.msra.mxu1 %v3161_v41  ;;  %3018 = vmatprep.subr.bf16.mxu0 %v3166_v46 }
  0x44   : > { %2939 = vmatmul.mubr.bf16.gmra.mxu0 %v3146_v42  ;;  %3066 = vmatprep.subr.bf16.mxu1 %v3167_v47 }
  0x45   : > { %2987 = vmatmul.mubr.bf16.gmra.mxu1 %v3147_v43  ;;  %2942 = vmatprep.mubr.bf16.mxu0 %v3150_v44 }
  0x46   : > { %2990 = vmatprep.mubr.bf16.mxu1 %v3151_v45  ;;  %3019 = vmatpush3.bf16.msra.mxu0 %v3166_v46 }
  0x47   : > { %3067 = vmatpush3.bf16.msra.mxu1 %v3167_v47  ;;  %3020 = vmatprep.subr.bf16.mxu0 %v3172_v51 }
  0x48   : > { %3068 = vmatprep.subr.bf16.mxu1 %v3173_v52 }
  0x4a   : > { %3021 = vmatpush3.bf16.msra.mxu0 %v3172_v51 }
  0x4b   : > { %3069 = vmatpush3.bf16.msra.mxu1 %v3173_v52 }
  0x4c   : > { %2943 = vmatmul.mubr.bf16.gmra.mxu0 %v3152_v48 }
  0x4d   : > { %2991 = vmatmul.mubr.bf16.gmra.mxu1 %v3153_v49  ;;  %2946 = vmatprep.mubr.bf16.mxu0 %v3156_v50 }
  0x4e   : > { %2994 = vmatprep.mubr.bf16.mxu1 %v3157_v53 }
  0x54   : > { %2947 = vmatmul.mubr.bf16.gmra.mxu0 %v3158_v54 }
  0x55   : > { %2995 = vmatmul.mubr.bf16.gmra.mxu1 %v3159_v55  ;;  %2950 = vmatprep.mubr.bf16.mxu0 %v3162_v56 }
  0x56   : > { %2998 = vmatprep.mubr.bf16.mxu1 %v3163_v57 }
  0x5c   : > { %2951 = vmatmul.mubr.bf16.gmra.mxu0 %v3164_v58 }
  0x5d   : > { %2999 = vmatmul.mubr.bf16.gmra.mxu1 %v3165_v59  ;;  %2954 = vmatprep.mubr.bf16.mxu0 %v3168_v60 }
  0x5e   : > { %3002 = vmatprep.mubr.bf16.mxu1 %v3169_v61 }
  0x64   : > { %2955 = vmatmul.mubr.bf16.gmra.mxu0 %v3170_v62 }
  0x65   : > { %3003 = vmatmul.mubr.bf16.gmra.mxu1 %v3171_v63  ;;  %3022 = vmatprep.mubr.bf16.mxu0 %v3174_v0 }
  0x66   : > { %3070 = vmatprep.mubr.bf16.mxu1 %v3175_v1 }
  0x6c   : > { %3023 = vmatmul.mubr.bf16.vlgmr.msra.gmra.mxu0 %v3176_v2 }
  0x6d   : > { %3071 = vmatmul.mubr.bf16.vlgmr.msra.gmra.mxu1 %v3177_v3  ;;  %3026 = vmatprep.mubr.bf16.mxu0 %v3178_v4 }
  0x6e   : > { %3074 = vmatprep.mubr.bf16.mxu1 %v3179_v5 }
  0x74   : > { %3027 = vmatmul.mubr.bf16.gmra.mxu0 %v3180_v6 }
  0x75   : > { %3075 = vmatmul.mubr.bf16.gmra.mxu1 %v3181_v7  ;;  %3030 = vmatprep.mubr.bf16.mxu0 %v3182_v8 }
  0x76   : > { %3078 = vmatprep.mubr.bf16.mxu1 %v3183_v9 }
  0x7c   : > { %3031 = vmatmul.mubr.bf16.gmra.mxu0 %v3184_v10 }
  0x7d   : > { %3079 = vmatmul.mubr.bf16.gmra.mxu1 %v3185_v11  ;;  %3034 = vmatprep.mubr.bf16.mxu0 %v3186_v12 }
  0x7e   : > { %3082 = vmatprep.mubr.bf16.mxu1 %v3187_v13 }
  0x84   : > { %3035 = vmatmul.mubr.bf16.gmra.mxu0 %v3188_v14 }
  0x85   : > { %3083 = vmatmul.mubr.bf16.gmra.mxu1 %v3189_v15  ;;  %3038 = vmatprep.mubr.bf16.mxu0 %v3190_v16 }
  0x86   : > { %3086 = vmatprep.mubr.bf16.mxu1 %v3191_v17 }
  0x8c   : > { %3039 = vmatmul.mubr.bf16.gmra.mxu0 %v3192_v18 }
  0x8d   : > { %3087 = vmatmul.mubr.bf16.gmra.mxu1 %v3193_v19  ;;  %3042 = vmatprep.mubr.bf16.mxu0 %v3194_v20 }
  0x8e   : > { %3090 = vmatprep.mubr.bf16.mxu1 %v3195_v21 }
  0x94   : > { %3043 = vmatmul.mubr.bf16.gmra.mxu0 %v3196_v22 }
  0x95   : > { %3091 = vmatmul.mubr.bf16.gmra.mxu1 %v3197_v23  ;;  %3046 = vmatprep.mubr.bf16.mxu0 %v3198_v24 }
  0x96   : > { %3094 = vmatprep.mubr.bf16.mxu1 %v3199_v25 }
  0x9c   : > { %3047 = vmatmul.mubr.bf16.gmra.mxu0 %v3200_v26 }
  0x9d   : > { %3095 = vmatmul.mubr.bf16.gmra.mxu1 %v3201_v27  ;;  %3050 = vmatprep.mubr.bf16.mxu0 %v3202_v28 }
  0x9e   : > { %3098 = vmatprep.mubr.bf16.mxu1 %v3203_v29 }
  0xa4   : > { %3051 = vmatmul.mubr.bf16.gmra.mxu0 %v3204_v30 }
  0xa5   : > { %3099 = vmatmul.mubr.bf16.gmra.mxu1 %v3205_v31 }
  0xec   : > { %v3410_v32 = vpop.f32.mrf.mxu0 }
  0xed   : > { %v3412_v33 = vpop.f32.mrf.mxu1 }
  0xee   : > { %v3416_v35 = vpop.f32.mrf.mxu0  ;;  %v3736_v30 = vmax.f32 %v3410_v32, %v3412_v33  ;;  %v3583_v32 = vld [vmem:[%s3714_s2] ss:$0 sm:$0xff] }
  0xef   : > { %v3418_v36 = vpop.f32.mrf.mxu1 }
  0xf0   : > { %v3422_v38 = vpop.f32.mrf.mxu0  ;;  %v3737_v23 = vmax.f32 %v3416_v35, %v3418_v36 }
  0xf1   : > { %v3424_v39 = vpop.f32.mrf.mxu1 }
  0xf2   : > { %v3426_v40 = vpop.f32.mrf.mxu0 }
  0xf3   : > { %v3428_v41 = vpop.f32.mrf.mxu1 }
  0xf4   : > { %v3430_v42 = vpop.f32.mrf.mxu0 }
  0xf5   : > { %v3432_v43 = vpop.f32.mrf.mxu1 }
  0xf6   : > { %v3436_v45 = vpop.f32.mrf.mxu0 }
  0xf7   : > { %v3438_v46 = vpop.f32.mrf.mxu1 }
  0xf8   : > { %v3442_v48 = vpop.f32.mrf.mxu0 }
  0xf9   : > { %v3444_v49 = vpop.f32.mrf.mxu1 }
  0xfa   : > { %v3446_v50 = vpop.f32.mrf.mxu0 }
  0xfb   : > { %v3448_v51 = vpop.f32.mrf.mxu1 }
  0xfc   : > { %v3450_v52 = vpop.f32.mrf.mxu0 }
  0xfd   : > { %v3452_v53 = vpop.f32.mrf.mxu1 }
  0xfe   : > { %v3456_v55 = vpop.f32.mrf.mxu0 }
  0xff   : > { %v3458_v56 = vpop.f32.mrf.mxu1 }
 0x100   : > { %v3462_v58 = vpop.f32.mrf.mxu0 }
 0x101   : > { %v3464_v59 = vpop.f32.mrf.mxu1 }
 0x102   : > { %v3466_v60 = vpop.f32.mrf.mxu0 }
 0x103   : > { %v3468_v61 = vpop.f32.mrf.mxu1 }
 0x104   : > { %v3470_v62 = vpop.f32.mrf.mxu0 }
 0x105   : > { %v3472_v63 = vpop.f32.mrf.mxu1 }
 0x106   : > { %v3476_v1 = vpop.f32.mrf.mxu0 }
 0x107   : > { %v3478_v2 = vpop.f32.mrf.mxu1 }
 0x108   : > { %v3482_v4 = vpop.f32.mrf.mxu0 }
 0x109   : > { %v3484_v5 = vpop.f32.mrf.mxu1 }
 0x10a   : > { %v3486_v6 = vpop.f32.mrf.mxu0 }
 0x10b   : > { %v3488_v7 = vpop.f32.mrf.mxu1 }
 0x10c   : > { %v3490_v8 = vpop.f32.mrf.mxu0 }
 0x10d   : > { %v3492_v9 = vpop.f32.mrf.mxu1 }
 0x10e   : > { %v3496_v11 = vpop.f32.mrf.mxu0 }
 0x10f   : > { %v3498_v12 = vpop.f32.mrf.mxu1 }
 0x110   : > { %v3502_v14 = vpop.f32.mrf.mxu0 }
 0x111   : > { %v3504_v15 = vpop.f32.mrf.mxu1 }
 0x112   : > { %v3506_v16 = vpop.f32.mrf.mxu0 }
 0x113   : > { %v3508_v17 = vpop.f32.mrf.mxu1 }
 0x114   : > { %v3510_v18 = vpop.f32.mrf.mxu0 }
 0x115   : > { %v3512_v19 = vpop.f32.mrf.mxu1 }
 0x116   : > { %v3516_v21 = vpop.f32.mrf.mxu0 }
 0x117   : > { %v3518_v22 = vpop.f32.mrf.mxu1 }
 0x118   : > { %v3522_v24 = vpop.f32.mrf.mxu0 }
 0x119   : > { %v3524_v25 = vpop.f32.mrf.mxu1 }
 0x11a   : > { %v3526_v26 = vpop.f32.mrf.mxu0 }
 0x11b   : > { %v3528_v27 = vpop.f32.mrf.mxu1 }
 0x11c   : > { %v3530_v28 = vpop.f32.mrf.mxu0 }
 0x11d   : > { %v3532_v29 = vpop.f32.mrf.mxu1 }
 0x11e   : > { %v3536_v31 = vpop.f32.mrf.mxu0 }
 0x11f   : > { %3722 = vst [vmem:[#allocation4_spill] sm:$0xff] %v3536_v31  ;;  %v3538_v20 = vpop.f32.mrf.mxu1 }
 0x120   : > { %3723 = vst [vmem:[#allocation5_spill] sm:$0xff] %v3538_v20  ;;  %v3542_v13 = vpop.f32.mrf.mxu0 }
 0x121   : > { %3724 = vst [vmem:[#allocation6_spill] sm:$0xff] %v3542_v13  ;;  %v3544_v10 = vpop.f32.mrf.mxu1  ;;  %v1074_v13 = vmax.f32 %v3422_v38, %v3424_v39 }
 0x122   : > { %3725 = vst [vmem:[#allocation7_spill] sm:$0xff] %v3544_v10  ;;  %v3546_v3 = vpop.f32.mrf.mxu0 }
 0x123   : > { %3726 = vst [vmem:[#allocation8_spill] sm:$0xff] %v3546_v3  ;;  %v3548_v0 = vpop.f32.mrf.mxu1 }
 0x124   : > { %3727 = vst [vmem:[#allocation9_spill] sm:$0xff] %v3548_v0  ;;  %v3550_v57 = vpop.f32.mrf.mxu0 }
 0x125   : > { %3728 = vst [vmem:[#allocation10_spill] sm:$0xff] %v3550_v57  ;;  %v3552_v54 = vpop.f32.mrf.mxu1 }
 0x126   : > { %3729 = vst [vmem:[#allocation11_spill] sm:$0xff] %v3552_v54  ;;  %v3556_v47 = vpop.f32.mrf.mxu0 }
 0x127   : > { %3730 = vst [vmem:[#allocation12_spill] sm:$0xff] %v3556_v47  ;;  %v3558_v44 = vpop.f32.mrf.mxu1 }
 0x128   : > { %3731 = vst [vmem:[#allocation13_spill] sm:$0xff] %v3558_v44  ;;  %v3562_v37 = vpop.f32.mrf.mxu0 }
 0x129   : > { %3732 = vst [vmem:[#allocation14_spill] sm:$0xff] %v3562_v37  ;;  %v3564_v34 = vpop.f32.mrf.mxu1 }
 0x12a   : > { %3733 = vst [vmem:[#allocation15_spill] sm:$0xff] %v3564_v34  ;;  %v3566_v3 = vpop.f32.mrf.mxu0 }
 0x12b   : > { %3734 = vst [vmem:[#allocation16_spill] sm:$0xff] %v3566_v3  ;;  %v3568_v0 = vpop.f32.mrf.mxu1  ;;  %v1072_v3 = vmax.f32 %v3426_v40, %v3428_v41 }
 0x12c   : > { %3735 = vst [vmem:[#allocation17_spill] sm:$0xff] %v3568_v0  ;;  %v3024_v20 = vpop.f32.mrf.mxu0 }
 0x12d   : > { %v1587_v54 = vmax.f32 %v3736_v30, %v3024_v20  ;;  %v3072_v57 = vpop.f32.mrf.mxu1 }
 0x12e   : > { %v1362_v31 = vpop.f32.mrf.mxu0 }
 0x12f   : > { %v1585_v44 = vmax.f32 %v3737_v23, %v1362_v31  ;;  %v1876_v47 = vpop.f32.mrf.mxu1  ;;  %v2101_v0 = vmax.f32 %v1587_v54, %v3072_v57  ;;  %v1078_v57 = vmax.f32 %v3442_v48, %v3444_v49  ;;  %v1076_v48 = vmax.f32 %v3446_v50, %v3448_v51 }
 0x130   : > { %v3025_v37 = vpop.f32.mrf.mxu0  ;;  %v3740_v50 = vmax.f32 %v3450_v52, %v3452_v53  ;;  %v1080_v52 = vmax.f32 %v3466_v60, %v3468_v61  ;;  %v3742_v60 = vmax.f32 %v3470_v62, %v3472_v63  ;;  %v1084_v62 = vmax.f32 %v3486_v6, %v3488_v7 }
 0x131   : > { %v1588_v34 = vmax.f32 %v1074_v13, %v3025_v37  ;;  %v3073_v10 = vpop.f32.mrf.mxu1  ;;  %v2099_v20 = vmax.f32 %v1585_v44, %v1876_v47  ;;  %v2204_v23 = vadd.f32 %v3583_v32, %v2101_v0  ;;  %v3738_v37 = vmax.f32 %v3430_v42, %v3432_v43 }
 0x132   : > { %v1365_v33 = vpop.f32.mrf.mxu0  ;;  %v3739_v42 = vmax.f32 %v3436_v45, %v3438_v46  ;;  %v3744_v6 = vmax.f32 %v3490_v8, %v3492_v9  ;;  %v1088_v8 = vmax.f32 %v3506_v16, %v3508_v17  ;;  %v3746_v16 = vmax.f32 %v3510_v18, %v3512_v19 }
 0x133   : > { %v2102_v38 = vmax.f32 %v1588_v34, %v3073_v10  ;;  %v1586_v39 = vmax.f32 %v1072_v3, %v1365_v33  ;;  %v1879_v35 = vpop.f32.mrf.mxu1  ;;  %v2202_v44 = vadd.f32 %v3583_v32, %v2099_v20  ;;  %v1092_v18 = vmax.f32 %v3526_v26, %v3528_v27 }
 0x134   : > { %v3028_v36 = vpop.f32.mrf.mxu0  ;;  %v3748_v26 = vmax.f32 %v3530_v28, %v3532_v29  ;;  %v3755_v28 = vld [vmem:[#allocation8_spill] sm:$0xff] }
 0x135   : > { %v2205_v30 = vadd.f32 %v3583_v32, %v2102_v38  ;;  %v2100_v40 = vmax.f32 %v1586_v39, %v1879_v35  ;;  %v1591_v41 = vmax.f32 %v3738_v37, %v3028_v36  ;;  %v3076_v54 = vpop.f32.mrf.mxu1  ;;  %v1082_v37 = vmax.f32 %v3462_v58, %v3464_v59 }
 0x136   : > { %v1378_v34 = vpop.f32.mrf.mxu0 }
 0x137   : > { %v2727_v47 = vpack.c.bf16 %v2205_v30, %v2204_v23  ;;  %v2203_v0 = vadd.f32 %v3583_v32, %v2100_v40  ;;  %v1589_v43 = vmax.f32 %v3739_v42, %v1378_v34  ;;  %v1892_v3 = vpop.f32.mrf.mxu1  ;;  %v2105_v13 = vmax.f32 %v1591_v41, %v3076_v54 }
 0x138   : > { %v3029_v10 = vpop.f32.mrf.mxu0 }
 0x139   : > { %2799 = vst [vmem:[%s3596_s13 + $0x8] sm:$0xff] %v2727_v47   ;;  %v2722_v49 = vpack.c.bf16 %v2203_v0, %v2202_v44  ;;  %v1592_v31 = vmax.f32 %v1078_v57, %v3029_v10  ;;  %v3077_v33 = vpop.f32.mrf.mxu1  ;;  %v2103_v20 = vmax.f32 %v1589_v43, %v1892_v3  ;;  %v2208_v45 = vadd.f32 %v3583_v32, %v2105_v13 }
 0x13a   : > { %v1381_v38 = vpop.f32.mrf.mxu0  ;;  %v3741_v44 = vmax.f32 %v3456_v55, %v3458_v56 }
 0x13b   : > { %2723 = vst [vmem:[%s3596_s13] sm:$0xff] %v2722_v49   ;;  %v2106_v39 = vmax.f32 %v1592_v31, %v3077_v33  ;;  %v1590_v35 = vmax.f32 %v1076_v48, %v1381_v38  ;;  %v1895_v36 = vpop.f32.mrf.mxu1  ;;  %v2206_v54 = vadd.f32 %v3583_v32, %v2103_v20  ;;  %v1086_v20 = vmax.f32 %v3482_v4, %v3484_v5 }
 0x13c   : > { %v3032_v23 = vpop.f32.mrf.mxu0 }
 0x13d   : > { %v2209_v46 = vadd.f32 %v3583_v32, %v2106_v39  ;;  %v2104_v30 = vmax.f32 %v1590_v35, %v1895_v36  ;;  %v1595_v51 = vmax.f32 %v3740_v50, %v3032_v23  ;;  %v3080_v40 = vpop.f32.mrf.mxu1 }
 0x13e   : > { %v1394_v41 = vpop.f32.mrf.mxu0 }
 0x13f   : > { %v2737_v57 = vpack.c.bf16 %v2209_v46, %v2208_v45  ;;  %v2207_v34 = vadd.f32 %v3583_v32, %v2104_v30  ;;  %v1593_v47 = vmax.f32 %v3741_v44, %v1394_v41  ;;  %v1908_v0 = vpop.f32.mrf.mxu1  ;;  %v2109_v43 = vmax.f32 %v1595_v51, %v3080_v40 }
 0x140   : > { %v3033_v42 = vpop.f32.mrf.mxu0  ;;  %v3743_v45 = vmax.f32 %v3476_v1, %v3478_v2 }
 0x141   : > { %2801 = vst [vmem:[%s3596_s13 + $0x18] sm:$0xff] %v2737_v57   ;;  %v2732_v53 = vpack.c.bf16 %v2207_v34, %v2206_v54  ;;  %v1596_v3 = vmax.f32 %v1082_v37, %v3033_v42  ;;  %v3081_v58 = vpop.f32.mrf.mxu1  ;;  %v2107_v10 = vmax.f32 %v1593_v47, %v1908_v0  ;;  %v2212_v55 = vadd.f32 %v3583_v32, %v2109_v43 }
 0x142   : > { %v1397_v59 = vpop.f32.mrf.mxu0  ;;  %v1090_v0 = vmax.f32 %v3502_v14, %v3504_v15 }
 0x143   : > { %2800 = vst [vmem:[%s3596_s13 + $0x10] sm:$0xff] %v2732_v53   ;;  %v2110_v48 = vmax.f32 %v1596_v3, %v3081_v58  ;;  %v1594_v49 = vmax.f32 %v1080_v52, %v1397_v59  ;;  %v1911_v13 = vpop.f32.mrf.mxu1  ;;  %v2210_v35 = vadd.f32 %v3583_v32, %v2107_v10  ;;  %v3745_v3 = vmax.f32 %v3496_v11, %v3498_v12 }
 0x144   : > { %v3036_v31 = vpop.f32.mrf.mxu0 }
 0x145   : > { %v2213_v56 = vadd.f32 %v3583_v32, %v2110_v48  ;;  %v2108_v33 = vmax.f32 %v1594_v49, %v1911_v13  ;;  %v1599_v61 = vmax.f32 %v3742_v60, %v3036_v31  ;;  %v3084_v38 = vpop.f32.mrf.mxu1 }
 0x146   : > { %v1410_v39 = vpop.f32.mrf.mxu0 }
 0x147   : > { %v2747_v36 = vpack.c.bf16 %v2213_v56, %v2212_v55  ;;  %v2211_v23 = vadd.f32 %v3583_v32, %v2108_v33  ;;  %v1597_v46 = vmax.f32 %v3743_v45, %v1410_v39  ;;  %v1924_v30 = vpop.f32.mrf.mxu1  ;;  %v2113_v51 = vmax.f32 %v1599_v61, %v3084_v38 }
 0x148   : > { %v3037_v50 = vpop.f32.mrf.mxu0  ;;  %v1094_v38 = vmax.f32 %v3522_v24, %v3524_v25 }
 0x149   : > { %2803 = vst [vmem:[%s3596_s13 + $0x28] sm:$0xff] %v2747_v36   ;;  %v2742_v63 = vpack.c.bf16 %v2211_v23, %v2210_v35  ;;  %v1600_v40 = vmax.f32 %v1086_v20, %v3037_v50  ;;  %v3085_v4 = vpop.f32.mrf.mxu1  ;;  %v2111_v37 = vmax.f32 %v1597_v46, %v1924_v30  ;;  %v2216_v1 = vadd.f32 %v3583_v32, %v2113_v51 }
 0x14a   : > { %v1413_v5 = vpop.f32.mrf.mxu0  ;;  %v3747_v23 = vmax.f32 %v3516_v21, %v3518_v22 }
 0x14b   : > { %2802 = vst [vmem:[%s3596_s13 + $0x20] sm:$0xff] %v2742_v63   ;;  %v2114_v41 = vmax.f32 %v1600_v40, %v3085_v4  ;;  %v1598_v54 = vmax.f32 %v1084_v62, %v1413_v5  ;;  %v1927_v57 = vpop.f32.mrf.mxu1  ;;  %v2214_v52 = vadd.f32 %v3583_v32, %v2111_v37 }
 0x14c   : > { %v3040_v34 = vpop.f32.mrf.mxu0 }
 0x14d   : > { %v2217_v2 = vadd.f32 %v3583_v32, %v2114_v41  ;;  %v2112_v44 = vmax.f32 %v1598_v54, %v1927_v57  ;;  %v1603_v7 = vmax.f32 %v3744_v6, %v3040_v34  ;;  %v3088_v47 = vpop.f32.mrf.mxu1  ;;  %v3749_v54 = vld [vmem:[#allocation7_spill] sm:$0xff]  ;;  %v3750_v57 = vld [vmem:[#allocation6_spill] sm:$0xff] }
 0x14e   : > { %v1426_v42 = vpop.f32.mrf.mxu0  ;;  %v1098_v34 = vmax.f32 %v3750_v57, %v3749_v54 }
 0x14f   : > { %v2757_v53 = vpack.c.bf16 %v2217_v2, %v2216_v1  ;;  %v2215_v43 = vadd.f32 %v3583_v32, %v2112_v44  ;;  %v1601_v58 = vmax.f32 %v3745_v3, %v1426_v42  ;;  %v1940_v59 = vpop.f32.mrf.mxu1  ;;  %v2117_v48 = vmax.f32 %v1603_v7, %v3088_v47  ;;  %v3751_v7 = vld [vmem:[#allocation4_spill] sm:$0xff]  ;;  %v3752_v47 = vld [vmem:[#allocation5_spill] sm:$0xff] }
 0x150   : > { %v3041_v10 = vpop.f32.mrf.mxu0 }
 0x151   : > { %2805 = vst [vmem:[%s3596_s13 + $0x38] sm:$0xff] %v2757_v53   ;;  %v2752_v9 = vpack.c.bf16 %v2215_v43, %v2214_v52  ;;  %v1604_v49 = vmax.f32 %v1090_v0, %v3041_v10  ;;  %v3089_v14 = vpop.f32.mrf.mxu1  ;;  %v2115_v13 = vmax.f32 %v1601_v58, %v1940_v59  ;;  %v2220_v11 = vadd.f32 %v3583_v32, %v2117_v48  ;;  %v3754_v43 = vld [vmem:[#allocation9_spill] sm:$0xff] }
 0x152   : > { %v1429_v15 = vpop.f32.mrf.mxu0  ;;  %v3753_v0 = vmax.f32 %v3751_v7, %v3752_v47  ;;  %v1096_v29 = vmax.f32 %v3755_v28, %v3754_v43 }
 0x153   : > { %2804 = vst [vmem:[%s3596_s13 + $0x30] sm:$0xff] %v2752_v9   ;;  %v2118_v31 = vmax.f32 %v1604_v49, %v3089_v14  ;;  %v1602_v55 = vmax.f32 %v1088_v8, %v1429_v15  ;;  %v1943_v56 = vpop.f32.mrf.mxu1  ;;  %v2218_v39 = vadd.f32 %v3583_v32, %v2115_v13 }
 0x154   : > { %v3044_v33 = vpop.f32.mrf.mxu0 }
 0x155   : > { %v2221_v12 = vadd.f32 %v3583_v32, %v2118_v31  ;;  %v2116_v60 = vmax.f32 %v1602_v55, %v1943_v56  ;;  %v1607_v17 = vmax.f32 %v3746_v16, %v3044_v33  ;;  %v3092_v61 = vpop.f32.mrf.mxu1  ;;  %v3756_v56 = vld [vmem:[#allocation10_spill] sm:$0xff]  ;;  %v3757_v33 = vld [vmem:[#allocation11_spill] sm:$0xff] }
 0x156   : > { %v1442_v20 = vpop.f32.mrf.mxu0  ;;  %v3759_v16 = vld [vmem:[#allocation15_spill] sm:$0xff] }
 0x157   : > { %v2767_v35 = vpack.c.bf16 %v2221_v12, %v2220_v11  ;;  %v2219_v36 = vadd.f32 %v3583_v32, %v2116_v60  ;;  %v1605_v45 = vmax.f32 %v3747_v23, %v1442_v20  ;;  %v1956_v46 = vpop.f32.mrf.mxu1  ;;  %v2121_v50 = vmax.f32 %v1607_v17, %v3092_v61  ;;  %v3760_v17 = vld [vmem:[#allocation14_spill] sm:$0xff]  ;;  %v3762_v23 = vld [vmem:[#allocation13_spill] sm:$0xff] }
 0x158   : > { %v3045_v30 = vpop.f32.mrf.mxu0  ;;  %v3758_v11 = vmax.f32 %v3756_v56, %v3757_v33  ;;  %v1102_v61 = vmax.f32 %v3760_v17, %v3759_v16 }
 0x159   : > { %2807 = vst [vmem:[%s3596_s13 + $0x48] sm:$0xff] %v2767_v35   ;;  %v2762_v19 = vpack.c.bf16 %v2219_v36, %v2218_v39  ;;  %v1608_v62 = vmax.f32 %v1094_v38, %v3045_v30  ;;  %v3093_v24 = vpop.f32.mrf.mxu1  ;;  %v2119_v63 = vmax.f32 %v1605_v45, %v1956_v46  ;;  %v2224_v21 = vadd.f32 %v3583_v32, %v2121_v50  ;;  %v3761_v36 = vld [vmem:[#allocation12_spill] sm:$0xff] }
 0x15a   : > { %v1445_v25 = vpop.f32.mrf.mxu0  ;;  %v3763_v45 = vmax.f32 %v3761_v36, %v3762_v23  ;;  %v3765_v50 = vld [vmem:[#allocation16_spill] sm:$0xff] }
 0x15b   : > { %2806 = vst [vmem:[%s3596_s13 + $0x40] sm:$0xff] %v2762_v19   ;;  %v2122_v51 = vmax.f32 %v1608_v62, %v3093_v24  ;;  %v1606_v40 = vmax.f32 %v1092_v18, %v1445_v25  ;;  %v1959_v4 = vpop.f32.mrf.mxu1  ;;  %v2222_v2 = vadd.f32 %v3583_v32, %v2119_v63  ;;  %v3764_v19 = vld [vmem:[#allocation17_spill] sm:$0xff] }
 0x15c   : > { %v3048_v5 = vpop.f32.mrf.mxu0  ;;  %v1100_v62 = vmax.f32 %v3765_v50, %v3764_v19 }
 0x15d   : > { %v2225_v22 = vadd.f32 %v3583_v32, %v2122_v51  ;;  %v2120_v37 = vmax.f32 %v1606_v40, %v1959_v4  ;;  %v1611_v27 = vmax.f32 %v3748_v26, %v3048_v5  ;;  %v3096_v41 = vpop.f32.mrf.mxu1 }
 0x15e   : > { %v1458_v1 = vpop.f32.mrf.mxu0 }
 0x15f   : > { %v2777_v44 = vpack.c.bf16 %v2225_v22, %v2224_v21  ;;  %v2223_v6 = vadd.f32 %v3583_v32, %v2120_v37  ;;  %v1609_v42 = vmax.f32 %v3753_v0, %v1458_v1  ;;  %v1972_v52 = vpop.f32.mrf.mxu1  ;;  %v2125_v58 = vmax.f32 %v1611_v27, %v3096_v41 }
 0x160   : > { %v3049_v53 = vpop.f32.mrf.mxu0 }
 0x161   : > { %2809 = vst [vmem:[%s3596_s13 + $0x58] sm:$0xff] %v2777_v44   ;;  %v2772_v3 = vpack.c.bf16 %v2223_v6, %v2222_v2  ;;  %v1612_v59 = vmax.f32 %v1098_v34, %v3049_v53  ;;  %v3097_v10 = vpop.f32.mrf.mxu1  ;;  %v2123_v9 = vmax.f32 %v1609_v42, %v1972_v52  ;;  %v2228_v13 = vadd.f32 %v3583_v32, %v2125_v58 }
 0x162   : > { %v1461_v8 = vpop.f32.mrf.mxu0 }
 0x163   : > { %2808 = vst [vmem:[%s3596_s13 + $0x50] sm:$0xff] %v2772_v3   ;;  %v2126_v48 = vmax.f32 %v1612_v59, %v3097_v10  ;;  %v1610_v49 = vmax.f32 %v1096_v29, %v1461_v8  ;;  %v1975_v14 = vpop.f32.mrf.mxu1  ;;  %v2226_v20 = vadd.f32 %v3583_v32, %v2123_v9 }
 0x164   : > { %v3052_v15 = vpop.f32.mrf.mxu0 }
 0x165   : > { %v2229_v31 = vadd.f32 %v3583_v32, %v2126_v48  ;;  %v2124_v55 = vmax.f32 %v1610_v49, %v1975_v14  ;;  %v1615_v12 = vmax.f32 %v3758_v11, %v3052_v15  ;;  %v3100_v60 = vpop.f32.mrf.mxu1 }
 0x166   : > { %v1474_v38 = vpop.f32.mrf.mxu0 }
 0x167   : > { %v2787_v39 = vpack.c.bf16 %v2229_v31, %v2228_v13  ;;  %v2227_v35 = vadd.f32 %v3583_v32, %v2124_v55  ;;  %v1613_v46 = vmax.f32 %v3763_v45, %v1474_v38  ;;  %v1988_v30 = vpop.f32.mrf.mxu1  ;;  %v2129_v25 = vmax.f32 %v1615_v12, %v3100_v60 }
 0x168   : > { %v3053_v18 = vpop.f32.mrf.mxu0 }
 0x169   : > { %2811 = vst [vmem:[%s3596_s13 + $0x68] sm:$0xff] %v2787_v39   ;;  %v2782_v24 = vpack.c.bf16 %v2227_v35, %v2226_v20  ;;  %v1616_v63 = vmax.f32 %v1102_v61, %v3053_v18  ;;  %v3101_v51 = vpop.f32.mrf.mxu1  ;;  %v2127_v4 = vmax.f32 %v1613_v46, %v1988_v30  ;;  %v2232_v37 = vadd.f32 %v3583_v32, %v2129_v25 }
 0x16a   : > { %v1477_v40 = vpop.f32.mrf.mxu0 }
 0x16b   : > { %2810 = vst [vmem:[%s3596_s13 + $0x60] sm:$0xff] %v2782_v24   ;;  %v2130_v5 = vmax.f32 %v1616_v63, %v3101_v51  ;;  %v1614_v21 = vmax.f32 %v1100_v62, %v1477_v40  ;;  %v1991_v22 = vpop.f32.mrf.mxu1  ;;  %v2230_v41 = vadd.f32 %v3583_v32, %v2127_v4 }
 0x16d   : > { %v2233_v26 = vadd.f32 %v3583_v32, %v2130_v5  ;;  %v2128_v27 = vmax.f32 %v1614_v21, %v1991_v22 }
 0x16f   : > { %v2797_v54 = vpack.c.bf16 %v2233_v26, %v2232_v37  ;;  %v2231_v57 = vadd.f32 %v3583_v32, %v2128_v27 }
 0x171   : > { %2813 = vst [vmem:[%s3596_s13 + $0x78] sm:$0xff] %v2797_v54   ;;  %v2792_v34 = vpack.c.bf16 %v2231_v57, %v2230_v41 }
 0x173   : > { %2812 = vst [vmem:[%s3596_s13 + $0x70] sm:$0xff] %v2792_v34  }
 0x174 PF: > { %s13_s12 = sadd.s32 1, %s3212_s12  }
 0x175   : > { %p10_p4 = scmp.ge.s32.totalorder %s13_s12, 4  }
 0x177   :  { %12 = sbr.rel (!%p10_p4) target bundleno = 1 (0x1), region = 65 }

// kernel: nn_forward.4
= control target key start
LH: loop header
LB: loop body
LE: loop exit
PB: predicated region body
PF: predicated region fallthrough
CT: control target
= control target key end

     0   :  { %s7919_s12 = smov 0   ;;  %s8966_s0 = inlined_call_operand.vmem [shape: bf16[2,4,7,64,128], index: 0, kind: input, shape index: {}]   ;;  %s8967_s1 = inlined_call_operand.vmem [shape: bf16[7,128,128], index: 1, kind: input, shape index: {}]   ;;  %s8968_s2 = inlined_call_operand.vmem [shape: f32[1,128], index: 2, kind: input, shape index: {}]   ;;  %s8969_s3 = inlined_call_operand.vmem [shape: bf16[2,64,128], index: 3, kind: output, shape index: {}]  }
   0x1 LB: > { %s5551_s13 = sadd.s32 4294967295, %s7897_s12   ;;  %p5555_p0 = scmp.ge.s32.totalorder %s7897_s12, 1  ;;  %s7897_s12 = sphi %s7919_s12, %s13_s12  }
   0x2   : > { %p137_p1 = scmp.lt.s32.totalorder %s7897_s12, 3 }
   0x4   : > { %p138_p2 = pnand %p5555_p0, %p137_p1 }
   0x5   : > { %p161_p3 = scmp.lt.s32.totalorder (!%p138_p2), %s5551_s13, 1 }
   0x6   : > { %141 = sbr.rel (%p138_p2) target bundleno = 678 (0x2a6), region = 32 }
   0xb   : > { %v7555_v0 = vld [vmem:[%s8967_s1 + $0x38] sm:$0xff]   ;;  %v7557_v2 = vld [vmem:[%s8967_s1 + $0x30] sm:$0xff]   ;;  %v7559_v4 = vld [vmem:[%s8967_s1 + $0x28] sm:$0xff]   ;;  %s8971_s13 = smov (!%p161_p3, %s5551_s13), 1 }
   0xc   : > { %v7556_v1 = vld [vmem:[%s8967_s1 + $0x78] sm:$0xff]   ;;  %6874 = vmatprep.subr.bf16.mxu0 %v7555_v0  ;;  %v7558_v3 = vld [vmem:[%s8967_s1 + $0x70] sm:$0xff]   ;;  %v7560_v5 = vld [vmem:[%s8967_s1 + $0x68] sm:$0xff]   ;;  %s7546_s30 = smul.u32 896, %s8971_s13  ;;  %s6506_s7 = sshll.u32 %s8971_s13, 5 }
   0xd   : > { %6898 = vmatprep.subr.bf16.mxu1 %v7556_v1  ;;  %6875 = vmatpush3.bf16.msra.mxu0 %v7555_v0  ;;  %v7561_v6 = vld [vmem:[%s8967_s1 + $0x20] sm:$0xff]   ;;  %v7563_v8 = vld [vmem:[%s8967_s1 + $0x18] sm:$0xff]   ;;  %v7565_v10 = vld [vmem:[%s8967_s1 + $0x10] sm:$0xff]   ;;  %s170_s11 = scalar_lea.vmem %s8969_s3, %s6506_s7 }
   0xe   : > { %6899 = vmatpush3.bf16.msra.mxu1 %v7556_v1  ;;  %6876 = vmatprep.subr.bf16.mxu0 %v7557_v2  ;;  %v7562_v7 = vld [vmem:[%s8967_s1 + $0x60] sm:$0xff]   ;;  %v7564_v9 = vld [vmem:[%s8967_s1 + $0x58] sm:$0xff]   ;;  %s7963_s10 = scalar_lea.vmem %s8966_s0, %s7546_s30  ;;  %v7566_v11 = vld [vmem:[%s8967_s1 + $0x50] sm:$0xff]  }
   0xf   : > { %6900 = vmatprep.subr.bf16.mxu1 %v7558_v3  ;;  %v7571_v12 = vld [vmem:[%s7963_s10] sm:$0xff]   ;;  %v7567_v14 = vld [vmem:[%s8967_s1 + $0x8] sm:$0xff]   ;;  %v7575_v19 = vld [vmem:[%s8967_s1 + $0xb8] sm:$0xff]  }
  0x10   : > { %v7572_v13 = vld [vmem:[%s7963_s10 + $0x20] sm:$0xff]   ;;  %6890 = vmatprep.mubr.bf16.mxu0 %v7571_v12  ;;  %v7568_v15 = vld [vmem:[%s8967_s1 + $0x48] sm:$0xff]   ;;  %v7576_v20 = vld [vmem:[%s8967_s1 + $0xf8] sm:$0xff]  }
  0x11   : > { %6877 = vmatpush3.bf16.msra.mxu0 %v7557_v2  ;;  %6914 = vmatprep.mubr.bf16.mxu1 %v7572_v13  ;;  %v7569_v16 = vld [vmem:[%s8967_s1] sm:$0xff]   ;;  %v7573_v18 = vld [vmem:[%s7963_s10 + $0x8] sm:$0xff]   ;;  %v7577_v22 = vld [vmem:[%s8967_s1 + $0xb0] sm:$0xff]  }
  0x12   : > { %6901 = vmatpush3.bf16.msra.mxu1 %v7558_v3  ;;  %6878 = vmatprep.subr.bf16.mxu0 %v7559_v4  ;;  %v7570_v17 = vld [vmem:[%s8967_s1 + $0x40] sm:$0xff]   ;;  %v7574_v21 = vld [vmem:[%s7963_s10 + $0x28] sm:$0xff]   ;;  %v7578_v23 = vld [vmem:[%s8967_s1 + $0xf0] sm:$0xff]  }
  0x13   : > { %6902 = vmatprep.subr.bf16.mxu1 %v7560_v5  ;;  %v7585_v24 = vld [vmem:[%s7963_s10 + $0x10] sm:$0xff]   ;;  %v7579_v26 = vld [vmem:[%s8967_s1 + $0xa8] sm:$0xff]   ;;  %v7581_v28 = vld [vmem:[%s8967_s1 + $0xa0] sm:$0xff]  }
  0x14   : > { %v7586_v25 = vld [vmem:[%s7963_s10 + $0x30] sm:$0xff]   ;;  %v7580_v27 = vld [vmem:[%s8967_s1 + $0xe8] sm:$0xff]   ;;  %v7587_v29 = vld [vmem:[%s7963_s10 + $0x18] sm:$0xff]  }
  0x15   : > { %6879 = vmatpush3.bf16.msra.mxu0 %v7559_v4  ;;  %v7588_v30 = vld [vmem:[%s7963_s10 + $0x38] sm:$0xff]   ;;  %v7582_v31 = vld [vmem:[%s8967_s1 + $0xe0] sm:$0xff]   ;;  %v7589_v36 = vld [vmem:[%s8967_s1 + $0x90] sm:$0xff]  }
  0x16   : > { %6903 = vmatpush3.bf16.msra.mxu1 %v7560_v5  ;;  %6880 = vmatprep.subr.bf16.mxu0 %v7561_v6  ;;  %v7595_v32 = vld [vmem:[%s7963_s10 + $0x40] sm:$0xff]   ;;  %v7583_v34 = vld [vmem:[%s8967_s1 + $0x98] sm:$0xff]   ;;  %v7590_v37 = vld [vmem:[%s8967_s1 + $0xd0] sm:$0xff]  }
  0x17   : > { %6904 = vmatprep.subr.bf16.mxu1 %v7562_v7  ;;  %v7596_v33 = vld [vmem:[%s7963_s10 + $0x60] sm:$0xff]   ;;  %v7584_v35 = vld [vmem:[%s8967_s1 + $0xd8] sm:$0xff]   ;;  %v7591_v38 = vld [vmem:[%s8967_s1 + $0x88] sm:$0xff]  }
  0x18   : > { %v7592_v39 = vld [vmem:[%s8967_s1 + $0xc8] sm:$0xff]   ;;  %v7593_v40 = vld [vmem:[%s8967_s1 + $0x80] sm:$0xff]   ;;  %v7599_v43 = vld [vmem:[%s8967_s1 + $0x138] sm:$0xff]  }
  0x19   : > { %6881 = vmatpush3.bf16.msra.mxu0 %v7561_v6  ;;  %v7594_v41 = vld [vmem:[%s8967_s1 + $0xc0] sm:$0xff]   ;;  %v7597_v42 = vld [vmem:[%s7963_s10 + $0x48] sm:$0xff]   ;;  %v7600_v44 = vld [vmem:[%s8967_s1 + $0x178] sm:$0xff]  }
  0x1a   : > { %6905 = vmatpush3.bf16.msra.mxu1 %v7562_v7  ;;  %6882 = vmatprep.subr.bf16.mxu0 %v7563_v8  ;;  %v7598_v45 = vld [vmem:[%s7963_s10 + $0x68] sm:$0xff]   ;;  %v7601_v46 = vld [vmem:[%s8967_s1 + $0x130] sm:$0xff]   ;;  %v7604_v50 = vld [vmem:[%s7963_s10 + $0x58] sm:$0xff]  }
  0x1b   : > { %6906 = vmatprep.subr.bf16.mxu1 %v7564_v9  ;;  %v7602_v47 = vld [vmem:[%s8967_s1 + $0x170] sm:$0xff]   ;;  %v7605_v51 = vld [vmem:[%s8967_s1 + $0x128] sm:$0xff]   ;;  %v7608_v53 = vld [vmem:[%s7963_s10 + $0x78] sm:$0xff]  }
  0x1c   : > { %v7603_v48 = vld [vmem:[%s7963_s10 + $0x50] sm:$0xff]   ;;  %v7606_v52 = vld [vmem:[%s8967_s1 + $0x168] sm:$0xff]   ;;  %v7609_v54 = vld [vmem:[%s8967_s1 + $0x120] sm:$0xff]  }
  0x1d   : > { %6883 = vmatpush3.bf16.msra.mxu0 %v7563_v8  ;;  %v7607_v49 = vld [vmem:[%s7963_s10 + $0x70] sm:$0xff]   ;;  %v7610_v55 = vld [vmem:[%s8967_s1 + $0x160] sm:$0xff]   ;;  %v7611_v58 = vld [vmem:[%s8967_s1 + $0x118] sm:$0xff]  }
  0x1e   : > { %6907 = vmatpush3.bf16.msra.mxu1 %v7564_v9  ;;  %6884 = vmatprep.subr.bf16.mxu0 %v7565_v10  ;;  %v7619_v56 = vld [vmem:[%s7963_s10 + $0x80] sm:$0xff]   ;;  %v7612_v59 = vld [vmem:[%s8967_s1 + $0x158] sm:$0xff]   ;;  %v7613_v60 = vld [vmem:[%s8967_s1 + $0x110] sm:$0xff]  }
  0x1f   : > { %6908 = vmatprep.subr.bf16.mxu1 %v7566_v11  ;;  %v7620_v57 = vld [vmem:[%s7963_s10 + $0xa0] sm:$0xff]   ;;  %v7614_v61 = vld [vmem:[%s8967_s1 + $0x150] sm:$0xff]   ;;  %v7615_v62 = vld [vmem:[%s8967_s1 + $0x108] sm:$0xff]  }
  0x20   : > { %v7616_v63 = vld [vmem:[%s8967_s1 + $0x148] sm:$0xff]   ;;  %v7617_v0 = vld [vmem:[%s8967_s1 + $0x100] sm:$0xff]   ;;  %v7623_v3 = vld [vmem:[%s8967_s1 + $0x1b8] sm:$0xff]  }
  0x21   : > { %6885 = vmatpush3.bf16.msra.mxu0 %v7565_v10  ;;  %v7618_v1 = vld [vmem:[%s8967_s1 + $0x140] sm:$0xff]   ;;  %v7621_v2 = vld [vmem:[%s7963_s10 + $0x88] sm:$0xff]   ;;  %v7624_v4 = vld [vmem:[%s8967_s1 + $0x38] sm:$0xff]  }
  0x22   : > { %6909 = vmatpush3.bf16.msra.mxu1 %v7566_v11  ;;  %6886 = vmatprep.subr.bf16.mxu0 %v7567_v14  ;;  %v7622_v5 = vld [vmem:[%s7963_s10 + $0xa8] sm:$0xff]   ;;  %v7625_v6 = vld [vmem:[%s8967_s1 + $0x1b0] sm:$0xff]   ;;  %v7628_v10 = vld [vmem:[%s7963_s10 + $0x98] sm:$0xff]  }
  0x23   : > { %6910 = vmatprep.subr.bf16.mxu1 %v7568_v15  ;;  %v7626_v7 = vld [vmem:[%s8967_s1 + $0x30] sm:$0xff]   ;;  %v7629_v11 = vld [vmem:[%s8967_s1 + $0x1a8] sm:$0xff]   ;;  %v7632_v13 = vld [vmem:[%s7963_s10 + $0xb8] sm:$0xff]  }
  0x24   : > { %v7627_v8 = vld [vmem:[%s7963_s10 + $0x90] sm:$0xff]   ;;  %v7630_v12 = vld [vmem:[%s8967_s1 + $0x28] sm:$0xff]  }
  0x25   : > { %6887 = vmatpush3.bf16.msra.mxu0 %v7567_v14  ;;  %v7631_v9 = vld [vmem:[%s7963_s10 + $0xb0] sm:$0xff]   ;;  %v7633_v14 = vld [vmem:[%s8967_s1 + $0x1a0] sm:$0xff]  }
  0x26   : > { %6911 = vmatpush3.bf16.msra.mxu1 %v7568_v15  ;;  %6888 = vmatprep.subr.bf16.mxu0 %v7569_v16  ;;  %v7634_v15 = vld [vmem:[%s8967_s1 + $0x20] sm:$0xff]  }
  0x27   : > { %6912 = vmatprep.subr.bf16.mxu1 %v7570_v17 }
  0x29   : > { %6889 = vmatpush3.bf16.msra.mxu0 %v7569_v16  ;;  %v7643_v16 = vld [vmem:[%s7963_s10 + $0xc0] sm:$0xff]  }
  0x2a   : > { %6913 = vmatpush3.bf16.msra.mxu1 %v7570_v17  ;;  %6922 = vmatprep.subr.bf16.mxu0 %v7575_v19  ;;  %v7644_v17 = vld [vmem:[%s7963_s10 + $0xe0] sm:$0xff]  }
  0x2b   : > { %6946 = vmatprep.subr.bf16.mxu1 %v7576_v20 }
  0x2c   : > { %6891 = vmatmul.mubr.bf16.vlgmr.msra.gmra.mxu0 %v7573_v18  ;;  %v7635_v18 = vld [vmem:[%s8967_s1 + $0x198] sm:$0xff]  }
  0x2d   : > { %6915 = vmatmul.mubr.bf16.vlgmr.msra.gmra.mxu1 %v7574_v21  ;;  %6923 = vmatpush3.bf16.msra.mxu0 %v7575_v19  ;;  %v7636_v19 = vld [vmem:[%s8967_s1 + $0x18] sm:$0xff]   ;;  %v7638_v21 = vld [vmem:[%s8967_s1 + $0x10] sm:$0xff]  }
  0x2e   : > { %6947 = vmatpush3.bf16.msra.mxu1 %v7576_v20  ;;  %6924 = vmatprep.subr.bf16.mxu0 %v7577_v22  ;;  %v7637_v20 = vld [vmem:[%s8967_s1 + $0x190] sm:$0xff]  }
  0x2f   : > { %6948 = vmatprep.subr.bf16.mxu1 %v7578_v23  ;;  %6894 = vmatprep.mubr.bf16.mxu0 %v7585_v24  ;;  %v7641_v24 = vld [vmem:[%s8967_s1 + $0x180] sm:$0xff]  }
  0x30   : > { %6918 = vmatprep.mubr.bf16.mxu1 %v7586_v25  ;;  %v7642_v25 = vld [vmem:[%s8967_s1] sm:$0xff]  }
  0x31   : > { %6925 = vmatpush3.bf16.msra.mxu0 %v7577_v22  ;;  %v7639_v22 = vld [vmem:[%s8967_s1 + $0x188] sm:$0xff]  }
  0x32   : > { %6949 = vmatpush3.bf16.msra.mxu1 %v7578_v23  ;;  %6926 = vmatprep.subr.bf16.mxu0 %v7579_v26  ;;  %v7640_v23 = vld [vmem:[%s8967_s1 + $0x8] sm:$0xff]  }
  0x33   : > { %6950 = vmatprep.subr.bf16.mxu1 %v7580_v27 }
  0x34   : > { %6895 = vmatmul.mubr.bf16.gmra.mxu0 %v7587_v29  ;;  %v7646_v29 = vld [vmem:[%s7963_s10 + $0xe8] sm:$0xff]  }
  0x35   : > { %6927 = vmatpush3.bf16.msra.mxu0 %v7579_v26  ;;  %6919 = vmatmul.mubr.bf16.gmra.mxu1 %v7588_v30  ;;  %v7645_v26 = vld [vmem:[%s7963_s10 + $0xc8] sm:$0xff]   ;;  %v7649_v30 = vld [vmem:[%s8967_s1 + $0x70] sm:$0xff]  }
  0x36   : > { %6951 = vmatpush3.bf16.msra.mxu1 %v7580_v27  ;;  %6928 = vmatprep.subr.bf16.mxu0 %v7581_v28  ;;  %v7647_v27 = vld [vmem:[%s8967_s1 + $0x78] sm:$0xff]  }
  0x37   : > { %6952 = vmatprep.subr.bf16.mxu1 %v7582_v31  ;;  %6938 = vmatprep.mubr.bf16.mxu0 %v7595_v32  ;;  %v7651_v32 = vld [vmem:[%s7963_s10 + $0xd0] sm:$0xff]  }
  0x38   : > { %6962 = vmatprep.mubr.bf16.mxu1 %v7596_v33  ;;  %v7659_v33 = vld [vmem:[%s7963_s10 + $0xf0] sm:$0xff]  }
  0x39   : > { %6929 = vmatpush3.bf16.msra.mxu0 %v7581_v28  ;;  %v7648_v28 = vld [vmem:[%s8967_s1 + $0xb8] sm:$0xff]  }
  0x3a   : > { %6953 = vmatpush3.bf16.msra.mxu1 %v7582_v31  ;;  %6930 = vmatprep.subr.bf16.mxu0 %v7583_v34  ;;  %v7650_v31 = vld [vmem:[%s8967_s1 + $0xb0] sm:$0xff]  }
  0x3b   : > { %6954 = vmatprep.subr.bf16.mxu1 %v7584_v35 }
  0x3d   : > { %6931 = vmatpush3.bf16.msra.mxu0 %v7583_v34  ;;  %v7652_v34 = vld [vmem:[%s7963_s10 + $0xd8] sm:$0xff]  }
  0x3e   : > { %6955 = vmatpush3.bf16.msra.mxu1 %v7584_v35  ;;  %6932 = vmatprep.subr.bf16.mxu0 %v7589_v36  ;;  %v7653_v35 = vld [vmem:[%s8967_s1 + $0x68] sm:$0xff]  }
  0x3f   : > { %6956 = vmatprep.subr.bf16.mxu1 %v7590_v37 }
  0x41   : > { %6933 = vmatpush3.bf16.msra.mxu0 %v7589_v36  ;;  %v7654_v36 = vld [vmem:[%s8967_s1 + $0xa8] sm:$0xff]  }
  0x42   : > { %6957 = vmatpush3.bf16.msra.mxu1 %v7590_v37  ;;  %6934 = vmatprep.subr.bf16.mxu0 %v7591_v38  ;;  %v7655_v37 = vld [vmem:[%s8967_s1 + $0x60] sm:$0xff]  }
  0x43   : > { %6958 = vmatprep.subr.bf16.mxu1 %v7592_v39 }
  0x45   : > { %6935 = vmatpush3.bf16.msra.mxu0 %v7591_v38  ;;  %v7662_v38 = vld [vmem:[%s7963_s10 + $0xf8] sm:$0xff]  }
  0x46   : > { %6959 = vmatpush3.bf16.msra.mxu1 %v7592_v39  ;;  %6936 = vmatprep.subr.bf16.mxu0 %v7593_v40  ;;  %v7656_v39 = vld [vmem:[%s8967_s1 + $0xa0] sm:$0xff]  }
  0x47   : > { %6960 = vmatprep.subr.bf16.mxu1 %v7594_v41 }
  0x49   : > { %6937 = vmatpush3.bf16.msra.mxu0 %v7593_v40  ;;  %v7667_v40 = vld [vmem:[%s7963_s10 + $0x100] sm:$0xff]  }
  0x4a   : > { %6961 = vmatpush3.bf16.msra.mxu1 %v7594_v41  ;;  %6970 = vmatprep.subr.bf16.mxu0 %v7599_v43  ;;  %v7668_v41 = vld [vmem:[%s7963_s10 + $0x120] sm:$0xff]  }
  0x4b   : > { %6994 = vmatprep.subr.bf16.mxu1 %v7600_v44 }
  0x4c   : > { %6939 = vmatmul.mubr.bf16.vlgmr.msra.gmra.mxu0 %v7597_v42  ;;  %v7657_v42 = vld [vmem:[%s8967_s1 + $0x58] sm:$0xff]  }
  0x4d   : > { %6963 = vmatmul.mubr.bf16.vlgmr.msra.gmra.mxu1 %v7598_v45  ;;  %6971 = vmatpush3.bf16.msra.mxu0 %v7599_v43  ;;  %v7658_v43 = vld [vmem:[%s8967_s1 + $0x98] sm:$0xff]   ;;  %v7661_v45 = vld [vmem:[%s8967_s1 + $0x90] sm:$0xff]  }
  0x4e   : > { %6995 = vmatpush3.bf16.msra.mxu1 %v7600_v44  ;;  %6972 = vmatprep.subr.bf16.mxu0 %v7601_v46  ;;  %v7660_v44 = vld [vmem:[%s8967_s1 + $0x50] sm:$0xff]  }
  0x4f   : > { %6996 = vmatprep.subr.bf16.mxu1 %v7602_v47  ;;  %6942 = vmatprep.mubr.bf16.mxu0 %v7603_v48  ;;  %v7665_v48 = vld [vmem:[%s8967_s1 + $0x40] sm:$0xff]  }
  0x50   : > { %6966 = vmatprep.mubr.bf16.mxu1 %v7607_v49  ;;  %v7666_v49 = vld [vmem:[%s8967_s1 + $0x80] sm:$0xff]  }
  0x51   : > { %6973 = vmatpush3.bf16.msra.mxu0 %v7601_v46  ;;  %v7663_v46 = vld [vmem:[%s8967_s1 + $0x48] sm:$0xff]  }
  0x52   : > { %6997 = vmatpush3.bf16.msra.mxu1 %v7602_v47  ;;  %6974 = vmatprep.subr.bf16.mxu0 %v7605_v51  ;;  %v7664_v47 = vld [vmem:[%s8967_s1 + $0x88] sm:$0xff]  }
  0x53   : > { %6998 = vmatprep.subr.bf16.mxu1 %v7606_v52 }
  0x54   : > { %6943 = vmatmul.mubr.bf16.gmra.mxu0 %v7604_v50  ;;  %v7669_v50 = vld [vmem:[%s7963_s10 + $0x108] sm:$0xff]  }
  0x55   : > { %6975 = vmatpush3.bf16.msra.mxu0 %v7605_v51  ;;  %6967 = vmatmul.mubr.bf16.gmra.mxu1 %v7608_v53  ;;  %v7671_v51 = vld [vmem:[%s8967_s1 + $0xf8] sm:$0xff]   ;;  %v7670_v53 = vld [vmem:[%s7963_s10 + $0x128] sm:$0xff]  }
  0x56   : > { %6999 = vmatpush3.bf16.msra.mxu1 %v7606_v52  ;;  %6976 = vmatprep.subr.bf16.mxu0 %v7609_v54  ;;  %v7672_v52 = vld [vmem:[%s8967_s1 + $0x138] sm:$0xff]  }
  0x57   : > { %7000 = vmatprep.subr.bf16.mxu1 %v7610_v55  ;;  %6986 = vmatprep.mubr.bf16.mxu0 %v7619_v56  ;;  %v7675_v56 = vld [vmem:[%s7963_s10 + $0x110] sm:$0xff]  }
  0x58   : > { %7010 = vmatprep.mubr.bf16.mxu1 %v7620_v57  ;;  %v7679_v57 = vld [vmem:[%s7963_s10 + $0x130] sm:$0xff]  }
  0x59   : > { %6977 = vmatpush3.bf16.msra.mxu0 %v7609_v54  ;;  %v7673_v54 = vld [vmem:[%s8967_s1 + $0xf0] sm:$0xff]  }
  0x5a   : > { %7001 = vmatpush3.bf16.msra.mxu1 %v7610_v55  ;;  %6978 = vmatprep.subr.bf16.mxu0 %v7611_v58  ;;  %v7674_v55 = vld [vmem:[%s8967_s1 + $0x130] sm:$0xff]  }
  0x5b   : > { %7002 = vmatprep.subr.bf16.mxu1 %v7612_v59 }
  0x5d   : > { %6979 = vmatpush3.bf16.msra.mxu0 %v7611_v58  ;;  %v7676_v58 = vld [vmem:[%s7963_s10 + $0x118] sm:$0xff]  }
  0x5e   : > { %7003 = vmatpush3.bf16.msra.mxu1 %v7612_v59  ;;  %6980 = vmatprep.subr.bf16.mxu0 %v7613_v60  ;;  %v7677_v59 = vld [vmem:[%s8967_s1 + $0xe8] sm:$0xff]  }
  0x5f   : > { %7004 = vmatprep.subr.bf16.mxu1 %v7614_v61 }
  0x61   : > { %6981 = vmatpush3.bf16.msra.mxu0 %v7613_v60  ;;  %v7678_v60 = vld [vmem:[%s8967_s1 + $0x128] sm:$0xff]  }
  0x62   : > { %7005 = vmatpush3.bf16.msra.mxu1 %v7614_v61  ;;  %6982 = vmatprep.subr.bf16.mxu0 %v7615_v62  ;;  %v7680_v61 = vld [vmem:[%s7963_s10 + $0x138] sm:$0xff]  }
  0x63   : > { %7006 = vmatprep.subr.bf16.mxu1 %v7616_v63 }
  0x65   : > { %6983 = vmatpush3.bf16.msra.mxu0 %v7615_v62  ;;  %v7681_v62 = vld [vmem:[%s8967_s1 + $0xe0] sm:$0xff]  }
  0x66   : > { %7007 = vmatpush3.bf16.msra.mxu1 %v7616_v63  ;;  %6984 = vmatprep.subr.bf16.mxu0 %v7617_v0  ;;  %v7682_v63 = vld [vmem:[%s8967_s1 + $0x120] sm:$0xff]  }
  0x67   : > { %7008 = vmatprep.subr.bf16.mxu1 %v7618_v1 }
  0x69   : > { %6985 = vmatpush3.bf16.msra.mxu0 %v7617_v0  ;;  %v7691_v0 = vld [vmem:[%s7963_s10 + $0x140] sm:$0xff]  }
  0x6a   : > { %7009 = vmatpush3.bf16.msra.mxu1 %v7618_v1  ;;  %7018 = vmatprep.subr.bf16.mxu0 %v7623_v3  ;;  %v7692_v1 = vld [vmem:[%s7963_s10 + $0x160] sm:$0xff]  }
  0x6b   : > { %7042 = vmatprep.subr.bf16.mxu1 %v7624_v4 }
  0x6c   : > { %6987 = vmatmul.mubr.bf16.vlgmr.msra.gmra.mxu0 %v7621_v2  ;;  %v7683_v2 = vld [vmem:[%s8967_s1 + $0xd8] sm:$0xff]  }
  0x6d   : > { %7011 = vmatmul.mubr.bf16.vlgmr.msra.gmra.mxu1 %v7622_v5  ;;  %7019 = vmatpush3.bf16.msra.mxu0 %v7623_v3  ;;  %v7684_v3 = vld [vmem:[%s8967_s1 + $0x118] sm:$0xff]   ;;  %v7686_v5 = vld [vmem:[%s8967_s1 + $0x110] sm:$0xff]  }
  0x6e   : > { %7043 = vmatpush3.bf16.msra.mxu1 %v7624_v4  ;;  %7020 = vmatprep.subr.bf16.mxu0 %v7625_v6  ;;  %v7685_v4 = vld [vmem:[%s8967_s1 + $0xd0] sm:$0xff]  }
  0x6f   : > { %7044 = vmatprep.subr.bf16.mxu1 %v7626_v7  ;;  %6990 = vmatprep.mubr.bf16.mxu0 %v7627_v8  ;;  %v7689_v8 = vld [vmem:[%s8967_s1 + $0xc0] sm:$0xff]  }
  0x70   : > { %7014 = vmatprep.mubr.bf16.mxu1 %v7631_v9  ;;  %v7690_v9 = vld [vmem:[%s8967_s1 + $0x100] sm:$0xff]  }
  0x71   : > { %7021 = vmatpush3.bf16.msra.mxu0 %v7625_v6  ;;  %v7687_v6 = vld [vmem:[%s8967_s1 + $0xc8] sm:$0xff]  }
  0x72   : > { %7045 = vmatpush3.bf16.msra.mxu1 %v7626_v7  ;;  %7022 = vmatprep.subr.bf16.mxu0 %v7629_v11  ;;  %v7688_v7 = vld [vmem:[%s8967_s1 + $0x108] sm:$0xff]  }
  0x73   : > { %7046 = vmatprep.subr.bf16.mxu1 %v7630_v12 }
  0x74   : > { %6991 = vmatmul.mubr.bf16.gmra.mxu0 %v7628_v10  ;;  %v7693_v10 = vld [vmem:[%s7963_s10 + $0x148] sm:$0xff]  }
  0x75   : > { %7023 = vmatpush3.bf16.msra.mxu0 %v7629_v11  ;;  %7015 = vmatmul.mubr.bf16.gmra.mxu1 %v7632_v13  ;;  %v7695_v11 = vld [vmem:[%s8967_s1 + $0x178] sm:$0xff]   ;;  %v7694_v13 = vld [vmem:[%s7963_s10 + $0x168] sm:$0xff]  }
  0x76   : > { %7047 = vmatpush3.bf16.msra.mxu1 %v7630_v12  ;;  %7024 = vmatprep.subr.bf16.mxu0 %v7633_v14  ;;  %v7696_v12 = vld [vmem:[%s8967_s1 + $0x1b8] sm:$0xff]  }
  0x77   : > { %7048 = vmatprep.subr.bf16.mxu1 %v7634_v15  ;;  %7034 = vmatprep.mubr.bf16.mxu0 %v7643_v16  ;;  %v7699_v16 = vld [vmem:[%s7963_s10 + $0x150] sm:$0xff]  }
  0x78   : > { %7058 = vmatprep.mubr.bf16.mxu1 %v7644_v17  ;;  %v7703_v17 = vld [vmem:[%s7963_s10 + $0x170] sm:$0xff]  }
  0x79   : > { %7025 = vmatpush3.bf16.msra.mxu0 %v7633_v14  ;;  %v7697_v14 = vld [vmem:[%s8967_s1 + $0x170] sm:$0xff]  }
  0x7a   : > { %7049 = vmatpush3.bf16.msra.mxu1 %v7634_v15  ;;  %7026 = vmatprep.subr.bf16.mxu0 %v7635_v18  ;;  %v7698_v15 = vld [vmem:[%s8967_s1 + $0x1b0] sm:$0xff]  }
  0x7b   : > { %7050 = vmatprep.subr.bf16.mxu1 %v7636_v19 }
  0x7d   : > { %7027 = vmatpush3.bf16.msra.mxu0 %v7635_v18  ;;  %v7700_v18 = vld [vmem:[%s7963_s10 + $0x158] sm:$0xff]  }
  0x7e   : > { %7051 = vmatpush3.bf16.msra.mxu1 %v7636_v19  ;;  %7028 = vmatprep.subr.bf16.mxu0 %v7637_v20  ;;  %v7701_v19 = vld [vmem:[%s8967_s1 + $0x168] sm:$0xff]  }
  0x7f   : > { %7052 = vmatprep.subr.bf16.mxu1 %v7638_v21 }
  0x81   : > { %7029 = vmatpush3.bf16.msra.mxu0 %v7637_v20  ;;  %v7702_v20 = vld [vmem:[%s8967_s1 + $0x1a8] sm:$0xff]  }
  0x82   : > { %7053 = vmatpush3.bf16.msra.mxu1 %v7638_v21  ;;  %7030 = vmatprep.subr.bf16.mxu0 %v7639_v22  ;;  %v7704_v21 = vld [vmem:[%s7963_s10 + $0x178] sm:$0xff]  }
  0x83   : > { %7054 = vmatprep.subr.bf16.mxu1 %v7640_v23 }
  0x85   : > { %7031 = vmatpush3.bf16.msra.mxu0 %v7639_v22  ;;  %v7705_v22 = vld [vmem:[%s8967_s1 + $0x160] sm:$0xff]  }
  0x86   : > { %7055 = vmatpush3.bf16.msra.mxu1 %v7640_v23  ;;  %7032 = vmatprep.subr.bf16.mxu0 %v7641_v24  ;;  %v7706_v23 = vld [vmem:[%s8967_s1 + $0x1a0] sm:$0xff]  }
  0x87   : > { %7056 = vmatprep.subr.bf16.mxu1 %v7642_v25 }
  0x89   : > { %7033 = vmatpush3.bf16.msra.mxu0 %v7641_v24  ;;  %v7715_v24 = vld [vmem:[%s7963_s10 + $0x180] sm:$0xff]  }
  0x8a   : > { %7057 = vmatpush3.bf16.msra.mxu1 %v7642_v25  ;;  %7066 = vmatprep.subr.bf16.mxu0 %v7647_v27  ;;  %v7716_v25 = vld [vmem:[%s7963_s10 + $0x1a0] sm:$0xff]  }
  0x8b   : > { %7090 = vmatprep.subr.bf16.mxu1 %v7648_v28 }
  0x8c   : > { %7035 = vmatmul.mubr.bf16.vlgmr.msra.gmra.mxu0 %v7645_v26  ;;  %v7707_v26 = vld [vmem:[%s8967_s1 + $0x158] sm:$0xff]  }
  0x8d   : > { %7059 = vmatmul.mubr.bf16.vlgmr.msra.gmra.mxu1 %v7646_v29  ;;  %7067 = vmatpush3.bf16.msra.mxu0 %v7647_v27  ;;  %v7708_v27 = vld [vmem:[%s8967_s1 + $0x198] sm:$0xff]   ;;  %v7710_v29 = vld [vmem:[%s8967_s1 + $0x190] sm:$0xff]  }
  0x8e   : > { %7091 = vmatpush3.bf16.msra.mxu1 %v7648_v28  ;;  %7068 = vmatprep.subr.bf16.mxu0 %v7649_v30  ;;  %v7709_v28 = vld [vmem:[%s8967_s1 + $0x150] sm:$0xff]  }
  0x8f   : > { %7092 = vmatprep.subr.bf16.mxu1 %v7650_v31  ;;  %7038 = vmatprep.mubr.bf16.mxu0 %v7651_v32  ;;  %v7713_v32 = vld [vmem:[%s8967_s1 + $0x140] sm:$0xff]  }
  0x90   : > { %7062 = vmatprep.mubr.bf16.mxu1 %v7659_v33  ;;  %v7714_v33 = vld [vmem:[%s8967_s1 + $0x180] sm:$0xff]  }
  0x91   : > { %7069 = vmatpush3.bf16.msra.mxu0 %v7649_v30  ;;  %v7711_v30 = vld [vmem:[%s8967_s1 + $0x148] sm:$0xff]  }
  0x92   : > { %7093 = vmatpush3.bf16.msra.mxu1 %v7650_v31  ;;  %7070 = vmatprep.subr.bf16.mxu0 %v7653_v35  ;;  %v7712_v31 = vld [vmem:[%s8967_s1 + $0x188] sm:$0xff]  }
  0x93   : > { %7094 = vmatprep.subr.bf16.mxu1 %v7654_v36 }
  0x94   : > { %7039 = vmatmul.mubr.bf16.gmra.mxu0 %v7652_v34  ;;  %v7717_v34 = vld [vmem:[%s7963_s10 + $0x188] sm:$0xff]  }
  0x95   : > { %7071 = vmatpush3.bf16.msra.mxu0 %v7653_v35  ;;  %7063 = vmatmul.mubr.bf16.gmra.mxu1 %v7662_v38  ;;  %v7719_v35 = vld [vmem:[%s8967_s1 + $0x38] sm:$0xff]   ;;  %v7721_v38 = vld [vmem:[%s8967_s1 + $0x30] sm:$0xff]  }
  0x96   : > { %7095 = vmatpush3.bf16.msra.mxu1 %v7654_v36  ;;  %7072 = vmatprep.subr.bf16.mxu0 %v7655_v37  ;;  %v7720_v36 = vld [vmem:[%s8967_s1 + $0x78] sm:$0xff]  }
  0x97   : > { %7096 = vmatprep.subr.bf16.mxu1 %v7656_v39  ;;  %7082 = vmatprep.mubr.bf16.mxu0 %v7667_v40  ;;  %v7723_v40 = vld [vmem:[%s7963_s10 + $0x190] sm:$0xff]  }
  0x98   : > { %7106 = vmatprep.mubr.bf16.mxu1 %v7668_v41 }
  0x99   : > { %7073 = vmatpush3.bf16.msra.mxu0 %v7655_v37  ;;  %v7718_v37 = vld [vmem:[%s7963_s10 + $0x1a8] sm:$0xff]  }
  0x9a   : > { %7097 = vmatpush3.bf16.msra.mxu1 %v7656_v39  ;;  %7074 = vmatprep.subr.bf16.mxu0 %v7657_v42  ;;  %v7722_v39 = vld [vmem:[%s8967_s1 + $0x70] sm:$0xff]  }
  0x9b   : > { %7098 = vmatprep.subr.bf16.mxu1 %v7658_v43 }
  0x9d   : > { %7075 = vmatpush3.bf16.msra.mxu0 %v7657_v42  ;;  %v7727_v42 = vld [vmem:[%s7963_s10 + $0x1b0] sm:$0xff]  }
  0x9e   : > { %7099 = vmatpush3.bf16.msra.mxu1 %v7658_v43  ;;  %7076 = vmatprep.subr.bf16.mxu0 %v7660_v44 }
  0x9f   : > { %7100 = vmatprep.subr.bf16.mxu1 %v7661_v45 }
  0xa1   : > { %7077 = vmatpush3.bf16.msra.mxu0 %v7660_v44 }
  0xa2   : > { %7101 = vmatpush3.bf16.msra.mxu1 %v7661_v45  ;;  %7078 = vmatprep.subr.bf16.mxu0 %v7663_v46 }
  0xa3   : > { %7102 = vmatprep.subr.bf16.mxu1 %v7664_v47 }
  0xa5   : > { %7079 = vmatpush3.bf16.msra.mxu0 %v7663_v46  ;;  %v7724_v46 = vld [vmem:[%s7963_s10 + $0x198] sm:$0xff]  }
  0xa6   : > { %7103 = vmatpush3.bf16.msra.mxu1 %v7664_v47  ;;  %7080 = vmatprep.subr.bf16.mxu0 %v7665_v48  ;;  %v7725_v47 = vld [vmem:[%s8967_s1 + $0x28] sm:$0xff]  }
  0xa7   : > { %7104 = vmatprep.subr.bf16.mxu1 %v7666_v49 }
  0xa9   : > { %7081 = vmatpush3.bf16.msra.mxu0 %v7665_v48 }
  0xaa   : > { %7105 = vmatpush3.bf16.msra.mxu1 %v7666_v49  ;;  %7114 = vmatprep.subr.bf16.mxu0 %v7671_v51  ;;  %v7726_v49 = vld [vmem:[%s8967_s1 + $0x68] sm:$0xff]  }
  0xab   : > { %7138 = vmatprep.subr.bf16.mxu1 %v7672_v52 }
  0xac   : > { %7083 = vmatmul.mubr.bf16.vlgmr.msra.gmra.mxu0 %v7669_v50 }
  0xad   : > { %7107 = vmatmul.mubr.bf16.vlgmr.msra.gmra.mxu1 %v7670_v53  ;;  %7115 = vmatpush3.bf16.msra.mxu0 %v7671_v51 }
  0xae   : > { %7139 = vmatpush3.bf16.msra.mxu1 %v7672_v52  ;;  %7116 = vmatprep.subr.bf16.mxu0 %v7673_v54  ;;  %v7728_v52 = vld [vmem:[%s7963_s10 + $0x1b8] sm:$0xff]  }
  0xaf   : > { %7140 = vmatprep.subr.bf16.mxu1 %v7674_v55  ;;  %7086 = vmatprep.mubr.bf16.mxu0 %v7675_v56 }
  0xb0   : > { %7110 = vmatprep.mubr.bf16.mxu1 %v7679_v57  ;;  %v7730_v57 = vld [vmem:[%s8967_s1 + $0x60] sm:$0xff]  }
  0xb1   : > { %7117 = vmatpush3.bf16.msra.mxu0 %v7673_v54  ;;  %v7729_v54 = vld [vmem:[%s8967_s1 + $0x20] sm:$0xff]  }
  0xb2   : > { %7141 = vmatpush3.bf16.msra.mxu1 %v7674_v55  ;;  %7118 = vmatprep.subr.bf16.mxu0 %v7677_v59 }
  0xb3   : > { %7142 = vmatprep.subr.bf16.mxu1 %v7678_v60 }
  0xb4   : > { %7087 = vmatmul.mubr.bf16.gmra.mxu0 %v7676_v58 }
  0xb5   : > { %7119 = vmatpush3.bf16.msra.mxu0 %v7677_v59  ;;  %7111 = vmatmul.mubr.bf16.gmra.mxu1 %v7680_v61  ;;  %v7739_v59 = vld [vmem:[%s7963_s10 + $0x1c0] sm:$0xff]  }
  0xb6   : > { %7143 = vmatpush3.bf16.msra.mxu1 %v7678_v60  ;;  %7120 = vmatprep.subr.bf16.mxu0 %v7681_v62 }
  0xb7   : > { %7144 = vmatprep.subr.bf16.mxu1 %v7682_v63  ;;  %7130 = vmatprep.mubr.bf16.mxu0 %v7691_v0  ;;  %v7731_v0 = vld [vmem:[%s8967_s1 + $0x18] sm:$0xff]  }
  0xb8   : > { %7154 = vmatprep.mubr.bf16.mxu1 %v7692_v1 }
  0xb9   : > { %7121 = vmatpush3.bf16.msra.mxu0 %v7681_v62  ;;  %v7740_v62 = vld [vmem:[%s7963_s10 + $0x1e0] sm:$0xff]  }
  0xba   : > { %7145 = vmatpush3.bf16.msra.mxu1 %v7682_v63  ;;  %7122 = vmatprep.subr.bf16.mxu0 %v7683_v2 }
  0xbb   : > { %7146 = vmatprep.subr.bf16.mxu1 %v7684_v3 }
  0xbd   : > { %7123 = vmatpush3.bf16.msra.mxu0 %v7683_v2 }
  0xbe   : > { %7147 = vmatpush3.bf16.msra.mxu1 %v7684_v3  ;;  %7124 = vmatprep.subr.bf16.mxu0 %v7685_v4  ;;  %v7732_v3 = vld [vmem:[%s8967_s1 + $0x58] sm:$0xff]  }
  0xbf   : > { %7148 = vmatprep.subr.bf16.mxu1 %v7686_v5 }
  0xc1   : > { %7125 = vmatpush3.bf16.msra.mxu0 %v7685_v4 }
  0xc2   : > { %7149 = vmatpush3.bf16.msra.mxu1 %v7686_v5  ;;  %7126 = vmatprep.subr.bf16.mxu0 %v7687_v6 }
  0xc3   : > { %7150 = vmatprep.subr.bf16.mxu1 %v7688_v7 }
  0xc5   : > { %7127 = vmatpush3.bf16.msra.mxu0 %v7687_v6 }
  0xc6   : > { %7151 = vmatpush3.bf16.msra.mxu1 %v7688_v7  ;;  %7128 = vmatprep.subr.bf16.mxu0 %v7689_v8 }
  0xc7   : > { %7152 = vmatprep.subr.bf16.mxu1 %v7690_v9 }
  0xc9   : > { %7129 = vmatpush3.bf16.msra.mxu0 %v7689_v8  ;;  %v7733_v8 = vld [vmem:[%s8967_s1 + $0x10] sm:$0xff]  }
  0xca   : > { %7153 = vmatpush3.bf16.msra.mxu1 %v7690_v9  ;;  %7162 = vmatprep.subr.bf16.mxu0 %v7695_v11 }
  0xcb   : > { %7186 = vmatprep.subr.bf16.mxu1 %v7696_v12 }
  0xcc   : > { %7131 = vmatmul.mubr.bf16.vlgmr.msra.gmra.mxu0 %v7693_v10 }
  0xcd   : > { %7155 = vmatmul.mubr.bf16.vlgmr.msra.gmra.mxu1 %v7694_v13  ;;  %7163 = vmatpush3.bf16.msra.mxu0 %v7695_v11  ;;  %v7734_v11 = vld [vmem:[%s8967_s1 + $0x50] sm:$0xff]  }
  0xce   : > { %7187 = vmatpush3.bf16.msra.mxu1 %v7696_v12  ;;  %7164 = vmatprep.subr.bf16.mxu0 %v7697_v14 }
  0xcf   : > { %7188 = vmatprep.subr.bf16.mxu1 %v7698_v15  ;;  %7134 = vmatprep.mubr.bf16.mxu0 %v7699_v16  ;;  %v7737_v16 = vld [vmem:[%s8967_s1] sm:$0xff]  }
  0xd0   : > { %7158 = vmatprep.mubr.bf16.mxu1 %v7703_v17  ;;  %v7738_v17 = vld [vmem:[%s8967_s1 + $0x40] sm:$0xff]  }
  0xd1   : > { %7165 = vmatpush3.bf16.msra.mxu0 %v7697_v14  ;;  %v7735_v14 = vld [vmem:[%s8967_s1 + $0x8] sm:$0xff]  }
  0xd2   : > { %7189 = vmatpush3.bf16.msra.mxu1 %v7698_v15  ;;  %7166 = vmatprep.subr.bf16.mxu0 %v7701_v19  ;;  %v7736_v15 = vld [vmem:[%s8967_s1 + $0x48] sm:$0xff]  }
  0xd3   : > { %7190 = vmatprep.subr.bf16.mxu1 %v7702_v20 }
  0xd4   : > { %7135 = vmatmul.mubr.bf16.gmra.mxu0 %v7700_v18  ;;  %v7741_v18 = vld [vmem:[%s7963_s10 + $0x1c8] sm:$0xff]  }
  0xd5   : > { %7167 = vmatpush3.bf16.msra.mxu0 %v7701_v19  ;;  %7159 = vmatmul.mubr.bf16.gmra.mxu1 %v7704_v21  ;;  %v7743_v19 = vld [vmem:[%s8967_s1 + $0xb8] sm:$0xff]   ;;  %v7742_v21 = vld [vmem:[%s7963_s10 + $0x1e8] sm:$0xff]  }
  0xd6   : > { %7191 = vmatpush3.bf16.msra.mxu1 %v7702_v20  ;;  %7168 = vmatprep.subr.bf16.mxu0 %v7705_v22  ;;  %v7744_v20 = vld [vmem:[%s8967_s1 + $0xf8] sm:$0xff]  }
  0xd7   : > { %7192 = vmatprep.subr.bf16.mxu1 %v7706_v23  ;;  %7178 = vmatprep.mubr.bf16.mxu0 %v7715_v24  ;;  %v7753_v24 = vld [vmem:[%s7963_s10 + $0x1d0] sm:$0xff]  }
  0xd8   : > { %7202 = vmatprep.mubr.bf16.mxu1 %v7716_v25 }
  0xd9   : > { %7169 = vmatpush3.bf16.msra.mxu0 %v7705_v22  ;;  %v7745_v22 = vld [vmem:[%s8967_s1 + $0xb0] sm:$0xff]  }
  0xda   : > { %7193 = vmatpush3.bf16.msra.mxu1 %v7706_v23  ;;  %7170 = vmatprep.subr.bf16.mxu0 %v7707_v26  ;;  %v7746_v23 = vld [vmem:[%s8967_s1 + $0xf0] sm:$0xff]  }
  0xdb   : > { %7194 = vmatprep.subr.bf16.mxu1 %v7708_v27 }
  0xdd   : > { %7171 = vmatpush3.bf16.msra.mxu0 %v7707_v26  ;;  %v7754_v26 = vld [vmem:[%s7963_s10 + $0x1f0] sm:$0xff]  }
  0xde   : > { %7195 = vmatpush3.bf16.msra.mxu1 %v7708_v27  ;;  %7172 = vmatprep.subr.bf16.mxu0 %v7709_v28 }
  0xdf   : > { %7196 = vmatprep.subr.bf16.mxu1 %v7710_v29 }
  0xe1   : > { %7173 = vmatpush3.bf16.msra.mxu0 %v7709_v28 }
  0xe2   : > { %7197 = vmatpush3.bf16.msra.mxu1 %v7710_v29  ;;  %7174 = vmatprep.subr.bf16.mxu0 %v7711_v30 }
  0xe3   : > { %7198 = vmatprep.subr.bf16.mxu1 %v7712_v31 }
  0xe5   : > { %7175 = vmatpush3.bf16.msra.mxu0 %v7711_v30  ;;  %v7747_v30 = vld [vmem:[%s8967_s1 + $0xa8] sm:$0xff]  }
  0xe6   : > { %7199 = vmatpush3.bf16.msra.mxu1 %v7712_v31  ;;  %7176 = vmatprep.subr.bf16.mxu0 %v7713_v32 }
  0xe7   : > { %7200 = vmatprep.subr.bf16.mxu1 %v7714_v33 }
  0xe9   : > { %7177 = vmatpush3.bf16.msra.mxu0 %v7713_v32 }
  0xea   : > { %7201 = vmatpush3.bf16.msra.mxu1 %v7714_v33  ;;  %7210 = vmatprep.subr.bf16.mxu0 %v7719_v35 }
  0xeb   : > { %7234 = vmatprep.subr.bf16.mxu1 %v7720_v36 }
  0xec   : > { %v6892_v41 = vpop.f32.mrf.mxu0  ;;  %7179 = vmatmul.mubr.bf16.vlgmr.msra.gmra.mxu0 %v7717_v34  ;;  %v7748_v34 = vld [vmem:[%s8967_s1 + $0xe8] sm:$0xff]  }
  0xed   : > { %v6916_v43 = vpop.f32.mrf.mxu1  ;;  %7203 = vmatmul.mubr.bf16.vlgmr.msra.gmra.mxu1 %v7718_v37  ;;  %7211 = vmatpush3.bf16.msra.mxu0 %v7719_v35  ;;  %v7755_v37 = vld [vmem:[%s7963_s10 + $0x1d8] sm:$0xff]  }
  0xee   : > { %v8337_v44 = vadd.f32 %v6916_v43, %v6892_v41  ;;  %7235 = vmatpush3.bf16.msra.mxu1 %v7720_v36  ;;  %v302_v45 = vpop.f32.mrf.mxu0  ;;  %7212 = vmatprep.subr.bf16.mxu0 %v7721_v38  ;;  %v7749_v36 = vld [vmem:[%s8967_s1 + $0xa0] sm:$0xff]   ;;  %v7756_v41 = vld [vmem:[%s7963_s10 + $0x1f8] sm:$0xff]  }
  0xef   : > { %v481_v48 = vpop.f32.mrf.mxu1  ;;  %7236 = vmatprep.subr.bf16.mxu1 %v7722_v39  ;;  %7182 = vmatprep.mubr.bf16.mxu0 %v7723_v40  ;;  %v7750_v43 = vld [vmem:[%s8967_s1 + $0xe0] sm:$0xff]  }
  0xf0   : > { %v8346_v50 = vadd.f32 %v481_v48, %v302_v45  ;;  %v6893_v51 = vpop.f32.mrf.mxu0  ;;  %7206 = vmatprep.mubr.bf16.mxu1 %v7727_v42 }
  0xf1   : > { %v6917_v53 = vpop.f32.mrf.mxu1  ;;  %7213 = vmatpush3.bf16.msra.mxu0 %v7721_v38 }
  0xf2   : > { %v8352_v55 = vadd.f32 %v6917_v53, %v6893_v51  ;;  %7237 = vmatpush3.bf16.msra.mxu1 %v7722_v39  ;;  %v305_v56 = vpop.f32.mrf.mxu0  ;;  %7214 = vmatprep.subr.bf16.mxu0 %v7725_v47 }
  0xf3   : > { %v484_v58 = vpop.f32.mrf.mxu1  ;;  %7238 = vmatprep.subr.bf16.mxu1 %v7726_v49 }
  0xf4   : > { %v8358_v60 = vadd.f32 %v484_v58, %v305_v56  ;;  %7183 = vmatmul.mubr.bf16.gmra.mxu0 %v7724_v46  ;;  %v6896_v61 = vpop.f32.mrf.mxu0  ;;  %v7752_v58 = vld [vmem:[%s8967_s1 + $0xd8] sm:$0xff]  }
  0xf5   : > { %7215 = vmatpush3.bf16.msra.mxu0 %v7725_v47  ;;  %7207 = vmatmul.mubr.bf16.gmra.mxu1 %v7728_v52  ;;  %v6920_v63 = vpop.f32.mrf.mxu1  ;;  %v7763_v47 = vld [vmem:[%s7963_s10 + $0x200] sm:$0xff]  }
  0xf6   : > { %7239 = vmatpush3.bf16.msra.mxu1 %v7726_v49  ;;  %7216 = vmatprep.subr.bf16.mxu0 %v7729_v54  ;;  %v8364_v1 = vadd.f32 %v6920_v63, %v6896_v61  ;;  %v318_v2 = vpop.f32.mrf.mxu0  ;;  %v7764_v49 = vld [vmem:[%s7963_s10 + $0x220] sm:$0xff]  }
  0xf7   : > { %7240 = vmatprep.subr.bf16.mxu1 %v7730_v57  ;;  %v497_v4 = vpop.f32.mrf.mxu1  ;;  %7226 = vmatprep.mubr.bf16.mxu0 %v7739_v59 }
  0xf8   : > { %v8369_v5 = vadd.f32 %v497_v4, %v318_v2  ;;  %v6897_v6 = vpop.f32.mrf.mxu0  ;;  %7250 = vmatprep.mubr.bf16.mxu1 %v7740_v62  ;;  %v7758_v4 = vld [vmem:[%s8967_s1 + $0xd0] sm:$0xff]  }
  0xf9   : > { %7217 = vmatpush3.bf16.msra.mxu0 %v7729_v54  ;;  %v6921_v7 = vpop.f32.mrf.mxu1  ;;  %v7751_v54 = vld [vmem:[%s8967_s1 + $0x98] sm:$0xff]  }
  0xfa   : > { %7241 = vmatpush3.bf16.msra.mxu1 %v7730_v57  ;;  %7218 = vmatprep.subr.bf16.mxu0 %v7731_v0  ;;  %v8374_v9 = vadd.f32 %v6921_v7, %v6897_v6  ;;  %v321_v10 = vpop.f32.mrf.mxu0  ;;  %v7759_v6 = vld [vmem:[%s8967_s1 + $0x88] sm:$0xff]  }
  0xfb   : > { %7242 = vmatprep.subr.bf16.mxu1 %v7732_v3  ;;  %v500_v12 = vpop.f32.mrf.mxu1  ;;  %v7760_v7 = vld [vmem:[%s8967_s1 + $0xc8] sm:$0xff]  }
  0xfc   : > { %v8379_v13 = vadd.f32 %v500_v12, %v321_v10  ;;  %v7765_v10 = vld [vmem:[%s7963_s10 + $0x208] sm:$0xff]   ;;  %v7768_v12 = vld [vmem:[%s8967_s1 + $0x178] sm:$0xff]  }
  0xfd   : > { %7219 = vmatpush3.bf16.msra.mxu0 %v7731_v0  ;;  %v7757_v0 = vld [vmem:[%s8967_s1 + $0x90] sm:$0xff]  }
  0xfe   : > { %7243 = vmatpush3.bf16.msra.mxu1 %v7732_v3  ;;  %7220 = vmatprep.subr.bf16.mxu0 %v7733_v8 }
  0xff   : > { %7244 = vmatprep.subr.bf16.mxu1 %v7734_v11 }
 0x101   : > { %7221 = vmatpush3.bf16.msra.mxu0 %v7733_v8  ;;  %v7761_v8 = vld [vmem:[%s8967_s1 + $0x80] sm:$0xff]  }
 0x102   : > { %7245 = vmatpush3.bf16.msra.mxu1 %v7734_v11  ;;  %7222 = vmatprep.subr.bf16.mxu0 %v7735_v14  ;;  %v7767_v11 = vld [vmem:[%s8967_s1 + $0x138] sm:$0xff]  }
 0x103   : > { %7246 = vmatprep.subr.bf16.mxu1 %v7736_v15 }
 0x105   : > { %7223 = vmatpush3.bf16.msra.mxu0 %v7735_v14  ;;  %v7769_v14 = vld [vmem:[%s8967_s1 + $0x130] sm:$0xff]  }
 0x106   : > { %7247 = vmatpush3.bf16.msra.mxu1 %v7736_v15  ;;  %7224 = vmatprep.subr.bf16.mxu0 %v7737_v16  ;;  %v7770_v15 = vld [vmem:[%s8967_s1 + $0x170] sm:$0xff]  }
 0x107   : > { %7248 = vmatprep.subr.bf16.mxu1 %v7738_v17 }
 0x109   : > { %7225 = vmatpush3.bf16.msra.mxu0 %v7737_v16  ;;  %v7771_v16 = vld [vmem:[%s7963_s10 + $0x210] sm:$0xff]  }
 0x10a   : > { %7249 = vmatpush3.bf16.msra.mxu1 %v7738_v17  ;;  %7258 = vmatprep.subr.bf16.mxu0 %v7743_v19 }
 0x10b   : > { %7282 = vmatprep.subr.bf16.mxu1 %v7744_v20 }
 0x10c   : > { %v6940_v25 = vpop.f32.mrf.mxu0  ;;  %7227 = vmatmul.mubr.bf16.vlgmr.msra.gmra.mxu0 %v7741_v18  ;;  %v7775_v18 = vld [vmem:[%s7963_s10 + $0x230] sm:$0xff]  }
 0x10d   : > { %v701_v27 = vadd.f32 %v6940_v25, %v8337_v44  ;;  %v6964_v28 = vpop.f32.mrf.mxu1  ;;  %7251 = vmatmul.mubr.bf16.vlgmr.msra.gmra.mxu1 %v7742_v21  ;;  %7259 = vmatpush3.bf16.msra.mxu0 %v7743_v19 }
 0x10e   : > { %7283 = vmatpush3.bf16.msra.mxu1 %v7744_v20  ;;  %v668_v29 = vpop.f32.mrf.mxu0  ;;  %7260 = vmatprep.subr.bf16.mxu0 %v7745_v22 }
 0x10f   : > { %v8413_v31 = vadd.f32 %v6964_v28, %v701_v27  ;;  %v699_v32 = vadd.f32 %v668_v29, %v8346_v50  ;;  %v855_v33 = vpop.f32.mrf.mxu1  ;;  %7284 = vmatprep.subr.bf16.mxu1 %v7746_v23  ;;  %7230 = vmatprep.mubr.bf16.mxu0 %v7753_v24  ;;  %v7774_v27 = vld [vmem:[%s8967_s1 + $0x168] sm:$0xff]   ;;  %v7776_v29 = vld [vmem:[%s7963_s10 + $0x238] sm:$0xff]  }
 0x110   : > { %v6941_v35 = vpop.f32.mrf.mxu0  ;;  %7254 = vmatprep.mubr.bf16.mxu1 %v7754_v26 }
 0x111   : > { %v8423_v38 = vadd.f32 %v855_v33, %v699_v32  ;;  %v702_v39 = vadd.f32 %v6941_v35, %v8352_v55  ;;  %v6965_v40 = vpop.f32.mrf.mxu1  ;;  %7261 = vmatpush3.bf16.msra.mxu0 %v7745_v22  ;;  %v7772_v22 = vld [vmem:[%s7963_s10 + $0x218] sm:$0xff]   ;;  %v7777_v33 = vld [vmem:[%s8967_s1 + $0x120] sm:$0xff]  }
 0x112   : > { %7285 = vmatpush3.bf16.msra.mxu1 %v7746_v23  ;;  %v671_v42 = vpop.f32.mrf.mxu0  ;;  %7262 = vmatprep.subr.bf16.mxu0 %v7747_v30  ;;  %v7773_v23 = vld [vmem:[%s8967_s1 + $0x128] sm:$0xff]   ;;  %v7778_v35 = vld [vmem:[%s8967_s1 + $0x160] sm:$0xff]  }
 0x113   : > { %v8430_v44 = vadd.f32 %v6965_v40, %v702_v39  ;;  %v700_v45 = vadd.f32 %v671_v42, %v8358_v60  ;;  %v858_v46 = vpop.f32.mrf.mxu1  ;;  %7286 = vmatprep.subr.bf16.mxu1 %v7748_v34  ;;  %v7787_v39 = vld [vmem:[%s7963_s10 + $0x240] sm:$0xff]  }
 0x114   : > { %v6944_v48 = vpop.f32.mrf.mxu0  ;;  %7231 = vmatmul.mubr.bf16.gmra.mxu0 %v7755_v37 }
 0x115   : > { %v8435_v50 = vadd.f32 %v858_v46, %v700_v45  ;;  %v705_v51 = vadd.f32 %v6944_v48, %v8364_v1  ;;  %7263 = vmatpush3.bf16.msra.mxu0 %v7747_v30  ;;  %v6968_v52 = vpop.f32.mrf.mxu1  ;;  %7255 = vmatmul.mubr.bf16.gmra.mxu1 %v7756_v41  ;;  %v7788_v41 = vld [vmem:[%s7963_s10 + $0x260] sm:$0xff]   ;;  %v7779_v46 = vld [vmem:[%s8967_s1 + $0x118] sm:$0xff]  }
 0x116   : > { %7287 = vmatpush3.bf16.msra.mxu1 %v7748_v34  ;;  %v684_v53 = vpop.f32.mrf.mxu0  ;;  %7264 = vmatprep.subr.bf16.mxu0 %v7749_v36 }
 0x117   : > { %v703_v55 = vadd.f32 %v684_v53, %v8369_v5  ;;  %v8442_v56 = vadd.f32 %v6968_v52, %v705_v51  ;;  %v871_v57 = vpop.f32.mrf.mxu1  ;;  %7288 = vmatprep.subr.bf16.mxu1 %v7750_v43  ;;  %7274 = vmatprep.mubr.bf16.mxu0 %v7763_v47 }
 0x118   : > { %v6945_v59 = vpop.f32.mrf.mxu0  ;;  %7298 = vmatprep.mubr.bf16.mxu1 %v7764_v49 }
 0x119   : > { %v706_v60 = vadd.f32 %v6945_v59, %v8374_v9  ;;  %v8448_v61 = vadd.f32 %v871_v57, %v703_v55  ;;  %7265 = vmatpush3.bf16.msra.mxu0 %v7749_v36  ;;  %v6969_v62 = vpop.f32.mrf.mxu1  ;;  %v7762_v9 = vld [vmem:[%s8967_s1 + $0xc0] sm:$0xff]  }
 0x11a   : > { %7289 = vmatpush3.bf16.msra.mxu1 %v7750_v43  ;;  %v687_v63 = vpop.f32.mrf.mxu0  ;;  %7266 = vmatprep.subr.bf16.mxu0 %v7751_v54 }
 0x11b   : > { %v704_v1 = vadd.f32 %v687_v63, %v8379_v13  ;;  %v8454_v2 = vadd.f32 %v6969_v62, %v706_v60  ;;  %v874_v3 = vpop.f32.mrf.mxu1  ;;  %7290 = vmatprep.subr.bf16.mxu1 %v7752_v58  ;;  %v7766_v13 = vld [vmem:[%s7963_s10 + $0x228] sm:$0xff]   ;;  %v7782_v60 = vld [vmem:[%s8967_s1 + $0x150] sm:$0xff]  }
 0x11c   : > { %v7783_v62 = vld [vmem:[%s8967_s1 + $0x108] sm:$0xff]  }
 0x11d   : > { %v8459_v5 = vadd.f32 %v874_v3, %v704_v1  ;;  %7267 = vmatpush3.bf16.msra.mxu0 %v7751_v54  ;;  %v7784_v63 = vld [vmem:[%s8967_s1 + $0x148] sm:$0xff]   ;;  %v7786_v1 = vld [vmem:[%s8967_s1 + $0x140] sm:$0xff]   ;;  %v7791_v3 = vld [vmem:[%s8967_s1 + $0x1b8] sm:$0xff]  }
 0x11e   : > { %7291 = vmatpush3.bf16.msra.mxu1 %v7752_v58  ;;  %7268 = vmatprep.subr.bf16.mxu0 %v7757_v0 }
 0x11f   : > { %7292 = vmatprep.subr.bf16.mxu1 %v7758_v4 }
 0x121   : > { %7269 = vmatpush3.bf16.msra.mxu0 %v7757_v0  ;;  %v7785_v0 = vld [vmem:[%s8967_s1 + $0x100] sm:$0xff]  }
 0x122   : > { %7293 = vmatpush3.bf16.msra.mxu1 %v7758_v4  ;;  %7270 = vmatprep.subr.bf16.mxu0 %v7759_v6  ;;  %v7792_v4 = vld [vmem:[%s8967_s1 + $0x38] sm:$0xff]  }
 0x123   : > { %7294 = vmatprep.subr.bf16.mxu1 %v7760_v7 }
 0x125   : > { %7271 = vmatpush3.bf16.msra.mxu0 %v7759_v6  ;;  %v7793_v6 = vld [vmem:[%s8967_s1 + $0x1b0] sm:$0xff]  }
 0x126   : > { %7295 = vmatpush3.bf16.msra.mxu1 %v7760_v7  ;;  %7272 = vmatprep.subr.bf16.mxu0 %v7761_v8  ;;  %v7794_v7 = vld [vmem:[%s8967_s1 + $0x30] sm:$0xff]  }
 0x127   : > { %7296 = vmatprep.subr.bf16.mxu1 %v7762_v9 }
 0x129   : > { %7273 = vmatpush3.bf16.msra.mxu0 %v7761_v8  ;;  %v7795_v8 = vld [vmem:[%s7963_s10 + $0x250] sm:$0xff]  }
 0x12a   : > { %7297 = vmatpush3.bf16.msra.mxu1 %v7762_v9  ;;  %7306 = vmatprep.subr.bf16.mxu0 %v7767_v11 }
 0x12b   : > { %7330 = vmatprep.subr.bf16.mxu1 %v7768_v12 }
 0x12c   : > { %v6988_v17 = vpop.f32.mrf.mxu0  ;;  %7275 = vmatmul.mubr.bf16.vlgmr.msra.gmra.mxu0 %v7765_v10  ;;  %v7799_v10 = vld [vmem:[%s7963_s10 + $0x270] sm:$0xff]  }
 0x12d   : > { %v1075_v19 = vadd.f32 %v6988_v17, %v8413_v31  ;;  %v7012_v20 = vpop.f32.mrf.mxu1  ;;  %7299 = vmatmul.mubr.bf16.vlgmr.msra.gmra.mxu1 %v7766_v13  ;;  %7307 = vmatpush3.bf16.msra.mxu0 %v7767_v11  ;;  %v7796_v13 = vld [vmem:[%s7963_s10 + $0x258] sm:$0xff]  }
 0x12e   : > { %7331 = vmatpush3.bf16.msra.mxu1 %v7768_v12  ;;  %v1042_v21 = vpop.f32.mrf.mxu0  ;;  %7308 = vmatprep.subr.bf16.mxu0 %v7769_v14 }
 0x12f   : > { %v8494_v24 = vadd.f32 %v7012_v20, %v1075_v19  ;;  %v1073_v25 = vadd.f32 %v1042_v21, %v8423_v38  ;;  %v1229_v26 = vpop.f32.mrf.mxu1  ;;  %7332 = vmatprep.subr.bf16.mxu1 %v7770_v15  ;;  %7278 = vmatprep.mubr.bf16.mxu0 %v7771_v16  ;;  %v7798_v16 = vld [vmem:[%s8967_s1 + $0x28] sm:$0xff]   ;;  %v7801_v21 = vld [vmem:[%s8967_s1 + $0x1a0] sm:$0xff]  }
 0x130   : > { %v6989_v28 = vpop.f32.mrf.mxu0  ;;  %7302 = vmatprep.mubr.bf16.mxu1 %v7775_v18  ;;  %v7800_v18 = vld [vmem:[%s7963_s10 + $0x278] sm:$0xff]  }
 0x131   : > { %v8501_v30 = vadd.f32 %v1229_v26, %v1073_v25  ;;  %v1076_v31 = vadd.f32 %v6989_v28, %v8430_v44  ;;  %v7013_v32 = vpop.f32.mrf.mxu1  ;;  %7309 = vmatpush3.bf16.msra.mxu0 %v7769_v14  ;;  %v7797_v14 = vld [vmem:[%s8967_s1 + $0x1a8] sm:$0xff]   ;;  %v7811_v25 = vld [vmem:[%s7963_s10 + $0x280] sm:$0xff]  }
 0x132   : > { %7333 = vmatpush3.bf16.msra.mxu1 %v7770_v15  ;;  %v1045_v34 = vpop.f32.mrf.mxu0  ;;  %7310 = vmatprep.subr.bf16.mxu0 %v7773_v23 }
 0x133   : > { %v8510_v36 = vadd.f32 %v7013_v32, %v1076_v31  ;;  %v1074_v37 = vadd.f32 %v1045_v34, %v8435_v50  ;;  %v1232_v38 = vpop.f32.mrf.mxu1  ;;  %7334 = vmatprep.subr.bf16.mxu1 %v7774_v27  ;;  %v7780_v50 = vld [vmem:[%s8967_s1 + $0x158] sm:$0xff]  }
 0x134   : > { %v6992_v40 = vpop.f32.mrf.mxu0  ;;  %7279 = vmatmul.mubr.bf16.gmra.mxu0 %v7772_v22  ;;  %v7803_v31 = vld [vmem:[%s8967_s1 + $0x198] sm:$0xff]  }
 0x135   : > { %v8515_v42 = vadd.f32 %v1232_v38, %v1074_v37  ;;  %v1079_v43 = vadd.f32 %v6992_v40, %v8442_v56  ;;  %7311 = vmatpush3.bf16.msra.mxu0 %v7773_v23  ;;  %v7016_v44 = vpop.f32.mrf.mxu1  ;;  %7303 = vmatmul.mubr.bf16.gmra.mxu1 %v7776_v29  ;;  %v7781_v56 = vld [vmem:[%s8967_s1 + $0x110] sm:$0xff]   ;;  %v7802_v23 = vld [vmem:[%s8967_s1 + $0x20] sm:$0xff]  }
 0x136   : > { %7335 = vmatpush3.bf16.msra.mxu1 %v7774_v27  ;;  %v1058_v45 = vpop.f32.mrf.mxu0  ;;  %7312 = vmatprep.subr.bf16.mxu0 %v7777_v33  ;;  %v7812_v27 = vld [vmem:[%s7963_s10 + $0x2a0] sm:$0xff]   ;;  %v7805_v38 = vld [vmem:[%s8967_s1 + $0x190] sm:$0xff]  }
 0x137   : > { %v1077_v47 = vadd.f32 %v1058_v45, %v8448_v61  ;;  %v8522_v48 = vadd.f32 %v7016_v44, %v1079_v43  ;;  %v1245_v49 = vpop.f32.mrf.mxu1  ;;  %7336 = vmatprep.subr.bf16.mxu1 %v7778_v35  ;;  %7322 = vmatprep.mubr.bf16.mxu0 %v7787_v39  ;;  %v7806_v40 = vld [vmem:[%s8967_s1 + $0x10] sm:$0xff]   ;;  %v7808_v44 = vld [vmem:[%s8967_s1 + $0x8] sm:$0xff]   ;;  %v7809_v45 = vld [vmem:[%s8967_s1 + $0x180] sm:$0xff]  }
 0x138   : > { %v6993_v51 = vpop.f32.mrf.mxu0  ;;  %7346 = vmatprep.mubr.bf16.mxu1 %v7788_v41 }
 0x139   : > { %v1080_v52 = vadd.f32 %v6993_v51, %v8454_v2  ;;  %v8528_v53 = vadd.f32 %v1245_v49, %v1077_v47  ;;  %7313 = vmatpush3.bf16.msra.mxu0 %v7777_v33  ;;  %v7017_v54 = vpop.f32.mrf.mxu1  ;;  %v7789_v2 = vld [vmem:[%s7963_s10 + $0x248] sm:$0xff]   ;;  %v7804_v33 = vld [vmem:[%s8967_s1 + $0x18] sm:$0xff]   ;;  %v7810_v47 = vld [vmem:[%s8967_s1] sm:$0xff]  }
 0x13a   : > { %7337 = vmatpush3.bf16.msra.mxu1 %v7778_v35  ;;  %v1061_v55 = vpop.f32.mrf.mxu0  ;;  %7314 = vmatprep.subr.bf16.mxu0 %v7779_v46  ;;  %v7813_v51 = vld [vmem:[%s7963_s10 + $0x288] sm:$0xff]  }
 0x13b   : > { %v1078_v57 = vadd.f32 %v1061_v55, %v8459_v5  ;;  %v8534_v58 = vadd.f32 %v7017_v54, %v1080_v52  ;;  %v1248_v59 = vpop.f32.mrf.mxu1  ;;  %7338 = vmatprep.subr.bf16.mxu1 %v7780_v50  ;;  %v7790_v5 = vld [vmem:[%s7963_s10 + $0x268] sm:$0xff]   ;;  %v7818_v55 = vld [vmem:[%s8967_s1 + $0xb0] sm:$0xff]  }
 0x13c   : > { %v7814_v52 = vld [vmem:[%s7963_s10 + $0x2a8] sm:$0xff]  }
 0x13d   : > { %v8539_v61 = vadd.f32 %v1248_v59, %v1078_v57  ;;  %7315 = vmatpush3.bf16.msra.mxu0 %v7779_v46 }
 0x13e   : > { %7339 = vmatpush3.bf16.msra.mxu1 %v7780_v50  ;;  %7316 = vmatprep.subr.bf16.mxu0 %v7781_v56  ;;  %v7816_v50 = vld [vmem:[%s8967_s1 + $0xb8] sm:$0xff]  }
 0x13f   : > { %7340 = vmatprep.subr.bf16.mxu1 %v7782_v60 }
 0x141   : > { %7317 = vmatpush3.bf16.msra.mxu0 %v7781_v56  ;;  %v7819_v56 = vld [vmem:[%s7963_s10 + $0x290] sm:$0xff]  }
 0x142   : > { %7341 = vmatpush3.bf16.msra.mxu1 %v7782_v60  ;;  %7318 = vmatprep.subr.bf16.mxu0 %v7783_v62 }
 0x143   : > { %7342 = vmatprep.subr.bf16.mxu1 %v7784_v63 }
 0x145   : > { %7319 = vmatpush3.bf16.msra.mxu0 %v7783_v62  ;;  %v7821_v62 = vld [vmem:[%s8967_s1 + $0x68] sm:$0xff]  }
 0x146   : > { %7343 = vmatpush3.bf16.msra.mxu1 %v7784_v63  ;;  %7320 = vmatprep.subr.bf16.mxu0 %v7785_v0 }
 0x147   : > { %7344 = vmatprep.subr.bf16.mxu1 %v7786_v1 }
 0x149   : > { %7321 = vmatpush3.bf16.msra.mxu0 %v7785_v0 }
 0x14a   : > { %7345 = vmatpush3.bf16.msra.mxu1 %v7786_v1  ;;  %7354 = vmatprep.subr.bf16.mxu0 %v7791_v3 }
 0x14b   : > { %7378 = vmatprep.subr.bf16.mxu1 %v7792_v4 }
 0x14c   : > { %v7036_v9 = vpop.f32.mrf.mxu0  ;;  %7323 = vmatmul.mubr.bf16.vlgmr.msra.gmra.mxu0 %v7789_v2  ;;  %v7822_v2 = vld [vmem:[%s8967_s1 + $0xa8] sm:$0xff]  }
 0x14d   : > { %v8570_v11 = vadd.f32 %v7036_v9, %v8494_v24  ;;  %7347 = vmatmul.mubr.bf16.vlgmr.msra.gmra.mxu1 %v7790_v5  ;;  %7355 = vmatpush3.bf16.msra.mxu0 %v7791_v3  ;;  %v8583_v19 = vpop.f32.mrf.mxu1 }
 0x14e   : > { %7379 = vmatpush3.bf16.msra.mxu1 %v7792_v4  ;;  %v1416_v12 = vpop.f32.mrf.mxu0  ;;  %7356 = vmatprep.subr.bf16.mxu0 %v7793_v6  ;;  %v7820_v4 = vld [vmem:[%s7963_s10 + $0x298] sm:$0xff]  }
 0x14f   : > { %v8577_v15 = vadd.f32 %v1416_v12, %v8501_v30  ;;  %7380 = vmatprep.subr.bf16.mxu1 %v7794_v7  ;;  %7326 = vmatprep.mubr.bf16.mxu0 %v7795_v8  ;;  %v8599_v28 = vpop.f32.mrf.mxu1  ;;  %v7830_v8 = vld [vmem:[%s7963_s10 + $0x2b8] sm:$0xff]  }
 0x150   : > { %v7037_v17 = vpop.f32.mrf.mxu0  ;;  %7350 = vmatprep.mubr.bf16.mxu1 %v7799_v10  ;;  %v7823_v10 = vld [vmem:[%s8967_s1 + $0x60] sm:$0xff]  }
 0x151   : > { %v8586_v20 = vadd.f32 %v7037_v17, %v8510_v36  ;;  %7357 = vmatpush3.bf16.msra.mxu0 %v7793_v6  ;;  %v8613_v35 = vpop.f32.mrf.mxu1  ;;  %v7835_v17 = vld [vmem:[%s7963_s10 + $0x2c0] sm:$0xff]  }
 0x152   : > { %7381 = vmatpush3.bf16.msra.mxu1 %v7794_v7  ;;  %v1419_v22 = vpop.f32.mrf.mxu0  ;;  %7358 = vmatprep.subr.bf16.mxu0 %v7797_v14 }
 0x153   : > { %v8595_v24 = vadd.f32 %v1419_v22, %v8515_v42  ;;  %7382 = vmatprep.subr.bf16.mxu1 %v7798_v16  ;;  %v1613_v41 = vpop.f32.mrf.mxu1  ;;  %v7807_v42 = vld [vmem:[%s8967_s1 + $0x188] sm:$0xff]  }
 0x154   : > { %v7040_v26 = vpop.f32.mrf.mxu0  ;;  %7327 = vmatmul.mubr.bf16.gmra.mxu0 %v7796_v13 }
 0x155   : > { %v8602_v29 = vadd.f32 %v7040_v26, %v8522_v48  ;;  %7359 = vmatpush3.bf16.msra.mxu0 %v7797_v14  ;;  %7351 = vmatmul.mubr.bf16.gmra.mxu1 %v7800_v18  ;;  %v8630_v43 = vpop.f32.mrf.mxu1  ;;  %v7815_v48 = vld [vmem:[%s8967_s1 + $0x78] sm:$0xff]  }
 0x156   : > { %7383 = vmatpush3.bf16.msra.mxu1 %v7798_v16  ;;  %v1432_v30 = vpop.f32.mrf.mxu0  ;;  %7360 = vmatprep.subr.bf16.mxu0 %v7801_v21  ;;  %v7824_v16 = vld [vmem:[%s8967_s1 + $0xa0] sm:$0xff]   ;;  %v7825_v26 = vld [vmem:[%s8967_s1 + $0x58] sm:$0xff]  }
 0x157   : > { %v8608_v32 = vadd.f32 %v1432_v30, %v8528_v53  ;;  %7384 = vmatprep.subr.bf16.mxu1 %v7802_v23  ;;  %7370 = vmatprep.mubr.bf16.mxu0 %v7811_v25  ;;  %v8638_v46 = vpop.f32.mrf.mxu1  ;;  %v7817_v53 = vld [vmem:[%s8967_s1 + $0x70] sm:$0xff]  }
 0x158   : > { %v7041_v34 = vpop.f32.mrf.mxu0  ;;  %7394 = vmatprep.mubr.bf16.mxu1 %v7812_v27 }
 0x159   : > { %v8616_v36 = vadd.f32 %v7041_v34, %v8534_v58  ;;  %7361 = vmatpush3.bf16.msra.mxu0 %v7801_v21  ;;  %v8646_v49 = vpop.f32.mrf.mxu1  ;;  %v7827_v58 = vld [vmem:[%s7963_s10 + $0x2b0] sm:$0xff]  }
 0x15a   : > { %7385 = vmatpush3.bf16.msra.mxu1 %v7802_v23  ;;  %v1435_v37 = vpop.f32.mrf.mxu0  ;;  %7362 = vmatprep.subr.bf16.mxu0 %v7803_v31 }
 0x15b   : > { %v8622_v39 = vadd.f32 %v1435_v37, %v8539_v61  ;;  %7386 = vmatprep.subr.bf16.mxu1 %v7804_v33  ;;  %v8656_v54 = vpop.f32.mrf.mxu1 }
 0x15d   : > { %7363 = vmatpush3.bf16.msra.mxu0 %v7803_v31  ;;  %v7826_v31 = vld [vmem:[%s8967_s1 + $0x98] sm:$0xff]  }
 0x15e   : > { %7387 = vmatpush3.bf16.msra.mxu1 %v7804_v33  ;;  %7364 = vmatprep.subr.bf16.mxu0 %v7805_v38 }
 0x15f   : > { %7388 = vmatprep.subr.bf16.mxu1 %v7806_v40 }
 0x161   : > { %7365 = vmatpush3.bf16.msra.mxu0 %v7805_v38 }
 0x162   : > { %7389 = vmatpush3.bf16.msra.mxu1 %v7806_v40  ;;  %7366 = vmatprep.subr.bf16.mxu0 %v7807_v42  ;;  %v7828_v40 = vld [vmem:[%s8967_s1 + $0x50] sm:$0xff]  }
 0x163   : > { %7390 = vmatprep.subr.bf16.mxu1 %v7808_v44 }
 0x165   : > { %7367 = vmatpush3.bf16.msra.mxu0 %v7807_v42 }
 0x166   : > { %7391 = vmatpush3.bf16.msra.mxu1 %v7808_v44  ;;  %7368 = vmatprep.subr.bf16.mxu0 %v7809_v45  ;;  %v7829_v44 = vld [vmem:[%s8967_s1 + $0x90] sm:$0xff]  }
 0x167   : > { %7392 = vmatprep.subr.bf16.mxu1 %v7810_v47 }
 0x169   : > { %7369 = vmatpush3.bf16.msra.mxu0 %v7809_v45 }
 0x16a   : > { %7393 = vmatpush3.bf16.msra.mxu1 %v7810_v47  ;;  %7402 = vmatprep.subr.bf16.mxu0 %v7815_v48  ;;  %v7832_v47 = vld [vmem:[%s8967_s1 + $0x88] sm:$0xff]  }
 0x16b   : > { %7426 = vmatprep.subr.bf16.mxu1 %v7816_v50 }
 0x16c   : > { %v7084_v57 = vpop.f32.mrf.mxu0  ;;  %7371 = vmatmul.mubr.bf16.vlgmr.msra.gmra.mxu0 %v7813_v51  ;;  %v7840_v51 = vld [vmem:[%s8967_s1 + $0x138] sm:$0xff]  }
 0x16d   : > { %v1821_v59 = vadd.f32 %v7084_v57, %v8583_v19  ;;  %v7108_v60 = vpop.f32.mrf.mxu1  ;;  %7395 = vmatmul.mubr.bf16.vlgmr.msra.gmra.mxu1 %v7814_v52  ;;  %7403 = vmatpush3.bf16.msra.mxu0 %v7815_v48  ;;  %v7836_v19 = vld [vmem:[%s7963_s10 + $0x2e0] sm:$0xff]   ;;  %v7837_v52 = vld [vmem:[%s7963_s10 + $0x2c8] sm:$0xff]  }
 0x16e   : > { %7427 = vmatpush3.bf16.msra.mxu1 %v7816_v50  ;;  %v1788_v61 = vpop.f32.mrf.mxu0  ;;  %7404 = vmatprep.subr.bf16.mxu0 %v7817_v53  ;;  %v7833_v48 = vld [vmem:[%s8967_s1 + $0x40] sm:$0xff]   ;;  %v7839_v50 = vld [vmem:[%s8967_s1 + $0xf8] sm:$0xff]  }
 0x16f   : > { %v8667_v63 = vadd.f32 %v7108_v60, %v1821_v59  ;;  %v1819_v0 = vadd.f32 %v1788_v61, %v8599_v28  ;;  %v1974_v1 = vpop.f32.mrf.mxu1  ;;  %7428 = vmatprep.subr.bf16.mxu1 %v7818_v55  ;;  %7374 = vmatprep.mubr.bf16.mxu0 %v7819_v56  ;;  %v7843_v56 = vld [vmem:[%s7963_s10 + $0x2d0] sm:$0xff]  }
 0x170   : > { %v7085_v3 = vpop.f32.mrf.mxu0  ;;  %7398 = vmatprep.mubr.bf16.mxu1 %v7827_v58  ;;  %v7847_v58 = vld [vmem:[%s7963_s10 + $0x2f0] sm:$0xff]  }
 0x171   : > { %v8674_v5 = vadd.f32 %v1974_v1, %v1819_v0  ;;  %v1822_v6 = vadd.f32 %v7085_v3, %v8613_v35  ;;  %v7109_v7 = vpop.f32.mrf.mxu1  ;;  %7405 = vmatpush3.bf16.msra.mxu0 %v7817_v53  ;;  %v7838_v53 = vld [vmem:[%s7963_s10 + $0x2e8] sm:$0xff]  }
 0x172   : > { %7429 = vmatpush3.bf16.msra.mxu1 %v7818_v55  ;;  %v1791_v9 = vpop.f32.mrf.mxu0  ;;  %7406 = vmatprep.subr.bf16.mxu0 %v7821_v62  ;;  %v7842_v55 = vld [vmem:[%s8967_s1 + $0x130] sm:$0xff]  }
 0x173   : > { %v8681_v12 = vadd.f32 %v7109_v7, %v1822_v6  ;;  %v1820_v13 = vadd.f32 %v1791_v9, %v1613_v41  ;;  %v1977_v14 = vpop.f32.mrf.mxu1  ;;  %7430 = vmatprep.subr.bf16.mxu1 %v7822_v2  ;;  %v7848_v9 = vld [vmem:[%s7963_s10 + $0x2f8] sm:$0xff]  }
 0x174   : > { %v7088_v18 = vpop.f32.mrf.mxu0  ;;  %7375 = vmatmul.mubr.bf16.gmra.mxu0 %v7820_v4  ;;  %v7844_v4 = vld [vmem:[%s7963_s10 + $0x2d8] sm:$0xff]  }
 0x175   : > { %v8688_v21 = vadd.f32 %v1977_v14, %v1820_v13  ;;  %v1825_v22 = vadd.f32 %v7088_v18, %v8630_v43  ;;  %7407 = vmatpush3.bf16.msra.mxu0 %v7821_v62  ;;  %v7112_v23 = vpop.f32.mrf.mxu1  ;;  %7399 = vmatmul.mubr.bf16.gmra.mxu1 %v7830_v8  ;;  %v7845_v62 = vld [vmem:[%s8967_s1 + $0xe8] sm:$0xff]  }
 0x176   : > { %7431 = vmatpush3.bf16.msra.mxu1 %v7822_v2  ;;  %v1804_v25 = vpop.f32.mrf.mxu0  ;;  %7408 = vmatprep.subr.bf16.mxu0 %v7823_v10 }
 0x177   : > { %v1823_v27 = vadd.f32 %v1804_v25, %v8638_v46  ;;  %v8695_v28 = vadd.f32 %v7112_v23, %v1825_v22  ;;  %v1990_v30 = vpop.f32.mrf.mxu1  ;;  %7432 = vmatprep.subr.bf16.mxu1 %v7824_v16  ;;  %7418 = vmatprep.mubr.bf16.mxu0 %v7835_v17  ;;  %v7831_v46 = vld [vmem:[%s8967_s1 + $0x48] sm:$0xff]   ;;  %v7859_v17 = vld [vmem:[%s7963_s10 + $0x300] sm:$0xff]  }
 0x178   : > { %v7089_v33 = vpop.f32.mrf.mxu0  ;;  %7442 = vmatprep.mubr.bf16.mxu1 %v7836_v19  ;;  %v7860_v19 = vld [vmem:[%s7963_s10 + $0x320] sm:$0xff]  }
 0x179   : > { %v1826_v34 = vadd.f32 %v7089_v33, %v8646_v49  ;;  %v8701_v35 = vadd.f32 %v1990_v30, %v1823_v27  ;;  %7409 = vmatpush3.bf16.msra.mxu0 %v7823_v10  ;;  %v7113_v37 = vpop.f32.mrf.mxu1  ;;  %v7834_v49 = vld [vmem:[%s8967_s1 + $0x80] sm:$0xff]  }
 0x17a   : > { %7433 = vmatpush3.bf16.msra.mxu1 %v7824_v16  ;;  %v1807_v38 = vpop.f32.mrf.mxu0  ;;  %7410 = vmatprep.subr.bf16.mxu0 %v7825_v26  ;;  %v7849_v10 = vld [vmem:[%s8967_s1 + $0xe0] sm:$0xff]  }
 0x17b   : > { %v1824_v41 = vadd.f32 %v1807_v38, %v8656_v54  ;;  %v8707_v42 = vadd.f32 %v7113_v37, %v1826_v34  ;;  %v1993_v43 = vpop.f32.mrf.mxu1  ;;  %7434 = vmatprep.subr.bf16.mxu1 %v7826_v31  ;;  %v7841_v54 = vld [vmem:[%s8967_s1 + $0xf0] sm:$0xff]  }
 0x17d   : > { %v8712_v45 = vadd.f32 %v1993_v43, %v1824_v41  ;;  %7411 = vmatpush3.bf16.msra.mxu0 %v7825_v26 }
 0x17e   : > { %7435 = vmatpush3.bf16.msra.mxu1 %v7826_v31  ;;  %7412 = vmatprep.subr.bf16.mxu0 %v7828_v40 }
 0x17f   : > { %7436 = vmatprep.subr.bf16.mxu1 %v7829_v44 }
 0x181   : > { %7413 = vmatpush3.bf16.msra.mxu0 %v7828_v40 }
 0x182   : > { %7437 = vmatpush3.bf16.msra.mxu1 %v7829_v44  ;;  %7414 = vmatprep.subr.bf16.mxu0 %v7831_v46 }
 0x183   : > { %7438 = vmatprep.subr.bf16.mxu1 %v7832_v47 }
 0x185   : > { %7415 = vmatpush3.bf16.msra.mxu0 %v7831_v46 }
 0x186   : > { %7439 = vmatpush3.bf16.msra.mxu1 %v7832_v47  ;;  %7416 = vmatprep.subr.bf16.mxu0 %v7833_v48  ;;  %v7855_v47 = vld [vmem:[%s8967_s1 + $0xc8] sm:$0xff]  }
 0x187   : > { %7440 = vmatprep.subr.bf16.mxu1 %v7834_v49 }
 0x189   : > { %7417 = vmatpush3.bf16.msra.mxu0 %v7833_v48  ;;  %v7857_v48 = vld [vmem:[%s8967_s1 + $0xc0] sm:$0xff]  }
 0x18a   : > { %7441 = vmatpush3.bf16.msra.mxu1 %v7834_v49  ;;  %7450 = vmatprep.subr.bf16.mxu0 %v7839_v50  ;;  %v7858_v49 = vld [vmem:[%s8967_s1 + $0x100] sm:$0xff]  }
 0x18b   : > { %7474 = vmatprep.subr.bf16.mxu1 %v7840_v51 }
 0x18c   : > { %v7132_v57 = vpop.f32.mrf.mxu0  ;;  %7419 = vmatmul.mubr.bf16.vlgmr.msra.gmra.mxu0 %v7837_v52  ;;  %v7861_v52 = vld [vmem:[%s7963_s10 + $0x308] sm:$0xff]  }
 0x18d   : > { %v2193_v59 = vadd.f32 %v7132_v57, %v8667_v63  ;;  %v7156_v60 = vpop.f32.mrf.mxu1  ;;  %7443 = vmatmul.mubr.bf16.vlgmr.msra.gmra.mxu1 %v7838_v53  ;;  %7451 = vmatpush3.bf16.msra.mxu0 %v7839_v50  ;;  %v7846_v63 = vld [vmem:[%s8967_s1 + $0x128] sm:$0xff]   ;;  %v7863_v50 = vld [vmem:[%s8967_s1 + $0x178] sm:$0xff]  }
 0x18e   : > { %7475 = vmatpush3.bf16.msra.mxu1 %v7840_v51  ;;  %v2160_v61 = vpop.f32.mrf.mxu0  ;;  %7452 = vmatprep.subr.bf16.mxu0 %v7841_v54  ;;  %v7864_v51 = vld [vmem:[%s8967_s1 + $0x1b8] sm:$0xff]   ;;  %v7862_v53 = vld [vmem:[%s7963_s10 + $0x328] sm:$0xff]  }
 0x18f   : > { %v8746_v0 = vadd.f32 %v7156_v60, %v2193_v59  ;;  %v2191_v1 = vadd.f32 %v2160_v61, %v8674_v5  ;;  %v2346_v2 = vpop.f32.mrf.mxu1  ;;  %7476 = vmatprep.subr.bf16.mxu1 %v7842_v55  ;;  %7422 = vmatprep.mubr.bf16.mxu0 %v7843_v56  ;;  %v7867_v56 = vld [vmem:[%s7963_s10 + $0x310] sm:$0xff]  }
 0x190   : > { %v7133_v3 = vpop.f32.mrf.mxu0  ;;  %7446 = vmatprep.mubr.bf16.mxu1 %v7847_v58  ;;  %v7871_v58 = vld [vmem:[%s7963_s10 + $0x330] sm:$0xff]  }
 0x191   : > { %v8753_v6 = vadd.f32 %v2346_v2, %v2191_v1  ;;  %v2194_v7 = vadd.f32 %v7133_v3, %v8681_v12  ;;  %v7157_v8 = vpop.f32.mrf.mxu1  ;;  %7453 = vmatpush3.bf16.msra.mxu0 %v7841_v54  ;;  %v7850_v12 = vld [vmem:[%s8967_s1 + $0x120] sm:$0xff]   ;;  %v7865_v54 = vld [vmem:[%s8967_s1 + $0x170] sm:$0xff]  }
 0x192   : > { %7477 = vmatpush3.bf16.msra.mxu1 %v7842_v55  ;;  %v2163_v5 = vpop.f32.mrf.mxu0  ;;  %7454 = vmatprep.subr.bf16.mxu0 %v7845_v62  ;;  %v7866_v55 = vld [vmem:[%s8967_s1 + $0x1b0] sm:$0xff]  }
 0x193   : > { %v8760_v13 = vadd.f32 %v7157_v8, %v2194_v7  ;;  %v2192_v14 = vadd.f32 %v2163_v5, %v8688_v21  ;;  %v2349_v16 = vpop.f32.mrf.mxu1  ;;  %7478 = vmatprep.subr.bf16.mxu1 %v7846_v63  ;;  %v7851_v21 = vld [vmem:[%s8967_s1 + $0xd8] sm:$0xff]  }
 0x194   : > { %v7136_v18 = vpop.f32.mrf.mxu0  ;;  %7423 = vmatmul.mubr.bf16.gmra.mxu0 %v7844_v4  ;;  %v7868_v4 = vld [vmem:[%s7963_s10 + $0x318] sm:$0xff]  }
 0x195   : > { %v8768_v22 = vadd.f32 %v2349_v16, %v2192_v14  ;;  %v2197_v23 = vadd.f32 %v7136_v18, %v8695_v28  ;;  %7455 = vmatpush3.bf16.msra.mxu0 %v7845_v62  ;;  %v7160_v25 = vpop.f32.mrf.mxu1  ;;  %7447 = vmatmul.mubr.bf16.gmra.mxu1 %v7848_v9  ;;  %v7852_v28 = vld [vmem:[%s8967_s1 + $0x118] sm:$0xff]   ;;  %v7869_v62 = vld [vmem:[%s8967_s1 + $0x168] sm:$0xff]   ;;  %v7873_v14 = vld [vmem:[%s8967_s1 + $0x160] sm:$0xff]  }
 0x196   : > { %7479 = vmatpush3.bf16.msra.mxu1 %v7846_v63  ;;  %v2176_v26 = vpop.f32.mrf.mxu0  ;;  %7456 = vmatprep.subr.bf16.mxu0 %v7849_v10 }
 0x197   : > { %v2195_v27 = vadd.f32 %v2176_v26, %v8701_v35  ;;  %v8775_v30 = vadd.f32 %v7160_v25, %v2197_v23  ;;  %v2362_v31 = vpop.f32.mrf.mxu1  ;;  %7480 = vmatprep.subr.bf16.mxu1 %v7850_v12  ;;  %7466 = vmatprep.mubr.bf16.mxu0 %v7859_v17  ;;  %v7853_v35 = vld [vmem:[%s8967_s1 + $0xd0] sm:$0xff]   ;;  %v7884_v25 = vld [vmem:[%s7963_s10 + $0x360] sm:$0xff]  }
 0x198   : > { %v7137_v33 = vpop.f32.mrf.mxu0  ;;  %7490 = vmatprep.mubr.bf16.mxu1 %v7860_v19  ;;  %v7883_v19 = vld [vmem:[%s7963_s10 + $0x340] sm:$0xff]  }
 0x199   : > { %v2198_v34 = vadd.f32 %v7137_v33, %v8707_v42  ;;  %v8781_v37 = vadd.f32 %v2362_v31, %v2195_v27  ;;  %7457 = vmatpush3.bf16.msra.mxu0 %v7849_v10  ;;  %v7161_v38 = vpop.f32.mrf.mxu1  ;;  %v7854_v42 = vld [vmem:[%s8967_s1 + $0x110] sm:$0xff]  }
 0x19a   : > { %7481 = vmatpush3.bf16.msra.mxu1 %v7850_v12  ;;  %v2179_v40 = vpop.f32.mrf.mxu0  ;;  %7458 = vmatprep.subr.bf16.mxu0 %v7851_v21 }
 0x19b   : > { %v2196_v41 = vadd.f32 %v2179_v40, %v8712_v45  ;;  %v8787_v43 = vadd.f32 %v7161_v38, %v2198_v34  ;;  %v2365_v44 = vpop.f32.mrf.mxu1  ;;  %7482 = vmatprep.subr.bf16.mxu1 %v7852_v28  ;;  %v7856_v45 = vld [vmem:[%s8967_s1 + $0x108] sm:$0xff]  }
 0x19d   : > { %v8792_v46 = vadd.f32 %v2365_v44, %v2196_v41  ;;  %7459 = vmatpush3.bf16.msra.mxu0 %v7851_v21 }
 0x19e   : > { %7483 = vmatpush3.bf16.msra.mxu1 %v7852_v28  ;;  %7460 = vmatprep.subr.bf16.mxu0 %v7853_v35  ;;  %v7875_v28 = vld [vmem:[%s8967_s1 + $0x158] sm:$0xff]  }
 0x19f   : > { %7484 = vmatprep.subr.bf16.mxu1 %v7854_v42 }
 0x1a1   : > { %7461 = vmatpush3.bf16.msra.mxu0 %v7853_v35 }
 0x1a2   : > { %7485 = vmatpush3.bf16.msra.mxu1 %v7854_v42  ;;  %7462 = vmatprep.subr.bf16.mxu0 %v7855_v47 }
 0x1a3   : > { %7486 = vmatprep.subr.bf16.mxu1 %v7856_v45 }
 0x1a5   : > { %7463 = vmatpush3.bf16.msra.mxu0 %v7855_v47 }
 0x1a6   : > { %7487 = vmatpush3.bf16.msra.mxu1 %v7856_v45  ;;  %7464 = vmatprep.subr.bf16.mxu0 %v7857_v48  ;;  %v7877_v45 = vld [vmem:[%s8967_s1 + $0x150] sm:$0xff]  }
 0x1a7   : > { %7488 = vmatprep.subr.bf16.mxu1 %v7858_v49 }
 0x1a9   : > { %7465 = vmatpush3.bf16.msra.mxu0 %v7857_v48 }
 0x1aa   : > { %7489 = vmatpush3.bf16.msra.mxu1 %v7858_v49  ;;  %7498 = vmatprep.subr.bf16.mxu0 %v7863_v50 }
 0x1ab   : > { %7522 = vmatprep.subr.bf16.mxu1 %v7864_v51 }
 0x1ac   : > { %v7180_v57 = vpop.f32.mrf.mxu0  ;;  %7467 = vmatmul.mubr.bf16.vlgmr.msra.gmra.mxu0 %v7861_v52 }
 0x1ad   : > { %v2565_v59 = vadd.f32 %v7180_v57, %v8746_v0  ;;  %v7204_v60 = vpop.f32.mrf.mxu1  ;;  %7491 = vmatmul.mubr.bf16.vlgmr.msra.gmra.mxu1 %v7862_v53  ;;  %7499 = vmatpush3.bf16.msra.mxu0 %v7863_v50  ;;  %v7870_v0 = vld [vmem:[%s8967_s1 + $0x1a8] sm:$0xff]   ;;  %v7882_v57 = vld [vmem:[%s8967_s1 + $0x180] sm:$0xff]  }
 0x1ae   : > { %7523 = vmatpush3.bf16.msra.mxu1 %v7864_v51  ;;  %v2532_v61 = vpop.f32.mrf.mxu0  ;;  %7500 = vmatprep.subr.bf16.mxu0 %v7865_v54 }
 0x1af   : > { %v8826_v1 = vadd.f32 %v7204_v60, %v2565_v59  ;;  %v2563_v2 = vadd.f32 %v2532_v61, %v8753_v6  ;;  %v2718_v63 = vpop.f32.mrf.mxu1  ;;  %7524 = vmatprep.subr.bf16.mxu1 %v7866_v55  ;;  %7470 = vmatprep.mubr.bf16.mxu0 %v7867_v56  ;;  %v7872_v6 = vld [vmem:[%s7963_s10 + $0x338] sm:$0xff]   ;;  %v7881_v56 = vld [vmem:[%s8967_s1 + $0x140] sm:$0xff]   ;;  %v7886_v59 = vld [vmem:[%s7963_s10 + $0x368] sm:$0xff]  }
 0x1b0   : > { %v7181_v3 = vpop.f32.mrf.mxu0  ;;  %7494 = vmatprep.mubr.bf16.mxu1 %v7871_v58  ;;  %v7885_v58 = vld [vmem:[%s7963_s10 + $0x348] sm:$0xff]   ;;  %v7887_v60 = vld [vmem:[%s7963_s10 + $0x350] sm:$0xff]  }
 0x1b1   : > { %v2783_v7 = vmax.f32 %v8570_v11, %v8826_v1  ;;  %v8835_v8 = vadd.f32 %v2718_v63, %v2563_v2  ;;  %v2566_v9 = vadd.f32 %v7181_v3, %v8760_v13  ;;  %v7205_v5 = vpop.f32.mrf.mxu1  ;;  %7501 = vmatpush3.bf16.msra.mxu0 %v7865_v54  ;;  %v7874_v13 = vld [vmem:[%s8967_s1 + $0x1a0] sm:$0xff]   ;;  %v7888_v61 = vld [vmem:[%s7963_s10 + $0x370] sm:$0xff]  }
 0x1b2   : > { %7525 = vmatpush3.bf16.msra.mxu1 %v7866_v55  ;;  %v2535_v10 = vpop.f32.mrf.mxu0  ;;  %7502 = vmatprep.subr.bf16.mxu0 %v7869_v62  ;;  %v7880_v55 = vld [vmem:[%s8967_s1 + $0x188] sm:$0xff]  }
 0x1b3   : > { %v2781_v16 = vmax.f32 %v8577_v15, %v8835_v8  ;;  %v8844_v12 = vadd.f32 %v7205_v5, %v2566_v9  ;;  %v2564_v17 = vadd.f32 %v2535_v10, %v8768_v22  ;;  %v2721_v18 = vpop.f32.mrf.mxu1  ;;  %7526 = vmatprep.subr.bf16.mxu1 %v7870_v0  ;;  %v7889_v5 = vld [vmem:[%s7963_s10 + $0x358] sm:$0xff]  }
 0x1b4   : > { %v7184_v23 = vpop.f32.mrf.mxu0  ;;  %7471 = vmatmul.mubr.bf16.gmra.mxu0 %v7868_v4  ;;  %v7890_v10 = vld [vmem:[%s7963_s10 + $0x378] sm:$0xff]  }
 0x1b5   : > { %v2784_v26 = vmax.f32 %v8586_v20, %v8844_v12  ;;  %v8854_v21 = vadd.f32 %v2721_v18, %v2564_v17  ;;  %v2569_v27 = vadd.f32 %v7184_v23, %v8775_v30  ;;  %7503 = vmatpush3.bf16.msra.mxu0 %v7869_v62  ;;  %v7208_v31 = vpop.f32.mrf.mxu1  ;;  %7495 = vmatmul.mubr.bf16.gmra.mxu1 %v7872_v6  ;;  %v7876_v30 = vld [vmem:[%s8967_s1 + $0x198] sm:$0xff]  }
 0x1b6   : > { %7527 = vmatpush3.bf16.msra.mxu1 %v7870_v0  ;;  %v2548_v22 = vpop.f32.mrf.mxu0  ;;  %7504 = vmatprep.subr.bf16.mxu0 %v7873_v14 }
 0x1b7   : > { %v2782_v33 = vmax.f32 %v8595_v24, %v8854_v21  ;;  %v2567_v34 = vadd.f32 %v2548_v22, %v8781_v37  ;;  %v8863_v38 = vadd.f32 %v7208_v31, %v2569_v27  ;;  %v2734_v40 = vpop.f32.mrf.mxu1  ;;  %7528 = vmatprep.subr.bf16.mxu1 %v7874_v13  ;;  %7514 = vmatprep.mubr.bf16.mxu0 %v7883_v19 }
 0x1b8   : > { %v7185_v35 = vpop.f32.mrf.mxu0  ;;  %7538 = vmatprep.mubr.bf16.mxu1 %v7884_v25 }
 0x1b9   : > { %v2787_v41 = vmax.f32 %v8602_v29, %v8863_v38  ;;  %v2570_v44 = vadd.f32 %v7185_v35, %v8787_v43  ;;  %v8871_v42 = vadd.f32 %v2734_v40, %v2567_v34  ;;  %7505 = vmatpush3.bf16.msra.mxu0 %v7873_v14  ;;  %v7209_v37 = vpop.f32.mrf.mxu1  ;;  %v7878_v43 = vld [vmem:[%s8967_s1 + $0x190] sm:$0xff]  }
 0x1ba   : > { %7529 = vmatpush3.bf16.msra.mxu1 %v7874_v13  ;;  %v2551_v47 = vpop.f32.mrf.mxu0  ;;  %7506 = vmatprep.subr.bf16.mxu0 %v7875_v28 }
 0x1bb   : > { %v2785_v48 = vmax.f32 %v8608_v32, %v8871_v42  ;;  %v2568_v49 = vadd.f32 %v2551_v47, %v8792_v46  ;;  %v8879_v50 = vadd.f32 %v7209_v37, %v2570_v44  ;;  %v2737_v51 = vpop.f32.mrf.mxu1  ;;  %7530 = vmatprep.subr.bf16.mxu1 %v7876_v30  ;;  %v7879_v46 = vld [vmem:[%s8967_s1 + $0x148] sm:$0xff]  }
 0x1bd   : > { %v2788_v52 = vmax.f32 %v8616_v36, %v8879_v50  ;;  %v8886_v53 = vadd.f32 %v2737_v51, %v2568_v49  ;;  %7507 = vmatpush3.bf16.msra.mxu0 %v7875_v28 }
 0x1be   : > { %7531 = vmatpush3.bf16.msra.mxu1 %v7876_v30  ;;  %7508 = vmatprep.subr.bf16.mxu0 %v7877_v45 }
 0x1bf   : > { %v2786_v54 = vmax.f32 %v8622_v39, %v8886_v53  ;;  %7532 = vmatprep.subr.bf16.mxu1 %v7878_v43 }
 0x1c1   : > { %7509 = vmatpush3.bf16.msra.mxu0 %v7877_v45 }
 0x1c2   : > { %7533 = vmatpush3.bf16.msra.mxu1 %v7878_v43  ;;  %7510 = vmatprep.subr.bf16.mxu0 %v7879_v46 }
 0x1c3   : > { %7534 = vmatprep.subr.bf16.mxu1 %v7880_v55 }
 0x1c5   : > { %7511 = vmatpush3.bf16.msra.mxu0 %v7879_v46 }
 0x1c6   : > { %7535 = vmatpush3.bf16.msra.mxu1 %v7880_v55  ;;  %7512 = vmatprep.subr.bf16.mxu0 %v7881_v56 }
 0x1c7   : > { %7536 = vmatprep.subr.bf16.mxu1 %v7882_v57 }
 0x1c9   : > { %7513 = vmatpush3.bf16.msra.mxu0 %v7881_v56 }
 0x1ca   : > { %7537 = vmatpush3.bf16.msra.mxu1 %v7882_v57 }
 0x1cc   : > { %v7228_v62 = vpop.f32.mrf.mxu0  ;;  %7515 = vmatmul.mubr.bf16.vlgmr.msra.gmra.mxu0 %v7885_v58 }
 0x1cd   : > { %v7252_v2 = vpop.f32.mrf.mxu1  ;;  %7539 = vmatmul.mubr.bf16.vlgmr.msra.gmra.mxu1 %v7886_v59  ;;  %7518 = vmatprep.mubr.bf16.mxu0 %v7887_v60 }
 0x1ce   : > { %v3139_v63 = vadd.f32 %v7252_v2, %v7228_v62  ;;  %v2928_v0 = vpop.f32.mrf.mxu0  ;;  %7542 = vmatprep.mubr.bf16.mxu1 %v7888_v61 }
 0x1cf   : > { %v3106_v3 = vpop.f32.mrf.mxu1 }
 0x1d0   : > { %v3137_v4 = vadd.f32 %v3106_v3, %v2928_v0  ;;  %v7229_v9 = vpop.f32.mrf.mxu0 }
 0x1d1   : > { %v7253_v6 = vpop.f32.mrf.mxu1 }
 0x1d2   : > { %v3140_v14 = vadd.f32 %v7253_v6, %v7229_v9  ;;  %v2931_v17 = vpop.f32.mrf.mxu0 }
 0x1d3   : > { %v3109_v18 = vpop.f32.mrf.mxu1 }
 0x1d4   : > { %v3138_v13 = vadd.f32 %v3109_v18, %v2931_v17  ;;  %7519 = vmatmul.mubr.bf16.gmra.mxu0 %v7889_v5  ;;  %v7232_v19 = vpop.f32.mrf.mxu0 }
 0x1d5   : > { %7543 = vmatmul.mubr.bf16.gmra.mxu1 %v7890_v10  ;;  %v7256_v23 = vpop.f32.mrf.mxu1 }
 0x1d6   : > { %v3143_v25 = vadd.f32 %v7256_v23, %v7232_v19  ;;  %v2944_v27 = vpop.f32.mrf.mxu0 }
 0x1d7   : > { %v3122_v31 = vpop.f32.mrf.mxu1 }
 0x1d8   : > { %v3141_v22 = vadd.f32 %v3122_v31, %v2944_v27  ;;  %v7233_v28 = vpop.f32.mrf.mxu0 }
 0x1d9   : > { %v7257_v34 = vpop.f32.mrf.mxu1 }
 0x1da   : > { %v3144_v40 = vadd.f32 %v7257_v34, %v7233_v28  ;;  %v2947_v30 = vpop.f32.mrf.mxu0 }
 0x1db   : > { %v3125_v35 = vpop.f32.mrf.mxu1 }
 0x1dc   : > { %v3142_v44 = vadd.f32 %v3125_v35, %v2947_v30 }
 0x1ec   : > { %v7276_v37 = vpop.f32.mrf.mxu0 }
 0x1ed   : > { %v3325_v47 = vadd.f32 %v7276_v37, %v3139_v63  ;;  %v7300_v45 = vpop.f32.mrf.mxu1 }
 0x1ee   : > { %v3292_v49 = vpop.f32.mrf.mxu0 }
 0x1ef   : > { %v3511_v51 = vadd.f32 %v7300_v45, %v3325_v47  ;;  %v3323_v43 = vadd.f32 %v3292_v49, %v3137_v4  ;;  %v3478_v46 = vpop.f32.mrf.mxu1 }
 0x1f0   : > { %v7277_v55 = vpop.f32.mrf.mxu0 }
 0x1f1   : > { %v3509_v56 = vadd.f32 %v3478_v46, %v3323_v43  ;;  %v3326_v57 = vadd.f32 %v7277_v55, %v3140_v14  ;;  %v7301_v58 = vpop.f32.mrf.mxu1 }
 0x1f2   : > { %v3295_v59 = vpop.f32.mrf.mxu0 }
 0x1f3   : > { %v3512_v60 = vadd.f32 %v7301_v58, %v3326_v57  ;;  %v3324_v61 = vadd.f32 %v3295_v59, %v3138_v13  ;;  %v3481_v62 = vpop.f32.mrf.mxu1 }
 0x1f4   : > { %v7280_v2 = vpop.f32.mrf.mxu0 }
 0x1f5   : > { %v3510_v0 = vadd.f32 %v3481_v62, %v3324_v61  ;;  %v3329_v3 = vadd.f32 %v7280_v2, %v3143_v25  ;;  %v7304_v9 = vpop.f32.mrf.mxu1 }
 0x1f6   : > { %v3308_v5 = vpop.f32.mrf.mxu0 }
 0x1f7   : > { %v3327_v6 = vadd.f32 %v3308_v5, %v3141_v22  ;;  %v3515_v63 = vadd.f32 %v7304_v9, %v3329_v3  ;;  %v3494_v10 = vpop.f32.mrf.mxu1 }
 0x1f8   : > { %v7281_v17 = vpop.f32.mrf.mxu0 }
 0x1f9   : > { %v3330_v18 = vadd.f32 %v7281_v17, %v3144_v40  ;;  %v3513_v4 = vadd.f32 %v3494_v10, %v3327_v6  ;;  %v7305_v19 = vpop.f32.mrf.mxu1 }
 0x1fa   : > { %v3311_v23 = vpop.f32.mrf.mxu0 }
 0x1fb   : > { %v3328_v27 = vadd.f32 %v3311_v23, %v3142_v44  ;;  %v3516_v14 = vadd.f32 %v7305_v19, %v3330_v18  ;;  %v3497_v31 = vpop.f32.mrf.mxu1 }
 0x1fd   : > { %v3514_v28 = vadd.f32 %v3497_v31, %v3328_v27 }
 0x20c   : > { %v7324_v34 = vpop.f32.mrf.mxu0 }
 0x20d   : > { %v3697_v13 = vadd.f32 %v7324_v34, %v3511_v51  ;;  %v7348_v30 = vpop.f32.mrf.mxu1 }
 0x20e   : > { %v3664_v35 = vpop.f32.mrf.mxu0 }
 0x20f   : > { %v3883_v37 = vadd.f32 %v7348_v30, %v3697_v13  ;;  %v3695_v25 = vadd.f32 %v3664_v35, %v3509_v56  ;;  %v3850_v47 = vpop.f32.mrf.mxu1 }
 0x210   : > { %v7325_v45 = vpop.f32.mrf.mxu0 }
 0x211   : > { %v3881_v22 = vadd.f32 %v3850_v47, %v3695_v25  ;;  %v7349_v49 = vpop.f32.mrf.mxu1  ;;  %v3698_v3 = vadd.f32 %v7325_v45, %v3512_v60 }
 0x212   : > { %v3667_v43 = vpop.f32.mrf.mxu0 }
 0x213   : > { %v3853_v46 = vpop.f32.mrf.mxu1  ;;  %v3696_v5 = vadd.f32 %v3667_v43, %v3510_v0  ;;  %v3884_v10 = vadd.f32 %v7349_v49, %v3698_v3 }
 0x214   : > { %v7328_v40 = vpop.f32.mrf.mxu0 }
 0x215   : > { %v3701_v55 = vadd.f32 %v7328_v40, %v3515_v63  ;;  %v7352_v57 = vpop.f32.mrf.mxu1  ;;  %v3882_v19 = vadd.f32 %v3853_v46, %v3696_v5 }
 0x216   : > { %v3680_v58 = vpop.f32.mrf.mxu0 }
 0x217   : > { %v3699_v44 = vadd.f32 %v3680_v58, %v3513_v4  ;;  %v3887_v59 = vadd.f32 %v7352_v57, %v3701_v55  ;;  %v3866_v61 = vpop.f32.mrf.mxu1 }
 0x218   : > { %v7329_v2 = vpop.f32.mrf.mxu0 }
 0x219   : > { %v3885_v62 = vadd.f32 %v3866_v61, %v3699_v44  ;;  %v7353_v60 = vpop.f32.mrf.mxu1  ;;  %v3702_v0 = vadd.f32 %v7329_v2, %v3516_v14 }
 0x21a   : > { %v3683_v51 = vpop.f32.mrf.mxu0 }
 0x21b   : > { %v3869_v8 = vpop.f32.mrf.mxu1  ;;  %v3888_v13 = vadd.f32 %v7353_v60, %v3702_v0 }
 0x22c   : > { %v7372_v9 = vpop.f32.mrf.mxu0 }
 0x22d   : > { %v4069_v56 = vadd.f32 %v7372_v9, %v3883_v37  ;;  %v7396_v30 = vpop.f32.mrf.mxu1 }
 0x22e   : > { %v4036_v6 = vpop.f32.mrf.mxu0 }
 0x22f   : > { %v8911_v17 = vmax.f32 %v2783_v7, %v4069_v56  ;;  %v4067_v63 = vadd.f32 %v4036_v6, %v3881_v22  ;;  %v3700_v7 = vadd.f32 %v3683_v51, %v3514_v28  ;;  %v4246_v29 = vpop.f32.mrf.mxu1 }
 0x230   : > { %v7373_v18 = vpop.f32.mrf.mxu0 }
 0x231   : > { %v8916_v4 = vmax.f32 %v2781_v16, %v4067_v63  ;;  %v4070_v23 = vadd.f32 %v7373_v18, %v3884_v10 }
 0x232   : > { %v4039_v27 = vpop.f32.mrf.mxu0 }
 0x233   : > { %v8921_v31 = vmax.f32 %v2784_v26, %v4070_v23  ;;  %v4068_v11 = vadd.f32 %v4039_v27, %v3882_v19  ;;  %v3886_v26 = vadd.f32 %v3869_v8, %v3700_v7 }
 0x234   : > { %v7376_v1 = vpop.f32.mrf.mxu0 }
 0x235   : > { %v8926_v34 = vmax.f32 %v2782_v33, %v4068_v11  ;;  %v4073_v15 = vadd.f32 %v7376_v1, %v3887_v59 }
 0x236   : > { %v4052_v16 = vpop.f32.mrf.mxu0 }
 0x237   : > { %v8931_v14 = vmax.f32 %v2787_v41, %v4073_v15  ;;  %v4071_v20 = vadd.f32 %v4052_v16, %v3885_v62  ;;  %v7397_v41 = vpop.f32.mrf.mxu1 }
 0x238   : > { %v7377_v12 = vpop.f32.mrf.mxu0 }
 0x239   : > { %v8936_v28 = vmax.f32 %v2785_v48, %v4071_v20  ;;  %v4074_v24 = vadd.f32 %v7377_v12, %v3888_v13  ;;  %v4249_v37 = vpop.f32.mrf.mxu1 }
 0x23a   : > { %v4055_v21 = vpop.f32.mrf.mxu0 }
 0x23b   : > { %v8941_v33 = vmax.f32 %v2788_v52, %v4074_v24  ;;  %v4072_v35 = vadd.f32 %v4055_v21, %v3886_v26  ;;  %v7400_v25 = vpop.f32.mrf.mxu1 }
 0x23d   : > { %v8946_v38 = vmax.f32 %v2786_v54, %v4072_v35  ;;  %v4262_v32 = vpop.f32.mrf.mxu1 }
 0x23f   : > { %v7401_v42 = vpop.f32.mrf.mxu1 }
 0x241   : > { %v4265_v47 = vpop.f32.mrf.mxu1 }
 0x24c   : > { %v7420_v48 = vpop.f32.mrf.mxu0 }
 0x24d   : > { %v7444_v22 = vpop.f32.mrf.mxu1  ;;  %v4457_v6 = vadd.f32 %v7420_v48, %v7396_v30 }
 0x24e   : > { %v4424_v45 = vpop.f32.mrf.mxu0 }
 0x24f   : > { %v4610_v36 = vpop.f32.mrf.mxu1  ;;  %v4455_v63 = vadd.f32 %v4424_v45, %v4246_v29  ;;  %v4643_v19 = vadd.f32 %v7444_v22, %v4457_v6 }
 0x250   : > { %v7421_v49 = vpop.f32.mrf.mxu0 }
 0x251   : > { %v7445_v52 = vpop.f32.mrf.mxu1  ;;  %v4458_v23 = vadd.f32 %v7421_v49, %v7397_v41  ;;  %v4641_v27 = vadd.f32 %v4610_v36, %v4455_v63 }
 0x252   : > { %v4427_v50 = vpop.f32.mrf.mxu0 }
 0x253   : > { %v4613_v46 = vpop.f32.mrf.mxu1  ;;  %v4456_v0 = vadd.f32 %v4427_v50, %v4249_v37  ;;  %v4644_v7 = vadd.f32 %v7445_v52, %v4458_v23 }
 0x254   : > { %v7424_v43 = vpop.f32.mrf.mxu0 }
 0x255   : > { %v7448_v40 = vpop.f32.mrf.mxu1  ;;  %v4461_v15 = vadd.f32 %v7424_v43, %v7400_v25  ;;  %v4642_v20 = vadd.f32 %v4613_v46, %v4456_v0 }
 0x256   : > { %v4440_v55 = vpop.f32.mrf.mxu0 }
 0x257   : > { %v4626_v39 = vpop.f32.mrf.mxu1  ;;  %v4459_v16 = vadd.f32 %v4440_v55, %v4262_v32  ;;  %v4647_v21 = vadd.f32 %v7448_v40, %v4461_v15 }
 0x258   : > { %v7425_v53 = vpop.f32.mrf.mxu0 }
 0x259   : > { %v7449_v54 = vpop.f32.mrf.mxu1  ;;  %v4462_v45 = vadd.f32 %v7425_v53, %v7401_v42  ;;  %v4645_v22 = vadd.f32 %v4626_v39, %v4459_v16 }
 0x25a   : > { %v4443_v57 = vpop.f32.mrf.mxu0 }
 0x25b   : > { %v4629_v44 = vpop.f32.mrf.mxu1  ;;  %v4460_v37 = vadd.f32 %v4443_v57, %v4265_v47 }
 0x26c   : > { %v7468_v58 = vpop.f32.mrf.mxu0 }
 0x26d   : > { %v7492_v59 = vpop.f32.mrf.mxu1  ;;  %v4829_v11 = vadd.f32 %v7468_v58, %v4643_v19 }
 0x26e   : > { %v4796_v61 = vpop.f32.mrf.mxu0 }
 0x26f   : > { %v4982_v62 = vpop.f32.mrf.mxu1  ;;  %v4827_v8 = vadd.f32 %v4796_v61, %v4641_v27  ;;  %v5015_v12 = vadd.f32 %v7492_v59, %v4829_v11  ;;  %v4648_v61 = vadd.f32 %v7449_v54, %v4462_v45 }
 0x270   : > { %v7469_v2 = vpop.f32.mrf.mxu0 }
 0x271   : > { %v7493_v51 = vpop.f32.mrf.mxu1  ;;  %v4830_v26 = vadd.f32 %v7469_v2, %v4644_v7  ;;  %v5013_v35 = vadd.f32 %v4982_v62, %v4827_v8  ;;  %v4646_v62 = vadd.f32 %v4629_v44, %v4460_v37 }
 0x272   : > { %v4799_v3 = vpop.f32.mrf.mxu0 }
 0x273   : > { %v4985_v9 = vpop.f32.mrf.mxu1  ;;  %v4828_v29 = vadd.f32 %v4799_v3, %v4642_v20  ;;  %v5016_v36 = vadd.f32 %v7493_v51, %v4830_v26 }
 0x274   : > { %v7472_v5 = vpop.f32.mrf.mxu0 }
 0x275   : > { %v7496_v56 = vpop.f32.mrf.mxu1  ;;  %v4833_v50 = vadd.f32 %v7472_v5, %v4647_v21  ;;  %v5014_v55 = vadd.f32 %v4985_v9, %v4828_v29  ;;  %v6495_v9 = vld [vmem:[%s8968_s2] ss:$0 sm:$0xff] }
 0x276   : > { %v4812_v10 = vpop.f32.mrf.mxu0 }
 0x277   : > { %v4998_v18 = vpop.f32.mrf.mxu1  ;;  %v4831_v43 = vadd.f32 %v4812_v10, %v4645_v22  ;;  %v5019_v3 = vadd.f32 %v7496_v56, %v4833_v50 }
 0x278   : > { %v7473_v60 = vpop.f32.mrf.mxu0 }
 0x279   : > { %v7497_v1 = vpop.f32.mrf.mxu1  ;;  %v4834_v57 = vadd.f32 %v7473_v60, %v4648_v61  ;;  %v5017_v51 = vadd.f32 %v4998_v18, %v4831_v43 }
 0x27a   : > { %v4815_v13 = vpop.f32.mrf.mxu0 }
 0x27b   : > { %v5001_v24 = vpop.f32.mrf.mxu1  ;;  %v4832_v5 = vadd.f32 %v4815_v13, %v4646_v62  ;;  %v5020_v0 = vadd.f32 %v7497_v1, %v4834_v57 }
 0x27d   : > { %v5018_v11 = vadd.f32 %v5001_v24, %v4832_v5 }
 0x28c   : > { %v7516_v30 = vpop.f32.mrf.mxu0 }
 0x28d   : > { %v5201_v48 = vadd.f32 %v7516_v30, %v5015_v12  ;;  %v7540_v41 = vpop.f32.mrf.mxu1 }
 0x28e   : > { %v5168_v49 = vpop.f32.mrf.mxu0 }
 0x28f   : > { %v5387_v25 = vadd.f32 %v7540_v41, %v5201_v48  ;;  %v5199_v52 = vadd.f32 %v5168_v49, %v5013_v35  ;;  %v5354_v32 = vpop.f32.mrf.mxu1 }
 0x290   : > { %v7517_v46 = vpop.f32.mrf.mxu0 }
 0x291   : > { %v5385_v58 = vadd.f32 %v5354_v32, %v5199_v52  ;;  %v5202_v59 = vadd.f32 %v7517_v46, %v5016_v36  ;;  %v7541_v40 = vpop.f32.mrf.mxu1  ;;  %v5419_v42 = vmax.f32 %v8911_v17, %v5387_v25 }
 0x292   : > { %v5171_v2 = vpop.f32.mrf.mxu0 }
 0x293   : > { %v5388_v47 = vadd.f32 %v7541_v40, %v5202_v59  ;;  %v5200_v39 = vadd.f32 %v5171_v2, %v5014_v55  ;;  %v5357_v53 = vpop.f32.mrf.mxu1  ;;  %v5417_v10 = vmax.f32 %v8916_v4, %v5385_v58  ;;  %v5450_v19 = vadd.f32 %v6495_v9, %v5419_v42 }
 0x294   : > { %v7520_v6 = vpop.f32.mrf.mxu0 }
 0x295   : > { %v5420_v54 = vmax.f32 %v8921_v31, %v5388_v47  ;;  %v5386_v44 = vadd.f32 %v5357_v53, %v5200_v39  ;;  %v5205_v56 = vadd.f32 %v7520_v6, %v5019_v3  ;;  %v7544_v63 = vpop.f32.mrf.mxu1  ;;  %v5448_v15 = vadd.f32 %v6495_v9, %v5417_v10 }
 0x296   : > { %v5184_v17 = vpop.f32.mrf.mxu0 }
 0x297   : > { %v5451_v23 = vadd.f32 %v6495_v9, %v5420_v54  ;;  %v5418_v60 = vmax.f32 %v8926_v34, %v5386_v44  ;;  %v5203_v18 = vadd.f32 %v5184_v17, %v5017_v51  ;;  %v5370_v27 = vpop.f32.mrf.mxu1  ;;  %v5391_v4 = vadd.f32 %v7544_v63, %v5205_v56 }
 0x298   : > { %v7521_v7 = vpop.f32.mrf.mxu0 }
 0x299   : > { %v6523_v31 = vpack.c.bf16 %v5451_v23, %v5450_v19  ;;  %v5449_v8 = vadd.f32 %v6495_v9, %v5418_v60  ;;  %v5389_v16 = vadd.f32 %v5370_v27, %v5203_v18  ;;  %v7545_v13 = vpop.f32.mrf.mxu1  ;;  %v5206_v20 = vadd.f32 %v7521_v7, %v5020_v0 }
 0x29a   : > { %v5187_v12 = vpop.f32.mrf.mxu0  ;;  %v5423_v30 = vmax.f32 %v8931_v14, %v5391_v4 }
 0x29b   : > { %6535 = vst [vmem:[%s170_s11 + $0x8] sm:$0xff] %v6523_v31   ;;  %v6518_v26 = vpack.c.bf16 %v5449_v8, %v5448_v15  ;;  %v5204_v34 = vadd.f32 %v5187_v12, %v5018_v11  ;;  %v5392_v1 = vadd.f32 %v7545_v13, %v5206_v20  ;;  %v5373_v24 = vpop.f32.mrf.mxu1  ;;  %v5421_v21 = vmax.f32 %v8936_v28, %v5389_v16 }
 0x29c   : > { %v5454_v41 = vadd.f32 %v6495_v9, %v5423_v30 }
 0x29d   : > { %6519 = vst [vmem:[%s170_s11] sm:$0xff] %v6518_v26   ;;  %v5390_v35 = vadd.f32 %v5373_v24, %v5204_v34  ;;  %v5424_v29 = vmax.f32 %v8941_v33, %v5392_v1  ;;  %v5452_v22 = vadd.f32 %v6495_v9, %v5421_v21 }
 0x29f   : > { %v5422_v48 = vmax.f32 %v8946_v38, %v5390_v35  ;;  %v5455_v45 = vadd.f32 %v6495_v9, %v5424_v29 }
 0x2a1   : > { %v5453_v37 = vadd.f32 %v6495_v9, %v5422_v48  ;;  %v6533_v49 = vpack.c.bf16 %v5455_v45, %v5454_v41 }
 0x2a3   : > { %v6528_v36 = vpack.c.bf16 %v5453_v37, %v5452_v22  ;;  %6537 = vst [vmem:[%s170_s11 + $0x18] sm:$0xff] %v6533_v49  }
 0x2a5   : > { %6536 = vst [vmem:[%s170_s11 + $0x10] sm:$0xff] %v6528_v36  }
 0x2a6 PF: > { %s13_s12 = sadd.s32 1, %s7897_s12  }
 0x2a7   : > { %p10_p4 = scmp.ge.s32.totalorder %s13_s12, 4  }
 0x2a9   :  { %12 = sbr.rel (!%p10_p4) target bundleno = 1 (0x1), region = 95 }

// kernel: nn_forward.5
= control target key start
LH: loop header
LB: loop body
LE: loop exit
PB: predicated region body
PF: predicated region fallthrough
CT: control target
= control target key end

     0   :  { %vm13570_vm0 = vmmov 0   ;;  %s16818_s1 = inlined_call_operand.vmem [shape: bf16[7,128,128], index: 1, kind: input, shape index: {}]   ;;  %s16819_s0 = inlined_call_operand.vmem [shape: bf16[1,4,7,128,128], index: 0, kind: input, shape index: {}]   ;;  %s16820_s3 = inlined_call_operand.vmem [shape: f32[16,128,128], index: 3, kind: input, shape index: {}]   ;;  %s16821_s2 = inlined_call_operand.vmem [shape: f32[1,128], index: 2, kind: input, shape index: {}]   ;;  %s16822_s4 = inlined_call_operand.vmem [shape: f32[1,128], index: 4, kind: input, shape index: {}]   ;;  %s16823_s5 = inlined_call_operand.vmem [shape: f32[128,128], index: 5, kind: input, shape index: {}]   ;;  %s16824_s6 = inlined_call_operand.vmem [shape: f32[1,128], index: 6, kind: input, shape index: {}]   ;;  %s16825_s7 = inlined_call_operand.vmem [shape: f32[1,8,128], index: 7, kind: output, shape index: {}]  }
   0x1   :  { %v13121_v0 = vld [vmem:[%s16818_s1 + $0x38] sm:$0xff]   ;;  %v13123_v2 = vld [vmem:[%s16818_s1 + $0x30] sm:$0xff]   ;;  %v13125_v4 = vld [vmem:[%s16818_s1 + $0x28] sm:$0xff]  }
   0x2   :  { %v13122_v1 = vld [vmem:[%s16818_s1 + $0x78] sm:$0xff]   ;;  %11628 = vmatprep.subr.bf16.mxu0 %v13121_v0  ;;  %v13124_v3 = vld [vmem:[%s16818_s1 + $0x70] sm:$0xff]   ;;  %v13126_v5 = vld [vmem:[%s16818_s1 + $0x68] sm:$0xff]  }
   0x3   :  { %11660 = vmatprep.subr.bf16.mxu1 %v13122_v1  ;;  %11629 = vmatpush3.bf16.msra.mxu0 %v13121_v0  ;;  %v13127_v6 = vld [vmem:[%s16818_s1 + $0x20] sm:$0xff]   ;;  %v13129_v8 = vld [vmem:[%s16818_s1 + $0x18] sm:$0xff]   ;;  %v13131_v10 = vld [vmem:[%s16818_s1 + $0x10] sm:$0xff]  }
   0x4   :  { %11661 = vmatpush3.bf16.msra.mxu1 %v13122_v1  ;;  %11630 = vmatprep.subr.bf16.mxu0 %v13123_v2  ;;  %v13128_v7 = vld [vmem:[%s16818_s1 + $0x60] sm:$0xff]   ;;  %v13130_v9 = vld [vmem:[%s16818_s1 + $0x58] sm:$0xff]   ;;  %v13132_v11 = vld [vmem:[%s16818_s1 + $0x50] sm:$0xff]  }
   0x5   :  { %11662 = vmatprep.subr.bf16.mxu1 %v13124_v3  ;;  %v13137_v12 = vld [vmem:[%s16819_s0] sm:$0xff]   ;;  %v13133_v14 = vld [vmem:[%s16818_s1 + $0x8] sm:$0xff]   ;;  %v13141_v19 = vld [vmem:[%s16818_s1 + $0xb8] sm:$0xff]  }
   0x6   :  { %v13138_v13 = vld [vmem:[%s16819_s0 + $0x40] sm:$0xff]   ;;  %11644 = vmatprep.mubr.bf16.mxu0 %v13137_v12  ;;  %v13134_v15 = vld [vmem:[%s16818_s1 + $0x48] sm:$0xff]   ;;  %v13142_v20 = vld [vmem:[%s16818_s1 + $0xf8] sm:$0xff]  }
   0x7   :  { %11631 = vmatpush3.bf16.msra.mxu0 %v13123_v2  ;;  %11676 = vmatprep.mubr.bf16.mxu1 %v13138_v13  ;;  %v13135_v16 = vld [vmem:[%s16818_s1] sm:$0xff]   ;;  %v13139_v18 = vld [vmem:[%s16819_s0 + $0x8] sm:$0xff]   ;;  %v13143_v22 = vld [vmem:[%s16818_s1 + $0xb0] sm:$0xff]  }
   0x8   :  { %11663 = vmatpush3.bf16.msra.mxu1 %v13124_v3  ;;  %11632 = vmatprep.subr.bf16.mxu0 %v13125_v4  ;;  %v13136_v17 = vld [vmem:[%s16818_s1 + $0x40] sm:$0xff]   ;;  %v13140_v21 = vld [vmem:[%s16819_s0 + $0x48] sm:$0xff]   ;;  %v13144_v23 = vld [vmem:[%s16818_s1 + $0xf0] sm:$0xff]  }
   0x9   :  { %11664 = vmatprep.subr.bf16.mxu1 %v13126_v5  ;;  %v13145_v24 = vld [vmem:[%s16819_s0 + $0x10] sm:$0xff]   ;;  %v13147_v26 = vld [vmem:[%s16819_s0 + $0x18] sm:$0xff]   ;;  %v13149_v27 = vld [vmem:[%s16818_s1 + $0xa8] sm:$0xff]  }
   0xa   :  { %v13146_v25 = vld [vmem:[%s16819_s0 + $0x50] sm:$0xff]   ;;  %v13150_v28 = vld [vmem:[%s16818_s1 + $0xe8] sm:$0xff]   ;;  %v13148_v29 = vld [vmem:[%s16819_s0 + $0x58] sm:$0xff]  }
   0xb   :  { %11633 = vmatpush3.bf16.msra.mxu0 %v13125_v4  ;;  %v13151_v30 = vld [vmem:[%s16818_s1 + $0xa0] sm:$0xff]   ;;  %v13155_v34 = vld [vmem:[%s16819_s0 + $0x28] sm:$0xff]   ;;  %v13157_v35 = vld [vmem:[%s16818_s1 + $0x98] sm:$0xff]  }
   0xc   :  { %11665 = vmatpush3.bf16.msra.mxu1 %v13126_v5  ;;  %11634 = vmatprep.subr.bf16.mxu0 %v13127_v6  ;;  %v13152_v31 = vld [vmem:[%s16818_s1 + $0xe0] sm:$0xff]   ;;  %v13158_v36 = vld [vmem:[%s16818_s1 + $0xd8] sm:$0xff]   ;;  %v13156_v37 = vld [vmem:[%s16819_s0 + $0x68] sm:$0xff]  }
   0xd   :  { %11666 = vmatprep.subr.bf16.mxu1 %v13128_v7  ;;  %v13153_v32 = vld [vmem:[%s16819_s0 + $0x20] sm:$0xff]   ;;  %v13159_v38 = vld [vmem:[%s16818_s1 + $0x90] sm:$0xff]   ;;  %v13163_v42 = vld [vmem:[%s16819_s0 + $0x38] sm:$0xff]  }
   0xe   :  { %v13154_v33 = vld [vmem:[%s16819_s0 + $0x60] sm:$0xff]   ;;  %v13160_v39 = vld [vmem:[%s16818_s1 + $0xd0] sm:$0xff]   ;;  %v13165_v43 = vld [vmem:[%s16818_s1 + $0x88] sm:$0xff]  }
   0xf   :  { %11635 = vmatpush3.bf16.msra.mxu0 %v13127_v6  ;;  %v13161_v40 = vld [vmem:[%s16819_s0 + $0x30] sm:$0xff]   ;;  %v13166_v44 = vld [vmem:[%s16818_s1 + $0xc8] sm:$0xff]   ;;  %v13164_v45 = vld [vmem:[%s16819_s0 + $0x78] sm:$0xff]  }
  0x10   :  { %11667 = vmatpush3.bf16.msra.mxu1 %v13128_v7  ;;  %11636 = vmatprep.subr.bf16.mxu0 %v13129_v8  ;;  %v13162_v41 = vld [vmem:[%s16819_s0 + $0x70] sm:$0xff]   ;;  %v13167_v46 = vld [vmem:[%s16818_s1 + $0x80] sm:$0xff]   ;;  %v13171_v50 = vld [vmem:[%s16819_s0 + $0x88] sm:$0xff]  }
  0x11   :  { %11668 = vmatprep.subr.bf16.mxu1 %v13130_v9  ;;  %v13168_v47 = vld [vmem:[%s16818_s1 + $0xc0] sm:$0xff]   ;;  %v13173_v51 = vld [vmem:[%s16818_s1 + $0x138] sm:$0xff]   ;;  %v13172_v53 = vld [vmem:[%s16819_s0 + $0xc8] sm:$0xff]  }
  0x12   :  { %v13169_v48 = vld [vmem:[%s16819_s0 + $0x80] sm:$0xff]   ;;  %v13174_v52 = vld [vmem:[%s16818_s1 + $0x178] sm:$0xff]   ;;  %v13175_v54 = vld [vmem:[%s16818_s1 + $0x130] sm:$0xff]  }
  0x13   :  { %11637 = vmatpush3.bf16.msra.mxu0 %v13129_v8  ;;  %v13170_v49 = vld [vmem:[%s16819_s0 + $0xc0] sm:$0xff]   ;;  %v13176_v55 = vld [vmem:[%s16818_s1 + $0x170] sm:$0xff]   ;;  %v13179_v58 = vld [vmem:[%s16819_s0 + $0x98] sm:$0xff]  }
  0x14   :  { %11669 = vmatpush3.bf16.msra.mxu1 %v13130_v9  ;;  %11638 = vmatprep.subr.bf16.mxu0 %v13131_v10  ;;  %v13177_v56 = vld [vmem:[%s16819_s0 + $0x90] sm:$0xff]   ;;  %v13181_v59 = vld [vmem:[%s16818_s1 + $0x128] sm:$0xff]   ;;  %v13180_v61 = vld [vmem:[%s16819_s0 + $0xd8] sm:$0xff]  }
  0x15   :  { %11670 = vmatprep.subr.bf16.mxu1 %v13132_v11  ;;  %v13178_v57 = vld [vmem:[%s16819_s0 + $0xd0] sm:$0xff]   ;;  %v13182_v60 = vld [vmem:[%s16818_s1 + $0x168] sm:$0xff]   ;;  %v13183_v62 = vld [vmem:[%s16818_s1 + $0x120] sm:$0xff]  }
  0x16   :  { %v13184_v63 = vld [vmem:[%s16818_s1 + $0x160] sm:$0xff]   ;;  %v13187_v2 = vld [vmem:[%s16819_s0 + $0xa8] sm:$0xff]   ;;  %v13189_v3 = vld [vmem:[%s16818_s1 + $0x118] sm:$0xff]  }
  0x17   :  { %11639 = vmatpush3.bf16.msra.mxu0 %v13131_v10  ;;  %v13185_v0 = vld [vmem:[%s16819_s0 + $0xa0] sm:$0xff]   ;;  %v13190_v4 = vld [vmem:[%s16818_s1 + $0x158] sm:$0xff]   ;;  %v13188_v5 = vld [vmem:[%s16819_s0 + $0xe8] sm:$0xff]  }
  0x18   :  { %11671 = vmatpush3.bf16.msra.mxu1 %v13132_v11  ;;  %11640 = vmatprep.subr.bf16.mxu0 %v13133_v14  ;;  %v13186_v1 = vld [vmem:[%s16819_s0 + $0xe0] sm:$0xff]   ;;  %v13191_v6 = vld [vmem:[%s16818_s1 + $0x110] sm:$0xff]   ;;  %v13195_v10 = vld [vmem:[%s16819_s0 + $0xb8] sm:$0xff]  }
  0x19   :  { %11672 = vmatprep.subr.bf16.mxu1 %v13134_v15  ;;  %v13192_v7 = vld [vmem:[%s16818_s1 + $0x150] sm:$0xff]   ;;  %v13197_v11 = vld [vmem:[%s16818_s1 + $0x108] sm:$0xff]   ;;  %v13196_v13 = vld [vmem:[%s16819_s0 + $0xf8] sm:$0xff]  }
  0x1a   :  { %v13193_v8 = vld [vmem:[%s16819_s0 + $0xb0] sm:$0xff]   ;;  %v13198_v12 = vld [vmem:[%s16818_s1 + $0x148] sm:$0xff]  }
  0x1b   :  { %11641 = vmatpush3.bf16.msra.mxu0 %v13133_v14  ;;  %v13194_v9 = vld [vmem:[%s16819_s0 + $0xf0] sm:$0xff]   ;;  %v13199_v14 = vld [vmem:[%s16818_s1 + $0x100] sm:$0xff]  }
  0x1c   :  { %11673 = vmatpush3.bf16.msra.mxu1 %v13134_v15  ;;  %11642 = vmatprep.subr.bf16.mxu0 %v13135_v16  ;;  %v13200_v15 = vld [vmem:[%s16818_s1 + $0x140] sm:$0xff]  }
  0x1d   :  { %11674 = vmatprep.subr.bf16.mxu1 %v13136_v17 }
  0x1f   :  { %11643 = vmatpush3.bf16.msra.mxu0 %v13135_v16  ;;  %v13201_v16 = vld [vmem:[%s16819_s0 + $0x100] sm:$0xff]  }
  0x20   :  { %11675 = vmatpush3.bf16.msra.mxu1 %v13136_v17  ;;  %11692 = vmatprep.subr.bf16.mxu0 %v13141_v19  ;;  %v13202_v17 = vld [vmem:[%s16819_s0 + $0x140] sm:$0xff]  }
  0x21   :  { %11724 = vmatprep.subr.bf16.mxu1 %v13142_v20 }
  0x22   :  { %11645 = vmatmul.mubr.bf16.vlgmr.msra.gmra.mxu0 %v13139_v18  ;;  %v13203_v18 = vld [vmem:[%s16819_s0 + $0x108] sm:$0xff]  }
  0x23   :  { %11677 = vmatmul.mubr.bf16.vlgmr.msra.gmra.mxu1 %v13140_v21  ;;  %11693 = vmatpush3.bf16.msra.mxu0 %v13141_v19  ;;  %v13205_v19 = vld [vmem:[%s16818_s1 + $0x1b8] sm:$0xff]   ;;  %v13204_v21 = vld [vmem:[%s16819_s0 + $0x148] sm:$0xff]  }
  0x24   :  { %11725 = vmatpush3.bf16.msra.mxu1 %v13142_v20  ;;  %11694 = vmatprep.subr.bf16.mxu0 %v13143_v22  ;;  %v13206_v20 = vld [vmem:[%s16818_s1 + $0x38] sm:$0xff]  }
  0x25   :  { %11726 = vmatprep.subr.bf16.mxu1 %v13144_v23  ;;  %11648 = vmatprep.mubr.bf16.mxu0 %v13145_v24  ;;  %v13209_v24 = vld [vmem:[%s16819_s0 + $0x110] sm:$0xff]  }
  0x26   :  { %11680 = vmatprep.mubr.bf16.mxu1 %v13146_v25  ;;  %v13210_v25 = vld [vmem:[%s16819_s0 + $0x150] sm:$0xff]  }
  0x27   :  { %11695 = vmatpush3.bf16.msra.mxu0 %v13143_v22  ;;  %v13207_v22 = vld [vmem:[%s16818_s1 + $0x1b0] sm:$0xff]  }
  0x28   :  { %11727 = vmatpush3.bf16.msra.mxu1 %v13144_v23  ;;  %11696 = vmatprep.subr.bf16.mxu0 %v13149_v27  ;;  %v13208_v23 = vld [vmem:[%s16818_s1 + $0x30] sm:$0xff]  }
  0x29   :  { %11728 = vmatprep.subr.bf16.mxu1 %v13150_v28 }
  0x2a   :  { %11649 = vmatmul.mubr.bf16.gmra.mxu0 %v13147_v26  ;;  %v13211_v26 = vld [vmem:[%s16819_s0 + $0x118] sm:$0xff]  }
  0x2b   :  { %11681 = vmatmul.mubr.bf16.gmra.mxu1 %v13148_v29  ;;  %11697 = vmatpush3.bf16.msra.mxu0 %v13149_v27  ;;  %v13213_v27 = vld [vmem:[%s16818_s1 + $0x1a8] sm:$0xff]   ;;  %v13212_v29 = vld [vmem:[%s16819_s0 + $0x158] sm:$0xff]  }
  0x2c   :  { %11729 = vmatpush3.bf16.msra.mxu1 %v13150_v28  ;;  %11698 = vmatprep.subr.bf16.mxu0 %v13151_v30  ;;  %v13214_v28 = vld [vmem:[%s16818_s1 + $0x28] sm:$0xff]  }
  0x2d   :  { %11730 = vmatprep.subr.bf16.mxu1 %v13152_v31  ;;  %11652 = vmatprep.mubr.bf16.mxu0 %v13153_v32  ;;  %v13217_v32 = vld [vmem:[%s16819_s0 + $0x120] sm:$0xff]  }
  0x2e   :  { %11684 = vmatprep.mubr.bf16.mxu1 %v13154_v33  ;;  %v13218_v33 = vld [vmem:[%s16819_s0 + $0x160] sm:$0xff]  }
  0x2f   :  { %11699 = vmatpush3.bf16.msra.mxu0 %v13151_v30  ;;  %v13215_v30 = vld [vmem:[%s16818_s1 + $0x1a0] sm:$0xff]  }
  0x30   :  { %11731 = vmatpush3.bf16.msra.mxu1 %v13152_v31  ;;  %11700 = vmatprep.subr.bf16.mxu0 %v13157_v35  ;;  %v13216_v31 = vld [vmem:[%s16818_s1 + $0x20] sm:$0xff]  }
  0x31   :  { %11732 = vmatprep.subr.bf16.mxu1 %v13158_v36 }
  0x32   :  { %11653 = vmatmul.mubr.bf16.gmra.mxu0 %v13155_v34  ;;  %v13219_v34 = vld [vmem:[%s16819_s0 + $0x128] sm:$0xff]  }
  0x33   :  { %11685 = vmatmul.mubr.bf16.gmra.mxu1 %v13156_v37  ;;  %11701 = vmatpush3.bf16.msra.mxu0 %v13157_v35  ;;  %v13221_v35 = vld [vmem:[%s16818_s1 + $0x198] sm:$0xff]   ;;  %v13220_v37 = vld [vmem:[%s16819_s0 + $0x168] sm:$0xff]  }
  0x34   :  { %11733 = vmatpush3.bf16.msra.mxu1 %v13158_v36  ;;  %11702 = vmatprep.subr.bf16.mxu0 %v13159_v38  ;;  %v13222_v36 = vld [vmem:[%s16818_s1 + $0x18] sm:$0xff]  }
  0x35   :  { %11734 = vmatprep.subr.bf16.mxu1 %v13160_v39  ;;  %11656 = vmatprep.mubr.bf16.mxu0 %v13161_v40  ;;  %v13225_v40 = vld [vmem:[%s16819_s0 + $0x130] sm:$0xff]  }
  0x36   :  { %11688 = vmatprep.mubr.bf16.mxu1 %v13162_v41  ;;  %v13226_v41 = vld [vmem:[%s16819_s0 + $0x170] sm:$0xff]  }
  0x37   :  { %11703 = vmatpush3.bf16.msra.mxu0 %v13159_v38  ;;  %v13223_v38 = vld [vmem:[%s16818_s1 + $0x190] sm:$0xff]  }
  0x38   :  { %11735 = vmatpush3.bf16.msra.mxu1 %v13160_v39  ;;  %11704 = vmatprep.subr.bf16.mxu0 %v13165_v43  ;;  %v13224_v39 = vld [vmem:[%s16818_s1 + $0x10] sm:$0xff]  }
  0x39   :  { %11736 = vmatprep.subr.bf16.mxu1 %v13166_v44 }
  0x3a   :  { %11657 = vmatmul.mubr.bf16.gmra.mxu0 %v13163_v42  ;;  %v13227_v42 = vld [vmem:[%s16819_s0 + $0x138] sm:$0xff]  }
  0x3b   :  { %11689 = vmatmul.mubr.bf16.gmra.mxu1 %v13164_v45  ;;  %11705 = vmatpush3.bf16.msra.mxu0 %v13165_v43  ;;  %v13229_v43 = vld [vmem:[%s16818_s1 + $0x188] sm:$0xff]   ;;  %v13228_v45 = vld [vmem:[%s16819_s0 + $0x178] sm:$0xff]  }
  0x3c   :  { %11737 = vmatpush3.bf16.msra.mxu1 %v13166_v44  ;;  %11706 = vmatprep.subr.bf16.mxu0 %v13167_v46  ;;  %v13230_v44 = vld [vmem:[%s16818_s1 + $0x8] sm:$0xff]  }
  0x3d   :  { %11738 = vmatprep.subr.bf16.mxu1 %v13168_v47  ;;  %11708 = vmatprep.mubr.bf16.mxu0 %v13169_v48  ;;  %v13233_v48 = vld [vmem:[%s16819_s0 + $0x180] sm:$0xff]  }
  0x3e   :  { %11740 = vmatprep.mubr.bf16.mxu1 %v13170_v49  ;;  %v13234_v49 = vld [vmem:[%s16819_s0 + $0x1c0] sm:$0xff]  }
  0x3f   :  { %11707 = vmatpush3.bf16.msra.mxu0 %v13167_v46  ;;  %v13231_v46 = vld [vmem:[%s16818_s1 + $0x180] sm:$0xff]  }
  0x40   :  { %11739 = vmatpush3.bf16.msra.mxu1 %v13168_v47  ;;  %11756 = vmatprep.subr.bf16.mxu0 %v13173_v51  ;;  %v13232_v47 = vld [vmem:[%s16818_s1] sm:$0xff]  }
  0x41   :  { %11788 = vmatprep.subr.bf16.mxu1 %v13174_v52 }
  0x42   :  { %11709 = vmatmul.mubr.bf16.vlgmr.msra.gmra.mxu0 %v13171_v50  ;;  %v13235_v50 = vld [vmem:[%s16819_s0 + $0x188] sm:$0xff]  }
  0x43   :  { %11741 = vmatmul.mubr.bf16.vlgmr.msra.gmra.mxu1 %v13172_v53  ;;  %11757 = vmatpush3.bf16.msra.mxu0 %v13173_v51  ;;  %v13237_v51 = vld [vmem:[%s16818_s1 + $0x78] sm:$0xff]   ;;  %v13236_v53 = vld [vmem:[%s16819_s0 + $0x1c8] sm:$0xff]  }
  0x44   :  { %11789 = vmatpush3.bf16.msra.mxu1 %v13174_v52  ;;  %11758 = vmatprep.subr.bf16.mxu0 %v13175_v54  ;;  %v13238_v52 = vld [vmem:[%s16818_s1 + $0xb8] sm:$0xff]  }
  0x45   :  { %11790 = vmatprep.subr.bf16.mxu1 %v13176_v55  ;;  %11712 = vmatprep.mubr.bf16.mxu0 %v13177_v56  ;;  %v13241_v56 = vld [vmem:[%s16819_s0 + $0x190] sm:$0xff]  }
  0x46   :  { %11744 = vmatprep.mubr.bf16.mxu1 %v13178_v57  ;;  %v13242_v57 = vld [vmem:[%s16819_s0 + $0x1d0] sm:$0xff]  }
  0x47   :  { %11759 = vmatpush3.bf16.msra.mxu0 %v13175_v54  ;;  %v13239_v54 = vld [vmem:[%s16818_s1 + $0x70] sm:$0xff]  }
  0x48   :  { %11791 = vmatpush3.bf16.msra.mxu1 %v13176_v55  ;;  %11760 = vmatprep.subr.bf16.mxu0 %v13181_v59  ;;  %v13240_v55 = vld [vmem:[%s16818_s1 + $0xb0] sm:$0xff]  }
  0x49   :  { %11792 = vmatprep.subr.bf16.mxu1 %v13182_v60 }
  0x4a   :  { %11713 = vmatmul.mubr.bf16.gmra.mxu0 %v13179_v58  ;;  %v13243_v58 = vld [vmem:[%s16819_s0 + $0x198] sm:$0xff]  }
  0x4b   :  { %11745 = vmatmul.mubr.bf16.gmra.mxu1 %v13180_v61  ;;  %11761 = vmatpush3.bf16.msra.mxu0 %v13181_v59  ;;  %v13245_v59 = vld [vmem:[%s16818_s1 + $0x68] sm:$0xff]   ;;  %v13244_v61 = vld [vmem:[%s16819_s0 + $0x1d8] sm:$0xff]  }
  0x4c   :  { %11793 = vmatpush3.bf16.msra.mxu1 %v13182_v60  ;;  %11762 = vmatprep.subr.bf16.mxu0 %v13183_v62  ;;  %v13246_v60 = vld [vmem:[%s16818_s1 + $0xa8] sm:$0xff]  }
  0x4d   :  { %11794 = vmatprep.subr.bf16.mxu1 %v13184_v63  ;;  %11716 = vmatprep.mubr.bf16.mxu0 %v13185_v0  ;;  %v13249_v0 = vld [vmem:[%s16819_s0 + $0x1a0] sm:$0xff]  }
  0x4e   :  { %11748 = vmatprep.mubr.bf16.mxu1 %v13186_v1  ;;  %v13250_v1 = vld [vmem:[%s16819_s0 + $0x1e0] sm:$0xff]  }
  0x4f   :  { %11763 = vmatpush3.bf16.msra.mxu0 %v13183_v62  ;;  %v13247_v62 = vld [vmem:[%s16818_s1 + $0x60] sm:$0xff]  }
  0x50   :  { %11795 = vmatpush3.bf16.msra.mxu1 %v13184_v63  ;;  %11764 = vmatprep.subr.bf16.mxu0 %v13189_v3  ;;  %v13248_v63 = vld [vmem:[%s16818_s1 + $0xa0] sm:$0xff]  }
  0x51   :  { %11796 = vmatprep.subr.bf16.mxu1 %v13190_v4 }
  0x52   :  { %11717 = vmatmul.mubr.bf16.gmra.mxu0 %v13187_v2  ;;  %v13251_v2 = vld [vmem:[%s16819_s0 + $0x1a8] sm:$0xff]  }
  0x53   :  { %11749 = vmatmul.mubr.bf16.gmra.mxu1 %v13188_v5  ;;  %11765 = vmatpush3.bf16.msra.mxu0 %v13189_v3  ;;  %v13253_v3 = vld [vmem:[%s16818_s1 + $0x58] sm:$0xff]   ;;  %v13252_v5 = vld [vmem:[%s16819_s0 + $0x1e8] sm:$0xff]  }
  0x54   :  { %11797 = vmatpush3.bf16.msra.mxu1 %v13190_v4  ;;  %11766 = vmatprep.subr.bf16.mxu0 %v13191_v6  ;;  %v13254_v4 = vld [vmem:[%s16818_s1 + $0x98] sm:$0xff]  }
  0x55   :  { %11798 = vmatprep.subr.bf16.mxu1 %v13192_v7  ;;  %11720 = vmatprep.mubr.bf16.mxu0 %v13193_v8  ;;  %v13257_v8 = vld [vmem:[%s16819_s0 + $0x1b0] sm:$0xff]  }
  0x56   :  { %11752 = vmatprep.mubr.bf16.mxu1 %v13194_v9  ;;  %v13258_v9 = vld [vmem:[%s16819_s0 + $0x1f0] sm:$0xff]  }
  0x57   :  { %11767 = vmatpush3.bf16.msra.mxu0 %v13191_v6  ;;  %v13255_v6 = vld [vmem:[%s16818_s1 + $0x50] sm:$0xff]  }
  0x58   :  { %11799 = vmatpush3.bf16.msra.mxu1 %v13192_v7  ;;  %11768 = vmatprep.subr.bf16.mxu0 %v13197_v11  ;;  %v13256_v7 = vld [vmem:[%s16818_s1 + $0x90] sm:$0xff]  }
  0x59   :  { %11800 = vmatprep.subr.bf16.mxu1 %v13198_v12 }
  0x5a   :  { %11721 = vmatmul.mubr.bf16.gmra.mxu0 %v13195_v10  ;;  %v13259_v10 = vld [vmem:[%s16819_s0 + $0x1b8] sm:$0xff]  }
  0x5b   :  { %11753 = vmatmul.mubr.bf16.gmra.mxu1 %v13196_v13  ;;  %11769 = vmatpush3.bf16.msra.mxu0 %v13197_v11  ;;  %v13261_v11 = vld [vmem:[%s16818_s1 + $0x48] sm:$0xff]   ;;  %v13260_v13 = vld [vmem:[%s16819_s0 + $0x1f8] sm:$0xff]  }
  0x5c   :  { %11801 = vmatpush3.bf16.msra.mxu1 %v13198_v12  ;;  %11770 = vmatprep.subr.bf16.mxu0 %v13199_v14  ;;  %v13262_v12 = vld [vmem:[%s16818_s1 + $0x88] sm:$0xff]  }
  0x5d   :  { %11802 = vmatprep.subr.bf16.mxu1 %v13200_v15  ;;  %11772 = vmatprep.mubr.bf16.mxu0 %v13201_v16  ;;  %v13265_v16 = vld [vmem:[%s16819_s0 + $0x200] sm:$0xff]  }
  0x5e   :  { %11804 = vmatprep.mubr.bf16.mxu1 %v13202_v17  ;;  %v13266_v17 = vld [vmem:[%s16819_s0 + $0x240] sm:$0xff]  }
  0x5f   :  { %11771 = vmatpush3.bf16.msra.mxu0 %v13199_v14  ;;  %v13263_v14 = vld [vmem:[%s16818_s1 + $0x40] sm:$0xff]  }
  0x60   :  { %11803 = vmatpush3.bf16.msra.mxu1 %v13200_v15  ;;  %11820 = vmatprep.subr.bf16.mxu0 %v13205_v19  ;;  %v13264_v15 = vld [vmem:[%s16818_s1 + $0x80] sm:$0xff]  }
  0x61   :  { %11852 = vmatprep.subr.bf16.mxu1 %v13206_v20 }
  0x62   :  { %11773 = vmatmul.mubr.bf16.vlgmr.msra.gmra.mxu0 %v13203_v18  ;;  %v13267_v18 = vld [vmem:[%s16819_s0 + $0x208] sm:$0xff]  }
  0x63   :  { %11805 = vmatmul.mubr.bf16.vlgmr.msra.gmra.mxu1 %v13204_v21  ;;  %11821 = vmatpush3.bf16.msra.mxu0 %v13205_v19  ;;  %v13269_v19 = vld [vmem:[%s16818_s1 + $0xf8] sm:$0xff]   ;;  %v13268_v21 = vld [vmem:[%s16819_s0 + $0x248] sm:$0xff]  }
  0x64   :  { %11853 = vmatpush3.bf16.msra.mxu1 %v13206_v20  ;;  %11822 = vmatprep.subr.bf16.mxu0 %v13207_v22  ;;  %v13270_v20 = vld [vmem:[%s16818_s1 + $0x138] sm:$0xff]  }
  0x65   :  { %11854 = vmatprep.subr.bf16.mxu1 %v13208_v23  ;;  %11776 = vmatprep.mubr.bf16.mxu0 %v13209_v24  ;;  %v13273_v24 = vld [vmem:[%s16819_s0 + $0x210] sm:$0xff]  }
  0x66   :  { %11808 = vmatprep.mubr.bf16.mxu1 %v13210_v25  ;;  %v13274_v25 = vld [vmem:[%s16819_s0 + $0x250] sm:$0xff]  }
  0x67   :  { %11823 = vmatpush3.bf16.msra.mxu0 %v13207_v22  ;;  %v13271_v22 = vld [vmem:[%s16818_s1 + $0xf0] sm:$0xff]  }
  0x68   :  { %11855 = vmatpush3.bf16.msra.mxu1 %v13208_v23  ;;  %11824 = vmatprep.subr.bf16.mxu0 %v13213_v27  ;;  %v13272_v23 = vld [vmem:[%s16818_s1 + $0x130] sm:$0xff]  }
  0x69   :  { %11856 = vmatprep.subr.bf16.mxu1 %v13214_v28 }
  0x6a   :  { %11777 = vmatmul.mubr.bf16.gmra.mxu0 %v13211_v26  ;;  %v13275_v26 = vld [vmem:[%s16819_s0 + $0x218] sm:$0xff]  }
  0x6b   :  { %11809 = vmatmul.mubr.bf16.gmra.mxu1 %v13212_v29  ;;  %11825 = vmatpush3.bf16.msra.mxu0 %v13213_v27  ;;  %v13277_v27 = vld [vmem:[%s16818_s1 + $0xe8] sm:$0xff]   ;;  %v13276_v29 = vld [vmem:[%s16819_s0 + $0x258] sm:$0xff]  }
  0x6c   :  { %11857 = vmatpush3.bf16.msra.mxu1 %v13214_v28  ;;  %11826 = vmatprep.subr.bf16.mxu0 %v13215_v30  ;;  %v13278_v28 = vld [vmem:[%s16818_s1 + $0x128] sm:$0xff]  }
  0x6d   :  { %11858 = vmatprep.subr.bf16.mxu1 %v13216_v31  ;;  %11780 = vmatprep.mubr.bf16.mxu0 %v13217_v32  ;;  %v13281_v32 = vld [vmem:[%s16819_s0 + $0x220] sm:$0xff]  }
  0x6e   :  { %11812 = vmatprep.mubr.bf16.mxu1 %v13218_v33  ;;  %v13282_v33 = vld [vmem:[%s16819_s0 + $0x260] sm:$0xff]  }
  0x6f   :  { %11827 = vmatpush3.bf16.msra.mxu0 %v13215_v30  ;;  %v13279_v30 = vld [vmem:[%s16818_s1 + $0xe0] sm:$0xff]  }
  0x70   :  { %11859 = vmatpush3.bf16.msra.mxu1 %v13216_v31  ;;  %11828 = vmatprep.subr.bf16.mxu0 %v13221_v35  ;;  %v13280_v31 = vld [vmem:[%s16818_s1 + $0x120] sm:$0xff]  }
  0x71   :  { %11860 = vmatprep.subr.bf16.mxu1 %v13222_v36 }
  0x72   :  { %11781 = vmatmul.mubr.bf16.gmra.mxu0 %v13219_v34  ;;  %v13283_v34 = vld [vmem:[%s16819_s0 + $0x228] sm:$0xff]  }
  0x73   :  { %11813 = vmatmul.mubr.bf16.gmra.mxu1 %v13220_v37  ;;  %11829 = vmatpush3.bf16.msra.mxu0 %v13221_v35  ;;  %v13285_v35 = vld [vmem:[%s16818_s1 + $0xd8] sm:$0xff]   ;;  %v13284_v37 = vld [vmem:[%s16819_s0 + $0x268] sm:$0xff]  }
  0x74   :  { %11861 = vmatpush3.bf16.msra.mxu1 %v13222_v36  ;;  %11830 = vmatprep.subr.bf16.mxu0 %v13223_v38  ;;  %v13286_v36 = vld [vmem:[%s16818_s1 + $0x118] sm:$0xff]  }
  0x75   :  { %11862 = vmatprep.subr.bf16.mxu1 %v13224_v39  ;;  %11784 = vmatprep.mubr.bf16.mxu0 %v13225_v40  ;;  %v13289_v40 = vld [vmem:[%s16819_s0 + $0x230] sm:$0xff]  }
  0x76   :  { %11816 = vmatprep.mubr.bf16.mxu1 %v13226_v41  ;;  %v13290_v41 = vld [vmem:[%s16819_s0 + $0x270] sm:$0xff]  }
  0x77   :  { %11831 = vmatpush3.bf16.msra.mxu0 %v13223_v38  ;;  %v13287_v38 = vld [vmem:[%s16818_s1 + $0xd0] sm:$0xff]  }
  0x78   :  { %11863 = vmatpush3.bf16.msra.mxu1 %v13224_v39  ;;  %11832 = vmatprep.subr.bf16.mxu0 %v13229_v43  ;;  %v13288_v39 = vld [vmem:[%s16818_s1 + $0x110] sm:$0xff]  }
  0x79   :  { %11864 = vmatprep.subr.bf16.mxu1 %v13230_v44 }
  0x7a   :  { %11785 = vmatmul.mubr.bf16.gmra.mxu0 %v13227_v42  ;;  %v13291_v42 = vld [vmem:[%s16819_s0 + $0x238] sm:$0xff]  }
  0x7b   :  { %11817 = vmatmul.mubr.bf16.gmra.mxu1 %v13228_v45  ;;  %11833 = vmatpush3.bf16.msra.mxu0 %v13229_v43  ;;  %v13293_v43 = vld [vmem:[%s16818_s1 + $0xc8] sm:$0xff]   ;;  %v13292_v45 = vld [vmem:[%s16819_s0 + $0x278] sm:$0xff]  }
  0x7c   :  { %11865 = vmatpush3.bf16.msra.mxu1 %v13230_v44  ;;  %11834 = vmatprep.subr.bf16.mxu0 %v13231_v46  ;;  %v13294_v44 = vld [vmem:[%s16818_s1 + $0x108] sm:$0xff]  }
  0x7d   :  { %11866 = vmatprep.subr.bf16.mxu1 %v13232_v47  ;;  %11836 = vmatprep.mubr.bf16.mxu0 %v13233_v48  ;;  %v13297_v48 = vld [vmem:[%s16819_s0 + $0x280] sm:$0xff]  }
  0x7e   :  { %11868 = vmatprep.mubr.bf16.mxu1 %v13234_v49  ;;  %v13298_v49 = vld [vmem:[%s16819_s0 + $0x2c0] sm:$0xff]  }
  0x7f   :  { %11835 = vmatpush3.bf16.msra.mxu0 %v13231_v46  ;;  %v13295_v46 = vld [vmem:[%s16818_s1 + $0xc0] sm:$0xff]  }
  0x80   :  { %11867 = vmatpush3.bf16.msra.mxu1 %v13232_v47  ;;  %11884 = vmatprep.subr.bf16.mxu0 %v13237_v51  ;;  %v13296_v47 = vld [vmem:[%s16818_s1 + $0x100] sm:$0xff]  }
  0x81   :  { %11916 = vmatprep.subr.bf16.mxu1 %v13238_v52 }
  0x82   :  { %11837 = vmatmul.mubr.bf16.vlgmr.msra.gmra.mxu0 %v13235_v50  ;;  %v13299_v50 = vld [vmem:[%s16819_s0 + $0x288] sm:$0xff]  }
  0x83   :  { %11869 = vmatmul.mubr.bf16.vlgmr.msra.gmra.mxu1 %v13236_v53  ;;  %11885 = vmatpush3.bf16.msra.mxu0 %v13237_v51  ;;  %v13301_v51 = vld [vmem:[%s16818_s1 + $0x178] sm:$0xff]   ;;  %v13300_v53 = vld [vmem:[%s16819_s0 + $0x2c8] sm:$0xff]  }
  0x84   :  { %11917 = vmatpush3.bf16.msra.mxu1 %v13238_v52  ;;  %11886 = vmatprep.subr.bf16.mxu0 %v13239_v54  ;;  %v13302_v52 = vld [vmem:[%s16818_s1 + $0x1b8] sm:$0xff]  }
  0x85   :  { %11918 = vmatprep.subr.bf16.mxu1 %v13240_v55  ;;  %11840 = vmatprep.mubr.bf16.mxu0 %v13241_v56  ;;  %v13305_v56 = vld [vmem:[%s16819_s0 + $0x290] sm:$0xff]  }
  0x86   :  { %11872 = vmatprep.mubr.bf16.mxu1 %v13242_v57  ;;  %v13306_v57 = vld [vmem:[%s16819_s0 + $0x2d0] sm:$0xff]  }
  0x87   :  { %11887 = vmatpush3.bf16.msra.mxu0 %v13239_v54  ;;  %v13303_v54 = vld [vmem:[%s16818_s1 + $0x170] sm:$0xff]  }
  0x88   :  { %11919 = vmatpush3.bf16.msra.mxu1 %v13240_v55  ;;  %11888 = vmatprep.subr.bf16.mxu0 %v13245_v59  ;;  %v13304_v55 = vld [vmem:[%s16818_s1 + $0x1b0] sm:$0xff]  }
  0x89   :  { %11920 = vmatprep.subr.bf16.mxu1 %v13246_v60 }
  0x8a   :  { %11841 = vmatmul.mubr.bf16.gmra.mxu0 %v13243_v58  ;;  %v13307_v58 = vld [vmem:[%s16819_s0 + $0x298] sm:$0xff]  }
  0x8b   :  { %11873 = vmatmul.mubr.bf16.gmra.mxu1 %v13244_v61  ;;  %11889 = vmatpush3.bf16.msra.mxu0 %v13245_v59  ;;  %v13309_v59 = vld [vmem:[%s16818_s1 + $0x168] sm:$0xff]   ;;  %v13308_v61 = vld [vmem:[%s16819_s0 + $0x2d8] sm:$0xff]  }
  0x8c   :  { %11921 = vmatpush3.bf16.msra.mxu1 %v13246_v60  ;;  %11890 = vmatprep.subr.bf16.mxu0 %v13247_v62  ;;  %v13310_v60 = vld [vmem:[%s16818_s1 + $0x1a8] sm:$0xff]  }
  0x8d   :  { %11922 = vmatprep.subr.bf16.mxu1 %v13248_v63  ;;  %11844 = vmatprep.mubr.bf16.mxu0 %v13249_v0  ;;  %v13313_v0 = vld [vmem:[%s16819_s0 + $0x2a0] sm:$0xff]  }
  0x8e   :  { %11876 = vmatprep.mubr.bf16.mxu1 %v13250_v1  ;;  %v13314_v1 = vld [vmem:[%s16819_s0 + $0x2e0] sm:$0xff]  }
  0x8f   :  { %11891 = vmatpush3.bf16.msra.mxu0 %v13247_v62  ;;  %v13311_v62 = vld [vmem:[%s16818_s1 + $0x160] sm:$0xff]  }
  0x90   :  { %11923 = vmatpush3.bf16.msra.mxu1 %v13248_v63  ;;  %11892 = vmatprep.subr.bf16.mxu0 %v13253_v3  ;;  %v13312_v63 = vld [vmem:[%s16818_s1 + $0x1a0] sm:$0xff]  }
  0x91   :  { %11924 = vmatprep.subr.bf16.mxu1 %v13254_v4 }
  0x92   :  { %11845 = vmatmul.mubr.bf16.gmra.mxu0 %v13251_v2  ;;  %v13315_v2 = vld [vmem:[%s16819_s0 + $0x2a8] sm:$0xff]  }
  0x93   :  { %11877 = vmatmul.mubr.bf16.gmra.mxu1 %v13252_v5  ;;  %11893 = vmatpush3.bf16.msra.mxu0 %v13253_v3  ;;  %v13317_v3 = vld [vmem:[%s16818_s1 + $0x158] sm:$0xff]   ;;  %v13316_v5 = vld [vmem:[%s16819_s0 + $0x2e8] sm:$0xff]  }
  0x94   :  { %11925 = vmatpush3.bf16.msra.mxu1 %v13254_v4  ;;  %11894 = vmatprep.subr.bf16.mxu0 %v13255_v6  ;;  %v13318_v4 = vld [vmem:[%s16818_s1 + $0x198] sm:$0xff]  }
  0x95   :  { %11926 = vmatprep.subr.bf16.mxu1 %v13256_v7  ;;  %11848 = vmatprep.mubr.bf16.mxu0 %v13257_v8  ;;  %v13321_v8 = vld [vmem:[%s16819_s0 + $0x2b0] sm:$0xff]  }
  0x96   :  { %11880 = vmatprep.mubr.bf16.mxu1 %v13258_v9  ;;  %v13322_v9 = vld [vmem:[%s16819_s0 + $0x2f0] sm:$0xff]  }
  0x97   :  { %11895 = vmatpush3.bf16.msra.mxu0 %v13255_v6  ;;  %v13319_v6 = vld [vmem:[%s16818_s1 + $0x150] sm:$0xff]  }
  0x98   :  { %11927 = vmatpush3.bf16.msra.mxu1 %v13256_v7  ;;  %11896 = vmatprep.subr.bf16.mxu0 %v13261_v11  ;;  %v13320_v7 = vld [vmem:[%s16818_s1 + $0x190] sm:$0xff]  }
  0x99   :  { %11928 = vmatprep.subr.bf16.mxu1 %v13262_v12 }
  0x9a   :  { %11849 = vmatmul.mubr.bf16.gmra.mxu0 %v13259_v10  ;;  %v13323_v10 = vld [vmem:[%s16819_s0 + $0x2b8] sm:$0xff]  }
  0x9b   :  { %11881 = vmatmul.mubr.bf16.gmra.mxu1 %v13260_v13  ;;  %11897 = vmatpush3.bf16.msra.mxu0 %v13261_v11  ;;  %v13325_v11 = vld [vmem:[%s16818_s1 + $0x148] sm:$0xff]   ;;  %v13324_v13 = vld [vmem:[%s16819_s0 + $0x2f8] sm:$0xff]  }
  0x9c   :  { %11929 = vmatpush3.bf16.msra.mxu1 %v13262_v12  ;;  %11898 = vmatprep.subr.bf16.mxu0 %v13263_v14  ;;  %v13326_v12 = vld [vmem:[%s16818_s1 + $0x188] sm:$0xff]  }
  0x9d   :  { %11930 = vmatprep.subr.bf16.mxu1 %v13264_v15  ;;  %11900 = vmatprep.mubr.bf16.mxu0 %v13265_v16  ;;  %v13329_v16 = vld [vmem:[%s16819_s0 + $0x300] sm:$0xff]  }
  0x9e   :  { %11932 = vmatprep.mubr.bf16.mxu1 %v13266_v17  ;;  %v13330_v17 = vld [vmem:[%s16819_s0 + $0x340] sm:$0xff]  }
  0x9f   :  { %11899 = vmatpush3.bf16.msra.mxu0 %v13263_v14  ;;  %v13327_v14 = vld [vmem:[%s16818_s1 + $0x140] sm:$0xff]  }
  0xa0   :  { %11931 = vmatpush3.bf16.msra.mxu1 %v13264_v15  ;;  %11948 = vmatprep.subr.bf16.mxu0 %v13269_v19  ;;  %v13328_v15 = vld [vmem:[%s16818_s1 + $0x180] sm:$0xff]  }
  0xa1   :  { %11980 = vmatprep.subr.bf16.mxu1 %v13270_v20 }
  0xa2   :  { %11901 = vmatmul.mubr.bf16.vlgmr.msra.gmra.mxu0 %v13267_v18  ;;  %v13331_v18 = vld [vmem:[%s16819_s0 + $0x308] sm:$0xff]  }
  0xa3   :  { %11933 = vmatmul.mubr.bf16.vlgmr.msra.gmra.mxu1 %v13268_v21  ;;  %11949 = vmatpush3.bf16.msra.mxu0 %v13269_v19  ;;  %v13333_v19 = vld [vmem:[%s16818_s1 + $0x38] sm:$0xff]   ;;  %v13332_v21 = vld [vmem:[%s16819_s0 + $0x348] sm:$0xff]  }
  0xa4   :  { %11981 = vmatpush3.bf16.msra.mxu1 %v13270_v20  ;;  %11950 = vmatprep.subr.bf16.mxu0 %v13271_v22  ;;  %v13334_v20 = vld [vmem:[%s16818_s1 + $0x78] sm:$0xff]  }
  0xa5   :  { %11982 = vmatprep.subr.bf16.mxu1 %v13272_v23  ;;  %11904 = vmatprep.mubr.bf16.mxu0 %v13273_v24  ;;  %v13337_v24 = vld [vmem:[%s16819_s0 + $0x310] sm:$0xff]  }
  0xa6   :  { %11936 = vmatprep.mubr.bf16.mxu1 %v13274_v25 }
  0xa7   :  { %11951 = vmatpush3.bf16.msra.mxu0 %v13271_v22  ;;  %v13335_v22 = vld [vmem:[%s16818_s1 + $0x30] sm:$0xff]  }
  0xa8   :  { %11983 = vmatpush3.bf16.msra.mxu1 %v13272_v23  ;;  %11952 = vmatprep.subr.bf16.mxu0 %v13277_v27  ;;  %v13336_v23 = vld [vmem:[%s16818_s1 + $0x70] sm:$0xff]  }
  0xa9   :  { %11984 = vmatprep.subr.bf16.mxu1 %v13278_v28 }
  0xaa   :  { %11905 = vmatmul.mubr.bf16.gmra.mxu0 %v13275_v26  ;;  %v13338_v26 = vld [vmem:[%s16819_s0 + $0x350] sm:$0xff]  }
  0xab   :  { %11937 = vmatmul.mubr.bf16.gmra.mxu1 %v13276_v29  ;;  %11953 = vmatpush3.bf16.msra.mxu0 %v13277_v27 }
  0xac   :  { %11985 = vmatpush3.bf16.msra.mxu1 %v13278_v28  ;;  %11954 = vmatprep.subr.bf16.mxu0 %v13279_v30 }
  0xad   :  { %11986 = vmatprep.subr.bf16.mxu1 %v13280_v31  ;;  %11908 = vmatprep.mubr.bf16.mxu0 %v13281_v32 }
  0xae   :  { %11940 = vmatprep.mubr.bf16.mxu1 %v13282_v33  ;;  %v13342_v33 = vld [vmem:[%s16818_s1 + $0x68] sm:$0xff]  }
  0xaf   :  { %11955 = vmatpush3.bf16.msra.mxu0 %v13279_v30  ;;  %v13339_v30 = vld [vmem:[%s16819_s0 + $0x318] sm:$0xff]  }
  0xb0   :  { %11987 = vmatpush3.bf16.msra.mxu1 %v13280_v31  ;;  %11956 = vmatprep.subr.bf16.mxu0 %v13285_v35  ;;  %v13341_v31 = vld [vmem:[%s16818_s1 + $0x28] sm:$0xff]  }
  0xb1   :  { %11988 = vmatprep.subr.bf16.mxu1 %v13286_v36 }
  0xb2   :  { %11909 = vmatmul.mubr.bf16.gmra.mxu0 %v13283_v34 }
  0xb3   :  { %11941 = vmatmul.mubr.bf16.gmra.mxu1 %v13284_v37  ;;  %11957 = vmatpush3.bf16.msra.mxu0 %v13285_v35 }
  0xb4   :  { %11989 = vmatpush3.bf16.msra.mxu1 %v13286_v36  ;;  %11958 = vmatprep.subr.bf16.mxu0 %v13287_v38  ;;  %v13340_v36 = vld [vmem:[%s16819_s0 + $0x358] sm:$0xff]  }
  0xb5   :  { %11990 = vmatprep.subr.bf16.mxu1 %v13288_v39  ;;  %11912 = vmatprep.mubr.bf16.mxu0 %v13289_v40 }
  0xb6   :  { %11944 = vmatprep.mubr.bf16.mxu1 %v13290_v41  ;;  %v13344_v41 = vld [vmem:[%s16818_s1 + $0x60] sm:$0xff]  }
  0xb7   :  { %11959 = vmatpush3.bf16.msra.mxu0 %v13287_v38  ;;  %v13343_v38 = vld [vmem:[%s16818_s1 + $0x20] sm:$0xff]  }
  0xb8   :  { %11991 = vmatpush3.bf16.msra.mxu1 %v13288_v39  ;;  %11960 = vmatprep.subr.bf16.mxu0 %v13293_v43 }
  0xb9   :  { %11992 = vmatprep.subr.bf16.mxu1 %v13294_v44 }
  0xba   :  { %11913 = vmatmul.mubr.bf16.gmra.mxu0 %v13291_v42 }
  0xbb   :  { %11945 = vmatmul.mubr.bf16.gmra.mxu1 %v13292_v45  ;;  %11961 = vmatpush3.bf16.msra.mxu0 %v13293_v43  ;;  %v13345_v43 = vld [vmem:[%s16819_s0 + $0x320] sm:$0xff]  }
  0xbc   :  { %11993 = vmatpush3.bf16.msra.mxu1 %v13294_v44  ;;  %11962 = vmatprep.subr.bf16.mxu0 %v13295_v46 }
  0xbd   :  { %11994 = vmatprep.subr.bf16.mxu1 %v13296_v47  ;;  %11964 = vmatprep.mubr.bf16.mxu0 %v13297_v48 }
  0xbe   :  { %11996 = vmatprep.mubr.bf16.mxu1 %v13298_v49 }
  0xbf   :  { %11963 = vmatpush3.bf16.msra.mxu0 %v13295_v46  ;;  %v13346_v46 = vld [vmem:[%s16819_s0 + $0x360] sm:$0xff]  }
  0xc0   :  { %11995 = vmatpush3.bf16.msra.mxu1 %v13296_v47  ;;  %12012 = vmatprep.subr.bf16.mxu0 %v13301_v51 }
  0xc1   :  { %12044 = vmatprep.subr.bf16.mxu1 %v13302_v52 }
  0xc2   :  { %11965 = vmatmul.mubr.bf16.vlgmr.msra.gmra.mxu0 %v13299_v50  ;;  %v13347_v50 = vld [vmem:[%s16819_s0 + $0x328] sm:$0xff]  }
  0xc3   :  { %11997 = vmatmul.mubr.bf16.vlgmr.msra.gmra.mxu1 %v13300_v53  ;;  %12013 = vmatpush3.bf16.msra.mxu0 %v13301_v51  ;;  %v13349_v51 = vld [vmem:[%s16818_s1 + $0x18] sm:$0xff]  }
  0xc4   :  { %12045 = vmatpush3.bf16.msra.mxu1 %v13302_v52  ;;  %12014 = vmatprep.subr.bf16.mxu0 %v13303_v54  ;;  %v13350_v53 = vld [vmem:[%s16818_s1 + $0x58] sm:$0xff]  }
  0xc5   :  { %12046 = vmatprep.subr.bf16.mxu1 %v13304_v55  ;;  %11968 = vmatprep.mubr.bf16.mxu0 %v13305_v56  ;;  %v13348_v56 = vld [vmem:[%s16819_s0 + $0x368] sm:$0xff]  }
  0xc6   :  { %12000 = vmatprep.mubr.bf16.mxu1 %v13306_v57 }
  0xc7   :  { %12015 = vmatpush3.bf16.msra.mxu0 %v13303_v54 }
  0xc8   :  { %12047 = vmatpush3.bf16.msra.mxu1 %v13304_v55  ;;  %12016 = vmatprep.subr.bf16.mxu0 %v13309_v59 }
  0xc9   :  { %12048 = vmatprep.subr.bf16.mxu1 %v13310_v60 }
  0xca   :  { %11969 = vmatmul.mubr.bf16.gmra.mxu0 %v13307_v58  ;;  %v13351_v58 = vld [vmem:[%s16818_s1 + $0x10] sm:$0xff]  }
  0xcb   :  { %12001 = vmatmul.mubr.bf16.gmra.mxu1 %v13308_v61  ;;  %12017 = vmatpush3.bf16.msra.mxu0 %v13309_v59  ;;  %v13352_v61 = vld [vmem:[%s16818_s1 + $0x50] sm:$0xff]  }
  0xcc   :  { %12049 = vmatpush3.bf16.msra.mxu1 %v13310_v60  ;;  %12018 = vmatprep.subr.bf16.mxu0 %v13311_v62 }
  0xcd   :  { %12050 = vmatprep.subr.bf16.mxu1 %v13312_v63  ;;  %11972 = vmatprep.mubr.bf16.mxu0 %v13313_v0 }
  0xce   :  { %12004 = vmatprep.mubr.bf16.mxu1 %v13314_v1 }
  0xcf   :  { %12019 = vmatpush3.bf16.msra.mxu0 %v13311_v62 }
  0xd0   :  { %12051 = vmatpush3.bf16.msra.mxu1 %v13312_v63  ;;  %12020 = vmatprep.subr.bf16.mxu0 %v13317_v3  ;;  %v13353_v63 = vld [vmem:[%s16819_s0 + $0x330] sm:$0xff]  }
  0xd1   :  { %12052 = vmatprep.subr.bf16.mxu1 %v13318_v4 }
  0xd2   :  { %11973 = vmatmul.mubr.bf16.gmra.mxu0 %v13315_v2  ;;  %v13354_v2 = vld [vmem:[%s16819_s0 + $0x370] sm:$0xff]  }
  0xd3   :  { %12005 = vmatmul.mubr.bf16.gmra.mxu1 %v13316_v5  ;;  %12021 = vmatpush3.bf16.msra.mxu0 %v13317_v3 }
  0xd4   :  { %12053 = vmatpush3.bf16.msra.mxu1 %v13318_v4  ;;  %12022 = vmatprep.subr.bf16.mxu0 %v13319_v6 }
  0xd5   :  { %12054 = vmatprep.subr.bf16.mxu1 %v13320_v7  ;;  %11976 = vmatprep.mubr.bf16.mxu0 %v13321_v8 }
  0xd6   :  { %12008 = vmatprep.mubr.bf16.mxu1 %v13322_v9  ;;  %v13358_v9 = vld [vmem:[%s16818_s1 + $0x48] sm:$0xff]  }
  0xd7   :  { %12023 = vmatpush3.bf16.msra.mxu0 %v13319_v6  ;;  %v13355_v6 = vld [vmem:[%s16819_s0 + $0x338] sm:$0xff]  }
  0xd8   :  { %12055 = vmatpush3.bf16.msra.mxu1 %v13320_v7  ;;  %12024 = vmatprep.subr.bf16.mxu0 %v13325_v11  ;;  %v13357_v7 = vld [vmem:[%s16818_s1 + $0x8] sm:$0xff]  }
  0xd9   :  { %12056 = vmatprep.subr.bf16.mxu1 %v13326_v12 }
  0xda   :  { %11977 = vmatmul.mubr.bf16.gmra.mxu0 %v13323_v10 }
  0xdb   :  { %12009 = vmatmul.mubr.bf16.gmra.mxu1 %v13324_v13  ;;  %12025 = vmatpush3.bf16.msra.mxu0 %v13325_v11 }
  0xdc   :  { %12057 = vmatpush3.bf16.msra.mxu1 %v13326_v12  ;;  %12026 = vmatprep.subr.bf16.mxu0 %v13327_v14  ;;  %v13356_v12 = vld [vmem:[%s16819_s0 + $0x378] sm:$0xff]  }
  0xdd   :  { %12058 = vmatprep.subr.bf16.mxu1 %v13328_v15  ;;  %12028 = vmatprep.mubr.bf16.mxu0 %v13329_v16 }
  0xde   :  { %12060 = vmatprep.mubr.bf16.mxu1 %v13330_v17  ;;  %v13360_v17 = vld [vmem:[%s16818_s1 + $0x40] sm:$0xff]  }
  0xdf   :  { %12027 = vmatpush3.bf16.msra.mxu0 %v13327_v14  ;;  %v13359_v14 = vld [vmem:[%s16818_s1] sm:$0xff]  }
  0xe0   :  { %12059 = vmatpush3.bf16.msra.mxu1 %v13328_v15  ;;  %12076 = vmatprep.subr.bf16.mxu0 %v13333_v19 }
  0xe1   :  { %12108 = vmatprep.subr.bf16.mxu1 %v13334_v20 }
  0xe2   :  { %v11646_v25 = vpop.f32.mrf.mxu0  ;;  %12029 = vmatmul.mubr.bf16.vlgmr.msra.gmra.mxu0 %v13331_v18 }
  0xe3   :  { %v11678_v27 = vpop.f32.mrf.mxu1  ;;  %12061 = vmatmul.mubr.bf16.vlgmr.msra.gmra.mxu1 %v13332_v21  ;;  %12077 = vmatpush3.bf16.msra.mxu0 %v13333_v19  ;;  %v13361_v19 = vld [vmem:[%s16819_s0 + $0x380] sm:$0xff]  }
  0xe4   :  { %v14265_v28 = vadd.f32 %v11678_v27, %v11646_v25  ;;  %12109 = vmatpush3.bf16.msra.mxu1 %v13334_v20  ;;  %v189_v29 = vpop.f32.mrf.mxu0  ;;  %12078 = vmatprep.subr.bf16.mxu0 %v13335_v22  ;;  %v13365_v27 = vld [vmem:[%s16818_s1 + $0xb8] sm:$0xff]  }
  0xe5   :  { %v448_v32 = vpop.f32.mrf.mxu1  ;;  %12110 = vmatprep.subr.bf16.mxu1 %v13336_v23  ;;  %12032 = vmatprep.mubr.bf16.mxu0 %v13337_v24 }
  0xe6   :  { %v14276_v34 = vadd.f32 %v448_v32, %v189_v29  ;;  %v11647_v35 = vpop.f32.mrf.mxu0  ;;  %12064 = vmatprep.mubr.bf16.mxu1 %v13338_v26  ;;  %v13363_v26 = vld [vmem:[%s16819_s0 + $0x388] sm:$0xff]  }
  0xe7   :  { %v11679_v37 = vpop.f32.mrf.mxu1  ;;  %12079 = vmatpush3.bf16.msra.mxu0 %v13335_v22  ;;  %v13362_v22 = vld [vmem:[%s16819_s0 + $0x3c0] sm:$0xff]  }
  0xe8   :  { %v14284_v39 = vadd.f32 %v11679_v37, %v11647_v35  ;;  %12111 = vmatpush3.bf16.msra.mxu1 %v13336_v23  ;;  %v192_v40 = vpop.f32.mrf.mxu0  ;;  %12080 = vmatprep.subr.bf16.mxu0 %v13341_v31 }
  0xe9   :  { %v451_v42 = vpop.f32.mrf.mxu1  ;;  %12112 = vmatprep.subr.bf16.mxu1 %v13342_v33 }
  0xea   :  { %v14292_v44 = vadd.f32 %v451_v42, %v192_v40  ;;  %v11650_v45 = vpop.f32.mrf.mxu0  ;;  %12033 = vmatmul.mubr.bf16.gmra.mxu0 %v13339_v30  ;;  %v13366_v30 = vld [vmem:[%s16818_s1 + $0xf8] sm:$0xff]   ;;  %v13368_v40 = vld [vmem:[%s16818_s1 + $0xf0] sm:$0xff]  }
  0xeb   :  { %v11682_v47 = vpop.f32.mrf.mxu1  ;;  %12065 = vmatmul.mubr.bf16.gmra.mxu1 %v13340_v36  ;;  %12081 = vmatpush3.bf16.msra.mxu0 %v13341_v31  ;;  %v13367_v36 = vld [vmem:[%s16818_s1 + $0xb0] sm:$0xff]  }
  0xec   :  { %v14297_v48 = vadd.f32 %v11682_v47, %v11650_v45  ;;  %12113 = vmatpush3.bf16.msra.mxu1 %v13342_v33  ;;  %v205_v49 = vpop.f32.mrf.mxu0  ;;  %12082 = vmatprep.subr.bf16.mxu0 %v13343_v38  ;;  %v13364_v33 = vld [vmem:[%s16819_s0 + $0x3c8] sm:$0xff]   ;;  %v13369_v42 = vld [vmem:[%s16819_s0 + $0x390] sm:$0xff]  }
  0xed   :  { %v464_v52 = vpop.f32.mrf.mxu1  ;;  %12114 = vmatprep.subr.bf16.mxu1 %v13344_v41  ;;  %12036 = vmatprep.mubr.bf16.mxu0 %v13345_v43 }
  0xee   :  { %v14308_v54 = vadd.f32 %v464_v52, %v205_v49  ;;  %v11651_v55 = vpop.f32.mrf.mxu0  ;;  %12068 = vmatprep.mubr.bf16.mxu1 %v13346_v46  ;;  %v13370_v46 = vld [vmem:[%s16819_s0 + $0x3d0] sm:$0xff]   ;;  %v13373_v52 = vld [vmem:[%s16818_s1 + $0xa8] sm:$0xff]  }
  0xef   :  { %v11683_v57 = vpop.f32.mrf.mxu1  ;;  %12083 = vmatpush3.bf16.msra.mxu0 %v13343_v38 }
  0xf0   :  { %v14316_v59 = vadd.f32 %v11683_v57, %v11651_v55  ;;  %12115 = vmatpush3.bf16.msra.mxu1 %v13344_v41  ;;  %v208_v60 = vpop.f32.mrf.mxu0  ;;  %12084 = vmatprep.subr.bf16.mxu0 %v13349_v51 }
  0xf1   :  { %v467_v62 = vpop.f32.mrf.mxu1  ;;  %12116 = vmatprep.subr.bf16.mxu1 %v13350_v53 }
  0xf2   :  { %v14324_v0 = vadd.f32 %v467_v62, %v208_v60  ;;  %v11654_v1 = vpop.f32.mrf.mxu0  ;;  %12037 = vmatmul.mubr.bf16.gmra.mxu0 %v13347_v50 }
  0xf3   :  { %v11686_v3 = vpop.f32.mrf.mxu1  ;;  %12069 = vmatmul.mubr.bf16.gmra.mxu1 %v13348_v56  ;;  %12085 = vmatpush3.bf16.msra.mxu0 %v13349_v51  ;;  %v13371_v51 = vld [vmem:[%s16819_s0 + $0x398] sm:$0xff]  }
  0xf4   :  { %v14329_v4 = vadd.f32 %v11686_v3, %v11654_v1  ;;  %12117 = vmatpush3.bf16.msra.mxu1 %v13350_v53  ;;  %v221_v5 = vpop.f32.mrf.mxu0  ;;  %12086 = vmatprep.subr.bf16.mxu0 %v13351_v58  ;;  %v13376_v1 = vld [vmem:[%s16818_s1 + $0xe0] sm:$0xff]  }
  0xf5   :  { %v480_v8 = vpop.f32.mrf.mxu1  ;;  %12118 = vmatprep.subr.bf16.mxu1 %v13352_v61  ;;  %12040 = vmatprep.mubr.bf16.mxu0 %v13353_v63 }
  0xf6   :  { %v14340_v10 = vadd.f32 %v480_v8, %v221_v5  ;;  %v11655_v11 = vpop.f32.mrf.mxu0  ;;  %12072 = vmatprep.mubr.bf16.mxu1 %v13354_v2 }
  0xf7   :  { %v11687_v13 = vpop.f32.mrf.mxu1  ;;  %12087 = vmatpush3.bf16.msra.mxu0 %v13351_v58  ;;  %v13372_v58 = vld [vmem:[%s16819_s0 + $0x3d8] sm:$0xff]  }
  0xf8   :  { %v14348_v15 = vadd.f32 %v11687_v13, %v11655_v11  ;;  %12119 = vmatpush3.bf16.msra.mxu1 %v13352_v61  ;;  %v224_v16 = vpop.f32.mrf.mxu0  ;;  %12088 = vmatprep.subr.bf16.mxu0 %v13357_v7  ;;  %v13381_v13 = vld [vmem:[%s16818_s1 + $0x98] sm:$0xff]  }
  0xf9   :  { %v483_v18 = vpop.f32.mrf.mxu1  ;;  %12120 = vmatprep.subr.bf16.mxu1 %v13358_v9 }
  0xfa   :  { %v14356_v20 = vadd.f32 %v483_v18, %v224_v16  ;;  %v11658_v21 = vpop.f32.mrf.mxu0  ;;  %12041 = vmatmul.mubr.bf16.gmra.mxu0 %v13355_v6 }
  0xfb   :  { %v11690_v23 = vpop.f32.mrf.mxu1  ;;  %12073 = vmatmul.mubr.bf16.gmra.mxu1 %v13356_v12  ;;  %12089 = vmatpush3.bf16.msra.mxu0 %v13357_v7  ;;  %v13378_v7 = vld [vmem:[%s16819_s0 + $0x3e0] sm:$0xff]   ;;  %v13379_v12 = vld [vmem:[%s16819_s0 + $0x3a8] sm:$0xff]  }
  0xfc   :  { %v14361_v24 = vadd.f32 %v11690_v23, %v11658_v21  ;;  %12121 = vmatpush3.bf16.msra.mxu1 %v13358_v9  ;;  %v237_v25 = vpop.f32.mrf.mxu0  ;;  %12090 = vmatprep.subr.bf16.mxu0 %v13359_v14 }
  0xfd   :  { %v496_v29 = vpop.f32.mrf.mxu1  ;;  %12122 = vmatprep.subr.bf16.mxu1 %v13360_v17  ;;  %12092 = vmatprep.mubr.bf16.mxu0 %v13361_v19  ;;  %v13380_v19 = vld [vmem:[%s16819_s0 + $0x3e8] sm:$0xff]  }
  0xfe   :  { %v14372_v31 = vadd.f32 %v496_v29, %v237_v25  ;;  %v11659_v32 = vpop.f32.mrf.mxu0  ;;  %12124 = vmatprep.mubr.bf16.mxu1 %v13362_v22 }
  0xff   :  { %v11691_v35 = vpop.f32.mrf.mxu1  ;;  %12091 = vmatpush3.bf16.msra.mxu0 %v13359_v14 }
 0x100   :  { %v14380_v37 = vadd.f32 %v11691_v35, %v11659_v32  ;;  %12123 = vmatpush3.bf16.msra.mxu1 %v13360_v17  ;;  %v240_v38 = vpop.f32.mrf.mxu0  ;;  %12140 = vmatprep.subr.bf16.mxu0 %v13365_v27 }
 0x101   :  { %v499_v41 = vpop.f32.mrf.mxu1  ;;  %12172 = vmatprep.subr.bf16.mxu1 %v13366_v30 }
 0x102   :  { %v14388_v43 = vadd.f32 %v499_v41, %v240_v38  ;;  %v11710_v45 = vpop.f32.mrf.mxu0  ;;  %12093 = vmatmul.mubr.bf16.vlgmr.msra.gmra.mxu0 %v13363_v26  ;;  %v13384_v26 = vld [vmem:[%s16818_s1 + $0xd0] sm:$0xff]   ;;  %v13389_v41 = vld [vmem:[%s16818_s1 + $0x88] sm:$0xff]  }
 0x103   :  { %v788_v47 = vadd.f32 %v11710_v45, %v14265_v28  ;;  %v11742_v49 = vpop.f32.mrf.mxu1  ;;  %12125 = vmatmul.mubr.bf16.vlgmr.msra.gmra.mxu1 %v13364_v33  ;;  %12141 = vmatpush3.bf16.msra.mxu0 %v13365_v27  ;;  %v13374_v28 = vld [vmem:[%s16818_s1 + $0xe8] sm:$0xff]   ;;  %v13386_v33 = vld [vmem:[%s16819_s0 + $0x3f0] sm:$0xff]  }
 0x104   :  { %12173 = vmatpush3.bf16.msra.mxu1 %v13366_v30  ;;  %v723_v50 = vpop.f32.mrf.mxu0  ;;  %12142 = vmatprep.subr.bf16.mxu0 %v13367_v36 }
 0x105   :  { %v14400_v53 = vadd.f32 %v11742_v49, %v788_v47  ;;  %v786_v55 = vadd.f32 %v723_v50, %v14276_v34  ;;  %v998_v56 = vpop.f32.mrf.mxu1  ;;  %12174 = vmatprep.subr.bf16.mxu1 %v13368_v40  ;;  %12096 = vmatprep.mubr.bf16.mxu0 %v13369_v42  ;;  %v13375_v34 = vld [vmem:[%s16818_s1 + $0xa0] sm:$0xff]   ;;  %v13388_v49 = vld [vmem:[%s16819_s0 + $0x3f8] sm:$0xff]  }
 0x106   :  { %v11711_v57 = vpop.f32.mrf.mxu0  ;;  %12128 = vmatprep.mubr.bf16.mxu1 %v13370_v46 }
 0x107   :  { %v14409_v60 = vadd.f32 %v998_v56, %v786_v55  ;;  %v789_v61 = vadd.f32 %v11711_v57, %v14284_v39  ;;  %v11743_v62 = vpop.f32.mrf.mxu1  ;;  %12143 = vmatpush3.bf16.msra.mxu0 %v13367_v36  ;;  %v13377_v39 = vld [vmem:[%s16819_s0 + $0x3a0] sm:$0xff]  }
 0x108   :  { %12175 = vmatpush3.bf16.msra.mxu1 %v13368_v40  ;;  %v726_v63 = vpop.f32.mrf.mxu0  ;;  %12144 = vmatprep.subr.bf16.mxu0 %v13373_v52  ;;  %v13387_v40 = vld [vmem:[%s16819_s0 + $0x3b8] sm:$0xff]   ;;  %v13392_v56 = vld [vmem:[%s16818_s1 + $0xc0] sm:$0xff]  }
 0x109   :  { %v14418_v2 = vadd.f32 %v11743_v62, %v789_v61  ;;  %v787_v3 = vadd.f32 %v726_v63, %v14292_v44  ;;  %v1001_v5 = vpop.f32.mrf.mxu1  ;;  %12176 = vmatprep.subr.bf16.mxu1 %v13374_v28  ;;  %v13394_v62 = vld [vmem:[%s16819_s0 + $0x440] sm:$0xff]  }
 0x10a   :  { %v11714_v6 = vpop.f32.mrf.mxu0  ;;  %12097 = vmatmul.mubr.bf16.gmra.mxu0 %v13371_v51 }
 0x10b   :  { %v14427_v8 = vadd.f32 %v1001_v5, %v787_v3  ;;  %v792_v9 = vadd.f32 %v11714_v6, %v14297_v48  ;;  %v11746_v11 = vpop.f32.mrf.mxu1  ;;  %12129 = vmatmul.mubr.bf16.gmra.mxu1 %v13372_v58  ;;  %12145 = vmatpush3.bf16.msra.mxu0 %v13373_v52  ;;  %v13382_v48 = vld [vmem:[%s16818_s1 + $0xd8] sm:$0xff]   ;;  %v13395_v3 = vld [vmem:[%s16819_s0 + $0x408] sm:$0xff]  }
 0x10c   :  { %12177 = vmatpush3.bf16.msra.mxu1 %v13374_v28  ;;  %v739_v44 = vpop.f32.mrf.mxu0  ;;  %12146 = vmatprep.subr.bf16.mxu0 %v13375_v34  ;;  %v13397_v5 = vld [vmem:[%s16818_s1 + $0x138] sm:$0xff]  }
 0x10d   :  { %v14436_v14 = vadd.f32 %v11746_v11, %v792_v9  ;;  %v790_v16 = vadd.f32 %v739_v44, %v14308_v54  ;;  %v1014_v17 = vpop.f32.mrf.mxu1  ;;  %12178 = vmatprep.subr.bf16.mxu1 %v13376_v1  ;;  %12100 = vmatprep.mubr.bf16.mxu0 %v13377_v39  ;;  %v13383_v54 = vld [vmem:[%s16818_s1 + $0x90] sm:$0xff]   ;;  %v13396_v11 = vld [vmem:[%s16819_s0 + $0x448] sm:$0xff]  }
 0x10e   :  { %v11715_v18 = vpop.f32.mrf.mxu0  ;;  %12132 = vmatprep.mubr.bf16.mxu1 %v13378_v7 }
 0x10f   :  { %v14445_v21 = vadd.f32 %v1014_v17, %v790_v16  ;;  %v793_v22 = vadd.f32 %v11715_v18, %v14316_v59  ;;  %v11747_v23 = vpop.f32.mrf.mxu1  ;;  %12147 = vmatpush3.bf16.msra.mxu0 %v13375_v34  ;;  %v13385_v59 = vld [vmem:[%s16819_s0 + $0x3b0] sm:$0xff]  }
 0x110   :  { %12179 = vmatpush3.bf16.msra.mxu1 %v13376_v1  ;;  %v742_v25 = vpop.f32.mrf.mxu0  ;;  %12148 = vmatprep.subr.bf16.mxu0 %v13381_v13  ;;  %v13400_v17 = vld [vmem:[%s16818_s1 + $0x170] sm:$0xff]  }
 0x111   :  { %v14454_v27 = vadd.f32 %v11747_v23, %v793_v22  ;;  %v791_v29 = vadd.f32 %v742_v25, %v14324_v0  ;;  %v1017_v30 = vpop.f32.mrf.mxu1  ;;  %12180 = vmatprep.subr.bf16.mxu1 %v13382_v48  ;;  %v13402_v23 = vld [vmem:[%s16819_s0 + $0x450] sm:$0xff]  }
 0x112   :  { %v11718_v32 = vpop.f32.mrf.mxu0  ;;  %12101 = vmatmul.mubr.bf16.gmra.mxu0 %v13379_v12 }
 0x113   :  { %v14463_v35 = vadd.f32 %v1017_v30, %v791_v29  ;;  %v796_v36 = vadd.f32 %v11718_v32, %v14329_v4  ;;  %v11750_v38 = vpop.f32.mrf.mxu1  ;;  %12133 = vmatmul.mubr.bf16.gmra.mxu1 %v13380_v19  ;;  %12149 = vmatpush3.bf16.msra.mxu0 %v13381_v13  ;;  %v13390_v4 = vld [vmem:[%s16818_s1 + $0xc8] sm:$0xff]   ;;  %v13403_v29 = vld [vmem:[%s16819_s0 + $0x418] sm:$0xff]  }
 0x114   :  { %12181 = vmatpush3.bf16.msra.mxu1 %v13382_v48  ;;  %v755_v0 = vpop.f32.mrf.mxu0  ;;  %12150 = vmatprep.subr.bf16.mxu0 %v13383_v54  ;;  %v13405_v30 = vld [vmem:[%s16818_s1 + $0x128] sm:$0xff]  }
 0x115   :  { %v14472_v42 = vadd.f32 %v11750_v38, %v796_v36  ;;  %v794_v45 = vadd.f32 %v755_v0, %v14340_v10  ;;  %v1030_v46 = vpop.f32.mrf.mxu1  ;;  %12182 = vmatprep.subr.bf16.mxu1 %v13384_v26  ;;  %12104 = vmatprep.mubr.bf16.mxu0 %v13385_v59  ;;  %v13391_v10 = vld [vmem:[%s16818_s1 + $0x80] sm:$0xff]   ;;  %v13404_v38 = vld [vmem:[%s16819_s0 + $0x458] sm:$0xff]  }
 0x116   :  { %v11719_v47 = vpop.f32.mrf.mxu0  ;;  %12136 = vmatprep.mubr.bf16.mxu1 %v13386_v33 }
 0x117   :  { %v14481_v50 = vadd.f32 %v1030_v46, %v794_v45  ;;  %v797_v51 = vadd.f32 %v11719_v47, %v14348_v15  ;;  %v11751_v52 = vpop.f32.mrf.mxu1  ;;  %12151 = vmatpush3.bf16.msra.mxu0 %v13383_v54  ;;  %v13393_v15 = vld [vmem:[%s16819_s0 + $0x400] sm:$0xff]  }
 0x118   :  { %12183 = vmatpush3.bf16.msra.mxu1 %v13384_v26  ;;  %v758_v55 = vpop.f32.mrf.mxu0  ;;  %12152 = vmatprep.subr.bf16.mxu0 %v13389_v41  ;;  %v13408_v46 = vld [vmem:[%s16818_s1 + $0x160] sm:$0xff]  }
 0x119   :  { %v14490_v28 = vadd.f32 %v11751_v52, %v797_v51  ;;  %v795_v57 = vadd.f32 %v758_v55, %v14356_v20  ;;  %v1033_v58 = vpop.f32.mrf.mxu1  ;;  %12184 = vmatprep.subr.bf16.mxu1 %v13390_v4  ;;  %v13410_v52 = vld [vmem:[%s16819_s0 + $0x460] sm:$0xff]  }
 0x11a   :  { %v11722_v61 = vpop.f32.mrf.mxu0  ;;  %12105 = vmatmul.mubr.bf16.gmra.mxu0 %v13387_v40 }
 0x11b   :  { %v14499_v34 = vadd.f32 %v1033_v58, %v795_v57  ;;  %v800_v63 = vadd.f32 %v11722_v61, %v14361_v24  ;;  %v11754_v1 = vpop.f32.mrf.mxu1  ;;  %12137 = vmatmul.mubr.bf16.gmra.mxu1 %v13388_v49  ;;  %12153 = vmatpush3.bf16.msra.mxu0 %v13389_v41  ;;  %v13398_v24 = vld [vmem:[%s16818_s1 + $0x178] sm:$0xff]   ;;  %v13411_v57 = vld [vmem:[%s16819_s0 + $0x428] sm:$0xff]  }
 0x11c   :  { %12185 = vmatpush3.bf16.msra.mxu1 %v13390_v4  ;;  %v771_v20 = vpop.f32.mrf.mxu0  ;;  %12154 = vmatprep.subr.bf16.mxu0 %v13391_v10  ;;  %v13413_v58 = vld [vmem:[%s16818_s1 + $0x118] sm:$0xff]  }
 0x11d   :  { %v14508_v39 = vadd.f32 %v11754_v1, %v800_v63  ;;  %v798_v6 = vadd.f32 %v771_v20, %v14372_v31  ;;  %v1046_v7 = vpop.f32.mrf.mxu1  ;;  %12186 = vmatprep.subr.bf16.mxu1 %v13392_v56  ;;  %12156 = vmatprep.mubr.bf16.mxu0 %v13393_v15  ;;  %v13399_v31 = vld [vmem:[%s16818_s1 + $0x130] sm:$0xff]   ;;  %v13412_v1 = vld [vmem:[%s16819_s0 + $0x468] sm:$0xff]  }
 0x11e   :  { %v11723_v9 = vpop.f32.mrf.mxu0  ;;  %12188 = vmatprep.mubr.bf16.mxu1 %v13394_v62 }
 0x11f   :  { %v14517_v44 = vadd.f32 %v1046_v7, %v798_v6  ;;  %v801_v12 = vadd.f32 %v11723_v9, %v14380_v37  ;;  %v11755_v13 = vpop.f32.mrf.mxu1  ;;  %12155 = vmatpush3.bf16.msra.mxu0 %v13391_v10  ;;  %v13401_v37 = vld [vmem:[%s16819_s0 + $0x410] sm:$0xff]  }
 0x120   :  { %12187 = vmatpush3.bf16.msra.mxu1 %v13392_v56  ;;  %v774_v16 = vpop.f32.mrf.mxu0  ;;  %12204 = vmatprep.subr.bf16.mxu0 %v13397_v5  ;;  %v13416_v7 = vld [vmem:[%s16818_s1 + $0x150] sm:$0xff]  }
 0x121   :  { %v14526_v48 = vadd.f32 %v11755_v13, %v801_v12  ;;  %v799_v18 = vadd.f32 %v774_v16, %v14388_v43  ;;  %v1049_v19 = vpop.f32.mrf.mxu1  ;;  %12236 = vmatprep.subr.bf16.mxu1 %v13398_v24  ;;  %v13418_v13 = vld [vmem:[%s16819_s0 + $0x470] sm:$0xff]  }
 0x122   :  { %v11774_v22 = vpop.f32.mrf.mxu0  ;;  %12157 = vmatmul.mubr.bf16.vlgmr.msra.gmra.mxu0 %v13395_v3 }
 0x123   :  { %v14535_v54 = vadd.f32 %v1049_v19, %v799_v18  ;;  %v1338_v25 = vadd.f32 %v11774_v22, %v14400_v53  ;;  %v11806_v26 = vpop.f32.mrf.mxu1  ;;  %12189 = vmatmul.mubr.bf16.vlgmr.msra.gmra.mxu1 %v13396_v11  ;;  %12205 = vmatpush3.bf16.msra.mxu0 %v13397_v5  ;;  %v13406_v53 = vld [vmem:[%s16818_s1 + $0x168] sm:$0xff]   ;;  %v13419_v18 = vld [vmem:[%s16819_s0 + $0x438] sm:$0xff]  }
 0x124   :  { %12237 = vmatpush3.bf16.msra.mxu1 %v13398_v24  ;;  %v1273_v43 = vpop.f32.mrf.mxu0  ;;  %12206 = vmatprep.subr.bf16.mxu0 %v13399_v31  ;;  %v13421_v19 = vld [vmem:[%s16818_s1 + $0x108] sm:$0xff]  }
 0x125   :  { %v14544_v59 = vadd.f32 %v11806_v26, %v1338_v25  ;;  %v1336_v32 = vadd.f32 %v1273_v43, %v14409_v60  ;;  %v1548_v33 = vpop.f32.mrf.mxu1  ;;  %12238 = vmatprep.subr.bf16.mxu1 %v13400_v17  ;;  %12160 = vmatprep.mubr.bf16.mxu0 %v13401_v37  ;;  %v13407_v60 = vld [vmem:[%s16818_s1 + $0x120] sm:$0xff]   ;;  %v13420_v26 = vld [vmem:[%s16819_s0 + $0x478] sm:$0xff]  }
 0x126   :  { %v11775_v36 = vpop.f32.mrf.mxu0  ;;  %12192 = vmatprep.mubr.bf16.mxu1 %v13402_v23 }
 0x127   :  { %v14553_v0 = vadd.f32 %v1548_v33, %v1336_v32  ;;  %v1339_v40 = vadd.f32 %v11775_v36, %v14418_v2  ;;  %v11807_v41 = vpop.f32.mrf.mxu1  ;;  %12207 = vmatpush3.bf16.msra.mxu0 %v13399_v31  ;;  %v13409_v2 = vld [vmem:[%s16819_s0 + $0x420] sm:$0xff]  }
 0x128   :  { %12239 = vmatpush3.bf16.msra.mxu1 %v13400_v17  ;;  %v1276_v45 = vpop.f32.mrf.mxu0  ;;  %12208 = vmatprep.subr.bf16.mxu0 %v13405_v30  ;;  %v13424_v33 = vld [vmem:[%s16818_s1 + $0x140] sm:$0xff]  }
 0x129   :  { %v14562_v4 = vadd.f32 %v11807_v41, %v1339_v40  ;;  %v1337_v47 = vadd.f32 %v1276_v45, %v14427_v8  ;;  %v1551_v49 = vpop.f32.mrf.mxu1  ;;  %12240 = vmatprep.subr.bf16.mxu1 %v13406_v53  ;;  %v13426_v41 = vld [vmem:[%s16819_s0 + $0x4c0] sm:$0xff]  }
 0x12a   :  { %v11778_v51 = vpop.f32.mrf.mxu0  ;;  %12161 = vmatmul.mubr.bf16.gmra.mxu0 %v13403_v29 }
 0x12b   :  { %v14571_v10 = vadd.f32 %v1551_v49, %v1337_v47  ;;  %v1342_v55 = vadd.f32 %v11778_v51, %v14436_v14  ;;  %v11810_v56 = vpop.f32.mrf.mxu1  ;;  %12193 = vmatmul.mubr.bf16.gmra.mxu1 %v13404_v38  ;;  %12209 = vmatpush3.bf16.msra.mxu0 %v13405_v30  ;;  %v13414_v14 = vld [vmem:[%s16818_s1 + $0x158] sm:$0xff]   ;;  %v13427_v47 = vld [vmem:[%s16819_s0 + $0x488] sm:$0xff]  }
 0x12c   :  { %12241 = vmatpush3.bf16.msra.mxu1 %v13406_v53  ;;  %v1289_v8 = vpop.f32.mrf.mxu0  ;;  %12210 = vmatprep.subr.bf16.mxu0 %v13407_v60  ;;  %v13429_v49 = vld [vmem:[%s16818_s1 + $0x1b8] sm:$0xff]  }
 0x12d   :  { %v14580_v15 = vadd.f32 %v11810_v56, %v1342_v55  ;;  %v1340_v61 = vadd.f32 %v1289_v8, %v14445_v21  ;;  %v1564_v62 = vpop.f32.mrf.mxu1  ;;  %12242 = vmatprep.subr.bf16.mxu1 %v13408_v46  ;;  %12164 = vmatprep.mubr.bf16.mxu0 %v13409_v2  ;;  %v13415_v21 = vld [vmem:[%s16818_s1 + $0x110] sm:$0xff]   ;;  %v13428_v56 = vld [vmem:[%s16819_s0 + $0x4c8] sm:$0xff]  }
 0x12e   :  { %v11779_v63 = vpop.f32.mrf.mxu0  ;;  %12196 = vmatprep.mubr.bf16.mxu1 %v13410_v52 }
 0x12f   :  { %v14589_v20 = vadd.f32 %v1564_v62, %v1340_v61  ;;  %v1343_v3 = vadd.f32 %v11779_v63, %v14454_v27  ;;  %v11811_v5 = vpop.f32.mrf.mxu1  ;;  %12211 = vmatpush3.bf16.msra.mxu0 %v13407_v60  ;;  %v13417_v27 = vld [vmem:[%s16819_s0 + $0x430] sm:$0xff]  }
 0x130   :  { %12243 = vmatpush3.bf16.msra.mxu1 %v13408_v46  ;;  %v1292_v6 = vpop.f32.mrf.mxu0  ;;  %12212 = vmatprep.subr.bf16.mxu0 %v13413_v58  ;;  %v13432_v62 = vld [vmem:[%s16818_s1 + $0x30] sm:$0xff]  }
 0x131   :  { %v14598_v24 = vadd.f32 %v11811_v5, %v1343_v3  ;;  %v1341_v9 = vadd.f32 %v1292_v6, %v14463_v35  ;;  %v1567_v11 = vpop.f32.mrf.mxu1  ;;  %12244 = vmatprep.subr.bf16.mxu1 %v13414_v14  ;;  %v13434_v5 = vld [vmem:[%s16819_s0 + $0x4d0] sm:$0xff]  }
 0x132   :  { %v11782_v12 = vpop.f32.mrf.mxu0  ;;  %12165 = vmatmul.mubr.bf16.gmra.mxu0 %v13411_v57 }
 0x133   :  { %v14607_v31 = vadd.f32 %v1567_v11, %v1341_v9  ;;  %v1346_v16 = vadd.f32 %v11782_v12, %v14472_v42  ;;  %v11814_v17 = vpop.f32.mrf.mxu1  ;;  %12197 = vmatmul.mubr.bf16.gmra.mxu1 %v13412_v1  ;;  %12213 = vmatpush3.bf16.msra.mxu0 %v13413_v58  ;;  %v13422_v42 = vld [vmem:[%s16818_s1 + $0x148] sm:$0xff]   ;;  %v13435_v9 = vld [vmem:[%s16819_s0 + $0x498] sm:$0xff]  }
 0x134   :  { %12245 = vmatpush3.bf16.msra.mxu1 %v13414_v14  ;;  %v1305_v35 = vpop.f32.mrf.mxu0  ;;  %12214 = vmatprep.subr.bf16.mxu0 %v13415_v21  ;;  %v13437_v11 = vld [vmem:[%s16818_s1 + $0x1a8] sm:$0xff]  }
 0x135   :  { %v14616_v37 = vadd.f32 %v11814_v17, %v1346_v16  ;;  %v1344_v22 = vadd.f32 %v1305_v35, %v14481_v50  ;;  %v1580_v23 = vpop.f32.mrf.mxu1  ;;  %12246 = vmatprep.subr.bf16.mxu1 %v13416_v7  ;;  %12168 = vmatprep.mubr.bf16.mxu0 %v13417_v27  ;;  %v13423_v50 = vld [vmem:[%s16818_s1 + $0x100] sm:$0xff]   ;;  %v13438_v12 = vld [vmem:[%s16818_s1 + $0x28] sm:$0xff]   ;;  %v13436_v16 = vld [vmem:[%s16819_s0 + $0x4d8] sm:$0xff]  }
 0x136   :  { %v11783_v25 = vpop.f32.mrf.mxu0  ;;  %12200 = vmatprep.mubr.bf16.mxu1 %v13418_v13 }
 0x137   :  { %v14625_v43 = vadd.f32 %v1580_v23, %v1344_v22  ;;  %v1347_v29 = vadd.f32 %v11783_v25, %v14490_v28  ;;  %v11815_v30 = vpop.f32.mrf.mxu1  ;;  %12215 = vmatpush3.bf16.msra.mxu0 %v13415_v21  ;;  %v13425_v28 = vld [vmem:[%s16819_s0 + $0x480] sm:$0xff]  }
 0x138   :  { %12247 = vmatpush3.bf16.msra.mxu1 %v13416_v7  ;;  %v1308_v32 = vpop.f32.mrf.mxu0  ;;  %12216 = vmatprep.subr.bf16.mxu0 %v13421_v19  ;;  %v13442_v25 = vld [vmem:[%s16819_s0 + $0x4e0] sm:$0xff]  }
 0x139   :  { %v14634_v53 = vadd.f32 %v11815_v30, %v1347_v29  ;;  %v1345_v36 = vadd.f32 %v1308_v32, %v14499_v34  ;;  %v1583_v38 = vpop.f32.mrf.mxu1  ;;  %12248 = vmatprep.subr.bf16.mxu1 %v13422_v42  ;;  %v13443_v30 = vld [vmem:[%s16819_s0 + $0x4a8] sm:$0xff]  }
 0x13a   :  { %v11786_v40 = vpop.f32.mrf.mxu0  ;;  %12169 = vmatmul.mubr.bf16.gmra.mxu0 %v13419_v18 }
 0x13b   :  { %v14643_v60 = vadd.f32 %v1583_v38, %v1345_v36  ;;  %v1350_v45 = vadd.f32 %v11786_v40, %v14508_v39  ;;  %v11818_v46 = vpop.f32.mrf.mxu1  ;;  %12201 = vmatmul.mubr.bf16.gmra.mxu1 %v13420_v26  ;;  %12217 = vmatpush3.bf16.msra.mxu0 %v13421_v19  ;;  %v13430_v39 = vld [vmem:[%s16818_s1 + $0x38] sm:$0xff]   ;;  %v13440_v19 = vld [vmem:[%s16818_s1 + $0x20] sm:$0xff]   ;;  %v13444_v38 = vld [vmem:[%s16819_s0 + $0x4e8] sm:$0xff]  }
 0x13c   :  { %12249 = vmatpush3.bf16.msra.mxu1 %v13422_v42  ;;  %v1321_v34 = vpop.f32.mrf.mxu0  ;;  %12218 = vmatprep.subr.bf16.mxu0 %v13423_v50 }
 0x13d   :  { %v14652_v2 = vadd.f32 %v11818_v46, %v1350_v45  ;;  %v1348_v51 = vadd.f32 %v1321_v34, %v14517_v44  ;;  %v1596_v52 = vpop.f32.mrf.mxu1  ;;  %12250 = vmatprep.subr.bf16.mxu1 %v13424_v33  ;;  %12220 = vmatprep.mubr.bf16.mxu0 %v13425_v28  ;;  %v13431_v44 = vld [vmem:[%s16818_s1 + $0x1b0] sm:$0xff]  }
 0x13e   :  { %v11787_v55 = vpop.f32.mrf.mxu0  ;;  %12252 = vmatprep.mubr.bf16.mxu1 %v13426_v41  ;;  %v13448_v45 = vld [vmem:[%s16818_s1 + $0x10] sm:$0xff]  }
 0x13f   :  { %v14661_v8 = vadd.f32 %v1596_v52, %v1348_v51  ;;  %v1351_v57 = vadd.f32 %v11787_v55, %v14526_v48  ;;  %v11819_v58 = vpop.f32.mrf.mxu1  ;;  %12219 = vmatpush3.bf16.msra.mxu0 %v13423_v50  ;;  %v13433_v48 = vld [vmem:[%s16819_s0 + $0x490] sm:$0xff]   ;;  %v13445_v50 = vld [vmem:[%s16818_s1 + $0x198] sm:$0xff]   ;;  %v13453_v55 = vld [vmem:[%s16818_s1 + $0x188] sm:$0xff]  }
 0x140   :  { %12251 = vmatpush3.bf16.msra.mxu1 %v13424_v33  ;;  %v1324_v61 = vpop.f32.mrf.mxu0  ;;  %12268 = vmatprep.subr.bf16.mxu0 %v13429_v49  ;;  %v13446_v33 = vld [vmem:[%s16818_s1 + $0x18] sm:$0xff]  }
 0x141   :  { %v14670_v14 = vadd.f32 %v11819_v58, %v1351_v57  ;;  %v1349_v63 = vadd.f32 %v1324_v61, %v14535_v54  ;;  %v1599_v1 = vpop.f32.mrf.mxu1  ;;  %12300 = vmatprep.subr.bf16.mxu1 %v13430_v39  ;;  %v13454_v57 = vld [vmem:[%s16818_s1 + $0x8] sm:$0xff]  }
 0x142   :  { %v11838_v3 = vpop.f32.mrf.mxu0  ;;  %12221 = vmatmul.mubr.bf16.vlgmr.msra.gmra.mxu0 %v13427_v47 }
 0x143   :  { %v14679_v21 = vadd.f32 %v1599_v1, %v1349_v63  ;;  %v14682_v6 = vadd.f32 %v11838_v3, %v14544_v59  ;;  %v14684_v7 = vpop.f32.mrf.mxu1  ;;  %12253 = vmatmul.mubr.bf16.vlgmr.msra.gmra.mxu1 %v13428_v56  ;;  %12269 = vmatpush3.bf16.msra.mxu0 %v13429_v49  ;;  %v13450_v49 = vld [vmem:[%s16819_s0 + $0x4f0] sm:$0xff]   ;;  %v13456_v1 = vld [vmem:[%s16818_s1] sm:$0xff]  }
 0x144   :  { %12301 = vmatpush3.bf16.msra.mxu1 %v13430_v39  ;;  %v1823_v54 = vpop.f32.mrf.mxu0  ;;  %12270 = vmatprep.subr.bf16.mxu0 %v13431_v44  ;;  %v13451_v39 = vld [vmem:[%s16819_s0 + $0x4b8] sm:$0xff]  }
 0x145   :  { %v14693_v27 = vadd.f32 %v1823_v54, %v14553_v0  ;;  %v14695_v59 = vpop.f32.mrf.mxu1  ;;  %12302 = vmatprep.subr.bf16.mxu1 %v13432_v62  ;;  %12224 = vmatprep.mubr.bf16.mxu0 %v13433_v48  ;;  %v13439_v0 = vld [vmem:[%s16818_s1 + $0x1a0] sm:$0xff]  }
 0x146   :  { %v11839_v13 = vpop.f32.mrf.mxu0  ;;  %12256 = vmatprep.mubr.bf16.mxu1 %v13434_v5  ;;  %v13458_v54 = vld [vmem:[%s16819_s0 + $0x540] sm:$0xff]  }
 0x147   :  { %v14704_v17 = vadd.f32 %v11839_v13, %v14562_v4  ;;  %v14706_v35 = vpop.f32.mrf.mxu1  ;;  %12271 = vmatpush3.bf16.msra.mxu0 %v13431_v44  ;;  %v13441_v4 = vld [vmem:[%s16819_s0 + $0x4a0] sm:$0xff]   ;;  %v13452_v44 = vld [vmem:[%s16819_s0 + $0x4f8] sm:$0xff]  }
 0x148   :  { %12303 = vmatpush3.bf16.msra.mxu1 %v13432_v62  ;;  %v1826_v18 = vpop.f32.mrf.mxu0  ;;  %12272 = vmatprep.subr.bf16.mxu0 %v13437_v11  ;;  %v13461_v13 = vld [vmem:[%s16818_s1 + $0x78] sm:$0xff]  }
 0x149   :  { %v14715_v22 = vadd.f32 %v1826_v18, %v14571_v10  ;;  %v14717_v23 = vpop.f32.mrf.mxu1  ;;  %12304 = vmatprep.subr.bf16.mxu1 %v13438_v12 }
 0x14a   :  { %v11842_v42 = vpop.f32.mrf.mxu0  ;;  %12225 = vmatmul.mubr.bf16.gmra.mxu0 %v13435_v9 }
 0x14b   :  { %v14726_v26 = vadd.f32 %v11842_v42, %v14580_v15  ;;  %v14728_v29 = vpop.f32.mrf.mxu1  ;;  %12257 = vmatmul.mubr.bf16.gmra.mxu1 %v13436_v16  ;;  %12273 = vmatpush3.bf16.msra.mxu0 %v13437_v11 }
 0x14c   :  { %12305 = vmatpush3.bf16.msra.mxu1 %v13438_v12  ;;  %v1839_v10 = vpop.f32.mrf.mxu0  ;;  %12274 = vmatprep.subr.bf16.mxu0 %v13439_v0  ;;  %v13459_v12 = vld [vmem:[%s16819_s0 + $0x508] sm:$0xff]  }
 0x14d   :  { %v14737_v32 = vadd.f32 %v1839_v10, %v14589_v20  ;;  %v14739_v15 = vpop.f32.mrf.mxu1  ;;  %12306 = vmatprep.subr.bf16.mxu1 %v13440_v19  ;;  %12228 = vmatprep.mubr.bf16.mxu0 %v13441_v4  ;;  %v13447_v20 = vld [vmem:[%s16818_s1 + $0x190] sm:$0xff]  }
 0x14e   :  { %v11843_v36 = vpop.f32.mrf.mxu0  ;;  %12260 = vmatprep.mubr.bf16.mxu1 %v13442_v25  ;;  %v13464_v10 = vld [vmem:[%s16818_s1 + $0xb0] sm:$0xff]  }
 0x14f   :  { %v14748_v28 = vadd.f32 %v11843_v36, %v14598_v24  ;;  %v14750_v40 = vpop.f32.mrf.mxu1  ;;  %12275 = vmatpush3.bf16.msra.mxu0 %v13439_v0  ;;  %v13449_v24 = vld [vmem:[%s16819_s0 + $0x4b0] sm:$0xff]   ;;  %v13462_v0 = vld [vmem:[%s16818_s1 + $0xb8] sm:$0xff]  }
 0x150   :  { %12307 = vmatpush3.bf16.msra.mxu1 %v13440_v19  ;;  %v1842_v41 = vpop.f32.mrf.mxu0  ;;  %12276 = vmatprep.subr.bf16.mxu0 %v13445_v50  ;;  %v13460_v19 = vld [vmem:[%s16819_s0 + $0x548] sm:$0xff]   ;;  %v13466_v36 = vld [vmem:[%s16819_s0 + $0x550] sm:$0xff]  }
 0x151   :  { %v14759_v46 = vadd.f32 %v1842_v41, %v14607_v31  ;;  %v14761_v34 = vpop.f32.mrf.mxu1  ;;  %12308 = vmatprep.subr.bf16.mxu1 %v13446_v33  ;;  %v13467_v41 = vld [vmem:[%s16819_s0 + $0x518] sm:$0xff]  }
 0x152   :  { %v11846_v47 = vpop.f32.mrf.mxu0  ;;  %12229 = vmatmul.mubr.bf16.gmra.mxu0 %v13443_v30 }
 0x153   :  { %v14770_v51 = vadd.f32 %v11846_v47, %v14616_v37  ;;  %v14772_v52 = vpop.f32.mrf.mxu1  ;;  %12261 = vmatmul.mubr.bf16.gmra.mxu1 %v13444_v38  ;;  %12277 = vmatpush3.bf16.msra.mxu0 %v13445_v50 }
 0x154   :  { %12309 = vmatpush3.bf16.msra.mxu1 %v13446_v33  ;;  %v1855_v31 = vpop.f32.mrf.mxu0  ;;  %12278 = vmatprep.subr.bf16.mxu0 %v13447_v20 }
 0x155   :  { %v14781_v56 = vadd.f32 %v1855_v31, %v14625_v43  ;;  %v14783_v37 = vpop.f32.mrf.mxu1  ;;  %12310 = vmatprep.subr.bf16.mxu1 %v13448_v45  ;;  %12232 = vmatprep.mubr.bf16.mxu0 %v13449_v24  ;;  %v13455_v43 = vld [vmem:[%s16818_s1 + $0x180] sm:$0xff]  }
 0x156   :  { %v11847_v58 = vpop.f32.mrf.mxu0  ;;  %12264 = vmatprep.mubr.bf16.mxu1 %v13450_v49 }
 0x157   :  { %v14792_v61 = vadd.f32 %v11847_v58, %v14634_v53  ;;  %v14794_v62 = vpop.f32.mrf.mxu1  ;;  %12279 = vmatpush3.bf16.msra.mxu0 %v13447_v20  ;;  %v13457_v53 = vld [vmem:[%s16819_s0 + $0x500] sm:$0xff]  }
 0x158   :  { %12311 = vmatpush3.bf16.msra.mxu1 %v13448_v45  ;;  %v1858_v63 = vpop.f32.mrf.mxu0  ;;  %12280 = vmatprep.subr.bf16.mxu0 %v13453_v55  ;;  %v13469_v45 = vld [vmem:[%s16818_s1 + $0x68] sm:$0xff]  }
 0x159   :  { %16838 = vst [vmem:[#allocation4_spill] sm:$0xff] %v14792_v61  ;;  %v14803_v48 = vadd.f32 %v1858_v63, %v14643_v60  ;;  %v14805_v3 = vpop.f32.mrf.mxu1  ;;  %12312 = vmatprep.subr.bf16.mxu1 %v13454_v57  ;;  %v13569_v61 = vmov 0.0  }
 0x15a   :  { %v11850_v5 = vpop.f32.mrf.mxu0  ;;  %12233 = vmatmul.mubr.bf16.gmra.mxu0 %v13451_v39  ;;  %v13468_v39 = vld [vmem:[%s16819_s0 + $0x558] sm:$0xff]  }
 0x15b   :  { %16839 = vst [vmem:[#allocation5_spill] sm:$0xff] %v14803_v48  ;;  %v14814_v9 = vadd.f32 %v11850_v5, %v14652_v2  ;;  %v14816_v11 = vpop.f32.mrf.mxu1  ;;  %12265 = vmatmul.mubr.bf16.gmra.mxu1 %v13452_v44  ;;  %12281 = vmatpush3.bf16.msra.mxu0 %v13453_v55 }
 0x15c   :  { %12313 = vmatpush3.bf16.msra.mxu1 %v13454_v57  ;;  %v1871_v60 = vpop.f32.mrf.mxu0  ;;  %12282 = vmatprep.subr.bf16.mxu0 %v13455_v43 }
 0x15d   :  { %16840 = vst [vmem:[#allocation6_spill] sm:$0xff] %v14814_v9  ;;  %v14825_v16 = vadd.f32 %v1871_v60, %v14661_v8  ;;  %v14827_v2 = vpop.f32.mrf.mxu1  ;;  %12314 = vmatprep.subr.bf16.mxu1 %v13456_v1  ;;  %12284 = vmatprep.mubr.bf16.mxu0 %v13457_v53  ;;  %v13463_v8 = vld [vmem:[%s16818_s1 + $0x70] sm:$0xff]  }
 0x15e   :  { %v11851_v18 = vpop.f32.mrf.mxu0  ;;  %12316 = vmatprep.mubr.bf16.mxu1 %v13458_v54  ;;  %v13474_v54 = vld [vmem:[%s16819_s0 + $0x560] sm:$0xff]  }
 0x15f   :  { %16841 = vst [vmem:[#allocation7_spill] sm:$0xff] %v14825_v16  ;;  %v14836_v4 = vadd.f32 %v11851_v18, %v14670_v14  ;;  %v14838_v42 = vpop.f32.mrf.mxu1  ;;  %12283 = vmatpush3.bf16.msra.mxu0 %v13455_v43  ;;  %v13465_v14 = vld [vmem:[%s16819_s0 + $0x510] sm:$0xff]   ;;  %v13472_v43 = vld [vmem:[%s16818_s1 + $0xa0] sm:$0xff]   ;;  %v13477_v18 = vld [vmem:[%s16818_s1 + $0x58] sm:$0xff]  }
 0x160   :  { %12315 = vmatpush3.bf16.msra.mxu1 %v13456_v1  ;;  %v1874_v25 = vpop.f32.mrf.mxu0  ;;  %12332 = vmatprep.subr.bf16.mxu0 %v13461_v13 }
 0x161   :  { %16842 = vst [vmem:[#allocation8_spill] sm:$0xff] %v14836_v4  ;;  %v14847_v30 = vadd.f32 %v1874_v25, %v14679_v21  ;;  %v14849_v50 = vpop.f32.mrf.mxu1  ;;  %12364 = vmatprep.subr.bf16.mxu1 %v13462_v0 }
 0x162   :  { %v11902_v33 = vpop.f32.mrf.mxu0  ;;  %12285 = vmatmul.mubr.bf16.vlgmr.msra.gmra.mxu0 %v13459_v12 }
 0x163   :  { %16843 = vst [vmem:[#allocation9_spill] sm:$0xff] %v14847_v30  ;;  %v2436_v38 = vadd.f32 %v11902_v33, %v14684_v7  ;;  %v11934_v20 = vpop.f32.mrf.mxu1  ;;  %12317 = vmatmul.mubr.bf16.vlgmr.msra.gmra.mxu1 %v13460_v19  ;;  %12333 = vmatpush3.bf16.msra.mxu0 %v13461_v13  ;;  %v13470_v7 = vld [vmem:[%s16818_s1 + $0xa8] sm:$0xff]  }
 0x164   :  { %12365 = vmatpush3.bf16.msra.mxu1 %v13462_v0  ;;  %v2371_v21 = vpop.f32.mrf.mxu0  ;;  %12334 = vmatprep.subr.bf16.mxu0 %v13463_v8  ;;  %v13475_v0 = vld [vmem:[%s16819_s0 + $0x528] sm:$0xff]  }
 0x165   :  { %v14864_v24 = vadd.f32 %v11934_v20, %v2436_v38  ;;  %v2434_v47 = vadd.f32 %v2371_v21, %v14695_v59  ;;  %v2645_v49 = vpop.f32.mrf.mxu1  ;;  %12366 = vmatprep.subr.bf16.mxu1 %v13464_v10  ;;  %12288 = vmatprep.mubr.bf16.mxu0 %v13465_v14  ;;  %v13471_v59 = vld [vmem:[%s16818_s1 + $0x60] sm:$0xff]   ;;  %v13476_v14 = vld [vmem:[%s16819_s0 + $0x568] sm:$0xff]   ;;  %v13480_v21 = vld [vmem:[%s16818_s1 + $0x90] sm:$0xff]  }
 0x166   :  { %v11903_v31 = vpop.f32.mrf.mxu0  ;;  %12320 = vmatprep.mubr.bf16.mxu1 %v13466_v36 }
 0x167   :  { %v14873_v55 = vadd.f32 %v2645_v49, %v2434_v47  ;;  %v2437_v57 = vadd.f32 %v11903_v31, %v14706_v35  ;;  %v11935_v58 = vpop.f32.mrf.mxu1  ;;  %12335 = vmatpush3.bf16.msra.mxu0 %v13463_v8  ;;  %v13473_v35 = vld [vmem:[%s16819_s0 + $0x520] sm:$0xff]  }
 0x168   :  { %12367 = vmatpush3.bf16.msra.mxu1 %v13464_v10  ;;  %v2374_v44 = vpop.f32.mrf.mxu0  ;;  %12336 = vmatprep.subr.bf16.mxu0 %v13469_v45 }
 0x169   :  { %v14882_v63 = vadd.f32 %v11935_v58, %v2437_v57  ;;  %v2435_v1 = vadd.f32 %v2374_v44, %v14717_v23  ;;  %v2648_v53 = vpop.f32.mrf.mxu1  ;;  %12368 = vmatprep.subr.bf16.mxu1 %v13470_v7  ;;  %v13483_v58 = vld [vmem:[%s16819_s0 + $0x538] sm:$0xff]  }
 0x16a   :  { %v11906_v5 = vpop.f32.mrf.mxu0  ;;  %12289 = vmatmul.mubr.bf16.gmra.mxu0 %v13467_v41 }
 0x16b   :  { %v14891_v60 = vadd.f32 %v2648_v53, %v2435_v1  ;;  %v2440_v12 = vadd.f32 %v11906_v5, %v14728_v29  ;;  %v11938_v13 = vpop.f32.mrf.mxu1  ;;  %12321 = vmatmul.mubr.bf16.gmra.mxu1 %v13468_v39  ;;  %12337 = vmatpush3.bf16.msra.mxu0 %v13469_v45  ;;  %v13478_v29 = vld [vmem:[%s16818_s1 + $0x98] sm:$0xff]  }
 0x16c   :  { %12369 = vmatpush3.bf16.msra.mxu1 %v13470_v7  ;;  %v2387_v23 = vpop.f32.mrf.mxu0  ;;  %12338 = vmatprep.subr.bf16.mxu0 %v13471_v59  ;;  %v13482_v7 = vld [vmem:[%s16819_s0 + $0x570] sm:$0xff]  }
 0x16d   :  { %v14900_v19 = vadd.f32 %v11938_v13, %v2440_v12  ;;  %v2438_v8 = vadd.f32 %v2387_v23, %v14739_v15  ;;  %v2661_v25 = vpop.f32.mrf.mxu1  ;;  %12370 = vmatprep.subr.bf16.mxu1 %v13472_v43  ;;  %12292 = vmatprep.mubr.bf16.mxu0 %v13473_v35  ;;  %v13479_v15 = vld [vmem:[%s16818_s1 + $0x50] sm:$0xff]   ;;  %v13484_v35 = vld [vmem:[%s16819_s0 + $0x578] sm:$0xff]   ;;  %v13488_v23 = vld [vmem:[%s16818_s1 + $0x80] sm:$0xff]  }
 0x16e   :  { %v11907_v10 = vpop.f32.mrf.mxu0  ;;  %12324 = vmatprep.mubr.bf16.mxu1 %v13474_v54 }
 0x16f   :  { %v14909_v33 = vadd.f32 %v2661_v25, %v2438_v8  ;;  %v2441_v36 = vadd.f32 %v11907_v10, %v14750_v40  ;;  %v11939_v38 = vpop.f32.mrf.mxu1  ;;  %12339 = vmatpush3.bf16.msra.mxu0 %v13471_v59  ;;  %v13481_v40 = vld [vmem:[%s16819_s0 + $0x530] sm:$0xff]   ;;  %v13485_v59 = vld [vmem:[%s16818_s1 + $0x48] sm:$0xff]  }
 0x170   :  { %12371 = vmatpush3.bf16.msra.mxu1 %v13472_v43  ;;  %v2390_v20 = vpop.f32.mrf.mxu0  ;;  %12340 = vmatprep.subr.bf16.mxu0 %v13477_v18 }
 0x171   :  { %v14918_v41 = vadd.f32 %v11939_v38, %v2441_v36  ;;  %v2439_v45 = vadd.f32 %v2390_v20, %v14761_v34  ;;  %v2664_v47 = vpop.f32.mrf.mxu1  ;;  %12372 = vmatprep.subr.bf16.mxu1 %v13478_v29  ;;  %v13491_v38 = vld [vmem:[%s16819_s0 + $0x588] sm:$0xff]  }
 0x172   :  { %v11910_v49 = vpop.f32.mrf.mxu0  ;;  %12293 = vmatmul.mubr.bf16.gmra.mxu0 %v13475_v0 }
 0x173   :  { %v14927_v31 = vadd.f32 %v2664_v47, %v2439_v45  ;;  %v2444_v39 = vadd.f32 %v11910_v49, %v14772_v52  ;;  %v11942_v57 = vpop.f32.mrf.mxu1  ;;  %12325 = vmatmul.mubr.bf16.gmra.mxu1 %v13476_v14  ;;  %12341 = vmatpush3.bf16.msra.mxu0 %v13477_v18  ;;  %v13486_v52 = vld [vmem:[%s16818_s1 + $0x88] sm:$0xff]  }
 0x174   :  { %12373 = vmatpush3.bf16.msra.mxu1 %v13478_v29  ;;  %v2403_v34 = vpop.f32.mrf.mxu0  ;;  %12342 = vmatprep.subr.bf16.mxu0 %v13479_v15  ;;  %v13490_v29 = vld [vmem:[%s16819_s0 + $0x5c0] sm:$0xff]  }
 0x175   :  { %v14936_v44 = vadd.f32 %v11942_v57, %v2444_v39  ;;  %v2442_v43 = vadd.f32 %v2403_v34, %v14783_v37  ;;  %v2677_v1 = vpop.f32.mrf.mxu1  ;;  %12374 = vmatprep.subr.bf16.mxu1 %v13480_v21  ;;  %12296 = vmatprep.mubr.bf16.mxu0 %v13481_v40  ;;  %v13487_v37 = vld [vmem:[%s16818_s1 + $0x40] sm:$0xff]   ;;  %v13492_v40 = vld [vmem:[%s16819_s0 + $0x5c8] sm:$0xff]   ;;  %v13496_v34 = vld [vmem:[%s16818_s1 + $0x130] sm:$0xff]  }
 0x176   :  { %v11911_v53 = vpop.f32.mrf.mxu0  ;;  %12328 = vmatprep.mubr.bf16.mxu1 %v13482_v7 }
 0x177   :  { %v14945_v5 = vadd.f32 %v2677_v1, %v2442_v43  ;;  %v2445_v54 = vadd.f32 %v11911_v53, %v14794_v62  ;;  %v11943_v12 = vpop.f32.mrf.mxu1  ;;  %12343 = vmatpush3.bf16.msra.mxu0 %v13479_v15  ;;  %v13489_v62 = vld [vmem:[%s16819_s0 + $0x580] sm:$0xff]   ;;  %v13493_v15 = vld [vmem:[%s16818_s1 + $0xf8] sm:$0xff]  }
 0x178   :  { %12375 = vmatpush3.bf16.msra.mxu1 %v13480_v21  ;;  %v2406_v13 = vpop.f32.mrf.mxu0  ;;  %12344 = vmatprep.subr.bf16.mxu0 %v13485_v59 }
 0x179   :  { %v14954_v0 = vadd.f32 %v11943_v12, %v2445_v54  ;;  %v2443_v18 = vadd.f32 %v2406_v13, %v14805_v3  ;;  %v2680_v8 = vpop.f32.mrf.mxu1  ;;  %12376 = vmatprep.subr.bf16.mxu1 %v13486_v52  ;;  %v13499_v12 = vld [vmem:[%s16819_s0 + $0x598] sm:$0xff]  }
 0x17a   :  { %v11914_v25 = vpop.f32.mrf.mxu0  ;;  %12297 = vmatmul.mubr.bf16.gmra.mxu0 %v13483_v58 }
 0x17b   :  { %v14963_v10 = vadd.f32 %v2680_v8, %v2443_v18  ;;  %v2448_v14 = vadd.f32 %v11914_v25, %v14816_v11  ;;  %v11946_v36 = vpop.f32.mrf.mxu1  ;;  %12329 = vmatmul.mubr.bf16.gmra.mxu1 %v13484_v35  ;;  %12345 = vmatpush3.bf16.msra.mxu0 %v13485_v59  ;;  %v13494_v11 = vld [vmem:[%s16818_s1 + $0x138] sm:$0xff]  }
 0x17c   :  { %12377 = vmatpush3.bf16.msra.mxu1 %v13486_v52  ;;  %v2419_v3 = vpop.f32.mrf.mxu0  ;;  %12346 = vmatprep.subr.bf16.mxu0 %v13487_v37  ;;  %v13498_v52 = vld [vmem:[%s16819_s0 + $0x5d0] sm:$0xff]  }
 0x17d   :  { %v14972_v20 = vadd.f32 %v11946_v36, %v2448_v14  ;;  %v2446_v21 = vadd.f32 %v2419_v3, %v14827_v2  ;;  %v2693_v45 = vpop.f32.mrf.mxu1  ;;  %12378 = vmatprep.subr.bf16.mxu1 %v13488_v23  ;;  %12348 = vmatprep.mubr.bf16.mxu0 %v13489_v62  ;;  %v13495_v2 = vld [vmem:[%s16818_s1 + $0xf0] sm:$0xff]   ;;  %v13500_v62 = vld [vmem:[%s16819_s0 + $0x5d8] sm:$0xff]   ;;  %v13504_v3 = vld [vmem:[%s16818_s1 + $0x120] sm:$0xff]  }
 0x17e   :  { %v11915_v47 = vpop.f32.mrf.mxu0  ;;  %12380 = vmatprep.mubr.bf16.mxu1 %v13490_v29 }
 0x17f   :  { %v14981_v49 = vadd.f32 %v2693_v45, %v2446_v21  ;;  %v2449_v7 = vadd.f32 %v11915_v47, %v14838_v42  ;;  %v11947_v39 = vpop.f32.mrf.mxu1  ;;  %12347 = vmatpush3.bf16.msra.mxu0 %v13487_v37  ;;  %v13497_v42 = vld [vmem:[%s16819_s0 + $0x590] sm:$0xff]   ;;  %v13501_v37 = vld [vmem:[%s16818_s1 + $0xe8] sm:$0xff]  }
 0x180   :  { %12379 = vmatpush3.bf16.msra.mxu1 %v13488_v23  ;;  %v2422_v57 = vpop.f32.mrf.mxu0  ;;  %12396 = vmatprep.subr.bf16.mxu0 %v13493_v15 }
 0x181   :  { %v14990_v58 = vadd.f32 %v11947_v39, %v2449_v7  ;;  %v2447_v59 = vadd.f32 %v2422_v57, %v14849_v50  ;;  %v2696_v43 = vpop.f32.mrf.mxu1  ;;  %12428 = vmatprep.subr.bf16.mxu1 %v13494_v11  ;;  %v13507_v39 = vld [vmem:[%s16819_s0 + $0x5a8] sm:$0xff]  }
 0x182   :  { %v11966_v1 = vpop.f32.mrf.mxu0  ;;  %12349 = vmatmul.mubr.bf16.vlgmr.msra.gmra.mxu0 %v13491_v38 }
 0x183   :  { %v14999_v53 = vadd.f32 %v2696_v43, %v2447_v59  ;;  %v2984_v35 = vadd.f32 %v11966_v1, %v14864_v24  ;;  %v11998_v54 = vpop.f32.mrf.mxu1  ;;  %12381 = vmatmul.mubr.bf16.vlgmr.msra.gmra.mxu1 %v13492_v40  ;;  %12397 = vmatpush3.bf16.msra.mxu0 %v13493_v15  ;;  %v13502_v24 = vld [vmem:[%s16818_s1 + $0x128] sm:$0xff]  }
 0x184   :  { %12429 = vmatpush3.bf16.msra.mxu1 %v13494_v11  ;;  %v2919_v50 = vpop.f32.mrf.mxu0  ;;  %12398 = vmatprep.subr.bf16.mxu0 %v13495_v2  ;;  %v13506_v11 = vld [vmem:[%s16819_s0 + $0x5e0] sm:$0xff]  }
 0x185   :  { %v15008_v13 = vadd.f32 %v11998_v54, %v2984_v35  ;;  %v2982_v23 = vadd.f32 %v2919_v50, %v14873_v55  ;;  %v3193_v18 = vpop.f32.mrf.mxu1  ;;  %12430 = vmatprep.subr.bf16.mxu1 %v13496_v34  ;;  %12352 = vmatprep.mubr.bf16.mxu0 %v13497_v42  ;;  %v13503_v55 = vld [vmem:[%s16818_s1 + $0xe0] sm:$0xff]   ;;  %v13508_v42 = vld [vmem:[%s16819_s0 + $0x5e8] sm:$0xff]   ;;  %v13512_v50 = vld [vmem:[%s16818_s1 + $0x110] sm:$0xff]  }
 0x186   :  { %v11967_v8 = vpop.f32.mrf.mxu0  ;;  %12384 = vmatprep.mubr.bf16.mxu1 %v13498_v52 }
 0x187   :  { %v15017_v25 = vadd.f32 %v3193_v18, %v2982_v23  ;;  %v2985_v29 = vadd.f32 %v11967_v8, %v14882_v63  ;;  %v11999_v14 = vpop.f32.mrf.mxu1  ;;  %12399 = vmatpush3.bf16.msra.mxu0 %v13495_v2  ;;  %v13505_v63 = vld [vmem:[%s16819_s0 + $0x5a0] sm:$0xff]   ;;  %v13509_v2 = vld [vmem:[%s16818_s1 + $0xd8] sm:$0xff]  }
 0x188   :  { %12431 = vmatpush3.bf16.msra.mxu1 %v13496_v34  ;;  %v2922_v36 = vpop.f32.mrf.mxu0  ;;  %12400 = vmatprep.subr.bf16.mxu0 %v13501_v37 }
 0x189   :  { %v15026_v38 = vadd.f32 %v11999_v14, %v2985_v29  ;;  %v2983_v15 = vadd.f32 %v2922_v36, %v14891_v60  ;;  %v3196_v21 = vpop.f32.mrf.mxu1  ;;  %12432 = vmatprep.subr.bf16.mxu1 %v13502_v24  ;;  %v13515_v14 = vld [vmem:[%s16819_s0 + $0x5b8] sm:$0xff]  }
 0x18a   :  { %v11970_v45 = vpop.f32.mrf.mxu0  ;;  %12353 = vmatmul.mubr.bf16.gmra.mxu0 %v13499_v12 }
 0x18b   :  { %v15035_v47 = vadd.f32 %v3196_v21, %v2983_v15  ;;  %v2988_v40 = vadd.f32 %v11970_v45, %v14900_v19  ;;  %v12002_v7 = vpop.f32.mrf.mxu1  ;;  %12385 = vmatmul.mubr.bf16.gmra.mxu1 %v13500_v62  ;;  %12401 = vmatpush3.bf16.msra.mxu0 %v13501_v37  ;;  %v13510_v19 = vld [vmem:[%s16818_s1 + $0x118] sm:$0xff]  }
 0x18c   :  { %12433 = vmatpush3.bf16.msra.mxu1 %v13502_v24  ;;  %v2935_v60 = vpop.f32.mrf.mxu0  ;;  %12402 = vmatprep.subr.bf16.mxu0 %v13503_v55  ;;  %v13514_v24 = vld [vmem:[%s16819_s0 + $0x5f0] sm:$0xff]  }
 0x18d   :  { %v15044_v57 = vadd.f32 %v12002_v7, %v2988_v40  ;;  %v2986_v34 = vadd.f32 %v2935_v60, %v14909_v33  ;;  %v3209_v59 = vpop.f32.mrf.mxu1  ;;  %12434 = vmatprep.subr.bf16.mxu1 %v13504_v3  ;;  %12356 = vmatprep.mubr.bf16.mxu0 %v13505_v63  ;;  %v13511_v33 = vld [vmem:[%s16818_s1 + $0xd0] sm:$0xff]   ;;  %v13516_v63 = vld [vmem:[%s16819_s0 + $0x5f8] sm:$0xff]   ;;  %v13520_v60 = vld [vmem:[%s16818_s1 + $0x100] sm:$0xff]  }
 0x18e   :  { %v11971_v43 = vpop.f32.mrf.mxu0  ;;  %12388 = vmatprep.mubr.bf16.mxu1 %v13506_v11 }
 0x18f   :  { %v15053_v1 = vadd.f32 %v3209_v59, %v2986_v34  ;;  %v2989_v52 = vadd.f32 %v11971_v43, %v14918_v41  ;;  %v12003_v35 = vpop.f32.mrf.mxu1  ;;  %12403 = vmatpush3.bf16.msra.mxu0 %v13503_v55  ;;  %v13513_v41 = vld [vmem:[%s16819_s0 + $0x5b0] sm:$0xff]   ;;  %v13517_v55 = vld [vmem:[%s16818_s1 + $0xc8] sm:$0xff]  }
 0x190   :  { %12435 = vmatpush3.bf16.msra.mxu1 %v13504_v3  ;;  %v2938_v54 = vpop.f32.mrf.mxu0  ;;  %12404 = vmatprep.subr.bf16.mxu0 %v13509_v2 }
 0x191   :  { %v15062_v12 = vadd.f32 %v12003_v35, %v2989_v52  ;;  %v2987_v37 = vadd.f32 %v2938_v54, %v14927_v31  ;;  %v3212_v23 = vpop.f32.mrf.mxu1  ;;  %12436 = vmatprep.subr.bf16.mxu1 %v13510_v19  ;;  %v13523_v35 = vld [vmem:[%s16819_s0 + $0x608] sm:$0xff]  }
 0x192   :  { %v11974_v18 = vpop.f32.mrf.mxu0  ;;  %12357 = vmatmul.mubr.bf16.gmra.mxu0 %v13507_v39 }
 0x193   :  { %v15071_v8 = vadd.f32 %v3212_v23, %v2987_v37  ;;  %v2992_v62 = vadd.f32 %v11974_v18, %v14936_v44  ;;  %v12006_v29 = vpop.f32.mrf.mxu1  ;;  %12389 = vmatmul.mubr.bf16.gmra.mxu1 %v13508_v42  ;;  %12405 = vmatpush3.bf16.msra.mxu0 %v13509_v2  ;;  %v13518_v44 = vld [vmem:[%s16818_s1 + $0x108] sm:$0xff]  }
 0x194   :  { %12437 = vmatpush3.bf16.msra.mxu1 %v13510_v19  ;;  %v2951_v31 = vpop.f32.mrf.mxu0  ;;  %12406 = vmatprep.subr.bf16.mxu0 %v13511_v33  ;;  %v13522_v19 = vld [vmem:[%s16819_s0 + $0x640] sm:$0xff]  }
 0x195   :  { %v15080_v36 = vadd.f32 %v12006_v29, %v2992_v62  ;;  %v2990_v3 = vadd.f32 %v2951_v31, %v14945_v5  ;;  %v3225_v15 = vpop.f32.mrf.mxu1  ;;  %12438 = vmatprep.subr.bf16.mxu1 %v13512_v50  ;;  %12360 = vmatprep.mubr.bf16.mxu0 %v13513_v41  ;;  %v13519_v5 = vld [vmem:[%s16818_s1 + $0xc0] sm:$0xff]   ;;  %v13524_v41 = vld [vmem:[%s16819_s0 + $0x648] sm:$0xff]   ;;  %v13528_v31 = vld [vmem:[%s16818_s1 + $0x1b0] sm:$0xff]  }
 0x196   :  { %v11975_v21 = vpop.f32.mrf.mxu0  ;;  %12392 = vmatprep.mubr.bf16.mxu1 %v13514_v24 }
 0x197   :  { %v15089_v45 = vadd.f32 %v3225_v15, %v2990_v3  ;;  %v2993_v11 = vadd.f32 %v11975_v21, %v14954_v0  ;;  %v12007_v40 = vpop.f32.mrf.mxu1  ;;  %12407 = vmatpush3.bf16.msra.mxu0 %v13511_v33  ;;  %v13521_v0 = vld [vmem:[%s16819_s0 + $0x600] sm:$0xff]   ;;  %v13525_v33 = vld [vmem:[%s16818_s1 + $0x178] sm:$0xff]  }
 0x198   :  { %12439 = vmatpush3.bf16.msra.mxu1 %v13512_v50  ;;  %v2954_v7 = vpop.f32.mrf.mxu0  ;;  %12408 = vmatprep.subr.bf16.mxu0 %v13517_v55 }
 0x199   :  { %v15098_v39 = vadd.f32 %v12007_v40, %v2993_v11  ;;  %v2991_v2 = vadd.f32 %v2954_v7, %v14963_v10  ;;  %v3228_v34 = vpop.f32.mrf.mxu1  ;;  %12440 = vmatprep.subr.bf16.mxu1 %v13518_v44  ;;  %v13531_v40 = vld [vmem:[%s16819_s0 + $0x618] sm:$0xff]  }
 0x19a   :  { %v11978_v59 = vpop.f32.mrf.mxu0  ;;  %12361 = vmatmul.mubr.bf16.gmra.mxu0 %v13515_v14 }
 0x19b   :  { %v15107_v43 = vadd.f32 %v3228_v34, %v2991_v2  ;;  %v2996_v42 = vadd.f32 %v11978_v59, %v14972_v20  ;;  %v12010_v52 = vpop.f32.mrf.mxu1  ;;  %12393 = vmatmul.mubr.bf16.gmra.mxu1 %v13516_v63  ;;  %12409 = vmatpush3.bf16.msra.mxu0 %v13517_v55  ;;  %v13526_v20 = vld [vmem:[%s16818_s1 + $0x1b8] sm:$0xff]  }
 0x19c   :  { %12441 = vmatpush3.bf16.msra.mxu1 %v13518_v44  ;;  %v2967_v10 = vpop.f32.mrf.mxu0  ;;  %12410 = vmatprep.subr.bf16.mxu0 %v13519_v5  ;;  %v13530_v44 = vld [vmem:[%s16819_s0 + $0x650] sm:$0xff]  }
 0x19d   :  { %v15116_v54 = vadd.f32 %v12010_v52, %v2996_v42  ;;  %v2994_v50 = vadd.f32 %v2967_v10, %v14981_v49  ;;  %v3241_v37 = vpop.f32.mrf.mxu1  ;;  %12442 = vmatprep.subr.bf16.mxu1 %v13520_v60  ;;  %12412 = vmatprep.mubr.bf16.mxu0 %v13521_v0  ;;  %v13527_v49 = vld [vmem:[%s16818_s1 + $0x170] sm:$0xff]   ;;  %v13532_v0 = vld [vmem:[%s16819_s0 + $0x658] sm:$0xff]   ;;  %v13535_v52 = vld [vmem:[%s16818_s1 + $0x160] sm:$0xff]  }
 0x19e   :  { %v11979_v23 = vpop.f32.mrf.mxu0  ;;  %12444 = vmatprep.mubr.bf16.mxu1 %v13522_v19 }
 0x19f   :  { %v15125_v18 = vadd.f32 %v3241_v37, %v2994_v50  ;;  %v2997_v24 = vadd.f32 %v11979_v23, %v14990_v58  ;;  %v12011_v62 = vpop.f32.mrf.mxu1  ;;  %12411 = vmatpush3.bf16.msra.mxu0 %v13519_v5  ;;  %v13529_v58 = vld [vmem:[%s16819_s0 + $0x610] sm:$0xff]   ;;  %v13533_v5 = vld [vmem:[%s16818_s1 + $0x168] sm:$0xff]  }
 0x1a0   :  { %12443 = vmatpush3.bf16.msra.mxu1 %v13520_v60  ;;  %v2970_v29 = vpop.f32.mrf.mxu0  ;;  %12460 = vmatprep.subr.bf16.mxu0 %v13525_v33 }
 0x1a1   :  { %v15134_v14 = vadd.f32 %v12011_v62, %v2997_v24  ;;  %v2995_v55 = vadd.f32 %v2970_v29, %v14999_v53  ;;  %v3244_v3 = vpop.f32.mrf.mxu1  ;;  %12492 = vmatprep.subr.bf16.mxu1 %v13526_v20 }
 0x1a2   :  { %v12030_v15 = vpop.f32.mrf.mxu0  ;;  %12413 = vmatmul.mubr.bf16.vlgmr.msra.gmra.mxu0 %v13523_v35  ;;  %v13536_v35 = vld [vmem:[%s16818_s1 + $0x1a0] sm:$0xff]  }
 0x1a3   :  { %v15143_v21 = vadd.f32 %v3244_v3, %v2995_v55  ;;  %v3532_v63 = vadd.f32 %v12030_v15, %v15008_v13  ;;  %v12062_v11 = vpop.f32.mrf.mxu1  ;;  %12445 = vmatmul.mubr.bf16.vlgmr.msra.gmra.mxu1 %v13524_v41  ;;  %12461 = vmatpush3.bf16.msra.mxu0 %v13525_v33  ;;  %v13534_v13 = vld [vmem:[%s16818_s1 + $0x1a8] sm:$0xff]   ;;  %v13538_v41 = vld [vmem:[%s16819_s0 + $0x660] sm:$0xff]   ;;  %v13541_v55 = vld [vmem:[%s16818_s1 + $0x158] sm:$0xff]  }
 0x1a4   :  { %12493 = vmatpush3.bf16.msra.mxu1 %v13526_v20  ;;  %v3467_v53 = vpop.f32.mrf.mxu0  ;;  %12462 = vmatprep.subr.bf16.mxu0 %v13527_v49  ;;  %v13537_v20 = vld [vmem:[%s16819_s0 + $0x620] sm:$0xff]  }
 0x1a5   :  { %v15152_v7 = vadd.f32 %v12062_v11, %v3532_v63  ;;  %v3530_v60 = vadd.f32 %v3467_v53, %v15017_v25  ;;  %v3741_v2 = vpop.f32.mrf.mxu1  ;;  %12494 = vmatprep.subr.bf16.mxu1 %v13528_v31  ;;  %12416 = vmatprep.mubr.bf16.mxu0 %v13529_v58  ;;  %v13540_v11 = vld [vmem:[%s16819_s0 + $0x668] sm:$0xff]  }
 0x1a6   :  { %v12031_v34 = vpop.f32.mrf.mxu0  ;;  %12448 = vmatprep.mubr.bf16.mxu1 %v13530_v44  ;;  %v13542_v44 = vld [vmem:[%s16818_s1 + $0x198] sm:$0xff]  }
 0x1a7   :  { %v15163_v19 = vadd.f32 %v3741_v2, %v3530_v60  ;;  %v3533_v25 = vadd.f32 %v12031_v34, %v15026_v38  ;;  %v12063_v42 = vpop.f32.mrf.mxu1  ;;  %12463 = vmatpush3.bf16.msra.mxu0 %v13527_v49  ;;  %v13543_v60 = vld [vmem:[%s16818_s1 + $0x150] sm:$0xff]  }
 0x1a8   :  { %12495 = vmatpush3.bf16.msra.mxu1 %v13528_v31  ;;  %v3470_v10 = vpop.f32.mrf.mxu0  ;;  %12464 = vmatprep.subr.bf16.mxu0 %v13533_v5  ;;  %v13539_v31 = vld [vmem:[%s16819_s0 + $0x628] sm:$0xff]  }
 0x1a9   :  { %v15174_v50 = vadd.f32 %v12063_v42, %v3533_v25  ;;  %v3531_v38 = vadd.f32 %v3470_v10, %v15035_v47  ;;  %v3744_v37 = vpop.f32.mrf.mxu1  ;;  %12496 = vmatprep.subr.bf16.mxu1 %v13534_v13  ;;  %v13545_v42 = vld [vmem:[%s16819_s0 + $0x630] sm:$0xff]  }
 0x1aa   :  { %v12034_v23 = vpop.f32.mrf.mxu0  ;;  %12417 = vmatmul.mubr.bf16.gmra.mxu0 %v13531_v40  ;;  %v13546_v10 = vld [vmem:[%s16819_s0 + $0x670] sm:$0xff]  }
 0x1ab   :  { %v15185_v62 = vadd.f32 %v3744_v37, %v3531_v38  ;;  %v3536_v49 = vadd.f32 %v12034_v23, %v15044_v57  ;;  %v12066_v47 = vpop.f32.mrf.mxu1  ;;  %12449 = vmatmul.mubr.bf16.gmra.mxu1 %v13532_v0  ;;  %12465 = vmatpush3.bf16.msra.mxu0 %v13533_v5  ;;  %v13547_v23 = vld [vmem:[%s16819_s0 + $0x638] sm:$0xff]  }
 0x1ac   :  { %12497 = vmatpush3.bf16.msra.mxu1 %v13534_v13  ;;  %v3483_v29 = vpop.f32.mrf.mxu0  ;;  %12466 = vmatprep.subr.bf16.mxu0 %v13535_v52  ;;  %v13544_v13 = vld [vmem:[%s16818_s1 + $0x190] sm:$0xff]  }
 0x1ad   :  { %v15196_v58 = vadd.f32 %v12066_v47, %v3536_v49  ;;  %v3534_v57 = vadd.f32 %v3483_v29, %v15053_v1  ;;  %v3757_v15 = vpop.f32.mrf.mxu1  ;;  %12498 = vmatprep.subr.bf16.mxu1 %v13536_v35  ;;  %12420 = vmatprep.mubr.bf16.mxu0 %v13537_v20 }
 0x1ae   :  { %v12035_v63 = vpop.f32.mrf.mxu0  ;;  %12452 = vmatprep.mubr.bf16.mxu1 %v13538_v41  ;;  %v13549_v41 = vld [vmem:[%s16818_s1 + $0x148] sm:$0xff]  }
 0x1af   :  { %v15207_v40 = vadd.f32 %v3757_v15, %v3534_v57  ;;  %v3537_v1 = vadd.f32 %v12035_v63, %v15062_v12  ;;  %v12067_v5 = vpop.f32.mrf.mxu1  ;;  %12467 = vmatpush3.bf16.msra.mxu0 %v13535_v52  ;;  %v13548_v57 = vld [vmem:[%s16819_s0 + $0x678] sm:$0xff]  }
 0x1b0   :  { %12499 = vmatpush3.bf16.msra.mxu1 %v13536_v35  ;;  %v3486_v2 = vpop.f32.mrf.mxu0  ;;  %12468 = vmatprep.subr.bf16.mxu0 %v13541_v55 }
 0x1b1   :  { %v15218_v0 = vadd.f32 %v12067_v5, %v3537_v1  ;;  %v3535_v12 = vadd.f32 %v3486_v2, %v15071_v8  ;;  %v3760_v25 = vpop.f32.mrf.mxu1  ;;  %12500 = vmatprep.subr.bf16.mxu1 %v13542_v44  ;;  %v13552_v5 = vld [vmem:[%s16818_s1 + $0x180] sm:$0xff]  }
 0x1b2   :  { %v12038_v52 = vpop.f32.mrf.mxu0  ;;  %12421 = vmatmul.mubr.bf16.gmra.mxu0 %v13539_v31  ;;  %v13550_v31 = vld [vmem:[%s16818_s1 + $0x188] sm:$0xff]  }
 0x1b3   :  { %v15229_v38 = vadd.f32 %v3760_v25, %v3535_v12  ;;  %v3540_v37 = vadd.f32 %v12038_v52, %v15080_v36  ;;  %v12070_v8 = vpop.f32.mrf.mxu1  ;;  %12453 = vmatmul.mubr.bf16.gmra.mxu1 %v13540_v11  ;;  %12469 = vmatpush3.bf16.msra.mxu0 %v13541_v55  ;;  %v13551_v11 = vld [vmem:[%s16818_s1 + $0x140] sm:$0xff]  }
 0x1b4   :  { %12501 = vmatpush3.bf16.msra.mxu1 %v13542_v44  ;;  %v3499_v20 = vpop.f32.mrf.mxu0  ;;  %12470 = vmatprep.subr.bf16.mxu0 %v13543_v60 }
 0x1b5   :  { %v15240_v47 = vadd.f32 %v12070_v8, %v3540_v37  ;;  %v3538_v36 = vadd.f32 %v3499_v20, %v15089_v45  ;;  %v3773_v29 = vpop.f32.mrf.mxu1  ;;  %12502 = vmatprep.subr.bf16.mxu1 %v13544_v13  ;;  %12424 = vmatprep.mubr.bf16.mxu0 %v13545_v42  ;;  %v13554_v42 = vld [vmem:[%s16819_s0 + $0x6c0] sm:$0xff]  }
 0x1b6   :  { %v12039_v55 = vpop.f32.mrf.mxu0  ;;  %12456 = vmatprep.mubr.bf16.mxu1 %v13546_v10 }
 0x1b7   :  { %v15251_v44 = vadd.f32 %v3773_v29, %v3538_v36  ;;  %v3541_v45 = vadd.f32 %v12039_v55, %v15098_v39  ;;  %v12071_v63 = vpop.f32.mrf.mxu1  ;;  %12471 = vmatpush3.bf16.msra.mxu0 %v13543_v60  ;;  %v13553_v60 = vld [vmem:[%s16819_s0 + $0x680] sm:$0xff]  }
 0x1b8   :  { %12503 = vmatpush3.bf16.msra.mxu1 %v13544_v13  ;;  %v3502_v1 = vpop.f32.mrf.mxu0  ;;  %12472 = vmatprep.subr.bf16.mxu0 %v13549_v41 }
 0x1b9   :  { %v15262_v12 = vadd.f32 %v12071_v63, %v3541_v45  ;;  %v3539_v39 = vadd.f32 %v3502_v1, %v15107_v43  ;;  %v3776_v25 = vpop.f32.mrf.mxu1  ;;  %12504 = vmatprep.subr.bf16.mxu1 %v13550_v31  ;;  %v13557_v63 = vld [vmem:[%s16819_s0 + $0x690] sm:$0xff]  }
 0x1ba   :  { %v12042_v13 = vpop.f32.mrf.mxu0  ;;  %12425 = vmatmul.mubr.bf16.gmra.mxu0 %v13547_v23 }
 0x1bb   :  { %16844 = vst [vmem:[#allocation10_spill] sm:$0xff] %v15262_v12  ;;  %v15273_v10 = vadd.f32 %v3776_v25, %v3539_v39  ;;  %v3544_v37 = vadd.f32 %v12042_v13, %v15116_v54  ;;  %v12074_v43 = vpop.f32.mrf.mxu1  ;;  %12457 = vmatmul.mubr.bf16.gmra.mxu1 %v13548_v57  ;;  %12473 = vmatpush3.bf16.msra.mxu0 %v13549_v41  ;;  %v13555_v54 = vld [vmem:[%s16819_s0 + $0x688] sm:$0xff]   ;;  %v13559_v39 = vld [vmem:[%s16819_s0 + $0x6d0] sm:$0xff]  }
 0x1bc   :  { %12505 = vmatpush3.bf16.msra.mxu1 %v13550_v31  ;;  %v3515_v8 = vpop.f32.mrf.mxu0  ;;  %12474 = vmatprep.subr.bf16.mxu0 %v13551_v11  ;;  %v13556_v41 = vld [vmem:[%s16819_s0 + $0x6c8] sm:$0xff]  }
 0x1bd   :  { %16845 = vst [vmem:[#allocation11_spill] sm:$0xff] %v15273_v10  ;;  %v15278_v23 = vadd.f32 %v12074_v43, %v3544_v37  ;;  %v3542_v36 = vadd.f32 %v3515_v8, %v15125_v18  ;;  %v3789_v29 = vpop.f32.mrf.mxu1  ;;  %12506 = vmatprep.subr.bf16.mxu1 %v13552_v5  ;;  %12476 = vmatprep.mubr.bf16.mxu0 %v13553_v60  ;;  %v13564_v25 = vld [vmem:[%s16819_s0 + $0x6e8] sm:$0xff]  }
 0x1be   :  { %v12043_v55 = vpop.f32.mrf.mxu0  ;;  %12508 = vmatprep.mubr.bf16.mxu1 %v13554_v42 }
 0x1bf   :  { %16846 = vst [vmem:[#allocation12_spill] sm:$0xff] %v15278_v23  ;;  %v15289_v57 = vadd.f32 %v3789_v29, %v3542_v36  ;;  %v3545_v18 = vadd.f32 %v12043_v55, %v15134_v14  ;;  %v12075_v45 = vpop.f32.mrf.mxu1  ;;  %12475 = vmatpush3.bf16.msra.mxu0 %v13551_v11 }
 0x1c0   :  { %12507 = vmatpush3.bf16.msra.mxu1 %v13552_v5  ;;  %v3518_v1 = vpop.f32.mrf.mxu0  ;;  %12524 = vmatprep.subr.mxu0 %v13569_v61 }
 0x1c1   :  { %16847 = vst [vmem:[#allocation13_spill] sm:$0xff] %v15289_v57  ;;  %v15300_v60 = vadd.f32 %v12075_v45, %v3545_v18  ;;  %v3543_v13 = vadd.f32 %v3518_v1, %v15143_v21  ;;  %v3792_v14 = vpop.f32.mrf.mxu1  ;;  %v13561_v18 = vld [vmem:[%s16819_s0 + $0x6a0] sm:$0xff]   ;;  %12559 = vmatprep.subr.mxu1 %v13569_v61 }
 0x1c2   :  { %v12094_v42 = vpop.f32.mrf.mxu0  ;;  %12477 = vmatmul.mubr.bf16.vlgmr.msra.gmra.mxu0 %v13555_v54  ;;  %v13558_v54 = vld [vmem:[%s16819_s0 + $0x698] sm:$0xff]   ;;  %v13563_v1 = vld [vmem:[%s16819_s0 + $0x6e0] sm:$0xff]  }
 0x1c3   :  { %16848 = vst [vmem:[#allocation14_spill] sm:$0xff] %v15300_v60  ;;  %v15305_v37 = vadd.f32 %v3792_v14, %v3543_v13  ;;  %v12126_v5 = vpop.f32.mrf.mxu1  ;;  %12509 = vmatmul.mubr.bf16.vlgmr.msra.gmra.mxu1 %v13556_v41  ;;  %12480 = vmatprep.mubr.bf16.mxu0 %v13557_v63  ;;  %v13560_v41 = vld [vmem:[%s16819_s0 + $0x6d8] sm:$0xff]  }
 0x1c4   :  { %v4386_v43 = vadd.f32 %v12126_v5, %v12094_v42  ;;  %v15307_v8 = vpop.f32.mrf.mxu0  ;;  %12512 = vmatprep.mubr.bf16.mxu1 %v13559_v39 }
 0x1c5   :  { %16849 = vst [vmem:[#allocation15_spill] sm:$0xff] %v15305_v37  ;;  %v15311_v29 = vpop.f32.mrf.mxu1 }
 0x1c6   :  { %v12095_v21 = vpop.f32.mrf.mxu0 }
 0x1c7   :  { %v12127_v55 = vpop.f32.mrf.mxu1 }
 0x1c8   :  { %v4387_v45 = vadd.f32 %v12127_v55, %v12095_v21  ;;  %v4066_v63 = vpop.f32.mrf.mxu0  ;;  %v13562_v21 = vld [vmem:[%s16819_s0 + $0x6a8] sm:$0xff]  }
 0x1c9   :  { %v4324_v39 = vpop.f32.mrf.mxu1 }
 0x1ca   :  { %v12098_v13 = vpop.f32.mrf.mxu0  ;;  %12481 = vmatmul.mubr.bf16.gmra.mxu0 %v13558_v54  ;;  %v13565_v54 = vld [vmem:[%s16819_s0 + $0x6b0] sm:$0xff]   ;;  %v4385_v30 = vadd.f32 %v4324_v39, %v4066_v63  ;;  %v10665_v39 = vld [vmem:[%s16820_s3 + $0xf8] sm:$0xff] }
 0x1cb   :  { %v12130_v14 = vpop.f32.mrf.mxu1  ;;  %12513 = vmatmul.mubr.bf16.gmra.mxu1 %v13560_v41  ;;  %12484 = vmatprep.mubr.bf16.mxu0 %v13561_v18 }
 0x1cc   :  { %v4390_v42 = vadd.f32 %v12130_v14, %v12098_v13  ;;  %v4079_v5 = vpop.f32.mrf.mxu0  ;;  %12516 = vmatprep.mubr.bf16.mxu1 %v13563_v1  ;;  %v13567_v1 = vld [vmem:[%s16819_s0 + $0x6f0] sm:$0xff]   ;;  %12560 = vmatpush3.msra.mxu1 %v10665_v39 }
 0x1cd   :  { %v4337_v36 = vpop.f32.mrf.mxu1  ;;  %12561 = vmatprep.subr.mxu1 %v13569_v61 }
 0x1ce   :  { %v12099_v11 = vpop.f32.mrf.mxu0  ;;  %v4388_v9 = vadd.f32 %v4337_v36, %v4079_v5 }
 0x1cf   :  { %v12131_v55 = vpop.f32.mrf.mxu1 }
 0x1d0   :  { %v15334_v41 = vadd.f32 %v12131_v55, %v12099_v11  ;;  %v4082_v18 = vpop.f32.mrf.mxu0  ;;  %v13566_v55 = vld [vmem:[%s16819_s0 + $0x6b8] sm:$0xff]  }
 0x1d1   :  { %v4340_v13 = vpop.f32.mrf.mxu1 }
 0x1d2   :  { %v12102_v14 = vpop.f32.mrf.mxu0  ;;  %12485 = vmatmul.mubr.bf16.gmra.mxu0 %v13562_v21  ;;  %v13568_v21 = vld [vmem:[%s16819_s0 + $0x6f8] sm:$0xff]  }
 0x1d3   :  { %v12134_v31 = vpop.f32.mrf.mxu1  ;;  %12517 = vmatmul.mubr.bf16.gmra.mxu1 %v13564_v25  ;;  %12488 = vmatprep.mubr.bf16.mxu0 %v13565_v54 }
 0x1d4   :  { %v15339_v20 = vadd.f32 %v12134_v31, %v12102_v14  ;;  %v15341_v52 = vpop.f32.mrf.mxu0  ;;  %12520 = vmatprep.mubr.bf16.mxu1 %v13567_v1 }
 0x1d5   :  { %v15343_v2 = vpop.f32.mrf.mxu1 }
 0x1d6   :  { %v12103_v11 = vpop.f32.mrf.mxu0  ;;  %v4392_v5 = vadd.f32 %v15343_v2, %v15341_v52 }
 0x1d7   :  { %v12135_v15 = vpop.f32.mrf.mxu1 }
 0x1d8   :  { %v15351_v49 = vadd.f32 %v12135_v15, %v12103_v11  ;;  %v15353_v25 = vpop.f32.mrf.mxu0 }
 0x1d9   :  { %v15355_v31 = vpop.f32.mrf.mxu1 }
 0x1da   :  { %v12106_v54 = vpop.f32.mrf.mxu0  ;;  %12489 = vmatmul.mubr.bf16.gmra.mxu0 %v13566_v55 }
 0x1db   :  { %v12138_v1 = vpop.f32.mrf.mxu1  ;;  %12521 = vmatmul.mubr.bf16.gmra.mxu1 %v13568_v21  ;;  %12556 = vmatprep.mubr.msk.f32.mxu0 %vm13570_vm0, %v13569_v61 }
 0x1dc   :  { %v15357_v14 = vadd.f32 %v12138_v1, %v12106_v54  ;;  %v15359_v35 = vpop.f32.mrf.mxu0  ;;  %12591 = vmatprep.mubr.msk.f32.mxu1 %vm13570_vm0, %v13569_v61 }
 0x1dd   :  { %v15361_v34 = vpop.f32.mrf.mxu1 }
 0x1de   :  { %v12107_v53 = vpop.f32.mrf.mxu0 }
 0x1df   :  { %v12139_v3 = vpop.f32.mrf.mxu1 }
 0x1e0   :  { %v15363_v24 = vadd.f32 %v12139_v3, %v12107_v53  ;;  %v15365_v15 = vpop.f32.mrf.mxu0 }
 0x1e1   :  { %v15367_v11 = vpop.f32.mrf.mxu1 }
 0x1e2   :  { %v12158_v33 = vpop.f32.mrf.mxu0 }
 0x1e3   :  { %v4660_v59 = vadd.f32 %v12158_v33, %v4386_v43  ;;  %v12190_v37 = vpop.f32.mrf.mxu1 }
 0x1e4   :  { %v15369_v55 = vpop.f32.mrf.mxu0 }
 0x1e5   :  { %v15371_v21 = vadd.f32 %v12190_v37, %v4660_v59  ;;  %v15373_v54 = vpop.f32.mrf.mxu1 }
 0x1e6   :  { %v12159_v1 = vpop.f32.mrf.mxu0 }
 0x1e7   :  { %v4661_v60 = vadd.f32 %v12159_v1, %v4387_v45  ;;  %v12191_v4 = vpop.f32.mrf.mxu1  ;;  %v7876_v1 = vld [vmem:[%s16820_s3 + $0x60] sm:$0xff] }
 0x1e8   :  { %v4598_v57 = vpop.f32.mrf.mxu0 }
 0x1e9   :  { %v15375_v3 = vadd.f32 %v12191_v4, %v4661_v60  ;;  %v4659_v53 = vadd.f32 %v4598_v57, %v4385_v30  ;;  %v4872_v16 = vpop.f32.mrf.mxu1  ;;  %v7879_v4 = vld [vmem:[%s16820_s3 + $0x78] sm:$0xff] }
 0x1ea   :  { %v12162_v23 = vpop.f32.mrf.mxu0  ;;  %12525 = vmatpush3.msra.mxu0 %v7879_v4 }
 0x1eb   :  { %v15377_v10 = vadd.f32 %v4872_v16, %v4659_v53  ;;  %v4664_v33 = vadd.f32 %v12162_v23, %v4390_v42  ;;  %v12194_v43 = vpop.f32.mrf.mxu1  ;;  %v4389_v16 = vadd.f32 %v4340_v13, %v4082_v18  ;;  %12526 = vmatprep.subr.mxu0 %v13569_v61  ;;  %v10664_v53 = vld [vmem:[%s16820_s3 + $0xf0] sm:$0xff] }
 0x1ec   :  { %v4611_v48 = vpop.f32.mrf.mxu0  ;;  %12562 = vmatpush3.msra.mxu1 %v10664_v53  ;;  %v10660_v53 = vld [vmem:[%s16820_s3 + $0xd0] sm:$0xff] }
 0x1ed   :  { %v15379_v59 = vadd.f32 %v12194_v43, %v4664_v33  ;;  %v4662_v37 = vadd.f32 %v4611_v48, %v4388_v9  ;;  %v4885_v12 = vpop.f32.mrf.mxu1  ;;  %v7878_v48 = vld [vmem:[%s16820_s3 + $0x70] sm:$0xff]  ;;  %12563 = vmatprep.subr.mxu1 %v13569_v61  ;;  %v7875_v43 = vld [vmem:[%s16820_s3 + $0x58] sm:$0xff] }
 0x1ee   :  { %v12163_v30 = vpop.f32.mrf.mxu0  ;;  %12527 = vmatpush3.msra.mxu0 %v7878_v48  ;;  %v7874_v48 = vld [vmem:[%s16820_s3 + $0x50] sm:$0xff] }
 0x1ef   :  { %v15386_v57 = vadd.f32 %v4885_v12, %v4662_v37  ;;  %v4665_v23 = vadd.f32 %v12163_v30, %v15334_v41  ;;  %v12195_v60 = vpop.f32.mrf.mxu1  ;;  %12528 = vmatprep.subr.mxu0 %v13569_v61  ;;  %v7877_v12 = vld [vmem:[%s16820_s3 + $0x68] sm:$0xff]  ;;  %v4393_v30 = vadd.f32 %v15355_v31, %v15353_v25 }
 0x1f0   :  { %v4614_v9 = vpop.f32.mrf.mxu0  ;;  %12529 = vmatpush3.msra.mxu0 %v7877_v12  ;;  %v10663_v37 = vld [vmem:[%s16820_s3 + $0xe8] sm:$0xff]  ;;  %v10661_v12 = vld [vmem:[%s16820_s3 + $0xd8] sm:$0xff] }
 0x1f1   :  { %v15393_v36 = vadd.f32 %v12195_v60, %v4665_v23  ;;  %v4663_v45 = vadd.f32 %v4614_v9, %v4389_v16  ;;  %v4888_v63 = vpop.f32.mrf.mxu1  ;;  %12530 = vmatprep.subr.mxu0 %v13569_v61  ;;  %12564 = vmatpush3.msra.mxu1 %v10663_v37  ;;  %v10662_v9 = vld [vmem:[%s16820_s3 + $0xe0] sm:$0xff]  ;;  %v4397_v37 = vadd.f32 %v15367_v11, %v15365_v15 }
 0x1f2   :  { %v12166_v42 = vpop.f32.mrf.mxu0  ;;  %12531 = vmatpush3.msra.mxu0 %v7876_v1  ;;  %12565 = vmatprep.subr.mxu1 %v13569_v61  ;;  %v7872_v1 = vld [vmem:[%s16820_s3 + $0x40] sm:$0xff] }
 0x1f3   :  { %v15404_v41 = vadd.f32 %v4888_v63, %v4663_v45  ;;  %v4668_v18 = vadd.f32 %v12166_v42, %v15339_v20  ;;  %v12198_v13 = vpop.f32.mrf.mxu1  ;;  %12532 = vmatprep.subr.mxu0 %v13569_v61  ;;  %12566 = vmatpush3.msra.mxu1 %v10662_v9  ;;  %v7873_v63 = vld [vmem:[%s16820_s3 + $0x48] sm:$0xff]  ;;  %v4396_v42 = vadd.f32 %v15361_v34, %v15359_v35  ;;  %v10658_v15 = vld [vmem:[%s16820_s3 + $0xc0] sm:$0xff] }
 0x1f4   :  { %v4627_v33 = vpop.f32.mrf.mxu0  ;;  %12533 = vmatpush3.msra.mxu0 %v7875_v43  ;;  %12567 = vmatprep.subr.mxu1 %v13569_v61  ;;  %v4384_v34 = vadd.f32 %v15311_v29, %v15307_v8  ;;  %v10659_v43 = vld [vmem:[%s16820_s3 + $0xc8] sm:$0xff] }
 0x1f5   :  { %v15415_v2 = vadd.f32 %v12198_v13, %v4668_v18  ;;  %v4666_v52 = vadd.f32 %v4627_v33, %v4392_v5  ;;  %v4901_v20 = vpop.f32.mrf.mxu1  ;;  %12534 = vmatprep.subr.mxu0 %v13569_v61  ;;  %12568 = vmatpush3.msra.mxu1 %v10661_v12  ;;  %v7869_v9 = vld [vmem:[%s16820_s3 + $0x28] sm:$0xff] }
 0x1f6   :  { %v12167_v4 = vpop.f32.mrf.mxu0  ;;  %12535 = vmatpush3.msra.mxu0 %v7874_v48  ;;  %12569 = vmatprep.subr.mxu1 %v13569_v61  ;;  %v4658_v29 = vadd.f32 %v15369_v55, %v4384_v34 }
 0x1f7   :  { %v15427_v16 = vadd.f32 %v4901_v20, %v4666_v52  ;;  %v4669_v23 = vadd.f32 %v12167_v4, %v15351_v49  ;;  %v12199_v60 = vpop.f32.mrf.mxu1  ;;  %12536 = vmatprep.subr.mxu0 %v13569_v61  ;;  %12570 = vmatpush3.msra.mxu1 %v10660_v53  ;;  %v7871_v20 = vld [vmem:[%s16820_s3 + $0x38] sm:$0xff] }
 0x1f8   :  { %v4630_v45 = vpop.f32.mrf.mxu0  ;;  %12537 = vmatpush3.msra.mxu0 %v7873_v63  ;;  %12571 = vmatprep.subr.mxu1 %v13569_v61  ;;  %v7867_v53 = vld [vmem:[%s16820_s3 + $0x18] sm:$0xff] }
 0x1f9   :  { %v15438_v25 = vadd.f32 %v12199_v60, %v4669_v23  ;;  %v4667_v31 = vadd.f32 %v4630_v45, %v4393_v30  ;;  %v4904_v49 = vpop.f32.mrf.mxu1  ;;  %12538 = vmatprep.subr.mxu0 %v13569_v61  ;;  %12572 = vmatpush3.msra.mxu1 %v10659_v43  ;;  %v7870_v60 = vld [vmem:[%s16820_s3 + $0x30] sm:$0xff]  ;;  %v10657_v45 = vld [vmem:[%s16820_s3 + $0xb8] sm:$0xff] }
 0x1fa   :  { %v12170_v39 = vpop.f32.mrf.mxu0  ;;  %12539 = vmatpush3.msra.mxu0 %v7872_v1  ;;  %12573 = vmatprep.subr.mxu1 %v13569_v61  ;;  %v7866_v43 = vld [vmem:[%s16820_s3 + $0x10] sm:$0xff] }
 0x1fb   :  { %v15450_v5 = vadd.f32 %v4904_v49, %v4667_v31  ;;  %v4672_v18 = vadd.f32 %v12170_v39, %v15357_v14  ;;  %v12202_v13 = vpop.f32.mrf.mxu1  ;;  %12540 = vmatprep.subr.mxu0 %v13569_v61  ;;  %12574 = vmatpush3.msra.mxu1 %v10658_v15  ;;  %v4932_v49 = vadd.f32 %v15373_v54, %v4658_v29 }
 0x1fc   :  { %v4643_v33 = vpop.f32.mrf.mxu0  ;;  %12541 = vmatpush3.msra.mxu0 %v7871_v20  ;;  %12575 = vmatprep.subr.mxu1 %v13569_v61 }
 0x1fd   :  { %v15463_v35 = vadd.f32 %v12202_v13, %v4672_v18  ;;  %v4670_v14 = vadd.f32 %v4643_v33, %v4396_v42  ;;  %v4917_v52 = vpop.f32.mrf.mxu1  ;;  %12542 = vmatprep.subr.mxu0 %v13569_v61  ;;  %12576 = vmatpush3.msra.mxu1 %v10657_v45  ;;  %v7868_v42 = vld [vmem:[%s16820_s3 + $0x20] sm:$0xff]  ;;  %v10656_v18 = vld [vmem:[%s16820_s3 + $0xb0] sm:$0xff]  ;;  %v10655_v33 = vld [vmem:[%s16820_s3 + $0xa8] sm:$0xff] }
 0x1fe   :  { %v12171_v8 = vpop.f32.mrf.mxu0  ;;  %12543 = vmatpush3.msra.mxu0 %v7870_v60  ;;  %12577 = vmatprep.subr.mxu1 %v13569_v61  ;;  %v10653_v60 = vld [vmem:[%s16820_s3 + $0x98] sm:$0xff] }
 0x1ff   :  { %v15476_v4 = vadd.f32 %v4917_v52, %v4670_v14  ;;  %v4673_v30 = vadd.f32 %v12171_v8, %v15363_v24  ;;  %v12203_v23 = vpop.f32.mrf.mxu1  ;;  %12544 = vmatprep.subr.mxu0 %v13569_v61  ;;  %12578 = vmatpush3.msra.mxu1 %v10656_v18 }
 0x200   :  { %v4646_v11 = vpop.f32.mrf.mxu0  ;;  %12545 = vmatpush3.msra.mxu0 %v7869_v9  ;;  %12579 = vmatprep.subr.mxu1 %v13569_v61  ;;  %v10652_v9 = vld [vmem:[%s16820_s3 + $0x90] sm:$0xff] }
 0x201   :  { %v15487_v55 = vadd.f32 %v12203_v23, %v4673_v30  ;;  %v4671_v48 = vadd.f32 %v4646_v11, %v4397_v37  ;;  %v4920_v24 = vpop.f32.mrf.mxu1  ;;  %12546 = vmatprep.subr.mxu0 %v13569_v61  ;;  %12580 = vmatpush3.msra.mxu1 %v10655_v33  ;;  %v10654_v37 = vld [vmem:[%s16820_s3 + $0xa0] sm:$0xff]  ;;  %v7865_v23 = vld [vmem:[%s16820_s3 + $0x8] sm:$0xff] }
 0x202   :  { %v12222_v31 = vpop.f32.mrf.mxu0  ;;  %12547 = vmatpush3.msra.mxu0 %v7868_v42  ;;  %12581 = vmatprep.subr.mxu1 %v13569_v61 }
 0x203   :  { %v15498_v63 = vadd.f32 %v4920_v24, %v4671_v48  ;;  %v5208_v12 = vadd.f32 %v12222_v31, %v15371_v21  ;;  %v12254_v39 = vpop.f32.mrf.mxu1  ;;  %12548 = vmatprep.subr.mxu0 %v13569_v61  ;;  %12582 = vmatpush3.msra.mxu1 %v10654_v37  ;;  %v7864_v24 = vld [vmem:[%s16820_s3] sm:$0xff] }
 0x204   :  { %v5143_v13 = vpop.f32.mrf.mxu0  ;;  %12549 = vmatpush3.msra.mxu0 %v7867_v53  ;;  %12583 = vmatprep.subr.mxu1 %v13569_v61 }
 0x205   :  { %v15509_v54 = vadd.f32 %v12254_v39, %v5208_v12  ;;  %v5206_v1 = vadd.f32 %v5143_v13, %v4932_v49  ;;  %v5417_v21 = vpop.f32.mrf.mxu1  ;;  %12550 = vmatprep.subr.mxu0 %v13569_v61  ;;  %12584 = vmatpush3.msra.mxu1 %v10653_v60  ;;  %v10651_v12 = vld [vmem:[%s16820_s3 + $0x88] sm:$0xff]  ;;  %v10650_v13 = vld [vmem:[%s16820_s3 + $0x80] sm:$0xff] }
 0x206   :  { %v12223_v34 = vpop.f32.mrf.mxu0  ;;  %12551 = vmatpush3.msra.mxu0 %v7866_v43  ;;  %12585 = vmatprep.subr.mxu1 %v13569_v61 }
 0x207   :  { %v15519_v14 = vadd.f32 %v5417_v21, %v5206_v1  ;;  %v5209_v52 = vadd.f32 %v12223_v34, %v15375_v3  ;;  %v12255_v20 = vpop.f32.mrf.mxu1  ;;  %12552 = vmatprep.subr.mxu0 %v13569_v61  ;;  %12586 = vmatpush3.msra.mxu1 %v10652_v9 }
 0x208   :  { %v5146_v8 = vpop.f32.mrf.mxu0  ;;  %12553 = vmatpush3.msra.mxu0 %v7865_v23  ;;  %12587 = vmatprep.subr.mxu1 %v13569_v61 }
 0x209   :  { %v15530_v29 = vadd.f32 %v12255_v20, %v5209_v52  ;;  %v5207_v3 = vadd.f32 %v5146_v8, %v15377_v10  ;;  %v5420_v30 = vpop.f32.mrf.mxu1  ;;  %12554 = vmatprep.subr.mxu0 %v13569_v61  ;;  %12588 = vmatpush3.msra.mxu1 %v10651_v12 }
 0x20a   :  { %v12226_v15 = vpop.f32.mrf.mxu0  ;;  %12555 = vmatpush3.msra.mxu0 %v7864_v24  ;;  %12589 = vmatprep.subr.mxu1 %v13569_v61 }
 0x20b   :  { %v15541_v11 = vadd.f32 %v5420_v30, %v5207_v3  ;;  %v5212_v10 = vadd.f32 %v12226_v15, %v15379_v59  ;;  %v12258_v48 = vpop.f32.mrf.mxu1  ;;  %12594 = vmatprep.subr.mxu0 %v13569_v61  ;;  %12590 = vmatpush3.msra.mxu1 %v10650_v13 }
 0x20c   :  { %v5159_v45 = vpop.f32.mrf.mxu0  ;;  %12629 = vmatprep.subr.mxu1 %v13569_v61 }
 0x20d   :  { %v15552_v31 = vadd.f32 %v12258_v48, %v5212_v10  ;;  %v5210_v59 = vadd.f32 %v5159_v45, %v15386_v57  ;;  %v5433_v49 = vpop.f32.mrf.mxu1 }
 0x20e   :  { %v12227_v39 = vpop.f32.mrf.mxu0 }
 0x20f   :  { %v15562_v42 = vadd.f32 %v5433_v49, %v5210_v59  ;;  %v5213_v18 = vadd.f32 %v12227_v39, %v15393_v36  ;;  %v12259_v57 = vpop.f32.mrf.mxu1 }
 0x210   :  { %v5162_v1 = vpop.f32.mrf.mxu0 }
 0x211   :  { %v5487_v21 = vadd.f32 %v12259_v57, %v5213_v18  ;;  %v5211_v53 = vadd.f32 %v5162_v1, %v15404_v41  ;;  %v5436_v33 = vpop.f32.mrf.mxu1 }
 0x212   :  { %v12230_v34 = vpop.f32.mrf.mxu0 }
 0x213   :  { %v5485_v36 = vadd.f32 %v5436_v33, %v5211_v53  ;;  %v5216_v52 = vadd.f32 %v12230_v34, %v15415_v2  ;;  %v12262_v20 = vpop.f32.mrf.mxu1 }
 0x214   :  { %v5175_v43 = vpop.f32.mrf.mxu0 }
 0x215   :  { %v5490_v37 = vadd.f32 %v12262_v20, %v5216_v52  ;;  %v5214_v8 = vadd.f32 %v5175_v43, %v15427_v16  ;;  %v5449_v3 = vpop.f32.mrf.mxu1 }
 0x216   :  { %v12231_v30 = vpop.f32.mrf.mxu0 }
 0x217   :  { %v5488_v23 = vadd.f32 %v5449_v3, %v5214_v8  ;;  %v5217_v60 = vadd.f32 %v12231_v30, %v15438_v25  ;;  %v12263_v15 = vpop.f32.mrf.mxu1 }
 0x218   :  { %v5178_v10 = vpop.f32.mrf.mxu0 }
 0x219   :  { %v5491_v41 = vadd.f32 %v12263_v15, %v5217_v60  ;;  %v5215_v48 = vadd.f32 %v5178_v10, %v15450_v5  ;;  %v5452_v24 = vpop.f32.mrf.mxu1 }
 0x21a   :  { %v12234_v9 = vpop.f32.mrf.mxu0 }
 0x21b   :  { %v5489_v45 = vadd.f32 %v5452_v24, %v5215_v48  ;;  %v5220_v2 = vadd.f32 %v12234_v9, %v15463_v35  ;;  %v12266_v59 = vpop.f32.mrf.mxu1  ;;  %v16852_v48 = vmax.f32 %v14704_v17, %v15174_v50  ;;  %v16853_v9 = vmax.f32 %v14715_v22, %v15185_v62 }
 0x21c   :  { %v5191_v49 = vpop.f32.mrf.mxu0 }
 0x21d   :  { %v5494_v12 = vadd.f32 %v12266_v59, %v5220_v2  ;;  %v5218_v16 = vadd.f32 %v5191_v49, %v15476_v4  ;;  %v5465_v39 = vpop.f32.mrf.mxu1  ;;  %v16850_v4 = vmax.f32 %v14682_v6, %v15152_v7  ;;  %v16854_v59 = vmax.f32 %v14726_v26, %v15196_v58 }
 0x21e   :  { %v12235_v18 = vpop.f32.mrf.mxu0 }
 0x21f   :  { %v5492_v57 = vadd.f32 %v5465_v39, %v5218_v16  ;;  %v5221_v25 = vadd.f32 %v12235_v18, %v15487_v55  ;;  %v12267_v13 = vpop.f32.mrf.mxu1  ;;  %v16855_v16 = vmax.f32 %v14737_v32, %v15207_v40 }
 0x220   :  { %v5194_v1 = vpop.f32.mrf.mxu0 }
 0x221   :  { %v5495_v53 = vadd.f32 %v12267_v13, %v5221_v25  ;;  %v5219_v5 = vadd.f32 %v5194_v1, %v15498_v63  ;;  %v5468_v33 = vpop.f32.mrf.mxu1  ;;  %v16851_v63 = vmax.f32 %v14693_v27, %v15163_v19 }
 0x222   :  { %v12286_v34 = vpop.f32.mrf.mxu0 }
 0x223   :  { %v5493_v52 = vadd.f32 %v5468_v33, %v5219_v5  ;;  %v5756_v35 = vadd.f32 %v12286_v34, %v15509_v54  ;;  %v15582_v20 = vpop.f32.mrf.mxu1 }
 0x224   :  { %v5691_v43 = vpop.f32.mrf.mxu0 }
 0x225   :  { %v15587_v8 = vmax.f32 %v16850_v4, %v5756_v35  ;;  %v5754_v55 = vadd.f32 %v5691_v43, %v15519_v14  ;;  %v15590_v3 = vpop.f32.mrf.mxu1  ;;  %v16860_v4 = vld [vmem:[#allocation4_spill] sm:$0xff] }
 0x226   :  { %v12287_v30 = vpop.f32.mrf.mxu0 }
 0x227   :  { %v15595_v60 = vmax.f32 %v16851_v63, %v5754_v55  ;;  %v5757_v54 = vadd.f32 %v12287_v30, %v15530_v29  ;;  %v12319_v15 = vpop.f32.mrf.mxu1 }
 0x228   :  { %v5694_v10 = vpop.f32.mrf.mxu0 }
 0x229   :  { %v15601_v6 = vmax.f32 %v16852_v48, %v5757_v54  ;;  %v5755_v7 = vadd.f32 %v5694_v10, %v15541_v11  ;;  %v15604_v14 = vpop.f32.mrf.mxu1  ;;  %v16863_v54 = vld [vmem:[#allocation5_spill] sm:$0xff] }
 0x22a   :  { %v12290_v24 = vpop.f32.mrf.mxu0 }
 0x22b   :  { %v15609_v27 = vmax.f32 %v16853_v9, %v5755_v7  ;;  %v5760_v19 = vadd.f32 %v12290_v24, %v15552_v31  ;;  %v12322_v29 = vpop.f32.mrf.mxu1  ;;  %v16856_v31 = vmax.f32 %v14748_v28, %v15218_v0  ;;  %v16866_v24 = vld [vmem:[#allocation6_spill] sm:$0xff] }
 0x22c   :  { %v5707_v2 = vpop.f32.mrf.mxu0 }
 0x22d   :  { %v15615_v17 = vmax.f32 %v16854_v59, %v5760_v19  ;;  %v5758_v50 = vadd.f32 %v5707_v2, %v15562_v42  ;;  %v6029_v11 = vpop.f32.mrf.mxu1  ;;  %v16857_v42 = vmax.f32 %v14759_v46, %v15229_v38 }
 0x22e   :  { %v12291_v49 = vpop.f32.mrf.mxu0 }
 0x22f   :  { %v15621_v39 = vmax.f32 %v16855_v16, %v5758_v50  ;;  %v5761_v22 = vadd.f32 %v12291_v49, %v5487_v21  ;;  %v12323_v62 = vpop.f32.mrf.mxu1  ;;  %v16858_v21 = vmax.f32 %v14770_v51, %v15240_v47  ;;  %v16869_v49 = vld [vmem:[#allocation7_spill] sm:$0xff] }
 0x230   :  { %v5710_v18 = vpop.f32.mrf.mxu0 }
 0x231   :  { %v15626_v25 = vmax.f32 %v16856_v31, %v5761_v22  ;;  %v5759_v26 = vadd.f32 %v5710_v18, %v5485_v36  ;;  %v6032_v58 = vpop.f32.mrf.mxu1  ;;  %v16859_v36 = vmax.f32 %v14781_v56, %v15251_v44 }
 0x232   :  { %v12294_v13 = vpop.f32.mrf.mxu0 }
 0x233   :  { %v15631_v1 = vmax.f32 %v16857_v42, %v5759_v26  ;;  %v5764_v5 = vadd.f32 %v12294_v13, %v5490_v37  ;;  %v12326_v32 = vpop.f32.mrf.mxu1  ;;  %v16861_v37 = vld [vmem:[#allocation10_spill] sm:$0xff]  ;;  %v16872_v13 = vld [vmem:[#allocation8_spill] sm:$0xff] }
 0x234   :  { %v5723_v40 = vpop.f32.mrf.mxu0  ;;  %v16862_v55 = vmax.f32 %v16860_v4, %v16861_v37 }
 0x235   :  { %v15636_v33 = vmax.f32 %v16858_v21, %v5764_v5  ;;  %v5762_v34 = vadd.f32 %v5723_v40, %v5488_v23  ;;  %v6045_v28 = vpop.f32.mrf.mxu1  ;;  %v16864_v23 = vld [vmem:[#allocation11_spill] sm:$0xff] }
 0x236   :  { %v12295_v0 = vpop.f32.mrf.mxu0  ;;  %v16865_v10 = vmax.f32 %v16863_v54, %v16864_v23 }
 0x237   :  { %v15641_v35 = vmax.f32 %v16859_v36, %v5762_v34  ;;  %v5765_v43 = vadd.f32 %v12295_v0, %v5491_v41  ;;  %v12327_v46 = vpop.f32.mrf.mxu1  ;;  %v16867_v41 = vld [vmem:[#allocation12_spill] sm:$0xff]  ;;  %v16875_v0 = vld [vmem:[#allocation9_spill] sm:$0xff] }
 0x238   :  { %v5726_v38 = vpop.f32.mrf.mxu0  ;;  %v16868_v9 = vmax.f32 %v16866_v24, %v16867_v41 }
 0x239   :  { %v15646_v30 = vmax.f32 %v16862_v55, %v5765_v43  ;;  %v5763_v63 = vadd.f32 %v5726_v38, %v5489_v45  ;;  %v6048_v51 = vpop.f32.mrf.mxu1  ;;  %v16870_v45 = vld [vmem:[#allocation13_spill] sm:$0xff] }
 0x23a   :  { %v12298_v47 = vpop.f32.mrf.mxu0  ;;  %v16871_v16 = vmax.f32 %v16869_v49, %v16870_v45 }
 0x23b   :  { %v15651_v48 = vmax.f32 %v16865_v10, %v5763_v63  ;;  %v5768_v7 = vadd.f32 %v12298_v47, %v5494_v12  ;;  %v12330_v56 = vpop.f32.mrf.mxu1  ;;  %v16873_v12 = vld [vmem:[#allocation14_spill] sm:$0xff] }
 0x23c   :  { %v5739_v44 = vpop.f32.mrf.mxu0  ;;  %v16874_v42 = vmax.f32 %v16872_v13, %v16873_v12 }
 0x23d   :  { %v15656_v19 = vmax.f32 %v16868_v9, %v5768_v7  ;;  %v5766_v2 = vadd.f32 %v5739_v44, %v5492_v57  ;;  %v6061_v59 = vpop.f32.mrf.mxu1  ;;  %v16876_v57 = vld [vmem:[#allocation15_spill] sm:$0xff] }
 0x23e   :  { %v12299_v50 = vpop.f32.mrf.mxu0  ;;  %v16877_v36 = vmax.f32 %v16875_v0, %v16876_v57 }
 0x23f   :  { %v15661_v22 = vmax.f32 %v16871_v16, %v5766_v2  ;;  %v5769_v18 = vadd.f32 %v12299_v50, %v5495_v53  ;;  %v12331_v31 = vpop.f32.mrf.mxu1 }
 0x240   :  { %v5742_v26 = vpop.f32.mrf.mxu0 }
 0x241   :  { %v15666_v5 = vmax.f32 %v16874_v42, %v5769_v18  ;;  %v5767_v40 = vadd.f32 %v5742_v26, %v5493_v52  ;;  %v6064_v21 = vpop.f32.mrf.mxu1 }
 0x242   :  { %v12350_v34 = vpop.f32.mrf.mxu0 }
 0x243   :  { %v15671_v43 = vmax.f32 %v16877_v36, %v5767_v40  ;;  %v6336_v38 = vadd.f32 %v12350_v34, %v15582_v20  ;;  %v12382_v4 = vpop.f32.mrf.mxu1 }
 0x244   :  { %v15674_v37 = vpop.f32.mrf.mxu0 }
 0x245   :  { %v15676_v53 = vadd.f32 %v12382_v4, %v6336_v38  ;;  %v15678_v55 = vpop.f32.mrf.mxu1 }
 0x246   :  { %v12351_v63 = vpop.f32.mrf.mxu0 }
 0x247   :  { %v6337_v47 = vadd.f32 %v12351_v63, %v12319_v15  ;;  %v12383_v54 = vpop.f32.mrf.mxu1 }
 0x248   :  { %v15680_v52 = vpop.f32.mrf.mxu0 }
 0x249   :  { %v6611_v23 = vadd.f32 %v12383_v54, %v6337_v47  ;;  %v15682_v10 = vpop.f32.mrf.mxu1 }
 0x24a   :  { %v12354_v7 = vpop.f32.mrf.mxu0 }
 0x24b   :  { %v6340_v44 = vadd.f32 %v12354_v7, %v12322_v29  ;;  %v12386_v24 = vpop.f32.mrf.mxu1 }
 0x24c   :  { %v6287_v41 = vpop.f32.mrf.mxu0 }
 0x24d   :  { %v6614_v20 = vadd.f32 %v12386_v24, %v6340_v44  ;;  %v6338_v9 = vadd.f32 %v6287_v41, %v6029_v11  ;;  %v6561_v2 = vpop.f32.mrf.mxu1 }
 0x24e   :  { %v12355_v50 = vpop.f32.mrf.mxu0 }
 0x24f   :  { %v6612_v49 = vadd.f32 %v6561_v2, %v6338_v9  ;;  %v6341_v45 = vadd.f32 %v12355_v50, %v12323_v62  ;;  %v12387_v16 = vpop.f32.mrf.mxu1 }
 0x250   :  { %v6290_v18 = vpop.f32.mrf.mxu0 }
 0x251   :  { %v6615_v26 = vadd.f32 %v12387_v16, %v6341_v45  ;;  %v6339_v15 = vadd.f32 %v6290_v18, %v6032_v58  ;;  %v6564_v13 = vpop.f32.mrf.mxu1 }
 0x252   :  { %v12358_v12 = vpop.f32.mrf.mxu0 }
 0x253   :  { %v6613_v42 = vadd.f32 %v6564_v13, %v6339_v15  ;;  %v6344_v40 = vadd.f32 %v12358_v12, %v12326_v32  ;;  %v12390_v34 = vpop.f32.mrf.mxu1 }
 0x254   :  { %v6303_v0 = vpop.f32.mrf.mxu0 }
 0x255   :  { %v6618_v57 = vadd.f32 %v12390_v34, %v6344_v40  ;;  %v6342_v29 = vadd.f32 %v6303_v0, %v6045_v28  ;;  %v6577_v36 = vpop.f32.mrf.mxu1 }
 0x256   :  { %v12359_v38 = vpop.f32.mrf.mxu0 }
 0x257   :  { %v6616_v4 = vadd.f32 %v6577_v36, %v6342_v29  ;;  %v6345_v11 = vadd.f32 %v12359_v38, %v12327_v46  ;;  %v12391_v63 = vpop.f32.mrf.mxu1 }
 0x258   :  { %v6306_v47 = vpop.f32.mrf.mxu0 }
 0x259   :  { %v6619_v54 = vadd.f32 %v12391_v63, %v6345_v11  ;;  %v6343_v62 = vadd.f32 %v6306_v47, %v6048_v51  ;;  %v6580_v7 = vpop.f32.mrf.mxu1 }
 0x25a   :  { %v12362_v44 = vpop.f32.mrf.mxu0 }
 0x25b   :  { %v6617_v24 = vadd.f32 %v6580_v7, %v6343_v62  ;;  %v6348_v58 = vadd.f32 %v12362_v44, %v12330_v56  ;;  %v12394_v41 = vpop.f32.mrf.mxu1 }
 0x25c   :  { %v6319_v9 = vpop.f32.mrf.mxu0 }
 0x25d   :  { %v6622_v2 = vadd.f32 %v12394_v41, %v6348_v58  ;;  %v6346_v32 = vadd.f32 %v6319_v9, %v6061_v59  ;;  %v6593_v50 = vpop.f32.mrf.mxu1 }
 0x25e   :  { %v12363_v45 = vpop.f32.mrf.mxu0 }
 0x25f   :  { %v6620_v16 = vadd.f32 %v6593_v50, %v6346_v32  ;;  %v6349_v28 = vadd.f32 %v12363_v45, %v12331_v31  ;;  %v12395_v18 = vpop.f32.mrf.mxu1 }
 0x260   :  { %v6322_v15 = vpop.f32.mrf.mxu0 }
 0x261   :  { %v6623_v13 = vadd.f32 %v12395_v18, %v6349_v28  ;;  %v6347_v46 = vadd.f32 %v6322_v15, %v6064_v21  ;;  %v6596_v12 = vpop.f32.mrf.mxu1 }
 0x262   :  { %v12414_v40 = vpop.f32.mrf.mxu0 }
 0x263   :  { %v6621_v34 = vadd.f32 %v6596_v12, %v6347_v46  ;;  %v12446_v51 = vpop.f32.mrf.mxu1 }
 0x264   :  { %v6819_v0 = vpop.f32.mrf.mxu0 }
 0x265   :  { %v7093_v29 = vpop.f32.mrf.mxu1 }
 0x266   :  { %v12415_v36 = vpop.f32.mrf.mxu0 }
 0x267   :  { %v6885_v56 = vadd.f32 %v12415_v36, %v6611_v23  ;;  %v12447_v38 = vpop.f32.mrf.mxu1 }
 0x268   :  { %v6822_v11 = vpop.f32.mrf.mxu0 }
 0x269   :  { %v15684_v63 = vadd.f32 %v12447_v38, %v6885_v56  ;;  %v15686_v59 = vpop.f32.mrf.mxu1 }
 0x26a   :  { %v12418_v47 = vpop.f32.mrf.mxu0 }
 0x26b   :  { %v6888_v31 = vadd.f32 %v12418_v47, %v6614_v20  ;;  %v12450_v62 = vpop.f32.mrf.mxu1 }
 0x26c   :  { %v6835_v7 = vpop.f32.mrf.mxu0 }
 0x26d   :  { %v15688_v44 = vadd.f32 %v12450_v62, %v6888_v31  ;;  %v6886_v21 = vadd.f32 %v6835_v7, %v6612_v49  ;;  %v7109_v58 = vpop.f32.mrf.mxu1  ;;  %v6334_v7 = vadd.f32 %v15674_v37, %v15590_v3 }
 0x26e   :  { %v12419_v41 = vpop.f32.mrf.mxu0 }
 0x26f   :  { %v15690_v9 = vadd.f32 %v7109_v58, %v6886_v21  ;;  %v6889_v32 = vadd.f32 %v12419_v41, %v6615_v26  ;;  %v12451_v50 = vpop.f32.mrf.mxu1 }
 0x270   :  { %v6838_v23 = vpop.f32.mrf.mxu0 }
 0x271   :  { %v15692_v45 = vadd.f32 %v12451_v50, %v6889_v32  ;;  %v6887_v28 = vadd.f32 %v6838_v23, %v6613_v42  ;;  %v7112_v18 = vpop.f32.mrf.mxu1 }
 0x272   :  { %v12422_v15 = vpop.f32.mrf.mxu0 }
 0x273   :  { %v15694_v46 = vadd.f32 %v7112_v18, %v6887_v28  ;;  %v6892_v20 = vadd.f32 %v12422_v15, %v6618_v57  ;;  %v12454_v12 = vpop.f32.mrf.mxu1  ;;  %v6884_v18 = vadd.f32 %v12414_v40, %v15676_v53 }
 0x274   :  { %v6851_v36 = vpop.f32.mrf.mxu0 }
 0x275   :  { %v15696_v56 = vadd.f32 %v12454_v12, %v6892_v20  ;;  %v6890_v49 = vadd.f32 %v6851_v36, %v6616_v4  ;;  %v7125_v38 = vpop.f32.mrf.mxu1  ;;  %v6608_v4 = vadd.f32 %v15678_v55, %v6334_v7  ;;  %v7158_v55 = vadd.f32 %v12446_v51, %v6884_v18 }
 0x276   :  { %v12423_v47 = vpop.f32.mrf.mxu0 }
 0x277   :  { %v15698_v31 = vadd.f32 %v7125_v38, %v6890_v49  ;;  %v6893_v26 = vadd.f32 %v12423_v47, %v6619_v54  ;;  %v12455_v62 = vpop.f32.mrf.mxu1  ;;  %v6335_v54 = vadd.f32 %v15680_v52, %v15604_v14 }
 0x278   :  { %v6854_v42 = vpop.f32.mrf.mxu0 }
 0x279   :  { %v15702_v21 = vadd.f32 %v12455_v62, %v6893_v26  ;;  %v6891_v58 = vadd.f32 %v6854_v42, %v6617_v24  ;;  %v7128_v41 = vpop.f32.mrf.mxu1  ;;  %v6882_v24 = vadd.f32 %v6819_v0, %v6608_v4  ;;  %v6609_v38 = vadd.f32 %v15682_v10, %v6335_v54  ;;  %v15731_v54 = vld [vmem:[%s16821_s2] ss:$0 sm:$0xff] }
 0x27a   :  { %v12426_v57 = vpop.f32.mrf.mxu0 }
 0x27b   :  { %v15704_v32 = vadd.f32 %v7128_v41, %v6891_v58  ;;  %v6896_v50 = vadd.f32 %v12426_v57, %v6622_v2  ;;  %v12458_v23 = vpop.f32.mrf.mxu1  ;;  %v7156_v53 = vadd.f32 %v7093_v29, %v6882_v24  ;;  %v6883_v40 = vadd.f32 %v6822_v11, %v6609_v38 }
 0x27c   :  { %v6867_v28 = vpop.f32.mrf.mxu0 }
 0x27d   :  { %v15710_v15 = vadd.f32 %v12458_v23, %v6896_v50  ;;  %v6894_v3 = vadd.f32 %v6867_v28, %v6620_v16  ;;  %v7141_v37 = vpop.f32.mrf.mxu1  ;;  %v7157_v10 = vadd.f32 %v15686_v59, %v6883_v40 }
 0x27e   :  { %v12427_v20 = vpop.f32.mrf.mxu0 }
 0x27f   :  { %v15712_v12 = vadd.f32 %v7141_v37, %v6894_v3  ;;  %v6897_v36 = vadd.f32 %v12427_v20, %v6623_v13  ;;  %v12459_v49 = vpop.f32.mrf.mxu1 }
 0x280   :  { %v6870_v2 = vpop.f32.mrf.mxu0 }
 0x281   :  { %v15715_v47 = vadd.f32 %v12459_v49, %v6897_v36  ;;  %v6895_v26 = vadd.f32 %v6870_v2, %v6621_v34  ;;  %v7144_v14 = vpop.f32.mrf.mxu1 }
 0x282   :  { %v12478_v52 = vpop.f32.mrf.mxu0 }
 0x283   :  { %v15717_v62 = vadd.f32 %v7144_v14, %v6895_v26  ;;  %v7432_v16 = vadd.f32 %v12478_v52, %v7158_v55  ;;  %v12510_v7 = vpop.f32.mrf.mxu1  ;;  %v10680_v55 = vld [vmem:[%s16820_s3 + $0x170] sm:$0xff] }
 0x284   :  { %v7367_v0 = vpop.f32.mrf.mxu0 }
 0x285   :  { %v15719_v42 = vadd.f32 %v12510_v7, %v7432_v16  ;;  %v7430_v13 = vadd.f32 %v7367_v0, %v7156_v53  ;;  %v7641_v58 = vpop.f32.mrf.mxu1  ;;  %v10679_v53 = vld [vmem:[%s16820_s3 + $0x168] sm:$0xff]  ;;  %v10697_v16 = vld [vmem:[%s16820_s3 + $0x1f8] sm:$0xff] }
 0x286   :  { %v12479_v41 = vpop.f32.mrf.mxu0 }
 0x287   :  { %v7770_v51 = vmax.f32 %v15587_v8, %v15719_v42  ;;  %v7704_v34 = vadd.f32 %v7641_v58, %v7430_v13  ;;  %v7433_v57 = vadd.f32 %v12479_v41, %v15684_v63  ;;  %v12511_v29 = vpop.f32.mrf.mxu1  ;;  %v10678_v41 = vld [vmem:[%s16820_s3 + $0x160] sm:$0xff]  ;;  %v10712_v42 = vld [vmem:[%s16820_s3 + $0x270] sm:$0xff] }
 0x288   :  { %v7370_v11 = vpop.f32.mrf.mxu0  ;;  %v10682_v8 = vld [vmem:[%s16820_s3 + $0x180] sm:$0xff] }
 0x289   :  { %v7768_v50 = vmax.f32 %v15595_v60, %v7704_v34  ;;  %v15726_v23 = vadd.f32 %v12511_v29, %v7433_v57  ;;  %v7431_v4 = vadd.f32 %v7370_v11, %v7157_v10  ;;  %v7644_v28 = vpop.f32.mrf.mxu1  ;;  %v10681_v60 = vld [vmem:[%s16820_s3 + $0x178] sm:$0xff]  ;;  %v10696_v10 = vld [vmem:[%s16820_s3 + $0x1f0] sm:$0xff] }
 0x28a   :  { %v12482_v59 = vpop.f32.mrf.mxu0 }
 0x28b   :  { %v7823_v18 = vadd.f32 %v15731_v54, %v7768_v50  ;;  %v7771_v3 = vmax.f32 %v15601_v6, %v15726_v23  ;;  %v7705_v63 = vadd.f32 %v7644_v28, %v7431_v4  ;;  %v7436_v37 = vadd.f32 %v12482_v59, %v15688_v44  ;;  %v12514_v20 = vpop.f32.mrf.mxu1  ;;  %v10677_v50 = vld [vmem:[%s16820_s3 + $0x158] sm:$0xff]  ;;  %v10695_v4 = vld [vmem:[%s16820_s3 + $0x1e8] sm:$0xff]  ;;  %v10710_v6 = vld [vmem:[%s16820_s3 + $0x260] sm:$0xff] }
 0x28c   :  { %v7383_v24 = vpop.f32.mrf.mxu0  ;;  %v10728_v23 = vld [vmem:[%s16820_s3 + $0x2f0] sm:$0xff] }
 0x28d   :  { %v7769_v36 = vmax.f32 %v15609_v27, %v7705_v63  ;;  %v7434_v49 = vadd.f32 %v7383_v24, %v15690_v9  ;;  %v7710_v2 = vadd.f32 %v12514_v20, %v7436_v37  ;;  %12557 = vmatmul.mubr.f32.vlgmr.msra.gmra.mxu0 %v7823_v18  ;;  %v7657_v38 = vpop.f32.mrf.mxu1  ;;  %v10676_v37 = vld [vmem:[%s16820_s3 + $0x150] sm:$0xff]  ;;  %v10694_v20 = vld [vmem:[%s16820_s3 + $0x1e0] sm:$0xff] }
 0x28e   :  { %12595 = vmatpush3.msra.mxu0 %v10681_v60  ;;  %v12483_v26 = vpop.f32.mrf.mxu0  ;;  %12626 = vmatprep.mubr.msk.f32.mxu0 %vm13570_vm0, %v13569_v61 }
 0x28f   :  { %v7824_v44 = vadd.f32 %v15731_v54, %v7769_v36  ;;  %v7774_v14 = vmax.f32 %v15615_v17, %v7710_v2  ;;  %v7437_v27 = vadd.f32 %v12483_v26, %v15692_v45  ;;  %v7708_v52 = vadd.f32 %v7657_v38, %v7434_v49  ;;  %12596 = vmatprep.subr.mxu0 %v13569_v61  ;;  %v12515_v9 = vpop.f32.mrf.mxu1  ;;  %v10675_v2 = vld [vmem:[%s16820_s3 + $0x148] sm:$0xff]  ;;  %v10693_v38 = vld [vmem:[%s16820_s3 + $0x1d8] sm:$0xff] }
 0x290   :  { %12597 = vmatpush3.msra.mxu0 %v10680_v55  ;;  %v7386_v40 = vpop.f32.mrf.mxu0 }
 0x291   :  { %v15758_v7 = vadd.f32 %v15731_v54, %v7774_v14  ;;  %v7772_v17 = vmax.f32 %v15621_v39, %v7708_v52  ;;  %v7435_v45 = vadd.f32 %v7386_v40, %v15694_v46  ;;  %v7711_v0 = vadd.f32 %v12515_v9, %v7437_v27  ;;  %12598 = vmatprep.subr.mxu0 %v13569_v61  ;;  %v7660_v13 = vpop.f32.mrf.mxu1  ;;  %v10674_v27 = vld [vmem:[%s16820_s3 + $0x140] sm:$0xff] }
 0x292   :  { %12592 = vmatmul.mubr.f32.vlgmr.msra.gmra.mxu1 %v7824_v44  ;;  %12599 = vmatpush3.msra.mxu0 %v10679_v53  ;;  %v12486_v58 = vpop.f32.mrf.mxu0 }
 0x293   :  { %v15770_v34 = vadd.f32 %v15731_v54, %v7772_v17  ;;  %v7775_v39 = vmax.f32 %v15626_v25, %v7711_v0  ;;  %12630 = vmatpush3.msra.mxu1 %v10697_v16  ;;  %v7440_v46 = vadd.f32 %v12486_v58, %v15696_v56  ;;  %v7709_v57 = vadd.f32 %v7660_v13, %v7435_v45  ;;  %v12518_v29 = vpop.f32.mrf.mxu1  ;;  %v10673_v17 = vld [vmem:[%s16820_s3 + $0x138] sm:$0xff]  ;;  %v10691_v45 = vld [vmem:[%s16820_s3 + $0x1c8] sm:$0xff] }
 0x294   :  { %12600 = vmatprep.subr.mxu0 %v13569_v61  ;;  %12631 = vmatprep.subr.mxu1 %v13569_v61  ;;  %v7399_v11 = vpop.f32.mrf.mxu0 }
 0x295   :  { %v15783_v25 = vadd.f32 %v15731_v54, %v7775_v39  ;;  %v7773_v56 = vmax.f32 %v15631_v1, %v7709_v57  ;;  %12601 = vmatpush3.msra.mxu0 %v10678_v41  ;;  %12632 = vmatpush3.msra.mxu1 %v10696_v10  ;;  %v7438_v28 = vadd.f32 %v7399_v11, %v15698_v31  ;;  %v7673_v59 = vpop.f32.mrf.mxu1  ;;  %v10672_v10 = vld [vmem:[%s16820_s3 + $0x130] sm:$0xff]  ;;  %v10690_v39 = vld [vmem:[%s16820_s3 + $0x1c0] sm:$0xff] }
 0x296   :  { %v7714_v18 = vadd.f32 %v12518_v29, %v7440_v46  ;;  %12602 = vmatprep.subr.mxu0 %v13569_v61  ;;  %12633 = vmatprep.subr.mxu1 %v13569_v61  ;;  %v12487_v63 = vpop.f32.mrf.mxu0 }
 0x297   :  { %v15796_v1 = vadd.f32 %v15731_v54, %v7773_v56  ;;  %12603 = vmatpush3.msra.mxu0 %v10677_v50  ;;  %12634 = vmatpush3.msra.mxu1 %v10695_v4  ;;  %v7441_v31 = vadd.f32 %v12487_v63, %v15702_v21  ;;  %v7712_v60 = vadd.f32 %v7673_v59, %v7438_v28  ;;  %v12519_v24 = vpop.f32.mrf.mxu1  ;;  %v10671_v50 = vld [vmem:[%s16820_s3 + $0x128] sm:$0xff]  ;;  %v10688_v63 = vld [vmem:[%s16820_s3 + $0x1b0] sm:$0xff] }
 0x298   :  { %v7778_v36 = vmax.f32 %v15636_v33, %v7714_v18  ;;  %12604 = vmatprep.subr.mxu0 %v13569_v61  ;;  %12635 = vmatprep.subr.mxu1 %v13569_v61  ;;  %v7402_v49 = vpop.f32.mrf.mxu0  ;;  %v10670_v18 = vld [vmem:[%s16820_s3 + $0x120] sm:$0xff] }
 0x299   :  { %v7776_v55 = vmax.f32 %v15641_v35, %v7712_v60  ;;  %12605 = vmatpush3.msra.mxu0 %v10676_v37  ;;  %12636 = vmatpush3.msra.mxu1 %v10694_v20  ;;  %v7439_v21 = vadd.f32 %v7402_v49, %v15704_v32  ;;  %v7715_v33 = vadd.f32 %v12519_v24, %v7441_v31  ;;  %v7676_v26 = vpop.f32.mrf.mxu1  ;;  %v10692_v35 = vld [vmem:[%s16820_s3 + $0x1d0] sm:$0xff]  ;;  %v10669_v20 = vld [vmem:[%s16820_s3 + $0x118] sm:$0xff]  ;;  %v10687_v31 = vld [vmem:[%s16820_s3 + $0x1a8] sm:$0xff] }
 0x29a   :  { %v15811_v44 = vadd.f32 %v15731_v54, %v7778_v36  ;;  %12606 = vmatprep.subr.mxu0 %v13569_v61  ;;  %12637 = vmatprep.subr.mxu1 %v13569_v61  ;;  %v12490_v14 = vpop.f32.mrf.mxu0  ;;  %v10686_v36 = vld [vmem:[%s16820_s3 + $0x1a0] sm:$0xff] }
 0x29b   :  { %v15822_v32 = vadd.f32 %v15731_v54, %v7776_v55  ;;  %v7779_v52 = vmax.f32 %v15646_v30, %v7715_v33  ;;  %12607 = vmatpush3.msra.mxu0 %v10675_v2  ;;  %12638 = vmatpush3.msra.mxu1 %v10693_v38  ;;  %v7444_v9 = vadd.f32 %v12490_v14, %v15710_v15  ;;  %v12522_v53 = vpop.f32.mrf.mxu1  ;;  %v10685_v2 = vld [vmem:[%s16820_s3 + $0x198] sm:$0xff]  ;;  %v10666_v38 = vld [vmem:[%s16820_s3 + $0x100] sm:$0xff]  ;;  %v10684_v55 = vld [vmem:[%s16820_s3 + $0x190] sm:$0xff] }
 0x29c   :  { %v7713_v40 = vadd.f32 %v7676_v26, %v7439_v21  ;;  %12608 = vmatprep.subr.mxu0 %v13569_v61  ;;  %12639 = vmatprep.subr.mxu1 %v13569_v61  ;;  %v7415_v16 = vpop.f32.mrf.mxu0  ;;  %v7825_v21 = vadd.f32 %v15731_v54, %v7770_v51  ;;  %v10683_v33 = vld [vmem:[%s16820_s3 + $0x188] sm:$0xff]  ;;  %v10713_v26 = vld [vmem:[%s16820_s3 + $0x278] sm:$0xff]  ;;  %v7826_v51 = vadd.f32 %v15731_v54, %v7771_v3 }
 0x29d   :  { %v15835_v30 = vadd.f32 %v15731_v54, %v7779_v52  ;;  %12609 = vmatpush3.msra.mxu0 %v10674_v27  ;;  %12640 = vmatpush3.msra.mxu1 %v10692_v35  ;;  %v7442_v15 = vadd.f32 %v7415_v16, %v15712_v12  ;;  %v7718_v0 = vadd.f32 %v12522_v53, %v7444_v9  ;;  %v7689_v13 = vpop.f32.mrf.mxu1  ;;  %v10711_v14 = vld [vmem:[%s16820_s3 + $0x268] sm:$0xff]  ;;  %v10729_v27 = vld [vmem:[%s16820_s3 + $0x2f8] sm:$0xff]  ;;  %v10708_v35 = vld [vmem:[%s16820_s3 + $0x250] sm:$0xff] }
 0x29e   :  { %v7777_v58 = vmax.f32 %v15651_v48, %v7713_v40  ;;  %12610 = vmatprep.subr.mxu0 %v13569_v61  ;;  %12641 = vmatprep.subr.mxu1 %v13569_v61  ;;  %v12491_v41 = vpop.f32.mrf.mxu0  ;;  %v10727_v3 = vld [vmem:[%s16820_s3 + $0x2e8] sm:$0xff]  ;;  %v10726_v52 = vld [vmem:[%s16820_s3 + $0x2e0] sm:$0xff]  ;;  %v10725_v53 = vld [vmem:[%s16820_s3 + $0x2d8] sm:$0xff] }
 0x29f   :  { %v7782_v46 = vmax.f32 %v15656_v19, %v7718_v0  ;;  %12611 = vmatpush3.msra.mxu0 %v10673_v17  ;;  %12642 = vmatpush3.msra.mxu1 %v10691_v45  ;;  %v7445_v12 = vadd.f32 %v12491_v41, %v15715_v47  ;;  %v7716_v48 = vadd.f32 %v7689_v13, %v7442_v15  ;;  %v12523_v57 = vpop.f32.mrf.mxu1  ;;  %v10689_v19 = vld [vmem:[%s16820_s3 + $0x1b8] sm:$0xff]  ;;  %v10707_v9 = vld [vmem:[%s16820_s3 + $0x248] sm:$0xff]  ;;  %v10706_v40 = vld [vmem:[%s16820_s3 + $0x240] sm:$0xff] }
 0x2a0   :  { %v15850_v29 = vadd.f32 %v15731_v54, %v7777_v58  ;;  %12612 = vmatprep.subr.mxu0 %v13569_v61  ;;  %12643 = vmatprep.subr.mxu1 %v13569_v61  ;;  %v7418_v11 = vpop.f32.mrf.mxu0  ;;  %v10724_v16 = vld [vmem:[%s16820_s3 + $0x2d0] sm:$0xff]  ;;  %v10705_v17 = vld [vmem:[%s16820_s3 + $0x238] sm:$0xff]  ;;  %v10723_v45 = vld [vmem:[%s16820_s3 + $0x2c8] sm:$0xff] }
 0x2a1   :  { %v15861_v47 = vadd.f32 %v15731_v54, %v7782_v46  ;;  %v7780_v4 = vmax.f32 %v15661_v22, %v7716_v48  ;;  %12613 = vmatpush3.msra.mxu0 %v10672_v10  ;;  %12644 = vmatpush3.msra.mxu1 %v10690_v39  ;;  %v7443_v56 = vadd.f32 %v7418_v11, %v15717_v62  ;;  %v7692_v28 = vpop.f32.mrf.mxu1  ;;  %v10704_v15 = vld [vmem:[%s16820_s3 + $0x230] sm:$0xff]  ;;  %v10722_v0 = vld [vmem:[%s16820_s3 + $0x2c0] sm:$0xff]  ;;  %v10703_v13 = vld [vmem:[%s16820_s3 + $0x228] sm:$0xff] }
 0x2a2   :  { %v7719_v59 = vadd.f32 %v12523_v57, %v7445_v12  ;;  %12614 = vmatprep.subr.mxu0 %v13569_v61  ;;  %12645 = vmatprep.subr.mxu1 %v13569_v61  ;;  %v10721_v58 = vld [vmem:[%s16820_s3 + $0x2b8] sm:$0xff]  ;;  %v10702_v41 = vld [vmem:[%s16820_s3 + $0x220] sm:$0xff]  ;;  %v10720_v10 = vld [vmem:[%s16820_s3 + $0x2b0] sm:$0xff] }
 0x2a3   :  { %v15874_v22 = vadd.f32 %v15731_v54, %v7780_v4  ;;  %12615 = vmatpush3.msra.mxu0 %v10671_v50  ;;  %12646 = vmatpush3.msra.mxu1 %v10689_v19  ;;  %v7717_v62 = vadd.f32 %v7692_v28, %v7443_v56  ;;  %v10701_v39 = vld [vmem:[%s16820_s3 + $0x218] sm:$0xff]  ;;  %v10719_v46 = vld [vmem:[%s16820_s3 + $0x2a8] sm:$0xff]  ;;  %v10700_v12 = vld [vmem:[%s16820_s3 + $0x210] sm:$0xff] }
 0x2a4   :  { %v7783_v37 = vmax.f32 %v15666_v5, %v7719_v59  ;;  %12616 = vmatprep.subr.mxu0 %v13569_v61  ;;  %12647 = vmatprep.subr.mxu1 %v13569_v61  ;;  %v10668_v5 = vld [vmem:[%s16820_s3 + $0x110] sm:$0xff]  ;;  %v10718_v48 = vld [vmem:[%s16820_s3 + $0x2a0] sm:$0xff]  ;;  %v10699_v57 = vld [vmem:[%s16820_s3 + $0x208] sm:$0xff] }
 0x2a5   :  { %v7781_v60 = vmax.f32 %v15671_v43, %v7717_v62  ;;  %12617 = vmatpush3.msra.mxu0 %v10670_v18  ;;  %12648 = vmatpush3.msra.mxu1 %v10688_v63  ;;  %v10667_v43 = vld [vmem:[%s16820_s3 + $0x108] sm:$0xff]  ;;  %v10717_v11 = vld [vmem:[%s16820_s3 + $0x298] sm:$0xff]  ;;  %v10698_v50 = vld [vmem:[%s16820_s3 + $0x200] sm:$0xff] }
 0x2a6   :  { %v15887_v24 = vadd.f32 %v15731_v54, %v7783_v37  ;;  %12618 = vmatprep.subr.mxu0 %v13569_v61  ;;  %12649 = vmatprep.subr.mxu1 %v13569_v61  ;;  %v10716_v19 = vld [vmem:[%s16820_s3 + $0x290] sm:$0xff]  ;;  %v10715_v4 = vld [vmem:[%s16820_s3 + $0x288] sm:$0xff]  ;;  %v10745_v56 = vld [vmem:[%s16820_s3 + $0x378] sm:$0xff] }
 0x2a7   :  { %v15898_v49 = vadd.f32 %v15731_v54, %v7781_v60  ;;  %12619 = vmatpush3.msra.mxu0 %v10669_v20  ;;  %12650 = vmatpush3.msra.mxu1 %v10687_v31  ;;  %v10709_v54 = vld [vmem:[%s16820_s3 + $0x258] sm:$0xff]  ;;  %v10714_v28 = vld [vmem:[%s16820_s3 + $0x280] sm:$0xff]  ;;  %v10744_v59 = vld [vmem:[%s16820_s3 + $0x370] sm:$0xff] }
 0x2a8   :  { %12620 = vmatprep.subr.mxu0 %v13569_v61  ;;  %12651 = vmatprep.subr.mxu1 %v13569_v61  ;;  %v10761_v18 = vld [vmem:[%s16820_s3 + $0x3f8] sm:$0xff]  ;;  %v10742_v63 = vld [vmem:[%s16820_s3 + $0x360] sm:$0xff]  ;;  %v10760_v62 = vld [vmem:[%s16820_s3 + $0x3f0] sm:$0xff] }
 0x2a9   :  { %12621 = vmatpush3.msra.mxu0 %v10668_v5  ;;  %12652 = vmatpush3.msra.mxu1 %v10686_v36  ;;  %v10759_v37 = vld [vmem:[%s16820_s3 + $0x3e8] sm:$0xff]  ;;  %v10740_v20 = vld [vmem:[%s16820_s3 + $0x350] sm:$0xff]  ;;  %v10758_v31 = vld [vmem:[%s16820_s3 + $0x3e0] sm:$0xff] }
 0x2aa   :  { %12622 = vmatprep.subr.mxu0 %v13569_v61  ;;  %12653 = vmatprep.subr.mxu1 %v13569_v61  ;;  %v10739_v60 = vld [vmem:[%s16820_s3 + $0x348] sm:$0xff]  ;;  %v10757_v5 = vld [vmem:[%s16820_s3 + $0x3d8] sm:$0xff]  ;;  %v10738_v36 = vld [vmem:[%s16820_s3 + $0x340] sm:$0xff] }
 0x2ab   :  { %12623 = vmatpush3.msra.mxu0 %v10667_v43  ;;  %12654 = vmatpush3.msra.mxu1 %v10685_v2  ;;  %v10756_v43 = vld [vmem:[%s16820_s3 + $0x3d0] sm:$0xff]  ;;  %v10737_v2 = vld [vmem:[%s16820_s3 + $0x338] sm:$0xff] }
 0x2ac   :  { %12624 = vmatprep.subr.mxu0 %v13569_v61  ;;  %12655 = vmatprep.subr.mxu1 %v13569_v61 }
 0x2ad   :  { %12625 = vmatpush3.msra.mxu0 %v10666_v38  ;;  %12656 = vmatpush3.msra.mxu1 %v10684_v55  ;;  %v10755_v38 = vld [vmem:[%s16820_s3 + $0x3c8] sm:$0xff]  ;;  %v10736_v55 = vld [vmem:[%s16820_s3 + $0x330] sm:$0xff] }
 0x2ae   :  { %12627 = vmatmul.mubr.f32.vlgmr.msra.gmra.mxu0 %v7825_v21  ;;  %12657 = vmatprep.subr.mxu1 %v13569_v61  ;;  %v10754_v21 = vld [vmem:[%s16820_s3 + $0x3c0] sm:$0xff] }
 0x2af   :  { %12664 = vmatprep.subr.mxu0 %v13569_v61  ;;  %12658 = vmatpush3.msra.mxu1 %v10683_v33  ;;  %v10735_v33 = vld [vmem:[%s16820_s3 + $0x328] sm:$0xff] }
 0x2b0   :  { %12665 = vmatpush3.msra.mxu0 %v10713_v26  ;;  %12659 = vmatprep.subr.mxu1 %v13569_v61  ;;  %v10753_v26 = vld [vmem:[%s16820_s3 + $0x3b8] sm:$0xff] }
 0x2b1   :  { %12666 = vmatprep.subr.mxu0 %v13569_v61  ;;  %12660 = vmatpush3.msra.mxu1 %v10682_v8  ;;  %v10734_v8 = vld [vmem:[%s16820_s3 + $0x320] sm:$0xff] }
 0x2b2   :  { %12661 = vmatprep.mubr.msk.f32.mxu1 %vm13570_vm0, %v13569_v61  ;;  %12667 = vmatpush3.msra.mxu0 %v10712_v42  ;;  %v10752_v42 = vld [vmem:[%s16820_s3 + $0x3b0] sm:$0xff] }
 0x2b3   :  { %12662 = vmatmul.mubr.f32.vlgmr.msra.gmra.mxu1 %v7826_v51  ;;  %12668 = vmatprep.subr.mxu0 %v13569_v61  ;;  %v10733_v51 = vld [vmem:[%s16820_s3 + $0x318] sm:$0xff] }
 0x2b4   :  { %12699 = vmatprep.subr.mxu1 %v13569_v61  ;;  %12669 = vmatpush3.msra.mxu0 %v10711_v14  ;;  %v10751_v14 = vld [vmem:[%s16820_s3 + $0x3a8] sm:$0xff] }
 0x2b5   :  { %12700 = vmatpush3.msra.mxu1 %v10729_v27  ;;  %12670 = vmatprep.subr.mxu0 %v13569_v61  ;;  %v10732_v27 = vld [vmem:[%s16820_s3 + $0x310] sm:$0xff] }
 0x2b6   :  { %12701 = vmatprep.subr.mxu1 %v13569_v61  ;;  %12671 = vmatpush3.msra.mxu0 %v10710_v6  ;;  %v10750_v6 = vld [vmem:[%s16820_s3 + $0x3a0] sm:$0xff] }
 0x2b7   :  { %12702 = vmatpush3.msra.mxu1 %v10728_v23  ;;  %12672 = vmatprep.subr.mxu0 %v13569_v61  ;;  %v10731_v23 = vld [vmem:[%s16820_s3 + $0x308] sm:$0xff] }
 0x2b8   :  { %12703 = vmatprep.subr.mxu1 %v13569_v61  ;;  %12673 = vmatpush3.msra.mxu0 %v10709_v54  ;;  %v10749_v54 = vld [vmem:[%s16820_s3 + $0x398] sm:$0xff] }
 0x2b9   :  { %12704 = vmatpush3.msra.mxu1 %v10727_v3  ;;  %12674 = vmatprep.subr.mxu0 %v13569_v61  ;;  %v10730_v3 = vld [vmem:[%s16820_s3 + $0x300] sm:$0xff] }
 0x2ba   :  { %12705 = vmatprep.subr.mxu1 %v13569_v61  ;;  %12675 = vmatpush3.msra.mxu0 %v10708_v35  ;;  %v10748_v35 = vld [vmem:[%s16820_s3 + $0x390] sm:$0xff] }
 0x2bb   :  { %12706 = vmatpush3.msra.mxu1 %v10726_v52  ;;  %12676 = vmatprep.subr.mxu0 %v13569_v61  ;;  %v10747_v52 = vld [vmem:[%s16820_s3 + $0x388] sm:$0xff] }
 0x2bc   :  { %12707 = vmatprep.subr.mxu1 %v13569_v61  ;;  %12677 = vmatpush3.msra.mxu0 %v10707_v9  ;;  %v10777_v9 = vld [vmem:[%s16820_s3 + $0x478] sm:$0xff] }
 0x2bd   :  { %12708 = vmatpush3.msra.mxu1 %v10725_v53  ;;  %12678 = vmatprep.subr.mxu0 %v13569_v61  ;;  %v10746_v53 = vld [vmem:[%s16820_s3 + $0x380] sm:$0xff] }
 0x2be   :  { %12709 = vmatprep.subr.mxu1 %v13569_v61  ;;  %12679 = vmatpush3.msra.mxu0 %v10706_v40  ;;  %v10776_v40 = vld [vmem:[%s16820_s3 + $0x470] sm:$0xff] }
 0x2bf   :  { %12710 = vmatpush3.msra.mxu1 %v10724_v16  ;;  %12680 = vmatprep.subr.mxu0 %v13569_v61  ;;  %v10793_v16 = vld [vmem:[%s16820_s3 + $0x4f8] sm:$0xff] }
 0x2c0   :  { %12711 = vmatprep.subr.mxu1 %v13569_v61  ;;  %12681 = vmatpush3.msra.mxu0 %v10705_v17  ;;  %v10774_v17 = vld [vmem:[%s16820_s3 + $0x460] sm:$0xff] }
 0x2c1   :  { %12712 = vmatpush3.msra.mxu1 %v10723_v45  ;;  %12682 = vmatprep.subr.mxu0 %v13569_v61  ;;  %v10792_v45 = vld [vmem:[%s16820_s3 + $0x4f0] sm:$0xff] }
 0x2c2   :  { %12713 = vmatprep.subr.mxu1 %v13569_v61  ;;  %12683 = vmatpush3.msra.mxu0 %v10704_v15  ;;  %v10791_v15 = vld [vmem:[%s16820_s3 + $0x4e8] sm:$0xff] }
 0x2c3   :  { %12714 = vmatpush3.msra.mxu1 %v10722_v0  ;;  %12684 = vmatprep.subr.mxu0 %v13569_v61  ;;  %v10772_v0 = vld [vmem:[%s16820_s3 + $0x450] sm:$0xff] }
 0x2c4   :  { %12715 = vmatprep.subr.mxu1 %v13569_v61  ;;  %12685 = vmatpush3.msra.mxu0 %v10703_v13  ;;  %v10790_v13 = vld [vmem:[%s16820_s3 + $0x4e0] sm:$0xff] }
 0x2c5   :  { %12716 = vmatpush3.msra.mxu1 %v10721_v58  ;;  %12686 = vmatprep.subr.mxu0 %v13569_v61  ;;  %v10771_v58 = vld [vmem:[%s16820_s3 + $0x448] sm:$0xff] }
 0x2c6   :  { %12717 = vmatprep.subr.mxu1 %v13569_v61  ;;  %12687 = vmatpush3.msra.mxu0 %v10702_v41  ;;  %v10789_v41 = vld [vmem:[%s16820_s3 + $0x4d8] sm:$0xff] }
 0x2c7   :  { %12718 = vmatpush3.msra.mxu1 %v10720_v10  ;;  %12688 = vmatprep.subr.mxu0 %v13569_v61  ;;  %v10770_v10 = vld [vmem:[%s16820_s3 + $0x440] sm:$0xff] }
 0x2c8   :  { %12719 = vmatprep.subr.mxu1 %v13569_v61  ;;  %12689 = vmatpush3.msra.mxu0 %v10701_v39  ;;  %v10788_v39 = vld [vmem:[%s16820_s3 + $0x4d0] sm:$0xff] }
 0x2c9   :  { %12720 = vmatpush3.msra.mxu1 %v10719_v46  ;;  %12690 = vmatprep.subr.mxu0 %v13569_v61  ;;  %v10769_v46 = vld [vmem:[%s16820_s3 + $0x438] sm:$0xff] }
 0x2ca   :  { %12721 = vmatprep.subr.mxu1 %v13569_v61  ;;  %12691 = vmatpush3.msra.mxu0 %v10700_v12  ;;  %v10787_v12 = vld [vmem:[%s16820_s3 + $0x4c8] sm:$0xff] }
 0x2cb   :  { %12722 = vmatpush3.msra.mxu1 %v10718_v48  ;;  %12692 = vmatprep.subr.mxu0 %v13569_v61  ;;  %v10768_v48 = vld [vmem:[%s16820_s3 + $0x430] sm:$0xff] }
 0x2cc   :  { %12723 = vmatprep.subr.mxu1 %v13569_v61  ;;  %12693 = vmatpush3.msra.mxu0 %v10699_v57  ;;  %v10786_v57 = vld [vmem:[%s16820_s3 + $0x4c0] sm:$0xff] }
 0x2cd   :  { %12724 = vmatpush3.msra.mxu1 %v10717_v11  ;;  %12694 = vmatprep.subr.mxu0 %v13569_v61  ;;  %v10767_v11 = vld [vmem:[%s16820_s3 + $0x428] sm:$0xff] }
 0x2ce   :  { %12725 = vmatprep.subr.mxu1 %v13569_v61  ;;  %12695 = vmatpush3.msra.mxu0 %v10698_v50  ;;  %v10785_v50 = vld [vmem:[%s16820_s3 + $0x4b8] sm:$0xff] }
 0x2cf   :  { %12696 = vmatprep.mubr.msk.f32.mxu0 %vm13570_vm0, %v13569_v61  ;;  %12726 = vmatpush3.msra.mxu1 %v10716_v19  ;;  %v10766_v19 = vld [vmem:[%s16820_s3 + $0x420] sm:$0xff] }
 0x2d0   :  { %12697 = vmatmul.mubr.f32.vlgmr.msra.gmra.mxu0 %v15770_v34  ;;  %12727 = vmatprep.subr.mxu1 %v13569_v61  ;;  %v10743_v34 = vld [vmem:[%s16820_s3 + $0x368] sm:$0xff] }
 0x2d1   :  { %12734 = vmatprep.subr.mxu0 %v13569_v61  ;;  %12728 = vmatpush3.msra.mxu1 %v10715_v4  ;;  %v10784_v4 = vld [vmem:[%s16820_s3 + $0x4b0] sm:$0xff] }
 0x2d2   :  { %12735 = vmatpush3.msra.mxu0 %v10745_v56  ;;  %12729 = vmatprep.subr.mxu1 %v13569_v61  ;;  %v10765_v56 = vld [vmem:[%s16820_s3 + $0x418] sm:$0xff] }
 0x2d3   :  { %12736 = vmatprep.subr.mxu0 %v13569_v61  ;;  %12730 = vmatpush3.msra.mxu1 %v10714_v28  ;;  %v10783_v28 = vld [vmem:[%s16820_s3 + $0x4a8] sm:$0xff] }
 0x2d4   :  { %12731 = vmatprep.mubr.msk.f32.mxu1 %vm13570_vm0, %v13569_v61  ;;  %12737 = vmatpush3.msra.mxu0 %v10744_v59  ;;  %v10764_v59 = vld [vmem:[%s16820_s3 + $0x410] sm:$0xff] }
 0x2d5   :  { %12732 = vmatmul.mubr.f32.vlgmr.msra.gmra.mxu1 %v15796_v1  ;;  %12738 = vmatprep.subr.mxu0 %v13569_v61  ;;  %v10741_v1 = vld [vmem:[%s16820_s3 + $0x358] sm:$0xff] }
 0x2d6   :  { %12769 = vmatprep.subr.mxu1 %v13569_v61  ;;  %12739 = vmatpush3.msra.mxu0 %v10743_v34  ;;  %v10782_v34 = vld [vmem:[%s16820_s3 + $0x4a0] sm:$0xff] }
 0x2d7   :  { %12770 = vmatpush3.msra.mxu1 %v10761_v18  ;;  %12740 = vmatprep.subr.mxu0 %v13569_v61  ;;  %v10763_v18 = vld [vmem:[%s16820_s3 + $0x408] sm:$0xff] }
 0x2d8   :  { %12771 = vmatprep.subr.mxu1 %v13569_v61  ;;  %12741 = vmatpush3.msra.mxu0 %v10742_v63  ;;  %v10781_v63 = vld [vmem:[%s16820_s3 + $0x498] sm:$0xff] }
 0x2d9   :  { %12772 = vmatpush3.msra.mxu1 %v10760_v62  ;;  %12742 = vmatprep.subr.mxu0 %v13569_v61  ;;  %v10762_v62 = vld [vmem:[%s16820_s3 + $0x400] sm:$0xff] }
 0x2da   :  { %12773 = vmatprep.subr.mxu1 %v13569_v61  ;;  %12743 = vmatpush3.msra.mxu0 %v10741_v1  ;;  %v10780_v1 = vld [vmem:[%s16820_s3 + $0x490] sm:$0xff] }
 0x2db   :  { %12774 = vmatpush3.msra.mxu1 %v10759_v37  ;;  %12744 = vmatprep.subr.mxu0 %v13569_v61  ;;  %v10779_v37 = vld [vmem:[%s16820_s3 + $0x488] sm:$0xff] }
 0x2dc   :  { %12775 = vmatprep.subr.mxu1 %v13569_v61  ;;  %12745 = vmatpush3.msra.mxu0 %v10740_v20  ;;  %v10809_v20 = vld [vmem:[%s16820_s3 + $0x578] sm:$0xff] }
 0x2dd   :  { %12776 = vmatpush3.msra.mxu1 %v10758_v31  ;;  %12746 = vmatprep.subr.mxu0 %v13569_v61  ;;  %v10778_v31 = vld [vmem:[%s16820_s3 + $0x480] sm:$0xff] }
 0x2de   :  { %12777 = vmatprep.subr.mxu1 %v13569_v61  ;;  %12747 = vmatpush3.msra.mxu0 %v10739_v60  ;;  %v10808_v60 = vld [vmem:[%s16820_s3 + $0x570] sm:$0xff] }
 0x2df   :  { %12778 = vmatpush3.msra.mxu1 %v10757_v5  ;;  %12748 = vmatprep.subr.mxu0 %v13569_v61  ;;  %v10825_v5 = vld [vmem:[%s16820_s3 + $0x5f8] sm:$0xff] }
 0x2e0   :  { %12779 = vmatprep.subr.mxu1 %v13569_v61  ;;  %12749 = vmatpush3.msra.mxu0 %v10738_v36  ;;  %v10806_v36 = vld [vmem:[%s16820_s3 + $0x560] sm:$0xff] }
 0x2e1   :  { %12780 = vmatpush3.msra.mxu1 %v10756_v43  ;;  %12750 = vmatprep.subr.mxu0 %v13569_v61  ;;  %v10824_v43 = vld [vmem:[%s16820_s3 + $0x5f0] sm:$0xff] }
 0x2e2   :  { %12781 = vmatprep.subr.mxu1 %v13569_v61  ;;  %12751 = vmatpush3.msra.mxu0 %v10737_v2  ;;  %v10823_v2 = vld [vmem:[%s16820_s3 + $0x5e8] sm:$0xff] }
 0x2e3   :  { %12782 = vmatpush3.msra.mxu1 %v10755_v38  ;;  %12752 = vmatprep.subr.mxu0 %v13569_v61  ;;  %v10804_v38 = vld [vmem:[%s16820_s3 + $0x550] sm:$0xff] }
 0x2e4   :  { %12783 = vmatprep.subr.mxu1 %v13569_v61  ;;  %12753 = vmatpush3.msra.mxu0 %v10736_v55  ;;  %v10822_v55 = vld [vmem:[%s16820_s3 + $0x5e0] sm:$0xff] }
 0x2e5   :  { %12784 = vmatpush3.msra.mxu1 %v10754_v21  ;;  %12754 = vmatprep.subr.mxu0 %v13569_v61  ;;  %v10803_v21 = vld [vmem:[%s16820_s3 + $0x548] sm:$0xff] }
 0x2e6   :  { %12785 = vmatprep.subr.mxu1 %v13569_v61  ;;  %12755 = vmatpush3.msra.mxu0 %v10735_v33  ;;  %v10821_v33 = vld [vmem:[%s16820_s3 + $0x5d8] sm:$0xff] }
 0x2e7   :  { %12786 = vmatpush3.msra.mxu1 %v10753_v26  ;;  %12756 = vmatprep.subr.mxu0 %v13569_v61  ;;  %v10802_v26 = vld [vmem:[%s16820_s3 + $0x540] sm:$0xff] }
 0x2e8   :  { %12787 = vmatprep.subr.mxu1 %v13569_v61  ;;  %12757 = vmatpush3.msra.mxu0 %v10734_v8  ;;  %v10820_v8 = vld [vmem:[%s16820_s3 + $0x5d0] sm:$0xff] }
 0x2e9   :  { %12788 = vmatpush3.msra.mxu1 %v10752_v42  ;;  %12758 = vmatprep.subr.mxu0 %v13569_v61  ;;  %v10801_v42 = vld [vmem:[%s16820_s3 + $0x538] sm:$0xff] }
 0x2ea   :  { %12789 = vmatprep.subr.mxu1 %v13569_v61  ;;  %12759 = vmatpush3.msra.mxu0 %v10733_v51  ;;  %v10819_v51 = vld [vmem:[%s16820_s3 + $0x5c8] sm:$0xff] }
 0x2eb   :  { %12790 = vmatpush3.msra.mxu1 %v10751_v14  ;;  %12760 = vmatprep.subr.mxu0 %v13569_v61  ;;  %v10800_v14 = vld [vmem:[%s16820_s3 + $0x530] sm:$0xff] }
 0x2ec   :  { %12791 = vmatprep.subr.mxu1 %v13569_v61  ;;  %12761 = vmatpush3.msra.mxu0 %v10732_v27  ;;  %v10818_v27 = vld [vmem:[%s16820_s3 + $0x5c0] sm:$0xff] }
 0x2ed   :  { %12792 = vmatpush3.msra.mxu1 %v10750_v6  ;;  %12762 = vmatprep.subr.mxu0 %v13569_v61  ;;  %v10799_v6 = vld [vmem:[%s16820_s3 + $0x528] sm:$0xff] }
 0x2ee   :  { %12793 = vmatprep.subr.mxu1 %v13569_v61  ;;  %12763 = vmatpush3.msra.mxu0 %v10731_v23  ;;  %v10817_v23 = vld [vmem:[%s16820_s3 + $0x5b8] sm:$0xff] }
 0x2ef   :  { %12794 = vmatpush3.msra.mxu1 %v10749_v54  ;;  %12764 = vmatprep.subr.mxu0 %v13569_v61  ;;  %v10798_v54 = vld [vmem:[%s16820_s3 + $0x520] sm:$0xff] }
 0x2f0   :  { %12795 = vmatprep.subr.mxu1 %v13569_v61  ;;  %12765 = vmatpush3.msra.mxu0 %v10730_v3  ;;  %v10816_v3 = vld [vmem:[%s16820_s3 + $0x5b0] sm:$0xff] }
 0x2f1   :  { %12766 = vmatprep.mubr.msk.f32.mxu0 %vm13570_vm0, %v13569_v61  ;;  %12796 = vmatpush3.msra.mxu1 %v10748_v35  ;;  %v10797_v35 = vld [vmem:[%s16820_s3 + $0x518] sm:$0xff] }
 0x2f2   :  { %12767 = vmatmul.mubr.f32.vlgmr.msra.gmra.mxu0 %v15758_v7  ;;  %12797 = vmatprep.subr.mxu1 %v13569_v61  ;;  %v10775_v7 = vld [vmem:[%s16820_s3 + $0x468] sm:$0xff] }
 0x2f3   :  { %12804 = vmatprep.subr.mxu0 %v13569_v61  ;;  %12798 = vmatpush3.msra.mxu1 %v10747_v52  ;;  %v10815_v52 = vld [vmem:[%s16820_s3 + $0x5a8] sm:$0xff] }
 0x2f4   :  { %12805 = vmatpush3.msra.mxu0 %v10777_v9  ;;  %12799 = vmatprep.subr.mxu1 %v13569_v61  ;;  %v10796_v9 = vld [vmem:[%s16820_s3 + $0x510] sm:$0xff] }
 0x2f5   :  { %12806 = vmatprep.subr.mxu0 %v13569_v61  ;;  %12800 = vmatpush3.msra.mxu1 %v10746_v53  ;;  %v10814_v53 = vld [vmem:[%s16820_s3 + $0x5a0] sm:$0xff] }
 0x2f6   :  { %12801 = vmatprep.mubr.msk.f32.mxu1 %vm13570_vm0, %v13569_v61  ;;  %12807 = vmatpush3.msra.mxu0 %v10776_v40  ;;  %v10795_v40 = vld [vmem:[%s16820_s3 + $0x508] sm:$0xff] }
 0x2f7   :  { %12802 = vmatmul.mubr.f32.vlgmr.msra.gmra.mxu1 %v15783_v25  ;;  %12808 = vmatprep.subr.mxu0 %v13569_v61  ;;  %v10773_v25 = vld [vmem:[%s16820_s3 + $0x458] sm:$0xff] }
 0x2f8   :  { %12839 = vmatprep.subr.mxu1 %v13569_v61  ;;  %12809 = vmatpush3.msra.mxu0 %v10775_v7  ;;  %v10813_v7 = vld [vmem:[%s16820_s3 + $0x598] sm:$0xff] }
 0x2f9   :  { %12840 = vmatpush3.msra.mxu1 %v10793_v16  ;;  %12810 = vmatprep.subr.mxu0 %v13569_v61  ;;  %v10794_v16 = vld [vmem:[%s16820_s3 + $0x500] sm:$0xff] }
 0x2fa   :  { %12841 = vmatprep.subr.mxu1 %v13569_v61  ;;  %12811 = vmatpush3.msra.mxu0 %v10774_v17  ;;  %v10812_v17 = vld [vmem:[%s16820_s3 + $0x590] sm:$0xff] }
 0x2fb   :  { %12842 = vmatpush3.msra.mxu1 %v10792_v45  ;;  %12812 = vmatprep.subr.mxu0 %v13569_v61  ;;  %v10811_v45 = vld [vmem:[%s16820_s3 + $0x588] sm:$0xff] }
 0x2fc   :  { %12843 = vmatprep.subr.mxu1 %v13569_v61  ;;  %12813 = vmatpush3.msra.mxu0 %v10773_v25  ;;  %v10841_v25 = vld [vmem:[%s16820_s3 + $0x678] sm:$0xff] }
 0x2fd   :  { %12844 = vmatpush3.msra.mxu1 %v10791_v15  ;;  %12814 = vmatprep.subr.mxu0 %v13569_v61  ;;  %v10810_v15 = vld [vmem:[%s16820_s3 + $0x580] sm:$0xff] }
 0x2fe   :  { %12845 = vmatprep.subr.mxu1 %v13569_v61  ;;  %12815 = vmatpush3.msra.mxu0 %v10772_v0  ;;  %v10840_v0 = vld [vmem:[%s16820_s3 + $0x670] sm:$0xff] }
 0x2ff   :  { %12846 = vmatpush3.msra.mxu1 %v10790_v13  ;;  %12816 = vmatprep.subr.mxu0 %v13569_v61  ;;  %v10857_v13 = vld [vmem:[%s16820_s3 + $0x6f8] sm:$0xff] }
 0x300   :  { %12847 = vmatprep.subr.mxu1 %v13569_v61  ;;  %12817 = vmatpush3.msra.mxu0 %v10771_v58  ;;  %v10838_v58 = vld [vmem:[%s16820_s3 + $0x660] sm:$0xff] }
 0x301   :  { %12848 = vmatpush3.msra.mxu1 %v10789_v41  ;;  %12818 = vmatprep.subr.mxu0 %v13569_v61  ;;  %v10856_v41 = vld [vmem:[%s16820_s3 + $0x6f0] sm:$0xff] }
 0x302   :  { %12849 = vmatprep.subr.mxu1 %v13569_v61  ;;  %12819 = vmatpush3.msra.mxu0 %v10770_v10  ;;  %v10855_v10 = vld [vmem:[%s16820_s3 + $0x6e8] sm:$0xff] }
 0x303   :  { %12850 = vmatpush3.msra.mxu1 %v10788_v39  ;;  %12820 = vmatprep.subr.mxu0 %v13569_v61  ;;  %v10836_v39 = vld [vmem:[%s16820_s3 + $0x650] sm:$0xff] }
 0x304   :  { %12851 = vmatprep.subr.mxu1 %v13569_v61  ;;  %12821 = vmatpush3.msra.mxu0 %v10769_v46  ;;  %v10854_v46 = vld [vmem:[%s16820_s3 + $0x6e0] sm:$0xff] }
 0x305   :  { %12852 = vmatpush3.msra.mxu1 %v10787_v12  ;;  %12822 = vmatprep.subr.mxu0 %v13569_v61  ;;  %v10835_v12 = vld [vmem:[%s16820_s3 + $0x648] sm:$0xff] }
 0x306   :  { %12853 = vmatprep.subr.mxu1 %v13569_v61  ;;  %12823 = vmatpush3.msra.mxu0 %v10768_v48  ;;  %v10853_v48 = vld [vmem:[%s16820_s3 + $0x6d8] sm:$0xff] }
 0x307   :  { %12854 = vmatpush3.msra.mxu1 %v10786_v57  ;;  %12824 = vmatprep.subr.mxu0 %v13569_v61  ;;  %v10834_v57 = vld [vmem:[%s16820_s3 + $0x640] sm:$0xff] }
 0x308   :  { %12855 = vmatprep.subr.mxu1 %v13569_v61  ;;  %12825 = vmatpush3.msra.mxu0 %v10767_v11  ;;  %v10852_v11 = vld [vmem:[%s16820_s3 + $0x6d0] sm:$0xff] }
 0x309   :  { %12856 = vmatpush3.msra.mxu1 %v10785_v50  ;;  %12826 = vmatprep.subr.mxu0 %v13569_v61  ;;  %v10833_v50 = vld [vmem:[%s16820_s3 + $0x638] sm:$0xff] }
 0x30a   :  { %12857 = vmatprep.subr.mxu1 %v13569_v61  ;;  %12827 = vmatpush3.msra.mxu0 %v10766_v19  ;;  %v10851_v19 = vld [vmem:[%s16820_s3 + $0x6c8] sm:$0xff] }
 0x30b   :  { %12858 = vmatpush3.msra.mxu1 %v10784_v4  ;;  %12828 = vmatprep.subr.mxu0 %v13569_v61  ;;  %v10832_v4 = vld [vmem:[%s16820_s3 + $0x630] sm:$0xff] }
 0x30c   :  { %12859 = vmatprep.subr.mxu1 %v13569_v61  ;;  %12829 = vmatpush3.msra.mxu0 %v10765_v56  ;;  %v10850_v56 = vld [vmem:[%s16820_s3 + $0x6c0] sm:$0xff] }
 0x30d   :  { %12860 = vmatpush3.msra.mxu1 %v10783_v28  ;;  %12830 = vmatprep.subr.mxu0 %v13569_v61  ;;  %v10831_v28 = vld [vmem:[%s16820_s3 + $0x628] sm:$0xff] }
 0x30e   :  { %12861 = vmatprep.subr.mxu1 %v13569_v61  ;;  %12831 = vmatpush3.msra.mxu0 %v10764_v59  ;;  %v10849_v59 = vld [vmem:[%s16820_s3 + $0x6b8] sm:$0xff] }
 0x30f   :  { %12862 = vmatpush3.msra.mxu1 %v10782_v34  ;;  %12832 = vmatprep.subr.mxu0 %v13569_v61  ;;  %v10830_v34 = vld [vmem:[%s16820_s3 + $0x620] sm:$0xff] }
 0x310   :  { %12863 = vmatprep.subr.mxu1 %v13569_v61  ;;  %12833 = vmatpush3.msra.mxu0 %v10763_v18  ;;  %v10848_v18 = vld [vmem:[%s16820_s3 + $0x6b0] sm:$0xff] }
 0x311   :  { %12864 = vmatpush3.msra.mxu1 %v10781_v63  ;;  %12834 = vmatprep.subr.mxu0 %v13569_v61  ;;  %v10829_v63 = vld [vmem:[%s16820_s3 + $0x618] sm:$0xff] }
 0x312   :  { %12865 = vmatprep.subr.mxu1 %v13569_v61  ;;  %12835 = vmatpush3.msra.mxu0 %v10762_v62 }
 0x313   :  { %12836 = vmatprep.mubr.msk.f32.mxu0 %vm13570_vm0, %v13569_v61  ;;  %12866 = vmatpush3.msra.mxu1 %v10780_v1  ;;  %v10847_v1 = vld [vmem:[%s16820_s3 + $0x6a8] sm:$0xff] }
 0x314   :  { %12837 = vmatmul.mubr.f32.vlgmr.msra.gmra.mxu0 %v15822_v32  ;;  %12867 = vmatprep.subr.mxu1 %v13569_v61  ;;  %v10807_v32 = vld [vmem:[%s16820_s3 + $0x568] sm:$0xff] }
 0x315   :  { %12874 = vmatprep.subr.mxu0 %v13569_v61  ;;  %12868 = vmatpush3.msra.mxu1 %v10779_v37  ;;  %v10649_v37 = vld [vmem:[%s16822_s4] ss:$0 sm:$0xff] }
 0x316   :  { %12875 = vmatpush3.msra.mxu0 %v10809_v20  ;;  %12869 = vmatprep.subr.mxu1 %v13569_v61  ;;  %v10828_v20 = vld [vmem:[%s16820_s3 + $0x610] sm:$0xff] }
 0x317   :  { %12876 = vmatprep.subr.mxu0 %v13569_v61  ;;  %12870 = vmatpush3.msra.mxu1 %v10778_v31 }
 0x318   :  { %12871 = vmatprep.mubr.msk.f32.mxu1 %vm13570_vm0, %v13569_v61  ;;  %12877 = vmatpush3.msra.mxu0 %v10808_v60  ;;  %v10846_v60 = vld [vmem:[%s16820_s3 + $0x6a0] sm:$0xff] }
 0x319   :  { %12872 = vmatmul.mubr.f32.vlgmr.msra.gmra.mxu1 %v15850_v29  ;;  %12878 = vmatprep.subr.mxu0 %v13569_v61  ;;  %v10805_v29 = vld [vmem:[%s16820_s3 + $0x558] sm:$0xff] }
 0x31a   :  { %12909 = vmatprep.subr.mxu1 %v13569_v61  ;;  %12879 = vmatpush3.msra.mxu0 %v10807_v32  ;;  %v10827_v32 = vld [vmem:[%s16820_s3 + $0x608] sm:$0xff] }
 0x31b   :  { %12910 = vmatpush3.msra.mxu1 %v10825_v5  ;;  %12880 = vmatprep.subr.mxu0 %v13569_v61 }
 0x31c   :  { %12911 = vmatprep.subr.mxu1 %v13569_v61  ;;  %12881 = vmatpush3.msra.mxu0 %v10806_v36  ;;  %v10845_v36 = vld [vmem:[%s16820_s3 + $0x698] sm:$0xff] }
 0x31d   :  { %12912 = vmatpush3.msra.mxu1 %v10824_v43  ;;  %12882 = vmatprep.subr.mxu0 %v13569_v61 }
 0x31e   :  { %12913 = vmatprep.subr.mxu1 %v13569_v61  ;;  %12883 = vmatpush3.msra.mxu0 %v10805_v29  ;;  %v10826_v29 = vld [vmem:[%s16820_s3 + $0x600] sm:$0xff] }
 0x31f   :  { %12914 = vmatpush3.msra.mxu1 %v10823_v2  ;;  %12884 = vmatprep.subr.mxu0 %v13569_v61 }
 0x320   :  { %12915 = vmatprep.subr.mxu1 %v13569_v61  ;;  %12885 = vmatpush3.msra.mxu0 %v10804_v38  ;;  %v10844_v38 = vld [vmem:[%s16820_s3 + $0x690] sm:$0xff] }
 0x321   :  { %12916 = vmatpush3.msra.mxu1 %v10822_v55  ;;  %12886 = vmatprep.subr.mxu0 %v13569_v61 }
 0x322   :  { %12917 = vmatprep.subr.mxu1 %v13569_v61  ;;  %12887 = vmatpush3.msra.mxu0 %v10803_v21  ;;  %v10843_v21 = vld [vmem:[%s16820_s3 + $0x688] sm:$0xff] }
 0x323   :  { %12918 = vmatpush3.msra.mxu1 %v10821_v33  ;;  %12888 = vmatprep.subr.mxu0 %v13569_v61  ;;  %v10873_v33 = vld [vmem:[%s16820_s3 + $0x778] sm:$0xff] }
 0x324   :  { %12919 = vmatprep.subr.mxu1 %v13569_v61  ;;  %12889 = vmatpush3.msra.mxu0 %v10802_v26  ;;  %v10842_v26 = vld [vmem:[%s16820_s3 + $0x680] sm:$0xff] }
 0x325   :  { %12920 = vmatpush3.msra.mxu1 %v10820_v8  ;;  %12890 = vmatprep.subr.mxu0 %v13569_v61  ;;  %v10872_v8 = vld [vmem:[%s16820_s3 + $0x770] sm:$0xff] }
 0x326   :  { %12921 = vmatprep.subr.mxu1 %v13569_v61  ;;  %12891 = vmatpush3.msra.mxu0 %v10801_v42  ;;  %v10889_v42 = vld [vmem:[%s16820_s3 + $0x7f8] sm:$0xff] }
 0x327   :  { %12922 = vmatpush3.msra.mxu1 %v10819_v51  ;;  %12892 = vmatprep.subr.mxu0 %v13569_v61  ;;  %v10870_v51 = vld [vmem:[%s16820_s3 + $0x760] sm:$0xff] }
 0x328   :  { %12923 = vmatprep.subr.mxu1 %v13569_v61  ;;  %12893 = vmatpush3.msra.mxu0 %v10800_v14  ;;  %v10888_v14 = vld [vmem:[%s16820_s3 + $0x7f0] sm:$0xff] }
 0x329   :  { %12924 = vmatpush3.msra.mxu1 %v10818_v27  ;;  %12894 = vmatprep.subr.mxu0 %v13569_v61  ;;  %v10887_v27 = vld [vmem:[%s16820_s3 + $0x7e8] sm:$0xff] }
 0x32a   :  { %12925 = vmatprep.subr.mxu1 %v13569_v61  ;;  %12895 = vmatpush3.msra.mxu0 %v10799_v6  ;;  %v10868_v6 = vld [vmem:[%s16820_s3 + $0x750] sm:$0xff] }
 0x32b   :  { %12926 = vmatpush3.msra.mxu1 %v10817_v23  ;;  %12896 = vmatprep.subr.mxu0 %v13569_v61  ;;  %v10886_v23 = vld [vmem:[%s16820_s3 + $0x7e0] sm:$0xff] }
 0x32c   :  { %12927 = vmatprep.subr.mxu1 %v13569_v61  ;;  %12897 = vmatpush3.msra.mxu0 %v10798_v54  ;;  %v10867_v54 = vld [vmem:[%s16820_s3 + $0x748] sm:$0xff] }
 0x32d   :  { %12928 = vmatpush3.msra.mxu1 %v10816_v3  ;;  %12898 = vmatprep.subr.mxu0 %v13569_v61  ;;  %v10885_v3 = vld [vmem:[%s16820_s3 + $0x7d8] sm:$0xff] }
 0x32e   :  { %12929 = vmatprep.subr.mxu1 %v13569_v61  ;;  %12899 = vmatpush3.msra.mxu0 %v10797_v35  ;;  %v10866_v35 = vld [vmem:[%s16820_s3 + $0x740] sm:$0xff] }
 0x32f   :  { %12930 = vmatpush3.msra.mxu1 %v10815_v52  ;;  %12900 = vmatprep.subr.mxu0 %v13569_v61  ;;  %v10884_v52 = vld [vmem:[%s16820_s3 + $0x7d0] sm:$0xff] }
 0x330   :  { %12931 = vmatprep.subr.mxu1 %v13569_v61  ;;  %12901 = vmatpush3.msra.mxu0 %v10796_v9  ;;  %v10865_v9 = vld [vmem:[%s16820_s3 + $0x738] sm:$0xff] }
 0x331   :  { %12932 = vmatpush3.msra.mxu1 %v10814_v53  ;;  %12902 = vmatprep.subr.mxu0 %v13569_v61  ;;  %v10883_v53 = vld [vmem:[%s16820_s3 + $0x7c8] sm:$0xff] }
 0x332   :  { %12933 = vmatprep.subr.mxu1 %v13569_v61  ;;  %12903 = vmatpush3.msra.mxu0 %v10795_v40  ;;  %v10864_v40 = vld [vmem:[%s16820_s3 + $0x730] sm:$0xff] }
 0x333   :  { %12934 = vmatpush3.msra.mxu1 %v10813_v7  ;;  %12904 = vmatprep.subr.mxu0 %v13569_v61  ;;  %v10882_v7 = vld [vmem:[%s16820_s3 + $0x7c0] sm:$0xff] }
 0x334   :  { %12935 = vmatprep.subr.mxu1 %v13569_v61  ;;  %12905 = vmatpush3.msra.mxu0 %v10794_v16  ;;  %v10863_v16 = vld [vmem:[%s16820_s3 + $0x728] sm:$0xff] }
 0x335   :  { %12906 = vmatprep.mubr.msk.f32.mxu0 %vm13570_vm0, %v13569_v61  ;;  %12936 = vmatpush3.msra.mxu1 %v10812_v17  ;;  %v10881_v17 = vld [vmem:[%s16820_s3 + $0x7b8] sm:$0xff] }
 0x336   :  { %12907 = vmatmul.mubr.f32.vlgmr.msra.gmra.mxu0 %v15811_v44  ;;  %12937 = vmatprep.subr.mxu1 %v13569_v61  ;;  %v10839_v44 = vld [vmem:[%s16820_s3 + $0x668] sm:$0xff] }
 0x337   :  { %12944 = vmatprep.subr.mxu0 %v13569_v61  ;;  %12938 = vmatpush3.msra.mxu1 %v10811_v45  ;;  %v10862_v45 = vld [vmem:[%s16820_s3 + $0x720] sm:$0xff] }
 0x338   :  { %12945 = vmatpush3.msra.mxu0 %v10841_v25  ;;  %12939 = vmatprep.subr.mxu1 %v13569_v61  ;;  %v10880_v25 = vld [vmem:[%s16820_s3 + $0x7b0] sm:$0xff] }
 0x339   :  { %12946 = vmatprep.subr.mxu0 %v13569_v61  ;;  %12940 = vmatpush3.msra.mxu1 %v10810_v15 }
 0x33a   :  { %12941 = vmatprep.mubr.msk.f32.mxu1 %vm13570_vm0, %v13569_v61  ;;  %12947 = vmatpush3.msra.mxu0 %v10840_v0  ;;  %v10861_v0 = vld [vmem:[%s16820_s3 + $0x718] sm:$0xff] }
 0x33b   :  { %12942 = vmatmul.mubr.f32.vlgmr.msra.gmra.mxu1 %v15835_v30  ;;  %12948 = vmatprep.subr.mxu0 %v13569_v61  ;;  %v10837_v30 = vld [vmem:[%s16820_s3 + $0x658] sm:$0xff] }
 0x33c   :  { %12979 = vmatprep.subr.mxu1 %v13569_v61  ;;  %12949 = vmatpush3.msra.mxu0 %v10839_v44 }
 0x33d   :  { %12980 = vmatpush3.msra.mxu1 %v10857_v13  ;;  %12950 = vmatprep.subr.mxu0 %v13569_v61  ;;  %v10879_v13 = vld [vmem:[%s16820_s3 + $0x7a8] sm:$0xff] }
 0x33e   :  { %12981 = vmatprep.subr.mxu1 %v13569_v61  ;;  %12951 = vmatpush3.msra.mxu0 %v10838_v58 }
 0x33f   :  { %12982 = vmatpush3.msra.mxu1 %v10856_v41  ;;  %12952 = vmatprep.subr.mxu0 %v13569_v61  ;;  %v10860_v41 = vld [vmem:[%s16820_s3 + $0x710] sm:$0xff] }
 0x340   :  { %12983 = vmatprep.subr.mxu1 %v13569_v61  ;;  %12953 = vmatpush3.msra.mxu0 %v10837_v30  ;;  %v10878_v30 = vld [vmem:[%s16820_s3 + $0x7a0] sm:$0xff] }
 0x341   :  { %12984 = vmatpush3.msra.mxu1 %v10855_v10  ;;  %12954 = vmatprep.subr.mxu0 %v13569_v61  ;;  %v10859_v10 = vld [vmem:[%s16820_s3 + $0x708] sm:$0xff] }
 0x342   :  { %12985 = vmatprep.subr.mxu1 %v13569_v61  ;;  %12955 = vmatpush3.msra.mxu0 %v10836_v39 }
 0x343   :  { %12986 = vmatpush3.msra.mxu1 %v10854_v46  ;;  %12956 = vmatprep.subr.mxu0 %v13569_v61  ;;  %v10877_v46 = vld [vmem:[%s16820_s3 + $0x798] sm:$0xff] }
 0x344   :  { %12987 = vmatprep.subr.mxu1 %v13569_v61  ;;  %12957 = vmatpush3.msra.mxu0 %v10835_v12 }
 0x345   :  { %12988 = vmatpush3.msra.mxu1 %v10853_v48  ;;  %12958 = vmatprep.subr.mxu0 %v13569_v61  ;;  %v10858_v48 = vld [vmem:[%s16820_s3 + $0x700] sm:$0xff] }
 0x346   :  { %12989 = vmatprep.subr.mxu1 %v13569_v61  ;;  %12959 = vmatpush3.msra.mxu0 %v10834_v57 }
 0x347   :  { %12990 = vmatpush3.msra.mxu1 %v10852_v11  ;;  %12960 = vmatprep.subr.mxu0 %v13569_v61  ;;  %v10876_v11 = vld [vmem:[%s16820_s3 + $0x790] sm:$0xff] }
 0x348   :  { %12991 = vmatprep.subr.mxu1 %v13569_v61  ;;  %12961 = vmatpush3.msra.mxu0 %v10833_v50  ;;  %v10875_v50 = vld [vmem:[%s16820_s3 + $0x788] sm:$0xff] }
 0x349   :  { %12992 = vmatpush3.msra.mxu1 %v10851_v19  ;;  %12962 = vmatprep.subr.mxu0 %v13569_v61  ;;  %v10874_v19 = vld [vmem:[%s16820_s3 + $0x780] sm:$0xff] }
 0x34a   :  { %12993 = vmatprep.subr.mxu1 %v13569_v61  ;;  %12963 = vmatpush3.msra.mxu0 %v10832_v4 }
 0x34b   :  { %12994 = vmatpush3.msra.mxu1 %v10850_v56  ;;  %12964 = vmatprep.subr.mxu0 %v13569_v61 }
 0x34c   :  { %12995 = vmatprep.subr.mxu1 %v13569_v61  ;;  %12965 = vmatpush3.msra.mxu0 %v10831_v28 }
 0x34d   :  { %12996 = vmatpush3.msra.mxu1 %v10849_v59  ;;  %12966 = vmatprep.subr.mxu0 %v13569_v61  ;;  %v7946_v62 = vpop.f32.mrf.mxu0 }
 0x34e   :  { %12997 = vmatprep.subr.mxu1 %v13569_v61  ;;  %12967 = vmatpush3.msra.mxu0 %v10830_v34  ;;  %v7950_v5 = vadd.f32 %v10649_v37, %v7946_v62  ;;  %v9298_v62 = vld [vmem:[%s16823_s5 + $0x60] sm:$0xff]  ;;  %v9296_v37 = vld [vmem:[%s16823_s5 + $0x50] sm:$0xff] }
 0x34f   :  { %12998 = vmatpush3.msra.mxu1 %v10848_v18  ;;  %12968 = vmatprep.subr.mxu0 %v13569_v61  ;;  %v12558_v31 = vpop.f32.mrf.mxu0  ;;  %v9301_v18 = vld [vmem:[%s16823_s5 + $0x78] sm:$0xff] }
 0x350   :  { %12999 = vmatprep.subr.mxu1 %v13569_v61  ;;  %12969 = vmatpush3.msra.mxu0 %v10829_v63  ;;  %v9300_v63 = vld [vmem:[%s16823_s5 + $0x70] sm:$0xff]  ;;  %v9294_v31 = vld [vmem:[%s16823_s5 + $0x40] sm:$0xff] }
 0x351   :  { %13000 = vmatpush3.msra.mxu1 %v10847_v1  ;;  %12970 = vmatprep.subr.mxu0 %v13569_v61  ;;  %v9297_v1 = vld [vmem:[%s16823_s5 + $0x58] sm:$0xff] }
 0x352   :  { %13001 = vmatprep.subr.mxu1 %v13569_v61  ;;  %12971 = vmatpush3.msra.mxu0 %v10828_v20  ;;  %v8035_v43 = vpop.f32.mrf.mxu1  ;;  %v9295_v20 = vld [vmem:[%s16823_s5 + $0x48] sm:$0xff] }
 0x353   :  { %13002 = vmatpush3.msra.mxu1 %v10846_v60  ;;  %12972 = vmatprep.subr.mxu0 %v13569_v61  ;;  %v16589_v2 = vadd.f32 %v8035_v43, %v7950_v5  ;;  %v9293_v60 = vld [vmem:[%s16823_s5 + $0x38] sm:$0xff] }
 0x354   :  { %13003 = vmatprep.subr.mxu1 %v13569_v61  ;;  %12973 = vmatpush3.msra.mxu0 %v10827_v32  ;;  %v12593_v55 = vpop.f32.mrf.mxu1  ;;  %v9292_v32 = vld [vmem:[%s16823_s5 + $0x30] sm:$0xff] }
 0x355   :  { %13004 = vmatpush3.msra.mxu1 %v10845_v36  ;;  %12974 = vmatprep.subr.mxu0 %v13569_v61  ;;  %v9291_v36 = vld [vmem:[%s16823_s5 + $0x28] sm:$0xff] }
 0x356   :  { %13005 = vmatprep.subr.mxu1 %v13569_v61  ;;  %12975 = vmatpush3.msra.mxu0 %v10826_v29 }
 0x357   :  { %12976 = vmatprep.mubr.msk.f32.mxu0 %vm13570_vm0, %v13569_v61  ;;  %13006 = vmatpush3.msra.mxu1 %v10844_v38 }
 0x358   :  { %12977 = vmatmul.mubr.f32.vlgmr.msra.gmra.mxu0 %v15874_v22  ;;  %13007 = vmatprep.subr.mxu1 %v13569_v61  ;;  %v10871_v22 = vld [vmem:[%s16820_s3 + $0x768] sm:$0xff] }
 0x359   :  { %13014 = vmatprep.subr.mxu0 %v13569_v61  ;;  %13008 = vmatpush3.msra.mxu1 %v10843_v21 }
 0x35a   :  { %13015 = vmatpush3.msra.mxu0 %v10873_v33  ;;  %13009 = vmatprep.subr.mxu1 %v13569_v61  ;;  %v9289_v33 = vld [vmem:[%s16823_s5 + $0x18] sm:$0xff] }
 0x35b   :  { %13016 = vmatprep.subr.mxu0 %v13569_v61  ;;  %13010 = vmatpush3.msra.mxu1 %v10842_v26  ;;  %v9288_v26 = vld [vmem:[%s16823_s5 + $0x10] sm:$0xff] }
 0x35c   :  { %13011 = vmatprep.mubr.msk.f32.mxu1 %vm13570_vm0, %v13569_v61  ;;  %13017 = vmatpush3.msra.mxu0 %v10872_v8  ;;  %v9287_v8 = vld [vmem:[%s16823_s5 + $0x8] sm:$0xff] }
 0x35d   :  { %13012 = vmatmul.mubr.f32.vlgmr.msra.gmra.mxu1 %v15898_v49  ;;  %13018 = vmatprep.subr.mxu0 %v13569_v61  ;;  %v10869_v49 = vld [vmem:[%s16820_s3 + $0x758] sm:$0xff] }
 0x35e   :  { %13049 = vmatprep.subr.mxu1 %v13569_v61  ;;  %13019 = vmatpush3.msra.mxu0 %v10871_v22  ;;  %v9286_v22 = vld [vmem:[%s16823_s5] sm:$0xff] }
 0x35f   :  { %13050 = vmatpush3.msra.mxu1 %v10889_v42  ;;  %13020 = vmatprep.subr.mxu0 %v13569_v61 }
 0x360   :  { %13051 = vmatprep.subr.mxu1 %v13569_v61  ;;  %13021 = vmatpush3.msra.mxu0 %v10870_v51 }
 0x361   :  { %13052 = vmatpush3.msra.mxu1 %v10888_v14  ;;  %13022 = vmatprep.subr.mxu0 %v13569_v61 }
 0x362   :  { %13053 = vmatprep.subr.mxu1 %v13569_v61  ;;  %13023 = vmatpush3.msra.mxu0 %v10869_v49 }
 0x363   :  { %13054 = vmatpush3.msra.mxu1 %v10887_v27  ;;  %13024 = vmatprep.subr.mxu0 %v13569_v61 }
 0x364   :  { %13055 = vmatprep.subr.mxu1 %v13569_v61  ;;  %13025 = vmatpush3.msra.mxu0 %v10868_v6 }
 0x365   :  { %13056 = vmatpush3.msra.mxu1 %v10886_v23  ;;  %13026 = vmatprep.subr.mxu0 %v13569_v61 }
 0x366   :  { %13057 = vmatprep.subr.mxu1 %v13569_v61  ;;  %13027 = vmatpush3.msra.mxu0 %v10867_v54 }
 0x367   :  { %13058 = vmatpush3.msra.mxu1 %v10885_v3  ;;  %13028 = vmatprep.subr.mxu0 %v13569_v61 }
 0x368   :  { %13059 = vmatprep.subr.mxu1 %v13569_v61  ;;  %13029 = vmatpush3.msra.mxu0 %v10866_v35 }
 0x369   :  { %13060 = vmatpush3.msra.mxu1 %v10884_v52  ;;  %13030 = vmatprep.subr.mxu0 %v13569_v61 }
 0x36a   :  { %13061 = vmatprep.subr.mxu1 %v13569_v61  ;;  %13031 = vmatpush3.msra.mxu0 %v10865_v9 }
 0x36b   :  { %13062 = vmatpush3.msra.mxu1 %v10883_v53  ;;  %13032 = vmatprep.subr.mxu0 %v13569_v61 }
 0x36c   :  { %13063 = vmatprep.subr.mxu1 %v13569_v61  ;;  %13033 = vmatpush3.msra.mxu0 %v10864_v40 }
 0x36d   :  { %13064 = vmatpush3.msra.mxu1 %v10882_v7  ;;  %13034 = vmatprep.subr.mxu0 %v13569_v61 }
 0x36e   :  { %13065 = vmatprep.subr.mxu1 %v13569_v61  ;;  %13035 = vmatpush3.msra.mxu0 %v10863_v16  ;;  %v8124_v15 = vpop.f32.mrf.mxu0 }
 0x36f   :  { %13066 = vmatpush3.msra.mxu1 %v10881_v17  ;;  %13036 = vmatprep.subr.mxu0 %v13569_v61  ;;  %v8128_v44 = vadd.f32 %v8124_v15, %v16589_v2  ;;  %v9290_v2 = vld [vmem:[%s16823_s5 + $0x20] sm:$0xff] }
 0x370   :  { %13067 = vmatprep.subr.mxu1 %v13569_v61  ;;  %13037 = vmatpush3.msra.mxu0 %v10862_v45  ;;  %v12628_v58 = vpop.f32.mrf.mxu0 }
 0x371   :  { %13068 = vmatpush3.msra.mxu1 %v10880_v25  ;;  %13038 = vmatprep.subr.mxu0 %v13569_v61  ;;  %v10890_v58 = vld [vmem:[%s16824_s6] ss:$0 sm:$0xff] }
 0x372   :  { %13069 = vmatprep.subr.mxu1 %v13569_v61  ;;  %13039 = vmatpush3.msra.mxu0 %v10861_v0 }
 0x373   :  { %13070 = vmatpush3.msra.mxu1 %v10879_v13  ;;  %13040 = vmatprep.subr.mxu0 %v13569_v61  ;;  %v8213_v39 = vpop.f32.mrf.mxu1 }
 0x374   :  { %13071 = vmatprep.subr.mxu1 %v13569_v61  ;;  %13041 = vmatpush3.msra.mxu0 %v10860_v41  ;;  %v8217_v12 = vadd.f32 %v8213_v39, %v8128_v44 }
 0x375   :  { %13072 = vmatpush3.msra.mxu1 %v10878_v30  ;;  %13042 = vmatprep.subr.mxu0 %v13569_v61  ;;  %v12663_v57 = vpop.f32.mrf.mxu1 }
 0x376   :  { %13073 = vmatprep.subr.mxu1 %v13569_v61  ;;  %13043 = vmatpush3.msra.mxu0 %v10859_v10 }
 0x377   :  { %13074 = vmatpush3.msra.mxu1 %v10877_v46  ;;  %13044 = vmatprep.subr.mxu0 %v13569_v61 }
 0x378   :  { %13075 = vmatprep.subr.mxu1 %v13569_v61  ;;  %13045 = vmatpush3.msra.mxu0 %v10858_v48 }
 0x379   :  { %13046 = vmatprep.mubr.msk.f32.mxu0 %vm13570_vm0, %v13569_v61  ;;  %13076 = vmatpush3.msra.mxu1 %v10876_v11 }
 0x37a   :  { %13047 = vmatmul.mubr.f32.vlgmr.msra.gmra.mxu0 %v15861_v47  ;;  %13077 = vmatprep.subr.mxu1 %v13569_v61 }
 0x37b   :  { %13078 = vmatpush3.msra.mxu1 %v10875_v50  ;;  %13081 = vmatprep.mubr.msk.f32.mxu1 %vm13570_vm0, %v13569_v61 }
 0x37c   :  { %13079 = vmatprep.subr.mxu1 %v13569_v61  ;;  %13084 = vmatprep.subr.mxu0 %v13569_v61 }
 0x37d   :  { %13080 = vmatpush3.msra.mxu1 %v10874_v19  ;;  %13116 = vmatprep.mubr.msk.f32.mxu0 %vm13570_vm0, %v13569_v61 }
 0x37e   :  { %13082 = vmatmul.mubr.f32.vlgmr.msra.gmra.mxu1 %v15887_v24  ;;  %13085 = vmatpush3.msra.mxu0 %v9301_v18  ;;  %v9299_v24 = vld [vmem:[%s16823_s5 + $0x68] sm:$0xff] }
 0x37f   :  { %13086 = vmatprep.subr.mxu0 %v13569_v61 }
 0x380   :  { %13087 = vmatpush3.msra.mxu0 %v9300_v63 }
 0x381   :  { %13088 = vmatprep.subr.mxu0 %v13569_v61 }
 0x382   :  { %13089 = vmatpush3.msra.mxu0 %v9299_v24 }
 0x383   :  { %13090 = vmatprep.subr.mxu0 %v13569_v61 }
 0x384   :  { %13091 = vmatpush3.msra.mxu0 %v9298_v62 }
 0x385   :  { %13092 = vmatprep.subr.mxu0 %v13569_v61 }
 0x386   :  { %13093 = vmatpush3.msra.mxu0 %v9297_v1 }
 0x387   :  { %13094 = vmatprep.subr.mxu0 %v13569_v61 }
 0x388   :  { %13095 = vmatpush3.msra.mxu0 %v9296_v37 }
 0x389   :  { %13096 = vmatprep.subr.mxu0 %v13569_v61 }
 0x38a   :  { %13097 = vmatpush3.msra.mxu0 %v9295_v20 }
 0x38b   :  { %13098 = vmatprep.subr.mxu0 %v13569_v61 }
 0x38c   :  { %13099 = vmatpush3.msra.mxu0 %v9294_v31 }
 0x38d   :  { %13100 = vmatprep.subr.mxu0 %v13569_v61 }
 0x38e   :  { %13101 = vmatpush3.msra.mxu0 %v9293_v60 }
 0x38f   :  { %13102 = vmatprep.subr.mxu0 %v13569_v61 }
 0x390   :  { %v8302_v47 = vpop.f32.mrf.mxu0  ;;  %13103 = vmatpush3.msra.mxu0 %v9292_v32 }
 0x391   :  { %v8306_v4 = vadd.f32 %v8302_v47, %v8217_v12  ;;  %13104 = vmatprep.subr.mxu0 %v13569_v61 }
 0x392   :  { %v12698_v56 = vpop.f32.mrf.mxu0  ;;  %13105 = vmatpush3.msra.mxu0 %v9291_v36 }
 0x393   :  { %13106 = vmatprep.subr.mxu0 %v13569_v61 }
 0x394   :  { %13107 = vmatpush3.msra.mxu0 %v9290_v2 }
 0x395   :  { %v8391_v28 = vpop.f32.mrf.mxu1  ;;  %13108 = vmatprep.subr.mxu0 %v13569_v61 }
 0x396   :  { %v8395_v59 = vadd.f32 %v8391_v28, %v8306_v4  ;;  %13109 = vmatpush3.msra.mxu0 %v9289_v33 }
 0x397   :  { %v12733_v34 = vpop.f32.mrf.mxu1  ;;  %13110 = vmatprep.subr.mxu0 %v13569_v61 }
 0x398   :  { %13111 = vmatpush3.msra.mxu0 %v9288_v26 }
 0x399   :  { %13112 = vmatprep.subr.mxu0 %v13569_v61 }
 0x39a   :  { %13113 = vmatpush3.msra.mxu0 %v9287_v8 }
 0x39b   :  { %13114 = vmatprep.subr.mxu0 %v13569_v61 }
 0x39c   :  { %13115 = vmatpush3.msra.mxu0 %v9286_v22 }
 0x3b2   :  { %v8480_v5 = vpop.f32.mrf.mxu0 }
 0x3b3   :  { %v8484_v43 = vadd.f32 %v8480_v5, %v8395_v59 }
 0x3b4   :  { %v12768_v29 = vpop.f32.mrf.mxu0 }
 0x3b7   :  { %v8569_v38 = vpop.f32.mrf.mxu1 }
 0x3b8   :  { %v8573_v55 = vadd.f32 %v8569_v38, %v8484_v43 }
 0x3b9   :  { %v12803_v21 = vpop.f32.mrf.mxu1 }
 0x3d4   :  { %v8658_v42 = vpop.f32.mrf.mxu0 }
 0x3d5   :  { %v8662_v51 = vadd.f32 %v8658_v42, %v8573_v55 }
 0x3d6   :  { %v12838_v14 = vpop.f32.mrf.mxu0 }
 0x3d9   :  { %v8747_v49 = vpop.f32.mrf.mxu1 }
 0x3da   :  { %v8751_v27 = vadd.f32 %v8747_v49, %v8662_v51 }
 0x3db   :  { %v12873_v6 = vpop.f32.mrf.mxu1 }
 0x3f6   :  { %v8836_v23 = vpop.f32.mrf.mxu0 }
 0x3f7   :  { %v8840_v61 = vadd.f32 %v8836_v23, %v8751_v27 }
 0x3f8   :  { %v12908_v54 = vpop.f32.mrf.mxu0 }
 0x3fb   :  { %v8925_v3 = vpop.f32.mrf.mxu1 }
 0x3fc   :  { %v8929_v7 = vadd.f32 %v8925_v3, %v8840_v61 }
 0x3fd   :  { %v12943_v35 = vpop.f32.mrf.mxu1 }
 0x418   :  { %v9014_v52 = vpop.f32.mrf.mxu0 }
 0x419   :  { %v9018_v16 = vadd.f32 %v9014_v52, %v8929_v7 }
 0x41a   :  { %v12978_v9 = vpop.f32.mrf.mxu0 }
 0x41d   :  { %v9103_v53 = vpop.f32.mrf.mxu1 }
 0x41e   :  { %v9107_v45 = vadd.f32 %v9103_v53, %v9018_v16 }
 0x41f   :  { %v13013_v40 = vpop.f32.mrf.mxu1 }
 0x43a   :  { %v9192_v17 = vpop.f32.mrf.mxu0 }
 0x43b   :  { %v9196_v15 = vadd.f32 %v9192_v17, %v9107_v45 }
 0x43c   :  { %v13048_v25 = vpop.f32.mrf.mxu0 }
 0x43e   :  { %v9281_v0 = vpop.f32.mrf.mxu1 }
 0x43f   :  { %v9285_v44 = vadd.f32 %v9281_v0, %v9196_v15 }
 0x440   :  { %v13083_v13 = vpop.f32.mrf.mxu1 }
 0x441   :  { %13117 = vmatmul.mubr.f32.vlgmr.msra.gmra.mxu0 %v9285_v44 }
 0x501   :  { %v9375_v41 = vpop.f32.mrf.mxu0 }
 0x502   :  { %v9376_v30 = vadd.f32 %v10890_v58, %v9375_v41 }
 0x503   :  { %v13118_v10 = vpop.f32.mrf.mxu0 }
 0x504   :  { %9379 = vst [vmem:[%s16825_s7] sm:$0xff] %v9376_v30 }

</bundles_post_ra>
